<compile_context>
chip_gen: v7x
topology: tpu7x:2x2x1
jax: 0.10.0
libtpu: 0.0.40
codegen_flags: <defaults>
</compile_context>

<pallas_src>
import functools
from functools import partial
from dataclasses import dataclass

import numpy as np
import jax
import jax.numpy as jnp
from jax.experimental import pallas as pl
from jax.experimental.pallas import tpu as pltpu

_EPS = 1e-5                       # BatchNorm2d default eps
_MAX_TILE_M = 512                 # rows per grid step (mult of 8; sized for 64 MiB v7x VMEM)
_VMEM_LIMIT = 48 * 1024 * 1024    # explicit scoped-VMEM cap (< v7x 64 MiB physical)


def _round_up(x, m):
    return (x + m - 1) // m * m


# ----------------------------------------------------------------------------
# Parameter container: arrays are pytree children, all layer metadata is
# static aux-data, so the whole tree can be passed straight into jax.jit.
# ----------------------------------------------------------------------------
@jax.tree_util.register_pytree_node_class
@dataclass
class ConvParams:
    w: jnp.ndarray        # (Kp, Np)  bf16, pre-padded at init
    gamma: jnp.ndarray    # (1, Np)   f32
    beta: jnp.ndarray     # (1, Np)   f32
    k: int
    stride: int
    pad: int
    kdim: int             # un-padded K (= k*k*Cin)
    ncols: int            # un-padded total output columns
    phases: int           # 1 = plain conv, 4 = sub-pixel ConvT
    splits: tuple         # Cout split sizes (for merged 1x1 pairs)
    cout: int = 0         # per-phase Cout (ConvT only)

    def tree_flatten(self):
        return ((self.w, self.gamma, self.beta),
                (self.k, self.stride, self.pad, self.kdim, self.ncols,
                 self.phases, self.splits, self.cout))

    @classmethod
    def tree_unflatten(cls, aux, children):
        w, gamma, beta = children
        return cls(w, gamma, beta, *aux)


# ----------------------------------------------------------------------------
# Fused Pallas kernel: (patches @ W) -> BatchNorm(train) -> ReLU
# grid axis 0 walks M tiles; the full (Mp, Np) output is VMEM-resident.
# ----------------------------------------------------------------------------
def _conv_bn_relu_kernel(tile_m, count, phases, eps,
                         p_ref, w_ref, g_ref, b_ref, o_ref, s_ref, q_ref):
    m_idx = pl.program_id(0)

    @pl.when(m_idx == 0)
    def _init():
        s_ref[...] = jnp.zeros_like(s_ref)
        q_ref[...] = jnp.zeros_like(q_ref)

    # bf16 x bf16 on the MXU, f32 accumulate.
    acc = jnp.dot(p_ref[...], w_ref[...], preferred_element_type=jnp.float32)
    row0 = pl.multiple_of(m_idx * tile_m, 8)
    o_ref[pl.ds(row0, tile_m), :] = acc
    # No conv bias -> zero-padded rows contribute exactly zero; no mask needed.
    s_ref[...] += jnp.sum(acc, axis=0, keepdims=True)
    q_ref[...] += jnp.sum(acc * acc, axis=0, keepdims=True)

    @pl.when(m_idx == pl.num_programs(0) - 1)
    def _finalize():
        s = s_ref[...]
        q = q_ref[...]
        if phases > 1:  # pool stats across the 4 sub-pixel phase column blocks
            c = s.shape[1] // phases
            s = sum(s[:, i * c:(i + 1) * c] for i in range(phases))
            q = sum(q[:, i * c:(i + 1) * c] for i in range(phases))
        inv = 1.0 / float(count)
        mean = s * inv
        var = jnp.maximum(q * inv - mean * mean, 0.0)   # biased var (BN training)
        inv_std = jax.lax.rsqrt(var + eps)
        if phases > 1:
            mean = jnp.concatenate([mean] * phases, axis=-1)
            inv_std = jnp.concatenate([inv_std] * phases, axis=-1)
        y = (o_ref[...] - mean) * inv_std * g_ref[...] + b_ref[...]
        o_ref[...] = jnp.maximum(y, 0.0)


@functools.lru_cache(maxsize=None)
def _get_fused_call(M, Kp, Np, phases, eps):
    tile_m = min(_MAX_TILE_M, max(8, _round_up(M, 8)))
    Mp = _round_up(M, tile_m)
    num_m = Mp // tile_m
    call = pl.pallas_call(
        partial(_conv_bn_relu_kernel, tile_m, phases * M, phases, eps),
        grid=(num_m,),
        out_shape=jax.ShapeDtypeStruct((Mp, Np), jnp.float32),
        in_specs=[
            pl.BlockSpec((tile_m, Kp), lambda m: (m, 0)),   # patches: streamed, double-buffered
            pl.BlockSpec((Kp, Np), lambda m: (0, 0)),       # weights: resident
            pl.BlockSpec((1, Np), lambda m: (0, 0)),        # BN gamma
            pl.BlockSpec((1, Np), lambda m: (0, 0)),        # BN beta
        ],
        out_specs=pl.BlockSpec((Mp, Np), lambda m: (0, 0)),  # output: VMEM-resident
        scratch_shapes=[pltpu.VMEM((1, Np), jnp.float32),    # column sums
                        pltpu.VMEM((1, Np), jnp.float32)],   # column sums of squares
        compiler_params=pltpu.CompilerParams(
            dimension_semantics=("arbitrary",),              # stats reduce across M tiles
            vmem_limit_bytes=_VMEM_LIMIT),
    )
    return call, Mp, tile_m


# ----------------------------------------------------------------------------
# JAX glue (all of this fuses under the single jit around the forward)
# ----------------------------------------------------------------------------
# TODO(synk): im2col is still built by (jit-fused) slicing in HLO; an in-kernel
# halo-DMA im2col would remove the k^2 patch materialization entirely.
def _im2col(x, k, stride, pad):
    n, h, w, c = x.shape
    if pad:
        x = jnp.pad(x, ((0, 0), (pad, pad), (pad, pad), (0, 0)))
    ho = (h + 2 * pad - k) // stride + 1
    wo = (w + 2 * pad - k) // stride + 1
    cols = []
    for i in range(k):
        for j in range(k):
            cols.append(x[:, i:i + stride * (ho - 1) + 1:stride,
                            j:j + stride * (wo - 1) + 1:stride, :])
    return jnp.concatenate(cols, axis=-1), ho, wo


def _fused_conv(x, prep):
    patches, ho, wo = _im2col(x, prep.k, prep.stride, prep.pad)
    n = x.shape[0]
    m = n * ho * wo
    kdim = prep.kdim
    Kp, Np = prep.w.shape
    call, Mp, _ = _get_fused_call(m, Kp, Np, prep.phases, _EPS)
    pmat = patches.reshape(m, kdim)
    pmat = jnp.pad(pmat, ((0, Mp - m), (0, Kp - kdim))).astype(jnp.bfloat16)
    out = call(pmat, prep.w, prep.gamma, prep.beta)
    return out[:m, :prep.ncols], n, ho, wo


def _basic(x, prep):
    out, n, ho, wo = _fused_conv(x, prep)
    return out.reshape(n, ho, wo, prep.ncols)


def _basic_split(x, prep):
    """Merged 1x1 convs sharing an input: one wide matmul, split afterwards."""
    out, n, ho, wo = _fused_conv(x, prep)
    ys, off = [], 0
    for c in prep.splits:
        ys.append(out[:, off:off + c].reshape(n, ho, wo, c))
        off += c
    return ys


def _seq2(x, plist):
    for p in plist:
        x = _basic(x, p)
    return x


def _upsample_block(x, prep):
    # ConvTranspose2d(k=4,s=2,p=1)+BN+ReLU via sub-pixel decomposition: one 3x3
    # conv whose 4*Cout output columns are the 4 output phases (BN pooled over
    # phases inside the kernel), then a pixel-shuffle interleave.
    out, n, ho, wo = _fused_conv(x, prep)
    c = prep.cout
    y = out.reshape(n, ho, wo, 2, 2, c)
    y = jnp.transpose(y, (0, 1, 3, 2, 4, 5)).reshape(n, 2 * ho, 2 * wo, c)
    return y


def _up_nn(x, s):     # F.interpolate(mode='nearest', scale_factor=s)
    return jnp.repeat(jnp.repeat(x, s, axis=1), s, axis=2)


def _down_nn(x, s):   # F.interpolate(mode='nearest', scale_factor=1/s)
    return x[:, ::s, ::s, :]


# ----------------------------------------------------------------------------
# Parameter init (deterministic, synthetic) + one-time pad/cast to TPU shapes
# ----------------------------------------------------------------------------
def _init_basic_raw(key, cin, cout, k):
    fan = cin * k * k
    w = jax.random.normal(key, (cout, cin, k, k), jnp.float32) / np.sqrt(fan)
    # (Cout,Cin,kh,kw) -> (kh,kw,Cin,Cout) -> flat, matching the im2col tap order.
    w_flat = jnp.transpose(w, (2, 3, 1, 0)).reshape(k * k * cin, cout)
    return dict(w=w_flat,
                gamma=jnp.ones((cout,), jnp.float32),
                beta=jnp.zeros((cout,), jnp.float32))


def _init_upsample_raw(key, c):
    # nn.ConvTranspose2d(c,c,4,2,1) weight (Cin,Cout,4,4), rewritten as a single
    # 3x3 conv with 4*Cout outputs (one 2x2 sub-kernel per output phase).
    fan = c * 4 * 4
    wt = np.asarray(jax.random.normal(key, (c, c, 4, 4), jnp.float32)) / np.sqrt(fan)
    # (output parity, 3x3 tap index) -> ConvT kernel index; other taps are zero.
    kmap = {(0, 0): 3, (0, 1): 1, (1, 1): 2, (1, 2): 0}
    w = np.zeros((3, 3, c, 4, c), np.float32)
    for a in (0, 1):
        for b in (0, 1):
            ph = a * 2 + b
            for ti in (0, 1, 2):
                kh = kmap.get((a, ti))
                if kh is None:
                    continue
                for tj in (0, 1, 2):
                    kw = kmap.get((b, tj))
                    if kw is None:
                        continue
                    w[ti, tj, :, ph, :] = wt[:, :, kh, kw]
    return dict(w=jnp.asarray(w.reshape(9 * c, 4 * c)),
                gamma=jnp.ones((c,), jnp.float32),
                beta=jnp.zeros((c,), jnp.float32),
                cout=c)


def _prep_convs(raws, k, stride, pad):
    """Optionally Cout-concatenate same-input layers, then pad/cast ONCE at init."""
    w = jnp.concatenate([r["w"] for r in raws], axis=1)
    g = jnp.concatenate([r["gamma"] for r in raws], axis=0)
    b = jnp.concatenate([r["beta"] for r in raws], axis=0)
    kdim, ncols = int(w.shape[0]), int(w.shape[1])
    Kp, Np = _round_up(kdim, 128), _round_up(ncols, 128)
    return ConvParams(
        w=jnp.pad(w, ((0, Kp - kdim), (0, Np - ncols))).astype(jnp.bfloat16),
        gamma=jnp.pad(g, (0, Np - ncols)).reshape(1, Np),
        beta=jnp.pad(b, (0, Np - ncols)).reshape(1, Np),
        k=k, stride=stride, pad=pad, kdim=kdim, ncols=ncols, phases=1,
        splits=tuple(int(r["w"].shape[1]) for r in raws))


def _prep_convt(raw):
    w, c = raw["w"], raw["cout"]
    kdim, ncols = int(w.shape[0]), int(w.shape[1])    # 9*c, 4*c
    Kp = _round_up(kdim, 128)
    assert ncols % 128 == 0, "sub-pixel ConvT path requires 4*Cout % 128 == 0"
    return ConvParams(
        w=jnp.pad(w, ((0, Kp - kdim), (0, 0))).astype(jnp.bfloat16),
        gamma=jnp.tile(raw["gamma"].reshape(1, -1), (1, 4)),
        beta=jnp.tile(raw["beta"].reshape(1, -1), (1, 4)),
        k=3, stride=1, pad=1, kdim=kdim, ncols=ncols, phases=4,
        splits=(c,), cout=c)


def init_backbone_params(key, in_c):
    single = {
        "b0_1": (in_c, 32, 3, 2, 1), "b0_2": (32, 32, 3, 1, 1), "b0_3": (32, 64, 3, 2, 1),
        "b1_0": (64, 32, 3, 1, 1),
        "b1_2": (64, 32, 1, 1, 0), "b1_3": (96, 32, 1, 1, 0),
        "b1_5": (64, 32, 1, 1, 0), "b1_6": (96, 32, 1, 1, 0),
        "b1_8": (64, 32, 1, 1, 0), "b1_9": (96, 32, 1, 1, 0),
        "b2_0": (64, 64, 3, 2, 1),
        "b2_3": (32, 64, 1, 1, 0), "b2_4": (96, 64, 1, 1, 0),
        "b2_7": (32, 64, 1, 1, 0), "b2_8": (96, 64, 1, 1, 0),
        "b2_11": (32, 64, 1, 1, 0), "b2_12": (96, 64, 1, 1, 0),
        "b3_0": (64, 96, 3, 2, 1),
        "b3_4": (32, 96, 1, 1, 0), "b3_5": (64, 96, 1, 1, 0),
        "b3_9": (32, 96, 1, 1, 0), "b3_10": (64, 96, 1, 1, 0),
        "b3_14": (32, 96, 1, 1, 0), "b3_15": (64, 96, 1, 1, 0),
        "b4_1": (32, 128, 3, 1, 1), "b4_2": (64, 128, 3, 1, 1), "b4_3": (96, 128, 3, 1, 1),
    }
    seqs = {
        "b1_1": 32, "b1_4": 32, "b1_7": 32,
        "b2_1": 64, "b2_2": 64, "b2_5": 64, "b2_6": 64, "b2_9": 64, "b2_10": 64,
        "b3_1": 96, "b3_2": 96, "b3_3": 96, "b3_6": 96, "b3_7": 96, "b3_8": 96,
        "b3_11": 96, "b3_12": 96, "b3_13": 96,
    }
    keys = jax.random.split(key, len(single) + 2 * len(seqs) + 2)
    it = iter(keys)
    raw = {name: _init_basic_raw(next(it), cin, cout, k)
           for name, (cin, cout, k, s, p) in single.items()}
    raw_seq = {name: [_init_basic_raw(next(it), c, c, 3), _init_basic_raw(next(it), c, c, 3)]
               for name, c in seqs.items()}
    raw_up1 = _init_upsample_raw(next(it), 128)
    raw_up2 = _init_upsample_raw(next(it), 128)

    P = {}
    for name in ("b0_1", "b0_2", "b0_3", "b1_0", "b2_0", "b3_0", "b4_1", "b4_2", "b4_3"):
        cin, cout, k, s, p = single[name]
        P[name] = _prep_convs([raw[name]], k, s, p)
    for name in seqs:
        P[name] = [_prep_convs([r], 3, 1, 1) for r in raw_seq[name]]
    # merge pairs of 1x1 mixing convs that consume the same tensor (wider N,
    # half the kernel launches; BN is per-column so this is exact).
    mix_pairs = {
        "mix_o1": ("b2_3", "b3_4"), "mix_o2": ("b1_2", "b3_5"), "mix_o3": ("b1_3", "b2_4"),
        "mix_f1": ("b2_7", "b3_9"), "mix_f2": ("b1_5", "b3_10"), "mix_f3": ("b1_6", "b2_8"),
        "mix_g1": ("b2_11", "b3_14"), "mix_g2": ("b1_8", "b3_15"), "mix_g3": ("b1_9", "b2_12"),
    }
    for mname, (a, b) in mix_pairs.items():
        P[mname] = _prep_convs([raw[a], raw[b]], 1, 1, 0)
    P["upsample1"] = _prep_convt(raw_up1)
    P["upsample2"] = _prep_convt(raw_up2)
    return P


# ----------------------------------------------------------------------------
# Backbone forward (NCHW in / NCHW out, matching the PyTorch module)
# ----------------------------------------------------------------------------
def backbone_forward(P, x_nchw):
    x = jnp.transpose(x_nchw, (0, 2, 3, 1))  # -> NHWC for the kernels
    bc = _basic

    p = bc(bc(bc(x, P["b0_1"]), P["b0_2"]), P["b0_3"])
    s1 = bc(p, P["b1_0"])
    s2 = bc(p, P["b2_0"])
    # TODO(synk): the reference forward computes s3 = b3_0(p), which gives s3 the
    # same resolution as s2 and makes the later k/q/c additions (x4 and x1/4
    # interpolation) shape-incompatible in PyTorch; we apply b3_0 to s2 so the
    # three-scale pyramid (R, R/2, R/4) implied by the interpolation factors holds.
    s3 = bc(s2, P["b3_0"])

    o1 = _seq2(s1, P["b1_1"])
    o2 = _seq2(s2, P["b2_1"]) + s2
    o2 = _seq2(o2, P["b2_2"]) + o2
    o3 = _seq2(s3, P["b3_1"]) + s3
    o3 = _seq2(o3, P["b3_2"]) + o3
    o3 = _seq2(o3, P["b3_3"]) + o3

    y_b2_3, y_b3_4 = _basic_split(o1, P["mix_o1"])
    y_b1_2, y_b3_5 = _basic_split(o2, P["mix_o2"])
    y_b1_3, y_b2_4 = _basic_split(o3, P["mix_o3"])
    k1 = o1 + s1 + _up_nn(y_b1_2, 2) + _up_nn(y_b1_3, 4)
    k2 = o2 + s2 + _down_nn(y_b2_3, 2) + _up_nn(y_b2_4, 2)
    k3 = o3 + s3 + _down_nn(y_b3_4, 4) + _down_nn(y_b3_5, 2)

    f1 = _seq2(k1, P["b1_4"])
    f2 = _seq2(k2, P["b2_2"]) + k2      # NOTE: reference reuses b2_2 here
    f2 = _seq2(f2, P["b2_6"]) + f2
    f3 = _seq2(k3, P["b3_6"]) + k3
    f3 = _seq2(f3, P["b3_7"]) + f3
    f3 = _seq2(f3, P["b3_8"]) + f3

    y_b2_7, y_b3_9 = _basic_split(f1, P["mix_f1"])
    y_b1_5, y_b3_10 = _basic_split(f2, P["mix_f2"])
    y_b1_6, y_b2_8 = _basic_split(f3, P["mix_f3"])
    q1 = f1 + k1 + _up_nn(y_b1_5, 2) + _up_nn(y_b1_6, 4)
    q2 = f2 + k2 + _down_nn(y_b2_7, 2) + _up_nn(y_b2_8, 2)
    q3 = f3 + k3 + _down_nn(y_b3_9, 4) + _down_nn(y_b3_10, 2)

    g1 = _seq2(q1, P["b1_7"])
    g2 = _seq2(q2, P["b2_9"]) + q2
    g2 = _seq2(g2, P["b2_10"]) + g2
    g3 = _seq2(q3, P["b3_11"]) + q3
    g3 = _seq2(g3, P["b3_12"]) + g3
    g3 = _seq2(g3, P["b3_13"]) + g3

    y_b2_11, y_b3_14 = _basic_split(g1, P["mix_g1"])
    y_b1_8, y_b3_15 = _basic_split(g2, P["mix_g2"])
    y_b1_9, y_b2_12 = _basic_split(g3, P["mix_g3"])
    c1 = g1 + q1 + _up_nn(y_b1_8, 2) + _up_nn(y_b1_9, 4)
    c2 = g2 + q2 + _down_nn(y_b2_11, 2) + _up_nn(y_b2_12, 2)
    c3 = g3 + q3 + _down_nn(y_b3_14, 4) + _down_nn(y_b3_15, 2)

    n = _upsample_block(bc(c3, P["b4_3"]), P["upsample1"])
    n = _upsample_block(bc(c2, P["b4_2"]) + n, P["upsample2"])
    n = bc(c1, P["b4_1"]) + n
    return jnp.transpose(n, (0, 3, 1, 2))  # back to NCHW


if __name__ == "__main__":
    key = jax.random.PRNGKey(0)
    pkey, xkey = jax.random.split(key)
    in_c = 4
    params = init_backbone_params(pkey, in_c)
    x = jax.random.normal(xkey, (2, in_c, 16, 16), jnp.float32)  # NCHW like PyTorch

    fwd = jax.jit(backbone_forward)          # one compiled graph for the whole forward
    out = jax.block_until_ready(fwd(params, x))
    assert out.shape == (2, 128, 4, 4), out.shape
    assert bool(jnp.all(jnp.isfinite(out)))
    print("KERNEL_OK")
</pallas_src>

<mosaic_0001>
module attributes {stable_mosaic.version = 11 : i64} {
  func.func @_conv_bn_relu_kernel(%arg0: i32, %arg1: memref<128x128xbf16, #tpu.memory_space<vmem>>, %arg2: memref<128x128xbf16, #tpu.memory_space<vmem>>, %arg3: memref<1x128xf32, #tpu.memory_space<vmem>>, %arg4: memref<1x128xf32, #tpu.memory_space<vmem>>, %arg5: memref<128x128xf32, #tpu.memory_space<vmem>>, %arg6: memref<1x128xf32, #tpu.memory_space<vmem>>, %arg7: memref<1x128xf32, #tpu.memory_space<vmem>>) attributes {dimension_semantics = [#tpu.dimension_semantics<arbitrary>], iteration_bounds = array<i64: 1>, scalar_prefetch = 0 : i64, scratch_operands = 2 : i64, tpu.core_type = #tpu.core_type<tc>, window_params = [{transform_indices = @transform_0, window_bounds = array<i64: 128, 128>}, {pipeline_mode = #tpu.pipeline_mode<synchronous>, transform_indices = @transform_1, window_bounds = array<i64: 128, 128>}, {pipeline_mode = #tpu.pipeline_mode<synchronous>, transform_indices = @transform_2, window_bounds = array<i64: 1, 128>}, {pipeline_mode = #tpu.pipeline_mode<synchronous>, transform_indices = @transform_3, window_bounds = array<i64: 1, 128>}, {pipeline_mode = #tpu.pipeline_mode<synchronous>, transform_indices = @transform_4, window_bounds = array<i64: 128, 128>}]} {
    %c0_i32 = arith.constant 0 : i32
    %0 = arith.cmpi eq, %arg0, %c0_i32 : i32
    %1 = arith.extui %0 : i1 to i32
    %c0_i32_0 = arith.constant 0 : i32
    %2 = arith.cmpi ne, %1, %c0_i32_0 : i32
    scf.if %2 {
      %cst_17 = arith.constant 0.000000e+00 : f32
      %24 = vector.broadcast %cst_17 : f32 to vector<1x128xf32>
      %c0_18 = arith.constant 0 : index
      %c0_19 = arith.constant 0 : index
      %25 = vector.load %arg6[%c0_18, %c0_19] : memref<1x128xf32, #tpu.memory_space<vmem>>, vector<1x128xf32>
      tpu.vector_store %arg6[%c0_18, %c0_19], %24 {strides = array<i32>} : memref<1x128xf32, #tpu.memory_space<vmem>>, vector<1x128xf32>,
      %cst_20 = arith.constant 0.000000e+00 : f32
      %26 = vector.broadcast %cst_20 : f32 to vector<1x128xf32>
      %c0_21 = arith.constant 0 : index
      %c0_22 = arith.constant 0 : index
      %27 = vector.load %arg7[%c0_21, %c0_22] : memref<1x128xf32, #tpu.memory_space<vmem>>, vector<1x128xf32>
      tpu.vector_store %arg7[%c0_21, %c0_22], %26 {strides = array<i32>} : memref<1x128xf32, #tpu.memory_space<vmem>>, vector<1x128xf32>,
    } else {
    }
    %c0 = arith.constant 0 : index
    %c0_1 = arith.constant 0 : index
    %3 = vector.load %arg1[%c0, %c0_1] : memref<128x128xbf16, #tpu.memory_space<vmem>>, vector<128x128xbf16>
    %c0_2 = arith.constant 0 : index
    %c0_3 = arith.constant 0 : index
    %4 = vector.load %arg2[%c0_2, %c0_3] : memref<128x128xbf16, #tpu.memory_space<vmem>>, vector<128x128xbf16>
    %cst = arith.constant dense<0.000000e+00> : vector<128x128xf32>
    %5 = tpu.matmul %3, %4, %cst {dimension_numbers = #tpu.dot_dimension_numbers<[1], [0], [0], [1], [0, 0, 1, 1], [], []>} : vector<128x128xbf16>, vector<128x128xbf16>, vector<128x128xf32> -> vector<128x128xf32>
    %c128_i32 = arith.constant 128 : i32
    %6 = arith.muli %arg0, %c128_i32 : i32
    %7 = tpu.assume_multiple %6, 8 : i32
    %8 = arith.index_cast %7 : i32 to index
    %c0_4 = arith.constant 0 : index
    %9 = vector.load %arg5[%8, %c0_4] : memref<128x128xf32, #tpu.memory_space<vmem>>, vector<128x128xf32>
    tpu.vector_store %arg5[%8, %c0_4], %5 {strides = array<i32>} : memref<128x128xf32, #tpu.memory_space<vmem>>, vector<128x128xf32>,
    %c0_5 = arith.constant 0 : index
    %c0_6 = arith.constant 0 : index
    %10 = vector.load %arg6[%c0_5, %c0_6] : memref<1x128xf32, #tpu.memory_space<vmem>>, vector<1x128xf32>
    %cst_7 = arith.constant dense<0.000000e+00> : vector<128xf32>
    %11 = vector.multi_reduction <add>, %5, %cst_7 [0] : vector<128x128xf32> to vector<128xf32>
    %12 = vector.shape_cast %11 : vector<128xf32> to vector<1x128xf32>
    %13 = arith.addf %10, %12 : vector<1x128xf32>
    %c0_8 = arith.constant 0 : index
    %c0_9 = arith.constant 0 : index
    %14 = vector.load %arg6[%c0_8, %c0_9] : memref<1x128xf32, #tpu.memory_space<vmem>>, vector<1x128xf32>
    tpu.vector_store %arg6[%c0_8, %c0_9], %13 {strides = array<i32>} : memref<1x128xf32, #tpu.memory_space<vmem>>, vector<1x128xf32>,
    %c0_10 = arith.constant 0 : index
    %c0_11 = arith.constant 0 : index
    %15 = vector.load %arg7[%c0_10, %c0_11] : memref<1x128xf32, #tpu.memory_space<vmem>>, vector<1x128xf32>
    %16 = arith.mulf %5, %5 : vector<128x128xf32>
    %cst_12 = arith.constant dense<0.000000e+00> : vector<128xf32>
    %17 = vector.multi_reduction <add>, %16, %cst_12 [0] : vector<128x128xf32> to vector<128xf32>
    %18 = vector.shape_cast %17 : vector<128xf32> to vector<1x128xf32>
    %19 = arith.addf %15, %18 : vector<1x128xf32>
    %c0_13 = arith.constant 0 : index
    %c0_14 = arith.constant 0 : index
    %20 = vector.load %arg7[%c0_13, %c0_14] : memref<1x128xf32, #tpu.memory_space<vmem>>, vector<1x128xf32>
    tpu.vector_store %arg7[%c0_13, %c0_14], %19 {strides = array<i32>} : memref<1x128xf32, #tpu.memory_space<vmem>>, vector<1x128xf32>,
    %c0_i32_15 = arith.constant 0 : i32
    %21 = arith.cmpi eq, %arg0, %c0_i32_15 : i32
    %22 = arith.extui %21 : i1 to i32
    %c0_i32_16 = arith.constant 0 : i32
    %23 = arith.cmpi ne, %22, %c0_i32_16 : i32
    scf.if %23 {
      %c0_17 = arith.constant 0 : index
      %c0_18 = arith.constant 0 : index
      %24 = vector.load %arg6[%c0_17, %c0_18] : memref<1x128xf32, #tpu.memory_space<vmem>>, vector<1x128xf32>
      %c0_19 = arith.constant 0 : index
      %c0_20 = arith.constant 0 : index
      %25 = vector.load %arg7[%c0_19, %c0_20] : memref<1x128xf32, #tpu.memory_space<vmem>>, vector<1x128xf32>
      %cst_21 = arith.constant 7.812500e-03 : f32
      %26 = vector.broadcast %cst_21 : f32 to vector<1x128xf32>
      %27 = arith.mulf %24, %26 : vector<1x128xf32>
      %cst_22 = arith.constant 7.812500e-03 : f32
      %28 = vector.broadcast %cst_22 : f32 to vector<1x128xf32>
      %29 = arith.mulf %25, %28 : vector<1x128xf32>
      %30 = arith.mulf %27, %27 : vector<1x128xf32>
      %31 = arith.subf %29, %30 : vector<1x128xf32>
      %cst_23 = arith.constant 0.000000e+00 : f32
      %32 = vector.broadcast %cst_23 : f32 to vector<1x128xf32>
      %33 = arith.maximumf %31, %32 : vector<1x128xf32>
      %cst_24 = arith.constant 9.99999974E-6 : f32
      %34 = vector.broadcast %cst_24 : f32 to vector<1x128xf32>
      %35 = arith.addf %33, %34 : vector<1x128xf32>
      %36 = math.rsqrt %35 : vector<1x128xf32>
      %c0_25 = arith.constant 0 : index
      %c0_26 = arith.constant 0 : index
      %37 = vector.load %arg5[%c0_25, %c0_26] : memref<128x128xf32, #tpu.memory_space<vmem>>, vector<128x128xf32>
      %38 = vector.broadcast %27 : vector<1x128xf32> to vector<128x128xf32>
      %39 = arith.subf %37, %38 : vector<128x128xf32>
      %40 = vector.broadcast %36 : vector<1x128xf32> to vector<128x128xf32>
      %41 = arith.mulf %39, %40 : vector<128x128xf32>
      %c0_27 = arith.constant 0 : index
      %c0_28 = arith.constant 0 : index
      %42 = vector.load %arg3[%c0_27, %c0_28] : memref<1x128xf32, #tpu.memory_space<vmem>>, vector<1x128xf32>
      %43 = vector.broadcast %42 : vector<1x128xf32> to vector<128x128xf32>
      %44 = arith.mulf %41, %43 : vector<128x128xf32>
      %c0_29 = arith.constant 0 : index
      %c0_30 = arith.constant 0 : index
      %45 = vector.load %arg4[%c0_29, %c0_30] : memref<1x128xf32, #tpu.memory_space<vmem>>, vector<1x128xf32>
      %46 = vector.broadcast %45 : vector<1x128xf32> to vector<128x128xf32>
      %47 = arith.addf %44, %46 : vector<128x128xf32>
      %cst_31 = arith.constant 0.000000e+00 : f32
      %48 = vector.broadcast %cst_31 : f32 to vector<128x128xf32>
      %49 = arith.maximumf %47, %48 : vector<128x128xf32>
      %c0_32 = arith.constant 0 : index
      %c0_33 = arith.constant 0 : index
      %50 = vector.load %arg5[%c0_32, %c0_33] : memref<128x128xf32, #tpu.memory_space<vmem>>, vector<128x128xf32>
      tpu.vector_store %arg5[%c0_32, %c0_33], %49 {strides = array<i32>} : memref<128x128xf32, #tpu.memory_space<vmem>>, vector<128x128xf32>,
    } else {
    }
    return
  }
  func.func @transform_0(%arg0: i32) -> (i32, i32) {
    %c0_i32 = arith.constant 0 : i32
    %c0_i32_0 = arith.constant 0 : i32
    return %arg0, %c0_i32 : i32, i32
  }
  func.func @transform_1(%arg0: i32) -> (i32, i32) {
    %c0_i32 = arith.constant 0 : i32
    %c0_i32_0 = arith.constant 0 : i32
    %c0_i32_1 = arith.constant 0 : i32
    return %c0_i32, %c0_i32_0 : i32, i32
  }
  func.func @transform_2(%arg0: i32) -> (i32, i32) {
    %c0_i32 = arith.constant 0 : i32
    %c0_i32_0 = arith.constant 0 : i32
    %c0_i32_1 = arith.constant 0 : i32
    return %c0_i32, %c0_i32_0 : i32, i32
  }
  func.func @transform_3(%arg0: i32) -> (i32, i32) {
    %c0_i32 = arith.constant 0 : i32
    %c0_i32_0 = arith.constant 0 : i32
    %c0_i32_1 = arith.constant 0 : i32
    return %c0_i32, %c0_i32_0 : i32, i32
  }
  func.func @transform_4(%arg0: i32) -> (i32, i32) {
    %c0_i32 = arith.constant 0 : i32
    %c0_i32_0 = arith.constant 0 : i32
    %c0_i32_1 = arith.constant 0 : i32
    return %c0_i32, %c0_i32_0 : i32, i32
  }
}

module attributes {stable_mosaic.version = 11 : i64} {
  func.func @_conv_bn_relu_kernel(%arg0: i32, %arg1: memref<128x384xbf16, #tpu.memory_space<vmem>>, %arg2: memref<384x128xbf16, #tpu.memory_space<vmem>>, %arg3: memref<1x128xf32, #tpu.memory_space<vmem>>, %arg4: memref<1x128xf32, #tpu.memory_space<vmem>>, %arg5: memref<128x128xf32, #tpu.memory_space<vmem>>, %arg6: memref<1x128xf32, #tpu.memory_space<vmem>>, %arg7: memref<1x128xf32, #tpu.memory_space<vmem>>) attributes {dimension_semantics = [#tpu.dimension_semantics<arbitrary>], iteration_bounds = array<i64: 1>, scalar_prefetch = 0 : i64, scratch_operands = 2 : i64, tpu.core_type = #tpu.core_type<tc>, window_params = [{transform_indices = @transform_0, window_bounds = array<i64: 128, 384>}, {pipeline_mode = #tpu.pipeline_mode<synchronous>, transform_indices = @transform_1, window_bounds = array<i64: 384, 128>}, {pipeline_mode = #tpu.pipeline_mode<synchronous>, transform_indices = @transform_2, window_bounds = array<i64: 1, 128>}, {pipeline_mode = #tpu.pipeline_mode<synchronous>, transform_indices = @transform_3, window_bounds = array<i64: 1, 128>}, {pipeline_mode = #tpu.pipeline_mode<synchronous>, transform_indices = @transform_4, window_bounds = array<i64: 128, 128>}]} {
    %c0_i32 = arith.constant 0 : i32
    %0 = arith.cmpi eq, %arg0, %c0_i32 : i32
    %1 = arith.extui %0 : i1 to i32
    %c0_i32_0 = arith.constant 0 : i32
    %2 = arith.cmpi ne, %1, %c0_i32_0 : i32
    scf.if %2 {
      %cst_17 = arith.constant 0.000000e+00 : f32
      %24 = vector.broadcast %cst_17 : f32 to vector<1x128xf32>
      %c0_18 = arith.constant 0 : index
      %c0_19 = arith.constant 0 : index
      %25 = vector.load %arg6[%c0_18, %c0_19] : memref<1x128xf32, #tpu.memory_space<vmem>>, vector<1x128xf32>
      tpu.vector_store %arg6[%c0_18, %c0_19], %24 {strides = array<i32>} : memref<1x128xf32, #tpu.memory_space<vmem>>, vector<1x128xf32>,
      %cst_20 = arith.constant 0.000000e+00 : f32
      %26 = vector.broadcast %cst_20 : f32 to vector<1x128xf32>
      %c0_21 = arith.constant 0 : index
      %c0_22 = arith.constant 0 : index
      %27 = vector.load %arg7[%c0_21, %c0_22] : memref<1x128xf32, #tpu.memory_space<vmem>>, vector<1x128xf32>
      tpu.vector_store %arg7[%c0_21, %c0_22], %26 {strides = array<i32>} : memref<1x128xf32, #tpu.memory_space<vmem>>, vector<1x128xf32>,
    } else {
    }
    %c0 = arith.constant 0 : index
    %c0_1 = arith.constant 0 : index
    %3 = vector.load %arg1[%c0, %c0_1] : memref<128x384xbf16, #tpu.memory_space<vmem>>, vector<128x384xbf16>
    %c0_2 = arith.constant 0 : index
    %c0_3 = arith.constant 0 : index
    %4 = vector.load %arg2[%c0_2, %c0_3] : memref<384x128xbf16, #tpu.memory_space<vmem>>, vector<384x128xbf16>
    %cst = arith.constant dense<0.000000e+00> : vector<128x128xf32>
    %5 = tpu.matmul %3, %4, %cst {dimension_numbers = #tpu.dot_dimension_numbers<[1], [0], [0], [1], [0, 0, 1, 1], [], []>} : vector<128x384xbf16>, vector<384x128xbf16>, vector<128x128xf32> -> vector<128x128xf32>
    %c128_i32 = arith.constant 128 : i32
    %6 = arith.muli %arg0, %c128_i32 : i32
    %7 = tpu.assume_multiple %6, 8 : i32
    %8 = arith.index_cast %7 : i32 to index
    %c0_4 = arith.constant 0 : index
    %9 = vector.load %arg5[%8, %c0_4] : memref<128x128xf32, #tpu.memory_space<vmem>>, vector<128x128xf32>
    tpu.vector_store %arg5[%8, %c0_4], %5 {strides = array<i32>} : memref<128x128xf32, #tpu.memory_space<vmem>>, vector<128x128xf32>,
    %c0_5 = arith.constant 0 : index
    %c0_6 = arith.constant 0 : index
    %10 = vector.load %arg6[%c0_5, %c0_6] : memref<1x128xf32, #tpu.memory_space<vmem>>, vector<1x128xf32>
    %cst_7 = arith.constant dense<0.000000e+00> : vector<128xf32>
    %11 = vector.multi_reduction <add>, %5, %cst_7 [0] : vector<128x128xf32> to vector<128xf32>
    %12 = vector.shape_cast %11 : vector<128xf32> to vector<1x128xf32>
    %13 = arith.addf %10, %12 : vector<1x128xf32>
    %c0_8 = arith.constant 0 : index
    %c0_9 = arith.constant 0 : index
    %14 = vector.load %arg6[%c0_8, %c0_9] : memref<1x128xf32, #tpu.memory_space<vmem>>, vector<1x128xf32>
    tpu.vector_store %arg6[%c0_8, %c0_9], %13 {strides = array<i32>} : memref<1x128xf32, #tpu.memory_space<vmem>>, vector<1x128xf32>,
    %c0_10 = arith.constant 0 : index
    %c0_11 = arith.constant 0 : index
    %15 = vector.load %arg7[%c0_10, %c0_11] : memref<1x128xf32, #tpu.memory_space<vmem>>, vector<1x128xf32>
    %16 = arith.mulf %5, %5 : vector<128x128xf32>
    %cst_12 = arith.constant dense<0.000000e+00> : vector<128xf32>
    %17 = vector.multi_reduction <add>, %16, %cst_12 [0] : vector<128x128xf32> to vector<128xf32>
    %18 = vector.shape_cast %17 : vector<128xf32> to vector<1x128xf32>
    %19 = arith.addf %15, %18 : vector<1x128xf32>
    %c0_13 = arith.constant 0 : index
    %c0_14 = arith.constant 0 : index
    %20 = vector.load %arg7[%c0_13, %c0_14] : memref<1x128xf32, #tpu.memory_space<vmem>>, vector<1x128xf32>
    tpu.vector_store %arg7[%c0_13, %c0_14], %19 {strides = array<i32>} : memref<1x128xf32, #tpu.memory_space<vmem>>, vector<1x128xf32>,
    %c0_i32_15 = arith.constant 0 : i32
    %21 = arith.cmpi eq, %arg0, %c0_i32_15 : i32
    %22 = arith.extui %21 : i1 to i32
    %c0_i32_16 = arith.constant 0 : i32
    %23 = arith.cmpi ne, %22, %c0_i32_16 : i32
    scf.if %23 {
      %c0_17 = arith.constant 0 : index
      %c0_18 = arith.constant 0 : index
      %24 = vector.load %arg6[%c0_17, %c0_18] : memref<1x128xf32, #tpu.memory_space<vmem>>, vector<1x128xf32>
      %c0_19 = arith.constant 0 : index
      %c0_20 = arith.constant 0 : index
      %25 = vector.load %arg7[%c0_19, %c0_20] : memref<1x128xf32, #tpu.memory_space<vmem>>, vector<1x128xf32>
      %cst_21 = arith.constant 7.812500e-03 : f32
      %26 = vector.broadcast %cst_21 : f32 to vector<1x128xf32>
      %27 = arith.mulf %24, %26 : vector<1x128xf32>
      %cst_22 = arith.constant 7.812500e-03 : f32
      %28 = vector.broadcast %cst_22 : f32 to vector<1x128xf32>
      %29 = arith.mulf %25, %28 : vector<1x128xf32>
      %30 = arith.mulf %27, %27 : vector<1x128xf32>
      %31 = arith.subf %29, %30 : vector<1x128xf32>
      %cst_23 = arith.constant 0.000000e+00 : f32
      %32 = vector.broadcast %cst_23 : f32 to vector<1x128xf32>
      %33 = arith.maximumf %31, %32 : vector<1x128xf32>
      %cst_24 = arith.constant 9.99999974E-6 : f32
      %34 = vector.broadcast %cst_24 : f32 to vector<1x128xf32>
      %35 = arith.addf %33, %34 : vector<1x128xf32>
      %36 = math.rsqrt %35 : vector<1x128xf32>
      %c0_25 = arith.constant 0 : index
      %c0_26 = arith.constant 0 : index
      %37 = vector.load %arg5[%c0_25, %c0_26] : memref<128x128xf32, #tpu.memory_space<vmem>>, vector<128x128xf32>
      %38 = vector.broadcast %27 : vector<1x128xf32> to vector<128x128xf32>
      %39 = arith.subf %37, %38 : vector<128x128xf32>
      %40 = vector.broadcast %36 : vector<1x128xf32> to vector<128x128xf32>
      %41 = arith.mulf %39, %40 : vector<128x128xf32>
      %c0_27 = arith.constant 0 : index
      %c0_28 = arith.constant 0 : index
      %42 = vector.load %arg3[%c0_27, %c0_28] : memref<1x128xf32, #tpu.memory_space<vmem>>, vector<1x128xf32>
      %43 = vector.broadcast %42 : vector<1x128xf32> to vector<128x128xf32>
      %44 = arith.mulf %41, %43 : vector<128x128xf32>
      %c0_29 = arith.constant 0 : index
      %c0_30 = arith.constant 0 : index
      %45 = vector.load %arg4[%c0_29, %c0_30] : memref<1x128xf32, #tpu.memory_space<vmem>>, vector<1x128xf32>
      %46 = vector.broadcast %45 : vector<1x128xf32> to vector<128x128xf32>
      %47 = arith.addf %44, %46 : vector<128x128xf32>
      %cst_31 = arith.constant 0.000000e+00 : f32
      %48 = vector.broadcast %cst_31 : f32 to vector<128x128xf32>
      %49 = arith.maximumf %47, %48 : vector<128x128xf32>
      %c0_32 = arith.constant 0 : index
      %c0_33 = arith.constant 0 : index
      %50 = vector.load %arg5[%c0_32, %c0_33] : memref<128x128xf32, #tpu.memory_space<vmem>>, vector<128x128xf32>
      tpu.vector_store %arg5[%c0_32, %c0_33], %49 {strides = array<i32>} : memref<128x128xf32, #tpu.memory_space<vmem>>, vector<128x128xf32>,
    } else {
    }
    return
  }
  func.func @transform_0(%arg0: i32) -> (i32, i32) {
    %c0_i32 = arith.constant 0 : i32
    %c0_i32_0 = arith.constant 0 : i32
    return %arg0, %c0_i32 : i32, i32
  }
  func.func @transform_1(%arg0: i32) -> (i32, i32) {
    %c0_i32 = arith.constant 0 : i32
    %c0_i32_0 = arith.constant 0 : i32
    %c0_i32_1 = arith.constant 0 : i32
    return %c0_i32, %c0_i32_0 : i32, i32
  }
  func.func @transform_2(%arg0: i32) -> (i32, i32) {
    %c0_i32 = arith.constant 0 : i32
    %c0_i32_0 = arith.constant 0 : i32
    %c0_i32_1 = arith.constant 0 : i32
    return %c0_i32, %c0_i32_0 : i32, i32
  }
  func.func @transform_3(%arg0: i32) -> (i32, i32) {
    %c0_i32 = arith.constant 0 : i32
    %c0_i32_0 = arith.constant 0 : i32
    %c0_i32_1 = arith.constant 0 : i32
    return %c0_i32, %c0_i32_0 : i32, i32
  }
  func.func @transform_4(%arg0: i32) -> (i32, i32) {
    %c0_i32 = arith.constant 0 : i32
    %c0_i32_0 = arith.constant 0 : i32
    %c0_i32_1 = arith.constant 0 : i32
    return %c0_i32, %c0_i32_0 : i32, i32
  }
}

module attributes {stable_mosaic.version = 11 : i64} {
  func.func @_conv_bn_relu_kernel(%arg0: i32, %arg1: memref<32x384xbf16, #tpu.memory_space<vmem>>, %arg2: memref<384x128xbf16, #tpu.memory_space<vmem>>, %arg3: memref<1x128xf32, #tpu.memory_space<vmem>>, %arg4: memref<1x128xf32, #tpu.memory_space<vmem>>, %arg5: memref<32x128xf32, #tpu.memory_space<vmem>>, %arg6: memref<1x128xf32, #tpu.memory_space<vmem>>, %arg7: memref<1x128xf32, #tpu.memory_space<vmem>>) attributes {dimension_semantics = [#tpu.dimension_semantics<arbitrary>], iteration_bounds = array<i64: 1>, scalar_prefetch = 0 : i64, scratch_operands = 2 : i64, tpu.core_type = #tpu.core_type<tc>, window_params = [{transform_indices = @transform_0, window_bounds = array<i64: 32, 384>}, {pipeline_mode = #tpu.pipeline_mode<synchronous>, transform_indices = @transform_1, window_bounds = array<i64: 384, 128>}, {pipeline_mode = #tpu.pipeline_mode<synchronous>, transform_indices = @transform_2, window_bounds = array<i64: 1, 128>}, {pipeline_mode = #tpu.pipeline_mode<synchronous>, transform_indices = @transform_3, window_bounds = array<i64: 1, 128>}, {pipeline_mode = #tpu.pipeline_mode<synchronous>, transform_indices = @transform_4, window_bounds = array<i64: 32, 128>}]} {
    %c0_i32 = arith.constant 0 : i32
    %0 = arith.cmpi eq, %arg0, %c0_i32 : i32
    %1 = arith.extui %0 : i1 to i32
    %c0_i32_0 = arith.constant 0 : i32
    %2 = arith.cmpi ne, %1, %c0_i32_0 : i32
    scf.if %2 {
      %cst_17 = arith.constant 0.000000e+00 : f32
      %24 = vector.broadcast %cst_17 : f32 to vector<1x128xf32>
      %c0_18 = arith.constant 0 : index
      %c0_19 = arith.constant 0 : index
      %25 = vector.load %arg6[%c0_18, %c0_19] : memref<1x128xf32, #tpu.memory_space<vmem>>, vector<1x128xf32>
      tpu.vector_store %arg6[%c0_18, %c0_19], %24 {strides = array<i32>} : memref<1x128xf32, #tpu.memory_space<vmem>>, vector<1x128xf32>,
      %cst_20 = arith.constant 0.000000e+00 : f32
      %26 = vector.broadcast %cst_20 : f32 to vector<1x128xf32>
      %c0_21 = arith.constant 0 : index
      %c0_22 = arith.constant 0 : index
      %27 = vector.load %arg7[%c0_21, %c0_22] : memref<1x128xf32, #tpu.memory_space<vmem>>, vector<1x128xf32>
      tpu.vector_store %arg7[%c0_21, %c0_22], %26 {strides = array<i32>} : memref<1x128xf32, #tpu.memory_space<vmem>>, vector<1x128xf32>,
    } else {
    }
    %c0 = arith.constant 0 : index
    %c0_1 = arith.constant 0 : index
    %3 = vector.load %arg1[%c0, %c0_1] : memref<32x384xbf16, #tpu.memory_space<vmem>>, vector<32x384xbf16>
    %c0_2 = arith.constant 0 : index
    %c0_3 = arith.constant 0 : index
    %4 = vector.load %arg2[%c0_2, %c0_3] : memref<384x128xbf16, #tpu.memory_space<vmem>>, vector<384x128xbf16>
    %cst = arith.constant dense<0.000000e+00> : vector<32x128xf32>
    %5 = tpu.matmul %3, %4, %cst {dimension_numbers = #tpu.dot_dimension_numbers<[1], [0], [0], [1], [0, 0, 1, 1], [], []>} : vector<32x384xbf16>, vector<384x128xbf16>, vector<32x128xf32> -> vector<32x128xf32>
    %c32_i32 = arith.constant 32 : i32
    %6 = arith.muli %arg0, %c32_i32 : i32
    %7 = tpu.assume_multiple %6, 8 : i32
    %8 = arith.index_cast %7 : i32 to index
    %c0_4 = arith.constant 0 : index
    %9 = vector.load %arg5[%8, %c0_4] : memref<32x128xf32, #tpu.memory_space<vmem>>, vector<32x128xf32>
    tpu.vector_store %arg5[%8, %c0_4], %5 {strides = array<i32>} : memref<32x128xf32, #tpu.memory_space<vmem>>, vector<32x128xf32>,
    %c0_5 = arith.constant 0 : index
    %c0_6 = arith.constant 0 : index
    %10 = vector.load %arg6[%c0_5, %c0_6] : memref<1x128xf32, #tpu.memory_space<vmem>>, vector<1x128xf32>
    %cst_7 = arith.constant dense<0.000000e+00> : vector<128xf32>
    %11 = vector.multi_reduction <add>, %5, %cst_7 [0] : vector<32x128xf32> to vector<128xf32>
    %12 = vector.shape_cast %11 : vector<128xf32> to vector<1x128xf32>
    %13 = arith.addf %10, %12 : vector<1x128xf32>
    %c0_8 = arith.constant 0 : index
    %c0_9 = arith.constant 0 : index
    %14 = vector.load %arg6[%c0_8, %c0_9] : memref<1x128xf32, #tpu.memory_space<vmem>>, vector<1x128xf32>
    tpu.vector_store %arg6[%c0_8, %c0_9], %13 {strides = array<i32>} : memref<1x128xf32, #tpu.memory_space<vmem>>, vector<1x128xf32>,
    %c0_10 = arith.constant 0 : index
    %c0_11 = arith.constant 0 : index
    %15 = vector.load %arg7[%c0_10, %c0_11] : memref<1x128xf32, #tpu.memory_space<vmem>>, vector<1x128xf32>
    %16 = arith.mulf %5, %5 : vector<32x128xf32>
    %cst_12 = arith.constant dense<0.000000e+00> : vector<128xf32>
    %17 = vector.multi_reduction <add>, %16, %cst_12 [0] : vector<32x128xf32> to vector<128xf32>
    %18 = vector.shape_cast %17 : vector<128xf32> to vector<1x128xf32>
    %19 = arith.addf %15, %18 : vector<1x128xf32>
    %c0_13 = arith.constant 0 : index
    %c0_14 = arith.constant 0 : index
    %20 = vector.load %arg7[%c0_13, %c0_14] : memref<1x128xf32, #tpu.memory_space<vmem>>, vector<1x128xf32>
    tpu.vector_store %arg7[%c0_13, %c0_14], %19 {strides = array<i32>} : memref<1x128xf32, #tpu.memory_space<vmem>>, vector<1x128xf32>,
    %c0_i32_15 = arith.constant 0 : i32
    %21 = arith.cmpi eq, %arg0, %c0_i32_15 : i32
    %22 = arith.extui %21 : i1 to i32
    %c0_i32_16 = arith.constant 0 : i32
    %23 = arith.cmpi ne, %22, %c0_i32_16 : i32
    scf.if %23 {
      %c0_17 = arith.constant 0 : index
      %c0_18 = arith.constant 0 : index
      %24 = vector.load %arg6[%c0_17, %c0_18] : memref<1x128xf32, #tpu.memory_space<vmem>>, vector<1x128xf32>
      %c0_19 = arith.constant 0 : index
      %c0_20 = arith.constant 0 : index
      %25 = vector.load %arg7[%c0_19, %c0_20] : memref<1x128xf32, #tpu.memory_space<vmem>>, vector<1x128xf32>
      %cst_21 = arith.constant 3.125000e-02 : f32
      %26 = vector.broadcast %cst_21 : f32 to vector<1x128xf32>
      %27 = arith.mulf %24, %26 : vector<1x128xf32>
      %cst_22 = arith.constant 3.125000e-02 : f32
      %28 = vector.broadcast %cst_22 : f32 to vector<1x128xf32>
      %29 = arith.mulf %25, %28 : vector<1x128xf32>
      %30 = arith.mulf %27, %27 : vector<1x128xf32>
      %31 = arith.subf %29, %30 : vector<1x128xf32>
      %cst_23 = arith.constant 0.000000e+00 : f32
      %32 = vector.broadcast %cst_23 : f32 to vector<1x128xf32>
      %33 = arith.maximumf %31, %32 : vector<1x128xf32>
      %cst_24 = arith.constant 9.99999974E-6 : f32
      %34 = vector.broadcast %cst_24 : f32 to vector<1x128xf32>
      %35 = arith.addf %33, %34 : vector<1x128xf32>
      %36 = math.rsqrt %35 : vector<1x128xf32>
      %c0_25 = arith.constant 0 : index
      %c0_26 = arith.constant 0 : index
      %37 = vector.load %arg5[%c0_25, %c0_26] : memref<32x128xf32, #tpu.memory_space<vmem>>, vector<32x128xf32>
      %38 = vector.broadcast %27 : vector<1x128xf32> to vector<32x128xf32>
      %39 = arith.subf %37, %38 : vector<32x128xf32>
      %40 = vector.broadcast %36 : vector<1x128xf32> to vector<32x128xf32>
      %41 = arith.mulf %39, %40 : vector<32x128xf32>
      %c0_27 = arith.constant 0 : index
      %c0_28 = arith.constant 0 : index
      %42 = vector.load %arg3[%c0_27, %c0_28] : memref<1x128xf32, #tpu.memory_space<vmem>>, vector<1x128xf32>
      %43 = vector.broadcast %42 : vector<1x128xf32> to vector<32x128xf32>
      %44 = arith.mulf %41, %43 : vector<32x128xf32>
      %c0_29 = arith.constant 0 : index
      %c0_30 = arith.constant 0 : index
      %45 = vector.load %arg4[%c0_29, %c0_30] : memref<1x128xf32, #tpu.memory_space<vmem>>, vector<1x128xf32>
      %46 = vector.broadcast %45 : vector<1x128xf32> to vector<32x128xf32>
      %47 = arith.addf %44, %46 : vector<32x128xf32>
      %cst_31 = arith.constant 0.000000e+00 : f32
      %48 = vector.broadcast %cst_31 : f32 to vector<32x128xf32>
      %49 = arith.maximumf %47, %48 : vector<32x128xf32>
      %c0_32 = arith.constant 0 : index
      %c0_33 = arith.constant 0 : index
      %50 = vector.load %arg5[%c0_32, %c0_33] : memref<32x128xf32, #tpu.memory_space<vmem>>, vector<32x128xf32>
      tpu.vector_store %arg5[%c0_32, %c0_33], %49 {strides = array<i32>} : memref<32x128xf32, #tpu.memory_space<vmem>>, vector<32x128xf32>,
    } else {
    }
    return
  }
  func.func @transform_0(%arg0: i32) -> (i32, i32) {
    %c0_i32 = arith.constant 0 : i32
    %c0_i32_0 = arith.constant 0 : i32
    return %arg0, %c0_i32 : i32, i32
  }
  func.func @transform_1(%arg0: i32) -> (i32, i32) {
    %c0_i32 = arith.constant 0 : i32
    %c0_i32_0 = arith.constant 0 : i32
    %c0_i32_1 = arith.constant 0 : i32
    return %c0_i32, %c0_i32_0 : i32, i32
  }
  func.func @transform_2(%arg0: i32) -> (i32, i32) {
    %c0_i32 = arith.constant 0 : i32
    %c0_i32_0 = arith.constant 0 : i32
    %c0_i32_1 = arith.constant 0 : i32
    return %c0_i32, %c0_i32_0 : i32, i32
  }
  func.func @transform_3(%arg0: i32) -> (i32, i32) {
    %c0_i32 = arith.constant 0 : i32
    %c0_i32_0 = arith.constant 0 : i32
    %c0_i32_1 = arith.constant 0 : i32
    return %c0_i32, %c0_i32_0 : i32, i32
  }
  func.func @transform_4(%arg0: i32) -> (i32, i32) {
    %c0_i32 = arith.constant 0 : i32
    %c0_i32_0 = arith.constant 0 : i32
    %c0_i32_1 = arith.constant 0 : i32
    return %c0_i32, %c0_i32_0 : i32, i32
  }
}

module attributes {stable_mosaic.version = 11 : i64} {
  func.func @_conv_bn_relu_kernel(%arg0: i32, %arg1: memref<32x640xbf16, #tpu.memory_space<vmem>>, %arg2: memref<640x128xbf16, #tpu.memory_space<vmem>>, %arg3: memref<1x128xf32, #tpu.memory_space<vmem>>, %arg4: memref<1x128xf32, #tpu.memory_space<vmem>>, %arg5: memref<32x128xf32, #tpu.memory_space<vmem>>, %arg6: memref<1x128xf32, #tpu.memory_space<vmem>>, %arg7: memref<1x128xf32, #tpu.memory_space<vmem>>) attributes {dimension_semantics = [#tpu.dimension_semantics<arbitrary>], iteration_bounds = array<i64: 1>, scalar_prefetch = 0 : i64, scratch_operands = 2 : i64, tpu.core_type = #tpu.core_type<tc>, window_params = [{transform_indices = @transform_0, window_bounds = array<i64: 32, 640>}, {pipeline_mode = #tpu.pipeline_mode<synchronous>, transform_indices = @transform_1, window_bounds = array<i64: 640, 128>}, {pipeline_mode = #tpu.pipeline_mode<synchronous>, transform_indices = @transform_2, window_bounds = array<i64: 1, 128>}, {pipeline_mode = #tpu.pipeline_mode<synchronous>, transform_indices = @transform_3, window_bounds = array<i64: 1, 128>}, {pipeline_mode = #tpu.pipeline_mode<synchronous>, transform_indices = @transform_4, window_bounds = array<i64: 32, 128>}]} {
    %c0_i32 = arith.constant 0 : i32
    %0 = arith.cmpi eq, %arg0, %c0_i32 : i32
    %1 = arith.extui %0 : i1 to i32
    %c0_i32_0 = arith.constant 0 : i32
    %2 = arith.cmpi ne, %1, %c0_i32_0 : i32
    scf.if %2 {
      %cst_17 = arith.constant 0.000000e+00 : f32
      %24 = vector.broadcast %cst_17 : f32 to vector<1x128xf32>
      %c0_18 = arith.constant 0 : index
      %c0_19 = arith.constant 0 : index
      %25 = vector.load %arg6[%c0_18, %c0_19] : memref<1x128xf32, #tpu.memory_space<vmem>>, vector<1x128xf32>
      tpu.vector_store %arg6[%c0_18, %c0_19], %24 {strides = array<i32>} : memref<1x128xf32, #tpu.memory_space<vmem>>, vector<1x128xf32>,
      %cst_20 = arith.constant 0.000000e+00 : f32
      %26 = vector.broadcast %cst_20 : f32 to vector<1x128xf32>
      %c0_21 = arith.constant 0 : index
      %c0_22 = arith.constant 0 : index
      %27 = vector.load %arg7[%c0_21, %c0_22] : memref<1x128xf32, #tpu.memory_space<vmem>>, vector<1x128xf32>
      tpu.vector_store %arg7[%c0_21, %c0_22], %26 {strides = array<i32>} : memref<1x128xf32, #tpu.memory_space<vmem>>, vector<1x128xf32>,
    } else {
    }
    %c0 = arith.constant 0 : index
    %c0_1 = arith.constant 0 : index
    %3 = vector.load %arg1[%c0, %c0_1] : memref<32x640xbf16, #tpu.memory_space<vmem>>, vector<32x640xbf16>
    %c0_2 = arith.constant 0 : index
    %c0_3 = arith.constant 0 : index
    %4 = vector.load %arg2[%c0_2, %c0_3] : memref<640x128xbf16, #tpu.memory_space<vmem>>, vector<640x128xbf16>
    %cst = arith.constant dense<0.000000e+00> : vector<32x128xf32>
    %5 = tpu.matmul %3, %4, %cst {dimension_numbers = #tpu.dot_dimension_numbers<[1], [0], [0], [1], [0, 0, 1, 1], [], []>} : vector<32x640xbf16>, vector<640x128xbf16>, vector<32x128xf32> -> vector<32x128xf32>
    %c32_i32 = arith.constant 32 : i32
    %6 = arith.muli %arg0, %c32_i32 : i32
    %7 = tpu.assume_multiple %6, 8 : i32
    %8 = arith.index_cast %7 : i32 to index
    %c0_4 = arith.constant 0 : index
    %9 = vector.load %arg5[%8, %c0_4] : memref<32x128xf32, #tpu.memory_space<vmem>>, vector<32x128xf32>
    tpu.vector_store %arg5[%8, %c0_4], %5 {strides = array<i32>} : memref<32x128xf32, #tpu.memory_space<vmem>>, vector<32x128xf32>,
    %c0_5 = arith.constant 0 : index
    %c0_6 = arith.constant 0 : index
    %10 = vector.load %arg6[%c0_5, %c0_6] : memref<1x128xf32, #tpu.memory_space<vmem>>, vector<1x128xf32>
    %cst_7 = arith.constant dense<0.000000e+00> : vector<128xf32>
    %11 = vector.multi_reduction <add>, %5, %cst_7 [0] : vector<32x128xf32> to vector<128xf32>
    %12 = vector.shape_cast %11 : vector<128xf32> to vector<1x128xf32>
    %13 = arith.addf %10, %12 : vector<1x128xf32>
    %c0_8 = arith.constant 0 : index
    %c0_9 = arith.constant 0 : index
    %14 = vector.load %arg6[%c0_8, %c0_9] : memref<1x128xf32, #tpu.memory_space<vmem>>, vector<1x128xf32>
    tpu.vector_store %arg6[%c0_8, %c0_9], %13 {strides = array<i32>} : memref<1x128xf32, #tpu.memory_space<vmem>>, vector<1x128xf32>,
    %c0_10 = arith.constant 0 : index
    %c0_11 = arith.constant 0 : index
    %15 = vector.load %arg7[%c0_10, %c0_11] : memref<1x128xf32, #tpu.memory_space<vmem>>, vector<1x128xf32>
    %16 = arith.mulf %5, %5 : vector<32x128xf32>
    %cst_12 = arith.constant dense<0.000000e+00> : vector<128xf32>
    %17 = vector.multi_reduction <add>, %16, %cst_12 [0] : vector<32x128xf32> to vector<128xf32>
    %18 = vector.shape_cast %17 : vector<128xf32> to vector<1x128xf32>
    %19 = arith.addf %15, %18 : vector<1x128xf32>
    %c0_13 = arith.constant 0 : index
    %c0_14 = arith.constant 0 : index
    %20 = vector.load %arg7[%c0_13, %c0_14] : memref<1x128xf32, #tpu.memory_space<vmem>>, vector<1x128xf32>
    tpu.vector_store %arg7[%c0_13, %c0_14], %19 {strides = array<i32>} : memref<1x128xf32, #tpu.memory_space<vmem>>, vector<1x128xf32>,
    %c0_i32_15 = arith.constant 0 : i32
    %21 = arith.cmpi eq, %arg0, %c0_i32_15 : i32
    %22 = arith.extui %21 : i1 to i32
    %c0_i32_16 = arith.constant 0 : i32
    %23 = arith.cmpi ne, %22, %c0_i32_16 : i32
    scf.if %23 {
      %c0_17 = arith.constant 0 : index
      %c0_18 = arith.constant 0 : index
      %24 = vector.load %arg6[%c0_17, %c0_18] : memref<1x128xf32, #tpu.memory_space<vmem>>, vector<1x128xf32>
      %c0_19 = arith.constant 0 : index
      %c0_20 = arith.constant 0 : index
      %25 = vector.load %arg7[%c0_19, %c0_20] : memref<1x128xf32, #tpu.memory_space<vmem>>, vector<1x128xf32>
      %cst_21 = arith.constant 3.125000e-02 : f32
      %26 = vector.broadcast %cst_21 : f32 to vector<1x128xf32>
      %27 = arith.mulf %24, %26 : vector<1x128xf32>
      %cst_22 = arith.constant 3.125000e-02 : f32
      %28 = vector.broadcast %cst_22 : f32 to vector<1x128xf32>
      %29 = arith.mulf %25, %28 : vector<1x128xf32>
      %30 = arith.mulf %27, %27 : vector<1x128xf32>
      %31 = arith.subf %29, %30 : vector<1x128xf32>
      %cst_23 = arith.constant 0.000000e+00 : f32
      %32 = vector.broadcast %cst_23 : f32 to vector<1x128xf32>
      %33 = arith.maximumf %31, %32 : vector<1x128xf32>
      %cst_24 = arith.constant 9.99999974E-6 : f32
      %34 = vector.broadcast %cst_24 : f32 to vector<1x128xf32>
      %35 = arith.addf %33, %34 : vector<1x128xf32>
      %36 = math.rsqrt %35 : vector<1x128xf32>
      %c0_25 = arith.constant 0 : index
      %c0_26 = arith.constant 0 : index
      %37 = vector.load %arg5[%c0_25, %c0_26] : memref<32x128xf32, #tpu.memory_space<vmem>>, vector<32x128xf32>
      %38 = vector.broadcast %27 : vector<1x128xf32> to vector<32x128xf32>
      %39 = arith.subf %37, %38 : vector<32x128xf32>
      %40 = vector.broadcast %36 : vector<1x128xf32> to vector<32x128xf32>
      %41 = arith.mulf %39, %40 : vector<32x128xf32>
      %c0_27 = arith.constant 0 : index
      %c0_28 = arith.constant 0 : index
      %42 = vector.load %arg3[%c0_27, %c0_28] : memref<1x128xf32, #tpu.memory_space<vmem>>, vector<1x128xf32>
      %43 = vector.broadcast %42 : vector<1x128xf32> to vector<32x128xf32>
      %44 = arith.mulf %41, %43 : vector<32x128xf32>
      %c0_29 = arith.constant 0 : index
      %c0_30 = arith.constant 0 : index
      %45 = vector.load %arg4[%c0_29, %c0_30] : memref<1x128xf32, #tpu.memory_space<vmem>>, vector<1x128xf32>
      %46 = vector.broadcast %45 : vector<1x128xf32> to vector<32x128xf32>
      %47 = arith.addf %44, %46 : vector<32x128xf32>
      %cst_31 = arith.constant 0.000000e+00 : f32
      %48 = vector.broadcast %cst_31 : f32 to vector<32x128xf32>
      %49 = arith.maximumf %47, %48 : vector<32x128xf32>
      %c0_32 = arith.constant 0 : index
      %c0_33 = arith.constant 0 : index
      %50 = vector.load %arg5[%c0_32, %c0_33] : memref<32x128xf32, #tpu.memory_space<vmem>>, vector<32x128xf32>
      tpu.vector_store %arg5[%c0_32, %c0_33], %49 {strides = array<i32>} : memref<32x128xf32, #tpu.memory_space<vmem>>, vector<32x128xf32>,
    } else {
    }
    return
  }
  func.func @transform_0(%arg0: i32) -> (i32, i32) {
    %c0_i32 = arith.constant 0 : i32
    %c0_i32_0 = arith.constant 0 : i32
    return %arg0, %c0_i32 : i32, i32
  }
  func.func @transform_1(%arg0: i32) -> (i32, i32) {
    %c0_i32 = arith.constant 0 : i32
    %c0_i32_0 = arith.constant 0 : i32
    %c0_i32_1 = arith.constant 0 : i32
    return %c0_i32, %c0_i32_0 : i32, i32
  }
  func.func @transform_2(%arg0: i32) -> (i32, i32) {
    %c0_i32 = arith.constant 0 : i32
    %c0_i32_0 = arith.constant 0 : i32
    %c0_i32_1 = arith.constant 0 : i32
    return %c0_i32, %c0_i32_0 : i32, i32
  }
  func.func @transform_3(%arg0: i32) -> (i32, i32) {
    %c0_i32 = arith.constant 0 : i32
    %c0_i32_0 = arith.constant 0 : i32
    %c0_i32_1 = arith.constant 0 : i32
    return %c0_i32, %c0_i32_0 : i32, i32
  }
  func.func @transform_4(%arg0: i32) -> (i32, i32) {
    %c0_i32 = arith.constant 0 : i32
    %c0_i32_0 = arith.constant 0 : i32
    %c0_i32_1 = arith.constant 0 : i32
    return %c0_i32, %c0_i32_0 : i32, i32
  }
}

module attributes {stable_mosaic.version = 11 : i64} {
  func.func @_conv_bn_relu_kernel(%arg0: i32, %arg1: memref<8x640xbf16, #tpu.memory_space<vmem>>, %arg2: memref<640x128xbf16, #tpu.memory_space<vmem>>, %arg3: memref<1x128xf32, #tpu.memory_space<vmem>>, %arg4: memref<1x128xf32, #tpu.memory_space<vmem>>, %arg5: memref<8x128xf32, #tpu.memory_space<vmem>>, %arg6: memref<1x128xf32, #tpu.memory_space<vmem>>, %arg7: memref<1x128xf32, #tpu.memory_space<vmem>>) attributes {dimension_semantics = [#tpu.dimension_semantics<arbitrary>], iteration_bounds = array<i64: 1>, scalar_prefetch = 0 : i64, scratch_operands = 2 : i64, tpu.core_type = #tpu.core_type<tc>, window_params = [{transform_indices = @transform_0, window_bounds = array<i64: 8, 640>}, {pipeline_mode = #tpu.pipeline_mode<synchronous>, transform_indices = @transform_1, window_bounds = array<i64: 640, 128>}, {pipeline_mode = #tpu.pipeline_mode<synchronous>, transform_indices = @transform_2, window_bounds = array<i64: 1, 128>}, {pipeline_mode = #tpu.pipeline_mode<synchronous>, transform_indices = @transform_3, window_bounds = array<i64: 1, 128>}, {pipeline_mode = #tpu.pipeline_mode<synchronous>, transform_indices = @transform_4, window_bounds = array<i64: 8, 128>}]} {
    %c0_i32 = arith.constant 0 : i32
    %0 = arith.cmpi eq, %arg0, %c0_i32 : i32
    %1 = arith.extui %0 : i1 to i32
    %c0_i32_0 = arith.constant 0 : i32
    %2 = arith.cmpi ne, %1, %c0_i32_0 : i32
    scf.if %2 {
      %cst_17 = arith.constant 0.000000e+00 : f32
      %24 = vector.broadcast %cst_17 : f32 to vector<1x128xf32>
      %c0_18 = arith.constant 0 : index
      %c0_19 = arith.constant 0 : index
      %25 = vector.load %arg6[%c0_18, %c0_19] : memref<1x128xf32, #tpu.memory_space<vmem>>, vector<1x128xf32>
      tpu.vector_store %arg6[%c0_18, %c0_19], %24 {strides = array<i32>} : memref<1x128xf32, #tpu.memory_space<vmem>>, vector<1x128xf32>,
      %cst_20 = arith.constant 0.000000e+00 : f32
      %26 = vector.broadcast %cst_20 : f32 to vector<1x128xf32>
      %c0_21 = arith.constant 0 : index
      %c0_22 = arith.constant 0 : index
      %27 = vector.load %arg7[%c0_21, %c0_22] : memref<1x128xf32, #tpu.memory_space<vmem>>, vector<1x128xf32>
      tpu.vector_store %arg7[%c0_21, %c0_22], %26 {strides = array<i32>} : memref<1x128xf32, #tpu.memory_space<vmem>>, vector<1x128xf32>,
    } else {
    }
    %c0 = arith.constant 0 : index
    %c0_1 = arith.constant 0 : index
    %3 = vector.load %arg1[%c0, %c0_1] : memref<8x640xbf16, #tpu.memory_space<vmem>>, vector<8x640xbf16>
    %c0_2 = arith.constant 0 : index
    %c0_3 = arith.constant 0 : index
    %4 = vector.load %arg2[%c0_2, %c0_3] : memref<640x128xbf16, #tpu.memory_space<vmem>>, vector<640x128xbf16>
    %cst = arith.constant dense<0.000000e+00> : vector<8x128xf32>
    %5 = tpu.matmul %3, %4, %cst {dimension_numbers = #tpu.dot_dimension_numbers<[1], [0], [0], [1], [0, 0, 1, 1], [], []>} : vector<8x640xbf16>, vector<640x128xbf16>, vector<8x128xf32> -> vector<8x128xf32>
    %c8_i32 = arith.constant 8 : i32
    %6 = arith.muli %arg0, %c8_i32 : i32
    %7 = tpu.assume_multiple %6, 8 : i32
    %8 = arith.index_cast %7 : i32 to index
    %c0_4 = arith.constant 0 : index
    %9 = vector.load %arg5[%8, %c0_4] : memref<8x128xf32, #tpu.memory_space<vmem>>, vector<8x128xf32>
    tpu.vector_store %arg5[%8, %c0_4], %5 {strides = array<i32>} : memref<8x128xf32, #tpu.memory_space<vmem>>, vector<8x128xf32>,
    %c0_5 = arith.constant 0 : index
    %c0_6 = arith.constant 0 : index
    %10 = vector.load %arg6[%c0_5, %c0_6] : memref<1x128xf32, #tpu.memory_space<vmem>>, vector<1x128xf32>
    %cst_7 = arith.constant dense<0.000000e+00> : vector<128xf32>
    %11 = vector.multi_reduction <add>, %5, %cst_7 [0] : vector<8x128xf32> to vector<128xf32>
    %12 = vector.shape_cast %11 : vector<128xf32> to vector<1x128xf32>
    %13 = arith.addf %10, %12 : vector<1x128xf32>
    %c0_8 = arith.constant 0 : index
    %c0_9 = arith.constant 0 : index
    %14 = vector.load %arg6[%c0_8, %c0_9] : memref<1x128xf32, #tpu.memory_space<vmem>>, vector<1x128xf32>
    tpu.vector_store %arg6[%c0_8, %c0_9], %13 {strides = array<i32>} : memref<1x128xf32, #tpu.memory_space<vmem>>, vector<1x128xf32>,
    %c0_10 = arith.constant 0 : index
    %c0_11 = arith.constant 0 : index
    %15 = vector.load %arg7[%c0_10, %c0_11] : memref<1x128xf32, #tpu.memory_space<vmem>>, vector<1x128xf32>
    %16 = arith.mulf %5, %5 : vector<8x128xf32>
    %cst_12 = arith.constant dense<0.000000e+00> : vector<128xf32>
    %17 = vector.multi_reduction <add>, %16, %cst_12 [0] : vector<8x128xf32> to vector<128xf32>
    %18 = vector.shape_cast %17 : vector<128xf32> to vector<1x128xf32>
    %19 = arith.addf %15, %18 : vector<1x128xf32>
    %c0_13 = arith.constant 0 : index
    %c0_14 = arith.constant 0 : index
    %20 = vector.load %arg7[%c0_13, %c0_14] : memref<1x128xf32, #tpu.memory_space<vmem>>, vector<1x128xf32>
    tpu.vector_store %arg7[%c0_13, %c0_14], %19 {strides = array<i32>} : memref<1x128xf32, #tpu.memory_space<vmem>>, vector<1x128xf32>,
    %c0_i32_15 = arith.constant 0 : i32
    %21 = arith.cmpi eq, %arg0, %c0_i32_15 : i32
    %22 = arith.extui %21 : i1 to i32
    %c0_i32_16 = arith.constant 0 : i32
    %23 = arith.cmpi ne, %22, %c0_i32_16 : i32
    scf.if %23 {
      %c0_17 = arith.constant 0 : index
      %c0_18 = arith.constant 0 : index
      %24 = vector.load %arg6[%c0_17, %c0_18] : memref<1x128xf32, #tpu.memory_space<vmem>>, vector<1x128xf32>
      %c0_19 = arith.constant 0 : index
      %c0_20 = arith.constant 0 : index
      %25 = vector.load %arg7[%c0_19, %c0_20] : memref<1x128xf32, #tpu.memory_space<vmem>>, vector<1x128xf32>
      %cst_21 = arith.constant 1.250000e-01 : f32
      %26 = vector.broadcast %cst_21 : f32 to vector<1x128xf32>
      %27 = arith.mulf %24, %26 : vector<1x128xf32>
      %cst_22 = arith.constant 1.250000e-01 : f32
      %28 = vector.broadcast %cst_22 : f32 to vector<1x128xf32>
      %29 = arith.mulf %25, %28 : vector<1x128xf32>
      %30 = arith.mulf %27, %27 : vector<1x128xf32>
      %31 = arith.subf %29, %30 : vector<1x128xf32>
      %cst_23 = arith.constant 0.000000e+00 : f32
      %32 = vector.broadcast %cst_23 : f32 to vector<1x128xf32>
      %33 = arith.maximumf %31, %32 : vector<1x128xf32>
      %cst_24 = arith.constant 9.99999974E-6 : f32
      %34 = vector.broadcast %cst_24 : f32 to vector<1x128xf32>
      %35 = arith.addf %33, %34 : vector<1x128xf32>
      %36 = math.rsqrt %35 : vector<1x128xf32>
      %c0_25 = arith.constant 0 : index
      %c0_26 = arith.constant 0 : index
      %37 = vector.load %arg5[%c0_25, %c0_26] : memref<8x128xf32, #tpu.memory_space<vmem>>, vector<8x128xf32>
      %38 = vector.broadcast %27 : vector<1x128xf32> to vector<8x128xf32>
      %39 = arith.subf %37, %38 : vector<8x128xf32>
      %40 = vector.broadcast %36 : vector<1x128xf32> to vector<8x128xf32>
      %41 = arith.mulf %39, %40 : vector<8x128xf32>
      %c0_27 = arith.constant 0 : index
      %c0_28 = arith.constant 0 : index
      %42 = vector.load %arg3[%c0_27, %c0_28] : memref<1x128xf32, #tpu.memory_space<vmem>>, vector<1x128xf32>
      %43 = vector.broadcast %42 : vector<1x128xf32> to vector<8x128xf32>
      %44 = arith.mulf %41, %43 : vector<8x128xf32>
      %c0_29 = arith.constant 0 : index
      %c0_30 = arith.constant 0 : index
      %45 = vector.load %arg4[%c0_29, %c0_30] : memref<1x128xf32, #tpu.memory_space<vmem>>, vector<1x128xf32>
      %46 = vector.broadcast %45 : vector<1x128xf32> to vector<8x128xf32>
      %47 = arith.addf %44, %46 : vector<8x128xf32>
      %cst_31 = arith.constant 0.000000e+00 : f32
      %48 = vector.broadcast %cst_31 : f32 to vector<8x128xf32>
      %49 = arith.maximumf %47, %48 : vector<8x128xf32>
      %c0_32 = arith.constant 0 : index
      %c0_33 = arith.constant 0 : index
      %50 = vector.load %arg5[%c0_32, %c0_33] : memref<8x128xf32, #tpu.memory_space<vmem>>, vector<8x128xf32>
      tpu.vector_store %arg5[%c0_32, %c0_33], %49 {strides = array<i32>} : memref<8x128xf32, #tpu.memory_space<vmem>>, vector<8x128xf32>,
    } else {
    }
    return
  }
  func.func @transform_0(%arg0: i32) -> (i32, i32) {
    %c0_i32 = arith.constant 0 : i32
    %c0_i32_0 = arith.constant 0 : i32
    return %arg0, %c0_i32 : i32, i32
  }
  func.func @transform_1(%arg0: i32) -> (i32, i32) {
    %c0_i32 = arith.constant 0 : i32
    %c0_i32_0 = arith.constant 0 : i32
    %c0_i32_1 = arith.constant 0 : i32
    return %c0_i32, %c0_i32_0 : i32, i32
  }
  func.func @transform_2(%arg0: i32) -> (i32, i32) {
    %c0_i32 = arith.constant 0 : i32
    %c0_i32_0 = arith.constant 0 : i32
    %c0_i32_1 = arith.constant 0 : i32
    return %c0_i32, %c0_i32_0 : i32, i32
  }
  func.func @transform_3(%arg0: i32) -> (i32, i32) {
    %c0_i32 = arith.constant 0 : i32
    %c0_i32_0 = arith.constant 0 : i32
    %c0_i32_1 = arith.constant 0 : i32
    return %c0_i32, %c0_i32_0 : i32, i32
  }
  func.func @transform_4(%arg0: i32) -> (i32, i32) {
    %c0_i32 = arith.constant 0 : i32
    %c0_i32_0 = arith.constant 0 : i32
    %c0_i32_1 = arith.constant 0 : i32
    return %c0_i32, %c0_i32_0 : i32, i32
  }
}

module attributes {stable_mosaic.version = 11 : i64} {
  func.func @_conv_bn_relu_kernel(%arg0: i32, %arg1: memref<8x640xbf16, #tpu.memory_space<vmem>>, %arg2: memref<640x128xbf16, #tpu.memory_space<vmem>>, %arg3: memref<1x128xf32, #tpu.memory_space<vmem>>, %arg4: memref<1x128xf32, #tpu.memory_space<vmem>>, %arg5: memref<8x128xf32, #tpu.memory_space<vmem>>, %arg6: memref<1x128xf32, #tpu.memory_space<vmem>>, %arg7: memref<1x128xf32, #tpu.memory_space<vmem>>) attributes {dimension_semantics = [#tpu.dimension_semantics<arbitrary>], iteration_bounds = array<i64: 1>, scalar_prefetch = 0 : i64, scratch_operands = 2 : i64, tpu.core_type = #tpu.core_type<tc>, window_params = [{transform_indices = @transform_0, window_bounds = array<i64: 8, 640>}, {pipeline_mode = #tpu.pipeline_mode<synchronous>, transform_indices = @transform_1, window_bounds = array<i64: 640, 128>}, {pipeline_mode = #tpu.pipeline_mode<synchronous>, transform_indices = @transform_2, window_bounds = array<i64: 1, 128>}, {pipeline_mode = #tpu.pipeline_mode<synchronous>, transform_indices = @transform_3, window_bounds = array<i64: 1, 128>}, {pipeline_mode = #tpu.pipeline_mode<synchronous>, transform_indices = @transform_4, window_bounds = array<i64: 8, 128>}]} {
    %c0_i32 = arith.constant 0 : i32
    %0 = arith.cmpi eq, %arg0, %c0_i32 : i32
    %1 = arith.extui %0 : i1 to i32
    %c0_i32_0 = arith.constant 0 : i32
    %2 = arith.cmpi ne, %1, %c0_i32_0 : i32
    scf.if %2 {
      %cst_17 = arith.constant 0.000000e+00 : f32
      %24 = vector.broadcast %cst_17 : f32 to vector<1x128xf32>
      %c0_18 = arith.constant 0 : index
      %c0_19 = arith.constant 0 : index
      %25 = vector.load %arg6[%c0_18, %c0_19] : memref<1x128xf32, #tpu.memory_space<vmem>>, vector<1x128xf32>
      tpu.vector_store %arg6[%c0_18, %c0_19], %24 {strides = array<i32>} : memref<1x128xf32, #tpu.memory_space<vmem>>, vector<1x128xf32>,
      %cst_20 = arith.constant 0.000000e+00 : f32
      %26 = vector.broadcast %cst_20 : f32 to vector<1x128xf32>
      %c0_21 = arith.constant 0 : index
      %c0_22 = arith.constant 0 : index
      %27 = vector.load %arg7[%c0_21, %c0_22] : memref<1x128xf32, #tpu.memory_space<vmem>>, vector<1x128xf32>
      tpu.vector_store %arg7[%c0_21, %c0_22], %26 {strides = array<i32>} : memref<1x128xf32, #tpu.memory_space<vmem>>, vector<1x128xf32>,
    } else {
    }
    %c0 = arith.constant 0 : index
    %c0_1 = arith.constant 0 : index
    %3 = vector.load %arg1[%c0, %c0_1] : memref<8x640xbf16, #tpu.memory_space<vmem>>, vector<8x640xbf16>
    %c0_2 = arith.constant 0 : index
    %c0_3 = arith.constant 0 : index
    %4 = vector.load %arg2[%c0_2, %c0_3] : memref<640x128xbf16, #tpu.memory_space<vmem>>, vector<640x128xbf16>
    %cst = arith.constant dense<0.000000e+00> : vector<8x128xf32>
    %5 = tpu.matmul %3, %4, %cst {dimension_numbers = #tpu.dot_dimension_numbers<[1], [0], [0], [1], [0, 0, 1, 1], [], []>} : vector<8x640xbf16>, vector<640x128xbf16>, vector<8x128xf32> -> vector<8x128xf32>
    %c8_i32 = arith.constant 8 : i32
    %6 = arith.muli %arg0, %c8_i32 : i32
    %7 = tpu.assume_multiple %6, 8 : i32
    %8 = arith.index_cast %7 : i32 to index
    %c0_4 = arith.constant 0 : index
    %9 = vector.load %arg5[%8, %c0_4] : memref<8x128xf32, #tpu.memory_space<vmem>>, vector<8x128xf32>
    tpu.vector_store %arg5[%8, %c0_4], %5 {strides = array<i32>} : memref<8x128xf32, #tpu.memory_space<vmem>>, vector<8x128xf32>,
    %c0_5 = arith.constant 0 : index
    %c0_6 = arith.constant 0 : index
    %10 = vector.load %arg6[%c0_5, %c0_6] : memref<1x128xf32, #tpu.memory_space<vmem>>, vector<1x128xf32>
    %cst_7 = arith.constant dense<0.000000e+00> : vector<128xf32>
    %11 = vector.multi_reduction <add>, %5, %cst_7 [0] : vector<8x128xf32> to vector<128xf32>
    %12 = vector.shape_cast %11 : vector<128xf32> to vector<1x128xf32>
    %13 = arith.addf %10, %12 : vector<1x128xf32>
    %c0_8 = arith.constant 0 : index
    %c0_9 = arith.constant 0 : index
    %14 = vector.load %arg6[%c0_8, %c0_9] : memref<1x128xf32, #tpu.memory_space<vmem>>, vector<1x128xf32>
    tpu.vector_store %arg6[%c0_8, %c0_9], %13 {strides = array<i32>} : memref<1x128xf32, #tpu.memory_space<vmem>>, vector<1x128xf32>,
    %c0_10 = arith.constant 0 : index
    %c0_11 = arith.constant 0 : index
    %15 = vector.load %arg7[%c0_10, %c0_11] : memref<1x128xf32, #tpu.memory_space<vmem>>, vector<1x128xf32>
    %16 = arith.mulf %5, %5 : vector<8x128xf32>
    %cst_12 = arith.constant dense<0.000000e+00> : vector<128xf32>
    %17 = vector.multi_reduction <add>, %16, %cst_12 [0] : vector<8x128xf32> to vector<128xf32>
    %18 = vector.shape_cast %17 : vector<128xf32> to vector<1x128xf32>
    %19 = arith.addf %15, %18 : vector<1x128xf32>
    %c0_13 = arith.constant 0 : index
    %c0_14 = arith.constant 0 : index
    %20 = vector.load %arg7[%c0_13, %c0_14] : memref<1x128xf32, #tpu.memory_space<vmem>>, vector<1x128xf32>
    tpu.vector_store %arg7[%c0_13, %c0_14], %19 {strides = array<i32>} : memref<1x128xf32, #tpu.memory_space<vmem>>, vector<1x128xf32>,
    %c0_i32_15 = arith.constant 0 : i32
    %21 = arith.cmpi eq, %arg0, %c0_i32_15 : i32
    %22 = arith.extui %21 : i1 to i32
    %c0_i32_16 = arith.constant 0 : i32
    %23 = arith.cmpi ne, %22, %c0_i32_16 : i32
    scf.if %23 {
      %c0_17 = arith.constant 0 : index
      %c0_18 = arith.constant 0 : index
      %24 = vector.load %arg6[%c0_17, %c0_18] : memref<1x128xf32, #tpu.memory_space<vmem>>, vector<1x128xf32>
      %c0_19 = arith.constant 0 : index
      %c0_20 = arith.constant 0 : index
      %25 = vector.load %arg7[%c0_19, %c0_20] : memref<1x128xf32, #tpu.memory_space<vmem>>, vector<1x128xf32>
      %cst_21 = arith.constant 5.000000e-01 : f32
      %26 = vector.broadcast %cst_21 : f32 to vector<1x128xf32>
      %27 = arith.mulf %24, %26 : vector<1x128xf32>
      %cst_22 = arith.constant 5.000000e-01 : f32
      %28 = vector.broadcast %cst_22 : f32 to vector<1x128xf32>
      %29 = arith.mulf %25, %28 : vector<1x128xf32>
      %30 = arith.mulf %27, %27 : vector<1x128xf32>
      %31 = arith.subf %29, %30 : vector<1x128xf32>
      %cst_23 = arith.constant 0.000000e+00 : f32
      %32 = vector.broadcast %cst_23 : f32 to vector<1x128xf32>
      %33 = arith.maximumf %31, %32 : vector<1x128xf32>
      %cst_24 = arith.constant 9.99999974E-6 : f32
      %34 = vector.broadcast %cst_24 : f32 to vector<1x128xf32>
      %35 = arith.addf %33, %34 : vector<1x128xf32>
      %36 = math.rsqrt %35 : vector<1x128xf32>
      %c0_25 = arith.constant 0 : index
      %c0_26 = arith.constant 0 : index
      %37 = vector.load %arg5[%c0_25, %c0_26] : memref<8x128xf32, #tpu.memory_space<vmem>>, vector<8x128xf32>
      %38 = vector.broadcast %27 : vector<1x128xf32> to vector<8x128xf32>
      %39 = arith.subf %37, %38 : vector<8x128xf32>
      %40 = vector.broadcast %36 : vector<1x128xf32> to vector<8x128xf32>
      %41 = arith.mulf %39, %40 : vector<8x128xf32>
      %c0_27 = arith.constant 0 : index
      %c0_28 = arith.constant 0 : index
      %42 = vector.load %arg3[%c0_27, %c0_28] : memref<1x128xf32, #tpu.memory_space<vmem>>, vector<1x128xf32>
      %43 = vector.broadcast %42 : vector<1x128xf32> to vector<8x128xf32>
      %44 = arith.mulf %41, %43 : vector<8x128xf32>
      %c0_29 = arith.constant 0 : index
      %c0_30 = arith.constant 0 : index
      %45 = vector.load %arg4[%c0_29, %c0_30] : memref<1x128xf32, #tpu.memory_space<vmem>>, vector<1x128xf32>
      %46 = vector.broadcast %45 : vector<1x128xf32> to vector<8x128xf32>
      %47 = arith.addf %44, %46 : vector<8x128xf32>
      %cst_31 = arith.constant 0.000000e+00 : f32
      %48 = vector.broadcast %cst_31 : f32 to vector<8x128xf32>
      %49 = arith.maximumf %47, %48 : vector<8x128xf32>
      %c0_32 = arith.constant 0 : index
      %c0_33 = arith.constant 0 : index
      %50 = vector.load %arg5[%c0_32, %c0_33] : memref<8x128xf32, #tpu.memory_space<vmem>>, vector<8x128xf32>
      tpu.vector_store %arg5[%c0_32, %c0_33], %49 {strides = array<i32>} : memref<8x128xf32, #tpu.memory_space<vmem>>, vector<8x128xf32>,
    } else {
    }
    return
  }
  func.func @transform_0(%arg0: i32) -> (i32, i32) {
    %c0_i32 = arith.constant 0 : i32
    %c0_i32_0 = arith.constant 0 : i32
    return %arg0, %c0_i32 : i32, i32
  }
  func.func @transform_1(%arg0: i32) -> (i32, i32) {
    %c0_i32 = arith.constant 0 : i32
    %c0_i32_0 = arith.constant 0 : i32
    %c0_i32_1 = arith.constant 0 : i32
    return %c0_i32, %c0_i32_0 : i32, i32
  }
  func.func @transform_2(%arg0: i32) -> (i32, i32) {
    %c0_i32 = arith.constant 0 : i32
    %c0_i32_0 = arith.constant 0 : i32
    %c0_i32_1 = arith.constant 0 : i32
    return %c0_i32, %c0_i32_0 : i32, i32
  }
  func.func @transform_3(%arg0: i32) -> (i32, i32) {
    %c0_i32 = arith.constant 0 : i32
    %c0_i32_0 = arith.constant 0 : i32
    %c0_i32_1 = arith.constant 0 : i32
    return %c0_i32, %c0_i32_0 : i32, i32
  }
  func.func @transform_4(%arg0: i32) -> (i32, i32) {
    %c0_i32 = arith.constant 0 : i32
    %c0_i32_0 = arith.constant 0 : i32
    %c0_i32_1 = arith.constant 0 : i32
    return %c0_i32, %c0_i32_0 : i32, i32
  }
}

module attributes {stable_mosaic.version = 11 : i64} {
  func.func @_conv_bn_relu_kernel(%arg0: i32, %arg1: memref<8x896xbf16, #tpu.memory_space<vmem>>, %arg2: memref<896x128xbf16, #tpu.memory_space<vmem>>, %arg3: memref<1x128xf32, #tpu.memory_space<vmem>>, %arg4: memref<1x128xf32, #tpu.memory_space<vmem>>, %arg5: memref<8x128xf32, #tpu.memory_space<vmem>>, %arg6: memref<1x128xf32, #tpu.memory_space<vmem>>, %arg7: memref<1x128xf32, #tpu.memory_space<vmem>>) attributes {dimension_semantics = [#tpu.dimension_semantics<arbitrary>], iteration_bounds = array<i64: 1>, scalar_prefetch = 0 : i64, scratch_operands = 2 : i64, tpu.core_type = #tpu.core_type<tc>, window_params = [{transform_indices = @transform_0, window_bounds = array<i64: 8, 896>}, {pipeline_mode = #tpu.pipeline_mode<synchronous>, transform_indices = @transform_1, window_bounds = array<i64: 896, 128>}, {pipeline_mode = #tpu.pipeline_mode<synchronous>, transform_indices = @transform_2, window_bounds = array<i64: 1, 128>}, {pipeline_mode = #tpu.pipeline_mode<synchronous>, transform_indices = @transform_3, window_bounds = array<i64: 1, 128>}, {pipeline_mode = #tpu.pipeline_mode<synchronous>, transform_indices = @transform_4, window_bounds = array<i64: 8, 128>}]} {
    %c0_i32 = arith.constant 0 : i32
    %0 = arith.cmpi eq, %arg0, %c0_i32 : i32
    %1 = arith.extui %0 : i1 to i32
    %c0_i32_0 = arith.constant 0 : i32
    %2 = arith.cmpi ne, %1, %c0_i32_0 : i32
    scf.if %2 {
      %cst_17 = arith.constant 0.000000e+00 : f32
      %24 = vector.broadcast %cst_17 : f32 to vector<1x128xf32>
      %c0_18 = arith.constant 0 : index
      %c0_19 = arith.constant 0 : index
      %25 = vector.load %arg6[%c0_18, %c0_19] : memref<1x128xf32, #tpu.memory_space<vmem>>, vector<1x128xf32>
      tpu.vector_store %arg6[%c0_18, %c0_19], %24 {strides = array<i32>} : memref<1x128xf32, #tpu.memory_space<vmem>>, vector<1x128xf32>,
      %cst_20 = arith.constant 0.000000e+00 : f32
      %26 = vector.broadcast %cst_20 : f32 to vector<1x128xf32>
      %c0_21 = arith.constant 0 : index
      %c0_22 = arith.constant 0 : index
      %27 = vector.load %arg7[%c0_21, %c0_22] : memref<1x128xf32, #tpu.memory_space<vmem>>, vector<1x128xf32>
      tpu.vector_store %arg7[%c0_21, %c0_22], %26 {strides = array<i32>} : memref<1x128xf32, #tpu.memory_space<vmem>>, vector<1x128xf32>,
    } else {
    }
    %c0 = arith.constant 0 : index
    %c0_1 = arith.constant 0 : index
    %3 = vector.load %arg1[%c0, %c0_1] : memref<8x896xbf16, #tpu.memory_space<vmem>>, vector<8x896xbf16>
    %c0_2 = arith.constant 0 : index
    %c0_3 = arith.constant 0 : index
    %4 = vector.load %arg2[%c0_2, %c0_3] : memref<896x128xbf16, #tpu.memory_space<vmem>>, vector<896x128xbf16>
    %cst = arith.constant dense<0.000000e+00> : vector<8x128xf32>
    %5 = tpu.matmul %3, %4, %cst {dimension_numbers = #tpu.dot_dimension_numbers<[1], [0], [0], [1], [0, 0, 1, 1], [], []>} : vector<8x896xbf16>, vector<896x128xbf16>, vector<8x128xf32> -> vector<8x128xf32>
    %c8_i32 = arith.constant 8 : i32
    %6 = arith.muli %arg0, %c8_i32 : i32
    %7 = tpu.assume_multiple %6, 8 : i32
    %8 = arith.index_cast %7 : i32 to index
    %c0_4 = arith.constant 0 : index
    %9 = vector.load %arg5[%8, %c0_4] : memref<8x128xf32, #tpu.memory_space<vmem>>, vector<8x128xf32>
    tpu.vector_store %arg5[%8, %c0_4], %5 {strides = array<i32>} : memref<8x128xf32, #tpu.memory_space<vmem>>, vector<8x128xf32>,
    %c0_5 = arith.constant 0 : index
    %c0_6 = arith.constant 0 : index
    %10 = vector.load %arg6[%c0_5, %c0_6] : memref<1x128xf32, #tpu.memory_space<vmem>>, vector<1x128xf32>
    %cst_7 = arith.constant dense<0.000000e+00> : vector<128xf32>
    %11 = vector.multi_reduction <add>, %5, %cst_7 [0] : vector<8x128xf32> to vector<128xf32>
    %12 = vector.shape_cast %11 : vector<128xf32> to vector<1x128xf32>
    %13 = arith.addf %10, %12 : vector<1x128xf32>
    %c0_8 = arith.constant 0 : index
    %c0_9 = arith.constant 0 : index
    %14 = vector.load %arg6[%c0_8, %c0_9] : memref<1x128xf32, #tpu.memory_space<vmem>>, vector<1x128xf32>
    tpu.vector_store %arg6[%c0_8, %c0_9], %13 {strides = array<i32>} : memref<1x128xf32, #tpu.memory_space<vmem>>, vector<1x128xf32>,
    %c0_10 = arith.constant 0 : index
    %c0_11 = arith.constant 0 : index
    %15 = vector.load %arg7[%c0_10, %c0_11] : memref<1x128xf32, #tpu.memory_space<vmem>>, vector<1x128xf32>
    %16 = arith.mulf %5, %5 : vector<8x128xf32>
    %cst_12 = arith.constant dense<0.000000e+00> : vector<128xf32>
    %17 = vector.multi_reduction <add>, %16, %cst_12 [0] : vector<8x128xf32> to vector<128xf32>
    %18 = vector.shape_cast %17 : vector<128xf32> to vector<1x128xf32>
    %19 = arith.addf %15, %18 : vector<1x128xf32>
    %c0_13 = arith.constant 0 : index
    %c0_14 = arith.constant 0 : index
    %20 = vector.load %arg7[%c0_13, %c0_14] : memref<1x128xf32, #tpu.memory_space<vmem>>, vector<1x128xf32>
    tpu.vector_store %arg7[%c0_13, %c0_14], %19 {strides = array<i32>} : memref<1x128xf32, #tpu.memory_space<vmem>>, vector<1x128xf32>,
    %c0_i32_15 = arith.constant 0 : i32
    %21 = arith.cmpi eq, %arg0, %c0_i32_15 : i32
    %22 = arith.extui %21 : i1 to i32
    %c0_i32_16 = arith.constant 0 : i32
    %23 = arith.cmpi ne, %22, %c0_i32_16 : i32
    scf.if %23 {
      %c0_17 = arith.constant 0 : index
      %c0_18 = arith.constant 0 : index
      %24 = vector.load %arg6[%c0_17, %c0_18] : memref<1x128xf32, #tpu.memory_space<vmem>>, vector<1x128xf32>
      %c0_19 = arith.constant 0 : index
      %c0_20 = arith.constant 0 : index
      %25 = vector.load %arg7[%c0_19, %c0_20] : memref<1x128xf32, #tpu.memory_space<vmem>>, vector<1x128xf32>
      %cst_21 = arith.constant 5.000000e-01 : f32
      %26 = vector.broadcast %cst_21 : f32 to vector<1x128xf32>
      %27 = arith.mulf %24, %26 : vector<1x128xf32>
      %cst_22 = arith.constant 5.000000e-01 : f32
      %28 = vector.broadcast %cst_22 : f32 to vector<1x128xf32>
      %29 = arith.mulf %25, %28 : vector<1x128xf32>
      %30 = arith.mulf %27, %27 : vector<1x128xf32>
      %31 = arith.subf %29, %30 : vector<1x128xf32>
      %cst_23 = arith.constant 0.000000e+00 : f32
      %32 = vector.broadcast %cst_23 : f32 to vector<1x128xf32>
      %33 = arith.maximumf %31, %32 : vector<1x128xf32>
      %cst_24 = arith.constant 9.99999974E-6 : f32
      %34 = vector.broadcast %cst_24 : f32 to vector<1x128xf32>
      %35 = arith.addf %33, %34 : vector<1x128xf32>
      %36 = math.rsqrt %35 : vector<1x128xf32>
      %c0_25 = arith.constant 0 : index
      %c0_26 = arith.constant 0 : index
      %37 = vector.load %arg5[%c0_25, %c0_26] : memref<8x128xf32, #tpu.memory_space<vmem>>, vector<8x128xf32>
      %38 = vector.broadcast %27 : vector<1x128xf32> to vector<8x128xf32>
      %39 = arith.subf %37, %38 : vector<8x128xf32>
      %40 = vector.broadcast %36 : vector<1x128xf32> to vector<8x128xf32>
      %41 = arith.mulf %39, %40 : vector<8x128xf32>
      %c0_27 = arith.constant 0 : index
      %c0_28 = arith.constant 0 : index
      %42 = vector.load %arg3[%c0_27, %c0_28] : memref<1x128xf32, #tpu.memory_space<vmem>>, vector<1x128xf32>
      %43 = vector.broadcast %42 : vector<1x128xf32> to vector<8x128xf32>
      %44 = arith.mulf %41, %43 : vector<8x128xf32>
      %c0_29 = arith.constant 0 : index
      %c0_30 = arith.constant 0 : index
      %45 = vector.load %arg4[%c0_29, %c0_30] : memref<1x128xf32, #tpu.memory_space<vmem>>, vector<1x128xf32>
      %46 = vector.broadcast %45 : vector<1x128xf32> to vector<8x128xf32>
      %47 = arith.addf %44, %46 : vector<8x128xf32>
      %cst_31 = arith.constant 0.000000e+00 : f32
      %48 = vector.broadcast %cst_31 : f32 to vector<8x128xf32>
      %49 = arith.maximumf %47, %48 : vector<8x128xf32>
      %c0_32 = arith.constant 0 : index
      %c0_33 = arith.constant 0 : index
      %50 = vector.load %arg5[%c0_32, %c0_33] : memref<8x128xf32, #tpu.memory_space<vmem>>, vector<8x128xf32>
      tpu.vector_store %arg5[%c0_32, %c0_33], %49 {strides = array<i32>} : memref<8x128xf32, #tpu.memory_space<vmem>>, vector<8x128xf32>,
    } else {
    }
    return
  }
  func.func @transform_0(%arg0: i32) -> (i32, i32) {
    %c0_i32 = arith.constant 0 : i32
    %c0_i32_0 = arith.constant 0 : i32
    return %arg0, %c0_i32 : i32, i32
  }
  func.func @transform_1(%arg0: i32) -> (i32, i32) {
    %c0_i32 = arith.constant 0 : i32
    %c0_i32_0 = arith.constant 0 : i32
    %c0_i32_1 = arith.constant 0 : i32
    return %c0_i32, %c0_i32_0 : i32, i32
  }
  func.func @transform_2(%arg0: i32) -> (i32, i32) {
    %c0_i32 = arith.constant 0 : i32
    %c0_i32_0 = arith.constant 0 : i32
    %c0_i32_1 = arith.constant 0 : i32
    return %c0_i32, %c0_i32_0 : i32, i32
  }
  func.func @transform_3(%arg0: i32) -> (i32, i32) {
    %c0_i32 = arith.constant 0 : i32
    %c0_i32_0 = arith.constant 0 : i32
    %c0_i32_1 = arith.constant 0 : i32
    return %c0_i32, %c0_i32_0 : i32, i32
  }
  func.func @transform_4(%arg0: i32) -> (i32, i32) {
    %c0_i32 = arith.constant 0 : i32
    %c0_i32_0 = arith.constant 0 : i32
    %c0_i32_1 = arith.constant 0 : i32
    return %c0_i32, %c0_i32_0 : i32, i32
  }
}

module attributes {stable_mosaic.version = 11 : i64} {
  func.func @_conv_bn_relu_kernel(%arg0: i32, %arg1: memref<8x128xbf16, #tpu.memory_space<vmem>>, %arg2: memref<128x128xbf16, #tpu.memory_space<vmem>>, %arg3: memref<1x128xf32, #tpu.memory_space<vmem>>, %arg4: memref<1x128xf32, #tpu.memory_space<vmem>>, %arg5: memref<8x128xf32, #tpu.memory_space<vmem>>, %arg6: memref<1x128xf32, #tpu.memory_space<vmem>>, %arg7: memref<1x128xf32, #tpu.memory_space<vmem>>) attributes {dimension_semantics = [#tpu.dimension_semantics<arbitrary>], iteration_bounds = array<i64: 1>, scalar_prefetch = 0 : i64, scratch_operands = 2 : i64, tpu.core_type = #tpu.core_type<tc>, window_params = [{transform_indices = @transform_0, window_bounds = array<i64: 8, 128>}, {pipeline_mode = #tpu.pipeline_mode<synchronous>, transform_indices = @transform_1, window_bounds = array<i64: 128, 128>}, {pipeline_mode = #tpu.pipeline_mode<synchronous>, transform_indices = @transform_2, window_bounds = array<i64: 1, 128>}, {pipeline_mode = #tpu.pipeline_mode<synchronous>, transform_indices = @transform_3, window_bounds = array<i64: 1, 128>}, {pipeline_mode = #tpu.pipeline_mode<synchronous>, transform_indices = @transform_4, window_bounds = array<i64: 8, 128>}]} {
    %c0_i32 = arith.constant 0 : i32
    %0 = arith.cmpi eq, %arg0, %c0_i32 : i32
    %1 = arith.extui %0 : i1 to i32
    %c0_i32_0 = arith.constant 0 : i32
    %2 = arith.cmpi ne, %1, %c0_i32_0 : i32
    scf.if %2 {
      %cst_17 = arith.constant 0.000000e+00 : f32
      %24 = vector.broadcast %cst_17 : f32 to vector<1x128xf32>
      %c0_18 = arith.constant 0 : index
      %c0_19 = arith.constant 0 : index
      %25 = vector.load %arg6[%c0_18, %c0_19] : memref<1x128xf32, #tpu.memory_space<vmem>>, vector<1x128xf32>
      tpu.vector_store %arg6[%c0_18, %c0_19], %24 {strides = array<i32>} : memref<1x128xf32, #tpu.memory_space<vmem>>, vector<1x128xf32>,
      %cst_20 = arith.constant 0.000000e+00 : f32
      %26 = vector.broadcast %cst_20 : f32 to vector<1x128xf32>
      %c0_21 = arith.constant 0 : index
      %c0_22 = arith.constant 0 : index
      %27 = vector.load %arg7[%c0_21, %c0_22] : memref<1x128xf32, #tpu.memory_space<vmem>>, vector<1x128xf32>
      tpu.vector_store %arg7[%c0_21, %c0_22], %26 {strides = array<i32>} : memref<1x128xf32, #tpu.memory_space<vmem>>, vector<1x128xf32>,
    } else {
    }
    %c0 = arith.constant 0 : index
    %c0_1 = arith.constant 0 : index
    %3 = vector.load %arg1[%c0, %c0_1] : memref<8x128xbf16, #tpu.memory_space<vmem>>, vector<8x128xbf16>
    %c0_2 = arith.constant 0 : index
    %c0_3 = arith.constant 0 : index
    %4 = vector.load %arg2[%c0_2, %c0_3] : memref<128x128xbf16, #tpu.memory_space<vmem>>, vector<128x128xbf16>
    %cst = arith.constant dense<0.000000e+00> : vector<8x128xf32>
    %5 = tpu.matmul %3, %4, %cst {dimension_numbers = #tpu.dot_dimension_numbers<[1], [0], [0], [1], [0, 0, 1, 1], [], []>} : vector<8x128xbf16>, vector<128x128xbf16>, vector<8x128xf32> -> vector<8x128xf32>
    %c8_i32 = arith.constant 8 : i32
    %6 = arith.muli %arg0, %c8_i32 : i32
    %7 = tpu.assume_multiple %6, 8 : i32
    %8 = arith.index_cast %7 : i32 to index
    %c0_4 = arith.constant 0 : index
    %9 = vector.load %arg5[%8, %c0_4] : memref<8x128xf32, #tpu.memory_space<vmem>>, vector<8x128xf32>
    tpu.vector_store %arg5[%8, %c0_4], %5 {strides = array<i32>} : memref<8x128xf32, #tpu.memory_space<vmem>>, vector<8x128xf32>,
    %c0_5 = arith.constant 0 : index
    %c0_6 = arith.constant 0 : index
    %10 = vector.load %arg6[%c0_5, %c0_6] : memref<1x128xf32, #tpu.memory_space<vmem>>, vector<1x128xf32>
    %cst_7 = arith.constant dense<0.000000e+00> : vector<128xf32>
    %11 = vector.multi_reduction <add>, %5, %cst_7 [0] : vector<8x128xf32> to vector<128xf32>
    %12 = vector.shape_cast %11 : vector<128xf32> to vector<1x128xf32>
    %13 = arith.addf %10, %12 : vector<1x128xf32>
    %c0_8 = arith.constant 0 : index
    %c0_9 = arith.constant 0 : index
    %14 = vector.load %arg6[%c0_8, %c0_9] : memref<1x128xf32, #tpu.memory_space<vmem>>, vector<1x128xf32>
    tpu.vector_store %arg6[%c0_8, %c0_9], %13 {strides = array<i32>} : memref<1x128xf32, #tpu.memory_space<vmem>>, vector<1x128xf32>,
    %c0_10 = arith.constant 0 : index
    %c0_11 = arith.constant 0 : index
    %15 = vector.load %arg7[%c0_10, %c0_11] : memref<1x128xf32, #tpu.memory_space<vmem>>, vector<1x128xf32>
    %16 = arith.mulf %5, %5 : vector<8x128xf32>
    %cst_12 = arith.constant dense<0.000000e+00> : vector<128xf32>
    %17 = vector.multi_reduction <add>, %16, %cst_12 [0] : vector<8x128xf32> to vector<128xf32>
    %18 = vector.shape_cast %17 : vector<128xf32> to vector<1x128xf32>
    %19 = arith.addf %15, %18 : vector<1x128xf32>
    %c0_13 = arith.constant 0 : index
    %c0_14 = arith.constant 0 : index
    %20 = vector.load %arg7[%c0_13, %c0_14] : memref<1x128xf32, #tpu.memory_space<vmem>>, vector<1x128xf32>
    tpu.vector_store %arg7[%c0_13, %c0_14], %19 {strides = array<i32>} : memref<1x128xf32, #tpu.memory_space<vmem>>, vector<1x128xf32>,
    %c0_i32_15 = arith.constant 0 : i32
    %21 = arith.cmpi eq, %arg0, %c0_i32_15 : i32
    %22 = arith.extui %21 : i1 to i32
    %c0_i32_16 = arith.constant 0 : i32
    %23 = arith.cmpi ne, %22, %c0_i32_16 : i32
    scf.if %23 {
      %c0_17 = arith.constant 0 : index
      %c0_18 = arith.constant 0 : index
      %24 = vector.load %arg6[%c0_17, %c0_18] : memref<1x128xf32, #tpu.memory_space<vmem>>, vector<1x128xf32>
      %c0_19 = arith.constant 0 : index
      %c0_20 = arith.constant 0 : index
      %25 = vector.load %arg7[%c0_19, %c0_20] : memref<1x128xf32, #tpu.memory_space<vmem>>, vector<1x128xf32>
      %cst_21 = arith.constant 5.000000e-01 : f32
      %26 = vector.broadcast %cst_21 : f32 to vector<1x128xf32>
      %27 = arith.mulf %24, %26 : vector<1x128xf32>
      %cst_22 = arith.constant 5.000000e-01 : f32
      %28 = vector.broadcast %cst_22 : f32 to vector<1x128xf32>
      %29 = arith.mulf %25, %28 : vector<1x128xf32>
      %30 = arith.mulf %27, %27 : vector<1x128xf32>
      %31 = arith.subf %29, %30 : vector<1x128xf32>
      %cst_23 = arith.constant 0.000000e+00 : f32
      %32 = vector.broadcast %cst_23 : f32 to vector<1x128xf32>
      %33 = arith.maximumf %31, %32 : vector<1x128xf32>
      %cst_24 = arith.constant 9.99999974E-6 : f32
      %34 = vector.broadcast %cst_24 : f32 to vector<1x128xf32>
      %35 = arith.addf %33, %34 : vector<1x128xf32>
      %36 = math.rsqrt %35 : vector<1x128xf32>
      %c0_25 = arith.constant 0 : index
      %c0_26 = arith.constant 0 : index
      %37 = vector.load %arg5[%c0_25, %c0_26] : memref<8x128xf32, #tpu.memory_space<vmem>>, vector<8x128xf32>
      %38 = vector.broadcast %27 : vector<1x128xf32> to vector<8x128xf32>
      %39 = arith.subf %37, %38 : vector<8x128xf32>
      %40 = vector.broadcast %36 : vector<1x128xf32> to vector<8x128xf32>
      %41 = arith.mulf %39, %40 : vector<8x128xf32>
      %c0_27 = arith.constant 0 : index
      %c0_28 = arith.constant 0 : index
      %42 = vector.load %arg3[%c0_27, %c0_28] : memref<1x128xf32, #tpu.memory_space<vmem>>, vector<1x128xf32>
      %43 = vector.broadcast %42 : vector<1x128xf32> to vector<8x128xf32>
      %44 = arith.mulf %41, %43 : vector<8x128xf32>
      %c0_29 = arith.constant 0 : index
      %c0_30 = arith.constant 0 : index
      %45 = vector.load %arg4[%c0_29, %c0_30] : memref<1x128xf32, #tpu.memory_space<vmem>>, vector<1x128xf32>
      %46 = vector.broadcast %45 : vector<1x128xf32> to vector<8x128xf32>
      %47 = arith.addf %44, %46 : vector<8x128xf32>
      %cst_31 = arith.constant 0.000000e+00 : f32
      %48 = vector.broadcast %cst_31 : f32 to vector<8x128xf32>
      %49 = arith.maximumf %47, %48 : vector<8x128xf32>
      %c0_32 = arith.constant 0 : index
      %c0_33 = arith.constant 0 : index
      %50 = vector.load %arg5[%c0_32, %c0_33] : memref<8x128xf32, #tpu.memory_space<vmem>>, vector<8x128xf32>
      tpu.vector_store %arg5[%c0_32, %c0_33], %49 {strides = array<i32>} : memref<8x128xf32, #tpu.memory_space<vmem>>, vector<8x128xf32>,
    } else {
    }
    return
  }
  func.func @transform_0(%arg0: i32) -> (i32, i32) {
    %c0_i32 = arith.constant 0 : i32
    %c0_i32_0 = arith.constant 0 : i32
    return %arg0, %c0_i32 : i32, i32
  }
  func.func @transform_1(%arg0: i32) -> (i32, i32) {
    %c0_i32 = arith.constant 0 : i32
    %c0_i32_0 = arith.constant 0 : i32
    %c0_i32_1 = arith.constant 0 : i32
    return %c0_i32, %c0_i32_0 : i32, i32
  }
  func.func @transform_2(%arg0: i32) -> (i32, i32) {
    %c0_i32 = arith.constant 0 : i32
    %c0_i32_0 = arith.constant 0 : i32
    %c0_i32_1 = arith.constant 0 : i32
    return %c0_i32, %c0_i32_0 : i32, i32
  }
  func.func @transform_3(%arg0: i32) -> (i32, i32) {
    %c0_i32 = arith.constant 0 : i32
    %c0_i32_0 = arith.constant 0 : i32
    %c0_i32_1 = arith.constant 0 : i32
    return %c0_i32, %c0_i32_0 : i32, i32
  }
  func.func @transform_4(%arg0: i32) -> (i32, i32) {
    %c0_i32 = arith.constant 0 : i32
    %c0_i32_0 = arith.constant 0 : i32
    %c0_i32_1 = arith.constant 0 : i32
    return %c0_i32, %c0_i32_0 : i32, i32
  }
}

module attributes {stable_mosaic.version = 11 : i64} {
  func.func @_conv_bn_relu_kernel(%arg0: i32, %arg1: memref<8x128xbf16, #tpu.memory_space<vmem>>, %arg2: memref<128x128xbf16, #tpu.memory_space<vmem>>, %arg3: memref<1x128xf32, #tpu.memory_space<vmem>>, %arg4: memref<1x128xf32, #tpu.memory_space<vmem>>, %arg5: memref<8x128xf32, #tpu.memory_space<vmem>>, %arg6: memref<1x128xf32, #tpu.memory_space<vmem>>, %arg7: memref<1x128xf32, #tpu.memory_space<vmem>>) attributes {dimension_semantics = [#tpu.dimension_semantics<arbitrary>], iteration_bounds = array<i64: 1>, scalar_prefetch = 0 : i64, scratch_operands = 2 : i64, tpu.core_type = #tpu.core_type<tc>, window_params = [{transform_indices = @transform_0, window_bounds = array<i64: 8, 128>}, {pipeline_mode = #tpu.pipeline_mode<synchronous>, transform_indices = @transform_1, window_bounds = array<i64: 128, 128>}, {pipeline_mode = #tpu.pipeline_mode<synchronous>, transform_indices = @transform_2, window_bounds = array<i64: 1, 128>}, {pipeline_mode = #tpu.pipeline_mode<synchronous>, transform_indices = @transform_3, window_bounds = array<i64: 1, 128>}, {pipeline_mode = #tpu.pipeline_mode<synchronous>, transform_indices = @transform_4, window_bounds = array<i64: 8, 128>}]} {
    %c0_i32 = arith.constant 0 : i32
    %0 = arith.cmpi eq, %arg0, %c0_i32 : i32
    %1 = arith.extui %0 : i1 to i32
    %c0_i32_0 = arith.constant 0 : i32
    %2 = arith.cmpi ne, %1, %c0_i32_0 : i32
    scf.if %2 {
      %cst_17 = arith.constant 0.000000e+00 : f32
      %24 = vector.broadcast %cst_17 : f32 to vector<1x128xf32>
      %c0_18 = arith.constant 0 : index
      %c0_19 = arith.constant 0 : index
      %25 = vector.load %arg6[%c0_18, %c0_19] : memref<1x128xf32, #tpu.memory_space<vmem>>, vector<1x128xf32>
      tpu.vector_store %arg6[%c0_18, %c0_19], %24 {strides = array<i32>} : memref<1x128xf32, #tpu.memory_space<vmem>>, vector<1x128xf32>,
      %cst_20 = arith.constant 0.000000e+00 : f32
      %26 = vector.broadcast %cst_20 : f32 to vector<1x128xf32>
      %c0_21 = arith.constant 0 : index
      %c0_22 = arith.constant 0 : index
      %27 = vector.load %arg7[%c0_21, %c0_22] : memref<1x128xf32, #tpu.memory_space<vmem>>, vector<1x128xf32>
      tpu.vector_store %arg7[%c0_21, %c0_22], %26 {strides = array<i32>} : memref<1x128xf32, #tpu.memory_space<vmem>>, vector<1x128xf32>,
    } else {
    }
    %c0 = arith.constant 0 : index
    %c0_1 = arith.constant 0 : index
    %3 = vector.load %arg1[%c0, %c0_1] : memref<8x128xbf16, #tpu.memory_space<vmem>>, vector<8x128xbf16>
    %c0_2 = arith.constant 0 : index
    %c0_3 = arith.constant 0 : index
    %4 = vector.load %arg2[%c0_2, %c0_3] : memref<128x128xbf16, #tpu.memory_space<vmem>>, vector<128x128xbf16>
    %cst = arith.constant dense<0.000000e+00> : vector<8x128xf32>
    %5 = tpu.matmul %3, %4, %cst {dimension_numbers = #tpu.dot_dimension_numbers<[1], [0], [0], [1], [0, 0, 1, 1], [], []>} : vector<8x128xbf16>, vector<128x128xbf16>, vector<8x128xf32> -> vector<8x128xf32>
    %c8_i32 = arith.constant 8 : i32
    %6 = arith.muli %arg0, %c8_i32 : i32
    %7 = tpu.assume_multiple %6, 8 : i32
    %8 = arith.index_cast %7 : i32 to index
    %c0_4 = arith.constant 0 : index
    %9 = vector.load %arg5[%8, %c0_4] : memref<8x128xf32, #tpu.memory_space<vmem>>, vector<8x128xf32>
    tpu.vector_store %arg5[%8, %c0_4], %5 {strides = array<i32>} : memref<8x128xf32, #tpu.memory_space<vmem>>, vector<8x128xf32>,
    %c0_5 = arith.constant 0 : index
    %c0_6 = arith.constant 0 : index
    %10 = vector.load %arg6[%c0_5, %c0_6] : memref<1x128xf32, #tpu.memory_space<vmem>>, vector<1x128xf32>
    %cst_7 = arith.constant dense<0.000000e+00> : vector<128xf32>
    %11 = vector.multi_reduction <add>, %5, %cst_7 [0] : vector<8x128xf32> to vector<128xf32>
    %12 = vector.shape_cast %11 : vector<128xf32> to vector<1x128xf32>
    %13 = arith.addf %10, %12 : vector<1x128xf32>
    %c0_8 = arith.constant 0 : index
    %c0_9 = arith.constant 0 : index
    %14 = vector.load %arg6[%c0_8, %c0_9] : memref<1x128xf32, #tpu.memory_space<vmem>>, vector<1x128xf32>
    tpu.vector_store %arg6[%c0_8, %c0_9], %13 {strides = array<i32>} : memref<1x128xf32, #tpu.memory_space<vmem>>, vector<1x128xf32>,
    %c0_10 = arith.constant 0 : index
    %c0_11 = arith.constant 0 : index
    %15 = vector.load %arg7[%c0_10, %c0_11] : memref<1x128xf32, #tpu.memory_space<vmem>>, vector<1x128xf32>
    %16 = arith.mulf %5, %5 : vector<8x128xf32>
    %cst_12 = arith.constant dense<0.000000e+00> : vector<128xf32>
    %17 = vector.multi_reduction <add>, %16, %cst_12 [0] : vector<8x128xf32> to vector<128xf32>
    %18 = vector.shape_cast %17 : vector<128xf32> to vector<1x128xf32>
    %19 = arith.addf %15, %18 : vector<1x128xf32>
    %c0_13 = arith.constant 0 : index
    %c0_14 = arith.constant 0 : index
    %20 = vector.load %arg7[%c0_13, %c0_14] : memref<1x128xf32, #tpu.memory_space<vmem>>, vector<1x128xf32>
    tpu.vector_store %arg7[%c0_13, %c0_14], %19 {strides = array<i32>} : memref<1x128xf32, #tpu.memory_space<vmem>>, vector<1x128xf32>,
    %c0_i32_15 = arith.constant 0 : i32
    %21 = arith.cmpi eq, %arg0, %c0_i32_15 : i32
    %22 = arith.extui %21 : i1 to i32
    %c0_i32_16 = arith.constant 0 : i32
    %23 = arith.cmpi ne, %22, %c0_i32_16 : i32
    scf.if %23 {
      %c0_17 = arith.constant 0 : index
      %c0_18 = arith.constant 0 : index
      %24 = vector.load %arg6[%c0_17, %c0_18] : memref<1x128xf32, #tpu.memory_space<vmem>>, vector<1x128xf32>
      %c0_19 = arith.constant 0 : index
      %c0_20 = arith.constant 0 : index
      %25 = vector.load %arg7[%c0_19, %c0_20] : memref<1x128xf32, #tpu.memory_space<vmem>>, vector<1x128xf32>
      %cst_21 = arith.constant 1.250000e-01 : f32
      %26 = vector.broadcast %cst_21 : f32 to vector<1x128xf32>
      %27 = arith.mulf %24, %26 : vector<1x128xf32>
      %cst_22 = arith.constant 1.250000e-01 : f32
      %28 = vector.broadcast %cst_22 : f32 to vector<1x128xf32>
      %29 = arith.mulf %25, %28 : vector<1x128xf32>
      %30 = arith.mulf %27, %27 : vector<1x128xf32>
      %31 = arith.subf %29, %30 : vector<1x128xf32>
      %cst_23 = arith.constant 0.000000e+00 : f32
      %32 = vector.broadcast %cst_23 : f32 to vector<1x128xf32>
      %33 = arith.maximumf %31, %32 : vector<1x128xf32>
      %cst_24 = arith.constant 9.99999974E-6 : f32
      %34 = vector.broadcast %cst_24 : f32 to vector<1x128xf32>
      %35 = arith.addf %33, %34 : vector<1x128xf32>
      %36 = math.rsqrt %35 : vector<1x128xf32>
      %c0_25 = arith.constant 0 : index
      %c0_26 = arith.constant 0 : index
      %37 = vector.load %arg5[%c0_25, %c0_26] : memref<8x128xf32, #tpu.memory_space<vmem>>, vector<8x128xf32>
      %38 = vector.broadcast %27 : vector<1x128xf32> to vector<8x128xf32>
      %39 = arith.subf %37, %38 : vector<8x128xf32>
      %40 = vector.broadcast %36 : vector<1x128xf32> to vector<8x128xf32>
      %41 = arith.mulf %39, %40 : vector<8x128xf32>
      %c0_27 = arith.constant 0 : index
      %c0_28 = arith.constant 0 : index
      %42 = vector.load %arg3[%c0_27, %c0_28] : memref<1x128xf32, #tpu.memory_space<vmem>>, vector<1x128xf32>
      %43 = vector.broadcast %42 : vector<1x128xf32> to vector<8x128xf32>
      %44 = arith.mulf %41, %43 : vector<8x128xf32>
      %c0_29 = arith.constant 0 : index
      %c0_30 = arith.constant 0 : index
      %45 = vector.load %arg4[%c0_29, %c0_30] : memref<1x128xf32, #tpu.memory_space<vmem>>, vector<1x128xf32>
      %46 = vector.broadcast %45 : vector<1x128xf32> to vector<8x128xf32>
      %47 = arith.addf %44, %46 : vector<8x128xf32>
      %cst_31 = arith.constant 0.000000e+00 : f32
      %48 = vector.broadcast %cst_31 : f32 to vector<8x128xf32>
      %49 = arith.maximumf %47, %48 : vector<8x128xf32>
      %c0_32 = arith.constant 0 : index
      %c0_33 = arith.constant 0 : index
      %50 = vector.load %arg5[%c0_32, %c0_33] : memref<8x128xf32, #tpu.memory_space<vmem>>, vector<8x128xf32>
      tpu.vector_store %arg5[%c0_32, %c0_33], %49 {strides = array<i32>} : memref<8x128xf32, #tpu.memory_space<vmem>>, vector<8x128xf32>,
    } else {
    }
    return
  }
  func.func @transform_0(%arg0: i32) -> (i32, i32) {
    %c0_i32 = arith.constant 0 : i32
    %c0_i32_0 = arith.constant 0 : i32
    return %arg0, %c0_i32 : i32, i32
  }
  func.func @transform_1(%arg0: i32) -> (i32, i32) {
    %c0_i32 = arith.constant 0 : i32
    %c0_i32_0 = arith.constant 0 : i32
    %c0_i32_1 = arith.constant 0 : i32
    return %c0_i32, %c0_i32_0 : i32, i32
  }
  func.func @transform_2(%arg0: i32) -> (i32, i32) {
    %c0_i32 = arith.constant 0 : i32
    %c0_i32_0 = arith.constant 0 : i32
    %c0_i32_1 = arith.constant 0 : i32
    return %c0_i32, %c0_i32_0 : i32, i32
  }
  func.func @transform_3(%arg0: i32) -> (i32, i32) {
    %c0_i32 = arith.constant 0 : i32
    %c0_i32_0 = arith.constant 0 : i32
    %c0_i32_1 = arith.constant 0 : i32
    return %c0_i32, %c0_i32_0 : i32, i32
  }
  func.func @transform_4(%arg0: i32) -> (i32, i32) {
    %c0_i32 = arith.constant 0 : i32
    %c0_i32_0 = arith.constant 0 : i32
    %c0_i32_1 = arith.constant 0 : i32
    return %c0_i32, %c0_i32_0 : i32, i32
  }
}

module attributes {stable_mosaic.version = 11 : i64} {
  func.func @_conv_bn_relu_kernel(%arg0: i32, %arg1: memref<32x128xbf16, #tpu.memory_space<vmem>>, %arg2: memref<128x256xbf16, #tpu.memory_space<vmem>>, %arg3: memref<1x256xf32, #tpu.memory_space<vmem>>, %arg4: memref<1x256xf32, #tpu.memory_space<vmem>>, %arg5: memref<32x256xf32, #tpu.memory_space<vmem>>, %arg6: memref<1x256xf32, #tpu.memory_space<vmem>>, %arg7: memref<1x256xf32, #tpu.memory_space<vmem>>) attributes {dimension_semantics = [#tpu.dimension_semantics<arbitrary>], iteration_bounds = array<i64: 1>, scalar_prefetch = 0 : i64, scratch_operands = 2 : i64, tpu.core_type = #tpu.core_type<tc>, window_params = [{transform_indices = @transform_0, window_bounds = array<i64: 32, 128>}, {pipeline_mode = #tpu.pipeline_mode<synchronous>, transform_indices = @transform_1, window_bounds = array<i64: 128, 256>}, {pipeline_mode = #tpu.pipeline_mode<synchronous>, transform_indices = @transform_2, window_bounds = array<i64: 1, 256>}, {pipeline_mode = #tpu.pipeline_mode<synchronous>, transform_indices = @transform_3, window_bounds = array<i64: 1, 256>}, {pipeline_mode = #tpu.pipeline_mode<synchronous>, transform_indices = @transform_4, window_bounds = array<i64: 32, 256>}]} {
    %c0_i32 = arith.constant 0 : i32
    %0 = arith.cmpi eq, %arg0, %c0_i32 : i32
    %1 = arith.extui %0 : i1 to i32
    %c0_i32_0 = arith.constant 0 : i32
    %2 = arith.cmpi ne, %1, %c0_i32_0 : i32
    scf.if %2 {
      %cst_17 = arith.constant 0.000000e+00 : f32
      %24 = vector.broadcast %cst_17 : f32 to vector<1x256xf32>
      %c0_18 = arith.constant 0 : index
      %c0_19 = arith.constant 0 : index
      %25 = vector.load %arg6[%c0_18, %c0_19] : memref<1x256xf32, #tpu.memory_space<vmem>>, vector<1x256xf32>
      tpu.vector_store %arg6[%c0_18, %c0_19], %24 {strides = array<i32>} : memref<1x256xf32, #tpu.memory_space<vmem>>, vector<1x256xf32>,
      %cst_20 = arith.constant 0.000000e+00 : f32
      %26 = vector.broadcast %cst_20 : f32 to vector<1x256xf32>
      %c0_21 = arith.constant 0 : index
      %c0_22 = arith.constant 0 : index
      %27 = vector.load %arg7[%c0_21, %c0_22] : memref<1x256xf32, #tpu.memory_space<vmem>>, vector<1x256xf32>
      tpu.vector_store %arg7[%c0_21, %c0_22], %26 {strides = array<i32>} : memref<1x256xf32, #tpu.memory_space<vmem>>, vector<1x256xf32>,
    } else {
    }
    %c0 = arith.constant 0 : index
    %c0_1 = arith.constant 0 : index
    %3 = vector.load %arg1[%c0, %c0_1] : memref<32x128xbf16, #tpu.memory_space<vmem>>, vector<32x128xbf16>
    %c0_2 = arith.constant 0 : index
    %c0_3 = arith.constant 0 : index
    %4 = vector.load %arg2[%c0_2, %c0_3] : memref<128x256xbf16, #tpu.memory_space<vmem>>, vector<128x256xbf16>
    %cst = arith.constant dense<0.000000e+00> : vector<32x256xf32>
    %5 = tpu.matmul %3, %4, %cst {dimension_numbers = #tpu.dot_dimension_numbers<[1], [0], [0], [1], [0, 0, 1, 1], [], []>} : vector<32x128xbf16>, vector<128x256xbf16>, vector<32x256xf32> -> vector<32x256xf32>
    %c32_i32 = arith.constant 32 : i32
    %6 = arith.muli %arg0, %c32_i32 : i32
    %7 = tpu.assume_multiple %6, 8 : i32
    %8 = arith.index_cast %7 : i32 to index
    %c0_4 = arith.constant 0 : index
    %9 = vector.load %arg5[%8, %c0_4] : memref<32x256xf32, #tpu.memory_space<vmem>>, vector<32x256xf32>
    tpu.vector_store %arg5[%8, %c0_4], %5 {strides = array<i32>} : memref<32x256xf32, #tpu.memory_space<vmem>>, vector<32x256xf32>,
    %c0_5 = arith.constant 0 : index
    %c0_6 = arith.constant 0 : index
    %10 = vector.load %arg6[%c0_5, %c0_6] : memref<1x256xf32, #tpu.memory_space<vmem>>, vector<1x256xf32>
    %cst_7 = arith.constant dense<0.000000e+00> : vector<256xf32>
    %11 = vector.multi_reduction <add>, %5, %cst_7 [0] : vector<32x256xf32> to vector<256xf32>
    %12 = vector.shape_cast %11 : vector<256xf32> to vector<1x256xf32>
    %13 = arith.addf %10, %12 : vector<1x256xf32>
    %c0_8 = arith.constant 0 : index
    %c0_9 = arith.constant 0 : index
    %14 = vector.load %arg6[%c0_8, %c0_9] : memref<1x256xf32, #tpu.memory_space<vmem>>, vector<1x256xf32>
    tpu.vector_store %arg6[%c0_8, %c0_9], %13 {strides = array<i32>} : memref<1x256xf32, #tpu.memory_space<vmem>>, vector<1x256xf32>,
    %c0_10 = arith.constant 0 : index
    %c0_11 = arith.constant 0 : index
    %15 = vector.load %arg7[%c0_10, %c0_11] : memref<1x256xf32, #tpu.memory_space<vmem>>, vector<1x256xf32>
    %16 = arith.mulf %5, %5 : vector<32x256xf32>
    %cst_12 = arith.constant dense<0.000000e+00> : vector<256xf32>
    %17 = vector.multi_reduction <add>, %16, %cst_12 [0] : vector<32x256xf32> to vector<256xf32>
    %18 = vector.shape_cast %17 : vector<256xf32> to vector<1x256xf32>
    %19 = arith.addf %15, %18 : vector<1x256xf32>
    %c0_13 = arith.constant 0 : index
    %c0_14 = arith.constant 0 : index
    %20 = vector.load %arg7[%c0_13, %c0_14] : memref<1x256xf32, #tpu.memory_space<vmem>>, vector<1x256xf32>
    tpu.vector_store %arg7[%c0_13, %c0_14], %19 {strides = array<i32>} : memref<1x256xf32, #tpu.memory_space<vmem>>, vector<1x256xf32>,
    %c0_i32_15 = arith.constant 0 : i32
    %21 = arith.cmpi eq, %arg0, %c0_i32_15 : i32
    %22 = arith.extui %21 : i1 to i32
    %c0_i32_16 = arith.constant 0 : i32
    %23 = arith.cmpi ne, %22, %c0_i32_16 : i32
    scf.if %23 {
      %c0_17 = arith.constant 0 : index
      %c0_18 = arith.constant 0 : index
      %24 = vector.load %arg6[%c0_17, %c0_18] : memref<1x256xf32, #tpu.memory_space<vmem>>, vector<1x256xf32>
      %c0_19 = arith.constant 0 : index
      %c0_20 = arith.constant 0 : index
      %25 = vector.load %arg7[%c0_19, %c0_20] : memref<1x256xf32, #tpu.memory_space<vmem>>, vector<1x256xf32>
      %cst_21 = arith.constant 3.125000e-02 : f32
      %26 = vector.broadcast %cst_21 : f32 to vector<1x256xf32>
      %27 = arith.mulf %24, %26 : vector<1x256xf32>
      %cst_22 = arith.constant 3.125000e-02 : f32
      %28 = vector.broadcast %cst_22 : f32 to vector<1x256xf32>
      %29 = arith.mulf %25, %28 : vector<1x256xf32>
      %30 = arith.mulf %27, %27 : vector<1x256xf32>
      %31 = arith.subf %29, %30 : vector<1x256xf32>
      %cst_23 = arith.constant 0.000000e+00 : f32
      %32 = vector.broadcast %cst_23 : f32 to vector<1x256xf32>
      %33 = arith.maximumf %31, %32 : vector<1x256xf32>
      %cst_24 = arith.constant 9.99999974E-6 : f32
      %34 = vector.broadcast %cst_24 : f32 to vector<1x256xf32>
      %35 = arith.addf %33, %34 : vector<1x256xf32>
      %36 = math.rsqrt %35 : vector<1x256xf32>
      %c0_25 = arith.constant 0 : index
      %c0_26 = arith.constant 0 : index
      %37 = vector.load %arg5[%c0_25, %c0_26] : memref<32x256xf32, #tpu.memory_space<vmem>>, vector<32x256xf32>
      %38 = vector.broadcast %27 : vector<1x256xf32> to vector<32x256xf32>
      %39 = arith.subf %37, %38 : vector<32x256xf32>
      %40 = vector.broadcast %36 : vector<1x256xf32> to vector<32x256xf32>
      %41 = arith.mulf %39, %40 : vector<32x256xf32>
      %c0_27 = arith.constant 0 : index
      %c0_28 = arith.constant 0 : index
      %42 = vector.load %arg3[%c0_27, %c0_28] : memref<1x256xf32, #tpu.memory_space<vmem>>, vector<1x256xf32>
      %43 = vector.broadcast %42 : vector<1x256xf32> to vector<32x256xf32>
      %44 = arith.mulf %41, %43 : vector<32x256xf32>
      %c0_29 = arith.constant 0 : index
      %c0_30 = arith.constant 0 : index
      %45 = vector.load %arg4[%c0_29, %c0_30] : memref<1x256xf32, #tpu.memory_space<vmem>>, vector<1x256xf32>
      %46 = vector.broadcast %45 : vector<1x256xf32> to vector<32x256xf32>
      %47 = arith.addf %44, %46 : vector<32x256xf32>
      %cst_31 = arith.constant 0.000000e+00 : f32
      %48 = vector.broadcast %cst_31 : f32 to vector<32x256xf32>
      %49 = arith.maximumf %47, %48 : vector<32x256xf32>
      %c0_32 = arith.constant 0 : index
      %c0_33 = arith.constant 0 : index
      %50 = vector.load %arg5[%c0_32, %c0_33] : memref<32x256xf32, #tpu.memory_space<vmem>>, vector<32x256xf32>
      tpu.vector_store %arg5[%c0_32, %c0_33], %49 {strides = array<i32>} : memref<32x256xf32, #tpu.memory_space<vmem>>, vector<32x256xf32>,
    } else {
    }
    return
  }
  func.func @transform_0(%arg0: i32) -> (i32, i32) {
    %c0_i32 = arith.constant 0 : i32
    %c0_i32_0 = arith.constant 0 : i32
    return %arg0, %c0_i32 : i32, i32
  }
  func.func @transform_1(%arg0: i32) -> (i32, i32) {
    %c0_i32 = arith.constant 0 : i32
    %c0_i32_0 = arith.constant 0 : i32
    %c0_i32_1 = arith.constant 0 : i32
    return %c0_i32, %c0_i32_0 : i32, i32
  }
  func.func @transform_2(%arg0: i32) -> (i32, i32) {
    %c0_i32 = arith.constant 0 : i32
    %c0_i32_0 = arith.constant 0 : i32
    %c0_i32_1 = arith.constant 0 : i32
    return %c0_i32, %c0_i32_0 : i32, i32
  }
  func.func @transform_3(%arg0: i32) -> (i32, i32) {
    %c0_i32 = arith.constant 0 : i32
    %c0_i32_0 = arith.constant 0 : i32
    %c0_i32_1 = arith.constant 0 : i32
    return %c0_i32, %c0_i32_0 : i32, i32
  }
  func.func @transform_4(%arg0: i32) -> (i32, i32) {
    %c0_i32 = arith.constant 0 : i32
    %c0_i32_0 = arith.constant 0 : i32
    %c0_i32_1 = arith.constant 0 : i32
    return %c0_i32, %c0_i32_0 : i32, i32
  }
}

module attributes {stable_mosaic.version = 11 : i64} {
  func.func @_conv_bn_relu_kernel(%arg0: i32, %arg1: memref<8x1152xbf16, #tpu.memory_space<vmem>>, %arg2: memref<1152x512xbf16, #tpu.memory_space<vmem>>, %arg3: memref<1x512xf32, #tpu.memory_space<vmem>>, %arg4: memref<1x512xf32, #tpu.memory_space<vmem>>, %arg5: memref<8x512xf32, #tpu.memory_space<vmem>>, %arg6: memref<1x512xf32, #tpu.memory_space<vmem>>, %arg7: memref<1x512xf32, #tpu.memory_space<vmem>>) attributes {dimension_semantics = [#tpu.dimension_semantics<arbitrary>], iteration_bounds = array<i64: 1>, scalar_prefetch = 0 : i64, scratch_operands = 2 : i64, tpu.core_type = #tpu.core_type<tc>, window_params = [{transform_indices = @transform_0, window_bounds = array<i64: 8, 1152>}, {pipeline_mode = #tpu.pipeline_mode<synchronous>, transform_indices = @transform_1, window_bounds = array<i64: 1152, 512>}, {pipeline_mode = #tpu.pipeline_mode<synchronous>, transform_indices = @transform_2, window_bounds = array<i64: 1, 512>}, {pipeline_mode = #tpu.pipeline_mode<synchronous>, transform_indices = @transform_3, window_bounds = array<i64: 1, 512>}, {pipeline_mode = #tpu.pipeline_mode<synchronous>, transform_indices = @transform_4, window_bounds = array<i64: 8, 512>}]} {
    %c0_i32 = arith.constant 0 : i32
    %0 = arith.cmpi eq, %arg0, %c0_i32 : i32
    %1 = arith.extui %0 : i1 to i32
    %c0_i32_0 = arith.constant 0 : i32
    %2 = arith.cmpi ne, %1, %c0_i32_0 : i32
    scf.if %2 {
      %cst_17 = arith.constant 0.000000e+00 : f32
      %24 = vector.broadcast %cst_17 : f32 to vector<1x512xf32>
      %c0_18 = arith.constant 0 : index
      %c0_19 = arith.constant 0 : index
      %25 = vector.load %arg6[%c0_18, %c0_19] : memref<1x512xf32, #tpu.memory_space<vmem>>, vector<1x512xf32>
      tpu.vector_store %arg6[%c0_18, %c0_19], %24 {strides = array<i32>} : memref<1x512xf32, #tpu.memory_space<vmem>>, vector<1x512xf32>,
      %cst_20 = arith.constant 0.000000e+00 : f32
      %26 = vector.broadcast %cst_20 : f32 to vector<1x512xf32>
      %c0_21 = arith.constant 0 : index
      %c0_22 = arith.constant 0 : index
      %27 = vector.load %arg7[%c0_21, %c0_22] : memref<1x512xf32, #tpu.memory_space<vmem>>, vector<1x512xf32>
      tpu.vector_store %arg7[%c0_21, %c0_22], %26 {strides = array<i32>} : memref<1x512xf32, #tpu.memory_space<vmem>>, vector<1x512xf32>,
    } else {
    }
    %c0 = arith.constant 0 : index
    %c0_1 = arith.constant 0 : index
    %3 = vector.load %arg1[%c0, %c0_1] : memref<8x1152xbf16, #tpu.memory_space<vmem>>, vector<8x1152xbf16>
    %c0_2 = arith.constant 0 : index
    %c0_3 = arith.constant 0 : index
    %4 = vector.load %arg2[%c0_2, %c0_3] : memref<1152x512xbf16, #tpu.memory_space<vmem>>, vector<1152x512xbf16>
    %cst = arith.constant dense<0.000000e+00> : vector<8x512xf32>
    %5 = tpu.matmul %3, %4, %cst {dimension_numbers = #tpu.dot_dimension_numbers<[1], [0], [0], [1], [0, 0, 1, 1], [], []>} : vector<8x1152xbf16>, vector<1152x512xbf16>, vector<8x512xf32> -> vector<8x512xf32>
    %c8_i32 = arith.constant 8 : i32
    %6 = arith.muli %arg0, %c8_i32 : i32
    %7 = tpu.assume_multiple %6, 8 : i32
    %8 = arith.index_cast %7 : i32 to index
    %c0_4 = arith.constant 0 : index
    %9 = vector.load %arg5[%8, %c0_4] : memref<8x512xf32, #tpu.memory_space<vmem>>, vector<8x512xf32>
    tpu.vector_store %arg5[%8, %c0_4], %5 {strides = array<i32>} : memref<8x512xf32, #tpu.memory_space<vmem>>, vector<8x512xf32>,
    %c0_5 = arith.constant 0 : index
    %c0_6 = arith.constant 0 : index
    %10 = vector.load %arg6[%c0_5, %c0_6] : memref<1x512xf32, #tpu.memory_space<vmem>>, vector<1x512xf32>
    %cst_7 = arith.constant dense<0.000000e+00> : vector<512xf32>
    %11 = vector.multi_reduction <add>, %5, %cst_7 [0] : vector<8x512xf32> to vector<512xf32>
    %12 = vector.shape_cast %11 : vector<512xf32> to vector<1x512xf32>
    %13 = arith.addf %10, %12 : vector<1x512xf32>
    %c0_8 = arith.constant 0 : index
    %c0_9 = arith.constant 0 : index
    %14 = vector.load %arg6[%c0_8, %c0_9] : memref<1x512xf32, #tpu.memory_space<vmem>>, vector<1x512xf32>
    tpu.vector_store %arg6[%c0_8, %c0_9], %13 {strides = array<i32>} : memref<1x512xf32, #tpu.memory_space<vmem>>, vector<1x512xf32>,
    %c0_10 = arith.constant 0 : index
    %c0_11 = arith.constant 0 : index
    %15 = vector.load %arg7[%c0_10, %c0_11] : memref<1x512xf32, #tpu.memory_space<vmem>>, vector<1x512xf32>
    %16 = arith.mulf %5, %5 : vector<8x512xf32>
    %cst_12 = arith.constant dense<0.000000e+00> : vector<512xf32>
    %17 = vector.multi_reduction <add>, %16, %cst_12 [0] : vector<8x512xf32> to vector<512xf32>
    %18 = vector.shape_cast %17 : vector<512xf32> to vector<1x512xf32>
    %19 = arith.addf %15, %18 : vector<1x512xf32>
    %c0_13 = arith.constant 0 : index
    %c0_14 = arith.constant 0 : index
    %20 = vector.load %arg7[%c0_13, %c0_14] : memref<1x512xf32, #tpu.memory_space<vmem>>, vector<1x512xf32>
    tpu.vector_store %arg7[%c0_13, %c0_14], %19 {strides = array<i32>} : memref<1x512xf32, #tpu.memory_space<vmem>>, vector<1x512xf32>,
    %c0_i32_15 = arith.constant 0 : i32
    %21 = arith.cmpi eq, %arg0, %c0_i32_15 : i32
    %22 = arith.extui %21 : i1 to i32
    %c0_i32_16 = arith.constant 0 : i32
    %23 = arith.cmpi ne, %22, %c0_i32_16 : i32
    scf.if %23 {
      %c0_17 = arith.constant 0 : index
      %c0_18 = arith.constant 0 : index
      %24 = vector.load %arg6[%c0_17, %c0_18] : memref<1x512xf32, #tpu.memory_space<vmem>>, vector<1x512xf32>
      %c0_19 = arith.constant 0 : index
      %c0_20 = arith.constant 0 : index
      %25 = vector.load %arg7[%c0_19, %c0_20] : memref<1x512xf32, #tpu.memory_space<vmem>>, vector<1x512xf32>
      %26 = vector.extract_strided_slice %24 {offsets = [0, 0], sizes = [1, 128], strides = [1, 1]} : vector<1x512xf32> to vector<1x128xf32>
      %cst_21 = arith.constant 0.000000e+00 : f32
      %27 = vector.broadcast %cst_21 : f32 to vector<1x128xf32>
      %28 = arith.addf %27, %26 : vector<1x128xf32>
      %29 = vector.extract_strided_slice %24 {offsets = [0, 128], sizes = [1, 128], strides = [1, 1]} : vector<1x512xf32> to vector<1x128xf32>
      %30 = arith.addf %28, %29 : vector<1x128xf32>
      %31 = vector.extract_strided_slice %24 {offsets = [0, 256], sizes = [1, 128], strides = [1, 1]} : vector<1x512xf32> to vector<1x128xf32>
      %32 = arith.addf %30, %31 : vector<1x128xf32>
      %33 = vector.extract_strided_slice %24 {offsets = [0, 384], sizes = [1, 128], strides = [1, 1]} : vector<1x512xf32> to vector<1x128xf32>
      %34 = arith.addf %32, %33 : vector<1x128xf32>
      %35 = vector.extract_strided_slice %25 {offsets = [0, 0], sizes = [1, 128], strides = [1, 1]} : vector<1x512xf32> to vector<1x128xf32>
      %cst_22 = arith.constant 0.000000e+00 : f32
      %36 = vector.broadcast %cst_22 : f32 to vector<1x128xf32>
      %37 = arith.addf %36, %35 : vector<1x128xf32>
      %38 = vector.extract_strided_slice %25 {offsets = [0, 128], sizes = [1, 128], strides = [1, 1]} : vector<1x512xf32> to vector<1x128xf32>
      %39 = arith.addf %37, %38 : vector<1x128xf32>
      %40 = vector.extract_strided_slice %25 {offsets = [0, 256], sizes = [1, 128], strides = [1, 1]} : vector<1x512xf32> to vector<1x128xf32>
      %41 = arith.addf %39, %40 : vector<1x128xf32>
      %42 = vector.extract_strided_slice %25 {offsets = [0, 384], sizes = [1, 128], strides = [1, 1]} : vector<1x512xf32> to vector<1x128xf32>
      %43 = arith.addf %41, %42 : vector<1x128xf32>
      %cst_23 = arith.constant 1.250000e-01 : f32
      %44 = vector.broadcast %cst_23 : f32 to vector<1x128xf32>
      %45 = arith.mulf %34, %44 : vector<1x128xf32>
      %cst_24 = arith.constant 1.250000e-01 : f32
      %46 = vector.broadcast %cst_24 : f32 to vector<1x128xf32>
      %47 = arith.mulf %43, %46 : vector<1x128xf32>
      %48 = arith.mulf %45, %45 : vector<1x128xf32>
      %49 = arith.subf %47, %48 : vector<1x128xf32>
      %cst_25 = arith.constant 0.000000e+00 : f32
      %50 = vector.broadcast %cst_25 : f32 to vector<1x128xf32>
      %51 = arith.maximumf %49, %50 : vector<1x128xf32>
      %cst_26 = arith.constant 9.99999974E-6 : f32
      %52 = vector.broadcast %cst_26 : f32 to vector<1x128xf32>
      %53 = arith.addf %51, %52 : vector<1x128xf32>
      %54 = math.rsqrt %53 : vector<1x128xf32>
      %55 = tpu.concatenate %45, %45, %45, %45 in 1 : vector<1x128xf32>, vector<1x128xf32>, vector<1x128xf32>, vector<1x128xf32> -> vector<1x512xf32>
      %56 = tpu.concatenate %54, %54, %54, %54 in 1 : vector<1x128xf32>, vector<1x128xf32>, vector<1x128xf32>, vector<1x128xf32> -> vector<1x512xf32>
      %c0_27 = arith.constant 0 : index
      %c0_28 = arith.constant 0 : index
      %57 = vector.load %arg5[%c0_27, %c0_28] : memref<8x512xf32, #tpu.memory_space<vmem>>, vector<8x512xf32>
      %58 = vector.broadcast %55 : vector<1x512xf32> to vector<8x512xf32>
      %59 = arith.subf %57, %58 : vector<8x512xf32>
      %60 = vector.broadcast %56 : vector<1x512xf32> to vector<8x512xf32>
      %61 = arith.mulf %59, %60 : vector<8x512xf32>
      %c0_29 = arith.constant 0 : index
      %c0_30 = arith.constant 0 : index
      %62 = vector.load %arg3[%c0_29, %c0_30] : memref<1x512xf32, #tpu.memory_space<vmem>>, vector<1x512xf32>
      %63 = vector.broadcast %62 : vector<1x512xf32> to vector<8x512xf32>
      %64 = arith.mulf %61, %63 : vector<8x512xf32>
      %c0_31 = arith.constant 0 : index
      %c0_32 = arith.constant 0 : index
      %65 = vector.load %arg4[%c0_31, %c0_32] : memref<1x512xf32, #tpu.memory_space<vmem>>, vector<1x512xf32>
      %66 = vector.broadcast %65 : vector<1x512xf32> to vector<8x512xf32>
      %67 = arith.addf %64, %66 : vector<8x512xf32>
      %cst_33 = arith.constant 0.000000e+00 : f32
      %68 = vector.broadcast %cst_33 : f32 to vector<8x512xf32>
      %69 = arith.maximumf %67, %68 : vector<8x512xf32>
      %c0_34 = arith.constant 0 : index
      %c0_35 = arith.constant 0 : index
      %70 = vector.load %arg5[%c0_34, %c0_35] : memref<8x512xf32, #tpu.memory_space<vmem>>, vector<8x512xf32>
      tpu.vector_store %arg5[%c0_34, %c0_35], %69 {strides = array<i32>} : memref<8x512xf32, #tpu.memory_space<vmem>>, vector<8x512xf32>,
    } else {
    }
    return
  }
  func.func @transform_0(%arg0: i32) -> (i32, i32) {
    %c0_i32 = arith.constant 0 : i32
    %c0_i32_0 = arith.constant 0 : i32
    return %arg0, %c0_i32 : i32, i32
  }
  func.func @transform_1(%arg0: i32) -> (i32, i32) {
    %c0_i32 = arith.constant 0 : i32
    %c0_i32_0 = arith.constant 0 : i32
    %c0_i32_1 = arith.constant 0 : i32
    return %c0_i32, %c0_i32_0 : i32, i32
  }
  func.func @transform_2(%arg0: i32) -> (i32, i32) {
    %c0_i32 = arith.constant 0 : i32
    %c0_i32_0 = arith.constant 0 : i32
    %c0_i32_1 = arith.constant 0 : i32
    return %c0_i32, %c0_i32_0 : i32, i32
  }
  func.func @transform_3(%arg0: i32) -> (i32, i32) {
    %c0_i32 = arith.constant 0 : i32
    %c0_i32_0 = arith.constant 0 : i32
    %c0_i32_1 = arith.constant 0 : i32
    return %c0_i32, %c0_i32_0 : i32, i32
  }
  func.func @transform_4(%arg0: i32) -> (i32, i32) {
    %c0_i32 = arith.constant 0 : i32
    %c0_i32_0 = arith.constant 0 : i32
    %c0_i32_1 = arith.constant 0 : i32
    return %c0_i32, %c0_i32_0 : i32, i32
  }
}

module attributes {stable_mosaic.version = 11 : i64} {
  func.func @_conv_bn_relu_kernel(%arg0: i32, %arg1: memref<8x1152xbf16, #tpu.memory_space<vmem>>, %arg2: memref<1152x512xbf16, #tpu.memory_space<vmem>>, %arg3: memref<1x512xf32, #tpu.memory_space<vmem>>, %arg4: memref<1x512xf32, #tpu.memory_space<vmem>>, %arg5: memref<8x512xf32, #tpu.memory_space<vmem>>, %arg6: memref<1x512xf32, #tpu.memory_space<vmem>>, %arg7: memref<1x512xf32, #tpu.memory_space<vmem>>) attributes {dimension_semantics = [#tpu.dimension_semantics<arbitrary>], iteration_bounds = array<i64: 1>, scalar_prefetch = 0 : i64, scratch_operands = 2 : i64, tpu.core_type = #tpu.core_type<tc>, window_params = [{transform_indices = @transform_0, window_bounds = array<i64: 8, 1152>}, {pipeline_mode = #tpu.pipeline_mode<synchronous>, transform_indices = @transform_1, window_bounds = array<i64: 1152, 512>}, {pipeline_mode = #tpu.pipeline_mode<synchronous>, transform_indices = @transform_2, window_bounds = array<i64: 1, 512>}, {pipeline_mode = #tpu.pipeline_mode<synchronous>, transform_indices = @transform_3, window_bounds = array<i64: 1, 512>}, {pipeline_mode = #tpu.pipeline_mode<synchronous>, transform_indices = @transform_4, window_bounds = array<i64: 8, 512>}]} {
    %c0_i32 = arith.constant 0 : i32
    %0 = arith.cmpi eq, %arg0, %c0_i32 : i32
    %1 = arith.extui %0 : i1 to i32
    %c0_i32_0 = arith.constant 0 : i32
    %2 = arith.cmpi ne, %1, %c0_i32_0 : i32
    scf.if %2 {
      %cst_17 = arith.constant 0.000000e+00 : f32
      %24 = vector.broadcast %cst_17 : f32 to vector<1x512xf32>
      %c0_18 = arith.constant 0 : index
      %c0_19 = arith.constant 0 : index
      %25 = vector.load %arg6[%c0_18, %c0_19] : memref<1x512xf32, #tpu.memory_space<vmem>>, vector<1x512xf32>
      tpu.vector_store %arg6[%c0_18, %c0_19], %24 {strides = array<i32>} : memref<1x512xf32, #tpu.memory_space<vmem>>, vector<1x512xf32>,
      %cst_20 = arith.constant 0.000000e+00 : f32
      %26 = vector.broadcast %cst_20 : f32 to vector<1x512xf32>
      %c0_21 = arith.constant 0 : index
      %c0_22 = arith.constant 0 : index
      %27 = vector.load %arg7[%c0_21, %c0_22] : memref<1x512xf32, #tpu.memory_space<vmem>>, vector<1x512xf32>
      tpu.vector_store %arg7[%c0_21, %c0_22], %26 {strides = array<i32>} : memref<1x512xf32, #tpu.memory_space<vmem>>, vector<1x512xf32>,
    } else {
    }
    %c0 = arith.constant 0 : index
    %c0_1 = arith.constant 0 : index
    %3 = vector.load %arg1[%c0, %c0_1] : memref<8x1152xbf16, #tpu.memory_space<vmem>>, vector<8x1152xbf16>
    %c0_2 = arith.constant 0 : index
    %c0_3 = arith.constant 0 : index
    %4 = vector.load %arg2[%c0_2, %c0_3] : memref<1152x512xbf16, #tpu.memory_space<vmem>>, vector<1152x512xbf16>
    %cst = arith.constant dense<0.000000e+00> : vector<8x512xf32>
    %5 = tpu.matmul %3, %4, %cst {dimension_numbers = #tpu.dot_dimension_numbers<[1], [0], [0], [1], [0, 0, 1, 1], [], []>} : vector<8x1152xbf16>, vector<1152x512xbf16>, vector<8x512xf32> -> vector<8x512xf32>
    %c8_i32 = arith.constant 8 : i32
    %6 = arith.muli %arg0, %c8_i32 : i32
    %7 = tpu.assume_multiple %6, 8 : i32
    %8 = arith.index_cast %7 : i32 to index
    %c0_4 = arith.constant 0 : index
    %9 = vector.load %arg5[%8, %c0_4] : memref<8x512xf32, #tpu.memory_space<vmem>>, vector<8x512xf32>
    tpu.vector_store %arg5[%8, %c0_4], %5 {strides = array<i32>} : memref<8x512xf32, #tpu.memory_space<vmem>>, vector<8x512xf32>,
    %c0_5 = arith.constant 0 : index
    %c0_6 = arith.constant 0 : index
    %10 = vector.load %arg6[%c0_5, %c0_6] : memref<1x512xf32, #tpu.memory_space<vmem>>, vector<1x512xf32>
    %cst_7 = arith.constant dense<0.000000e+00> : vector<512xf32>
    %11 = vector.multi_reduction <add>, %5, %cst_7 [0] : vector<8x512xf32> to vector<512xf32>
    %12 = vector.shape_cast %11 : vector<512xf32> to vector<1x512xf32>
    %13 = arith.addf %10, %12 : vector<1x512xf32>
    %c0_8 = arith.constant 0 : index
    %c0_9 = arith.constant 0 : index
    %14 = vector.load %arg6[%c0_8, %c0_9] : memref<1x512xf32, #tpu.memory_space<vmem>>, vector<1x512xf32>
    tpu.vector_store %arg6[%c0_8, %c0_9], %13 {strides = array<i32>} : memref<1x512xf32, #tpu.memory_space<vmem>>, vector<1x512xf32>,
    %c0_10 = arith.constant 0 : index
    %c0_11 = arith.constant 0 : index
    %15 = vector.load %arg7[%c0_10, %c0_11] : memref<1x512xf32, #tpu.memory_space<vmem>>, vector<1x512xf32>
    %16 = arith.mulf %5, %5 : vector<8x512xf32>
    %cst_12 = arith.constant dense<0.000000e+00> : vector<512xf32>
    %17 = vector.multi_reduction <add>, %16, %cst_12 [0] : vector<8x512xf32> to vector<512xf32>
    %18 = vector.shape_cast %17 : vector<512xf32> to vector<1x512xf32>
    %19 = arith.addf %15, %18 : vector<1x512xf32>
    %c0_13 = arith.constant 0 : index
    %c0_14 = arith.constant 0 : index
    %20 = vector.load %arg7[%c0_13, %c0_14] : memref<1x512xf32, #tpu.memory_space<vmem>>, vector<1x512xf32>
    tpu.vector_store %arg7[%c0_13, %c0_14], %19 {strides = array<i32>} : memref<1x512xf32, #tpu.memory_space<vmem>>, vector<1x512xf32>,
    %c0_i32_15 = arith.constant 0 : i32
    %21 = arith.cmpi eq, %arg0, %c0_i32_15 : i32
    %22 = arith.extui %21 : i1 to i32
    %c0_i32_16 = arith.constant 0 : i32
    %23 = arith.cmpi ne, %22, %c0_i32_16 : i32
    scf.if %23 {
      %c0_17 = arith.constant 0 : index
      %c0_18 = arith.constant 0 : index
      %24 = vector.load %arg6[%c0_17, %c0_18] : memref<1x512xf32, #tpu.memory_space<vmem>>, vector<1x512xf32>
      %c0_19 = arith.constant 0 : index
      %c0_20 = arith.constant 0 : index
      %25 = vector.load %arg7[%c0_19, %c0_20] : memref<1x512xf32, #tpu.memory_space<vmem>>, vector<1x512xf32>
      %26 = vector.extract_strided_slice %24 {offsets = [0, 0], sizes = [1, 128], strides = [1, 1]} : vector<1x512xf32> to vector<1x128xf32>
      %cst_21 = arith.constant 0.000000e+00 : f32
      %27 = vector.broadcast %cst_21 : f32 to vector<1x128xf32>
      %28 = arith.addf %27, %26 : vector<1x128xf32>
      %29 = vector.extract_strided_slice %24 {offsets = [0, 128], sizes = [1, 128], strides = [1, 1]} : vector<1x512xf32> to vector<1x128xf32>
      %30 = arith.addf %28, %29 : vector<1x128xf32>
      %31 = vector.extract_strided_slice %24 {offsets = [0, 256], sizes = [1, 128], strides = [1, 1]} : vector<1x512xf32> to vector<1x128xf32>
      %32 = arith.addf %30, %31 : vector<1x128xf32>
      %33 = vector.extract_strided_slice %24 {offsets = [0, 384], sizes = [1, 128], strides = [1, 1]} : vector<1x512xf32> to vector<1x128xf32>
      %34 = arith.addf %32, %33 : vector<1x128xf32>
      %35 = vector.extract_strided_slice %25 {offsets = [0, 0], sizes = [1, 128], strides = [1, 1]} : vector<1x512xf32> to vector<1x128xf32>
      %cst_22 = arith.constant 0.000000e+00 : f32
      %36 = vector.broadcast %cst_22 : f32 to vector<1x128xf32>
      %37 = arith.addf %36, %35 : vector<1x128xf32>
      %38 = vector.extract_strided_slice %25 {offsets = [0, 128], sizes = [1, 128], strides = [1, 1]} : vector<1x512xf32> to vector<1x128xf32>
      %39 = arith.addf %37, %38 : vector<1x128xf32>
      %40 = vector.extract_strided_slice %25 {offsets = [0, 256], sizes = [1, 128], strides = [1, 1]} : vector<1x512xf32> to vector<1x128xf32>
      %41 = arith.addf %39, %40 : vector<1x128xf32>
      %42 = vector.extract_strided_slice %25 {offsets = [0, 384], sizes = [1, 128], strides = [1, 1]} : vector<1x512xf32> to vector<1x128xf32>
      %43 = arith.addf %41, %42 : vector<1x128xf32>
      %cst_23 = arith.constant 3.125000e-02 : f32
      %44 = vector.broadcast %cst_23 : f32 to vector<1x128xf32>
      %45 = arith.mulf %34, %44 : vector<1x128xf32>
      %cst_24 = arith.constant 3.125000e-02 : f32
      %46 = vector.broadcast %cst_24 : f32 to vector<1x128xf32>
      %47 = arith.mulf %43, %46 : vector<1x128xf32>
      %48 = arith.mulf %45, %45 : vector<1x128xf32>
      %49 = arith.subf %47, %48 : vector<1x128xf32>
      %cst_25 = arith.constant 0.000000e+00 : f32
      %50 = vector.broadcast %cst_25 : f32 to vector<1x128xf32>
      %51 = arith.maximumf %49, %50 : vector<1x128xf32>
      %cst_26 = arith.constant 9.99999974E-6 : f32
      %52 = vector.broadcast %cst_26 : f32 to vector<1x128xf32>
      %53 = arith.addf %51, %52 : vector<1x128xf32>
      %54 = math.rsqrt %53 : vector<1x128xf32>
      %55 = tpu.concatenate %45, %45, %45, %45 in 1 : vector<1x128xf32>, vector<1x128xf32>, vector<1x128xf32>, vector<1x128xf32> -> vector<1x512xf32>
      %56 = tpu.concatenate %54, %54, %54, %54 in 1 : vector<1x128xf32>, vector<1x128xf32>, vector<1x128xf32>, vector<1x128xf32> -> vector<1x512xf32>
      %c0_27 = arith.constant 0 : index
      %c0_28 = arith.constant 0 : index
      %57 = vector.load %arg5[%c0_27, %c0_28] : memref<8x512xf32, #tpu.memory_space<vmem>>, vector<8x512xf32>
      %58 = vector.broadcast %55 : vector<1x512xf32> to vector<8x512xf32>
      %59 = arith.subf %57, %58 : vector<8x512xf32>
      %60 = vector.broadcast %56 : vector<1x512xf32> to vector<8x512xf32>
      %61 = arith.mulf %59, %60 : vector<8x512xf32>
      %c0_29 = arith.constant 0 : index
      %c0_30 = arith.constant 0 : index
      %62 = vector.load %arg3[%c0_29, %c0_30] : memref<1x512xf32, #tpu.memory_space<vmem>>, vector<1x512xf32>
      %63 = vector.broadcast %62 : vector<1x512xf32> to vector<8x512xf32>
      %64 = arith.mulf %61, %63 : vector<8x512xf32>
      %c0_31 = arith.constant 0 : index
      %c0_32 = arith.constant 0 : index
      %65 = vector.load %arg4[%c0_31, %c0_32] : memref<1x512xf32, #tpu.memory_space<vmem>>, vector<1x512xf32>
      %66 = vector.broadcast %65 : vector<1x512xf32> to vector<8x512xf32>
      %67 = arith.addf %64, %66 : vector<8x512xf32>
      %cst_33 = arith.constant 0.000000e+00 : f32
      %68 = vector.broadcast %cst_33 : f32 to vector<8x512xf32>
      %69 = arith.maximumf %67, %68 : vector<8x512xf32>
      %c0_34 = arith.constant 0 : index
      %c0_35 = arith.constant 0 : index
      %70 = vector.load %arg5[%c0_34, %c0_35] : memref<8x512xf32, #tpu.memory_space<vmem>>, vector<8x512xf32>
      tpu.vector_store %arg5[%c0_34, %c0_35], %69 {strides = array<i32>} : memref<8x512xf32, #tpu.memory_space<vmem>>, vector<8x512xf32>,
    } else {
    }
    return
  }
  func.func @transform_0(%arg0: i32) -> (i32, i32) {
    %c0_i32 = arith.constant 0 : i32
    %c0_i32_0 = arith.constant 0 : i32
    return %arg0, %c0_i32 : i32, i32
  }
  func.func @transform_1(%arg0: i32) -> (i32, i32) {
    %c0_i32 = arith.constant 0 : i32
    %c0_i32_0 = arith.constant 0 : i32
    %c0_i32_1 = arith.constant 0 : i32
    return %c0_i32, %c0_i32_0 : i32, i32
  }
  func.func @transform_2(%arg0: i32) -> (i32, i32) {
    %c0_i32 = arith.constant 0 : i32
    %c0_i32_0 = arith.constant 0 : i32
    %c0_i32_1 = arith.constant 0 : i32
    return %c0_i32, %c0_i32_0 : i32, i32
  }
  func.func @transform_3(%arg0: i32) -> (i32, i32) {
    %c0_i32 = arith.constant 0 : i32
    %c0_i32_0 = arith.constant 0 : i32
    %c0_i32_1 = arith.constant 0 : i32
    return %c0_i32, %c0_i32_0 : i32, i32
  }
  func.func @transform_4(%arg0: i32) -> (i32, i32) {
    %c0_i32 = arith.constant 0 : i32
    %c0_i32_0 = arith.constant 0 : i32
    %c0_i32_1 = arith.constant 0 : i32
    return %c0_i32, %c0_i32_0 : i32, i32
  }
}

</mosaic_0001>

<bundles_post_ra>
// kernel: backbone_forward.56
= control target key start
LH: loop header
LB: loop body
LE: loop exit
PB: predicated region body
PF: predicated region fallthrough
CT: control target
= control target key end

     0   :  { %v586_v16 = vmov 0.0   ;;  %s810_s1 = inlined_call_operand.vmem [shape: bf16[128,128], index: 1, kind: input, shape index: {}]   ;;  %s811_s0 = inlined_call_operand.vmem [shape: bf16[128,128], index: 0, kind: input, shape index: {}]   ;;  %s812_s2 = inlined_call_operand.vmem [shape: f32[1,128], index: 2, kind: input, shape index: {}]   ;;  %s813_s3 = inlined_call_operand.vmem [shape: f32[1,128], index: 3, kind: input, shape index: {}]   ;;  %s814_s4 = inlined_call_operand.vmem [shape: f32[128,128], index: 4, kind: output, shape index: {}]  }
   0x1   :  { %v568_v0 = vld [vmem:[%s810_s1] sm:$0xff]   ;;  %v569_v1 = vld [vmem:[%s810_s1 + $0x8] sm:$0xff]   ;;  %v570_v2 = vld [vmem:[%s810_s1 + $0x10] sm:$0xff]   ;;  %22 = vst [vmem:[#allocation2] sm:$0x1] %v586_v16 }
   0x2   :  { %519 = vmatprep.subr.bf16.mxu0 %v568_v0  ;;  %551 = vmatprep.subr.bf16.mxu1 %v568_v0  ;;  %v571_v3 = vld [vmem:[%s810_s1 + $0x18] sm:$0xff]   ;;  %v576_v4 = vld [vmem:[%s811_s0] sm:$0xff]   ;;  %v573_v7 = vld [vmem:[%s810_s1 + $0x28] sm:$0xff]   ;;  %23 = vst [vmem:[#allocation3] sm:$0x1] %v586_v16 }
   0x3   :  { %520 = vmatpush3.bf16.msra.mxu0 %v568_v0  ;;  %559 = vmatpush3.bf16.msra.mxu1 %v568_v0  ;;  %v572_v5 = vld [vmem:[%s810_s1 + $0x20] sm:$0xff]   ;;  %v574_v8 = vld [vmem:[%s810_s1 + $0x30] sm:$0xff]   ;;  %v575_v9 = vld [vmem:[%s810_s1 + $0x38] sm:$0xff]  }
   0x4   :  { %521 = vmatprep.subr.bf16.mxu0 %v569_v1  ;;  %552 = vmatprep.subr.bf16.mxu1 %v569_v1  ;;  %v580_v6 = vld [vmem:[%s811_s0 + $0x20] sm:$0xff]   ;;  %v577_v10 = vld [vmem:[%s811_s0 + $0x8] sm:$0xff]   ;;  %v578_v12 = vld [vmem:[%s811_s0 + $0x10] sm:$0xff]  }
   0x5   :  { %535 = vmatprep.mubr.bf16.mxu0 %v576_v4  ;;  %543 = vmatprep.mubr.bf16.mxu1 %v580_v6  ;;  %v581_v11 = vld [vmem:[%s811_s0 + $0x28] sm:$0xff]   ;;  %v582_v13 = vld [vmem:[%s811_s0 + $0x30] sm:$0xff]   ;;  %v579_v14 = vld [vmem:[%s811_s0 + $0x18] sm:$0xff]  }
   0x6   :  { %v583_v15 = vld [vmem:[%s811_s0 + $0x38] sm:$0xff]  }
   0x7   :  { %522 = vmatpush3.bf16.msra.mxu0 %v569_v1  ;;  %560 = vmatpush3.bf16.msra.mxu1 %v569_v1 }
   0x8   :  { %523 = vmatprep.subr.bf16.mxu0 %v570_v2  ;;  %553 = vmatprep.subr.bf16.mxu1 %v570_v2 }
   0xb   :  { %524 = vmatpush3.bf16.msra.mxu0 %v570_v2  ;;  %561 = vmatpush3.bf16.msra.mxu1 %v570_v2 }
   0xc   :  { %525 = vmatprep.subr.bf16.mxu0 %v571_v3  ;;  %554 = vmatprep.subr.bf16.mxu1 %v571_v3 }
   0xf   :  { %526 = vmatpush3.bf16.msra.mxu0 %v571_v3  ;;  %562 = vmatpush3.bf16.msra.mxu1 %v571_v3 }
  0x10   :  { %527 = vmatprep.subr.bf16.mxu0 %v572_v5  ;;  %555 = vmatprep.subr.bf16.mxu1 %v572_v5 }
  0x13   :  { %528 = vmatpush3.bf16.msra.mxu0 %v572_v5  ;;  %563 = vmatpush3.bf16.msra.mxu1 %v572_v5 }
  0x14   :  { %529 = vmatprep.subr.bf16.mxu0 %v573_v7  ;;  %556 = vmatprep.subr.bf16.mxu1 %v573_v7 }
  0x17   :  { %530 = vmatpush3.bf16.msra.mxu0 %v573_v7  ;;  %564 = vmatpush3.bf16.msra.mxu1 %v573_v7 }
  0x18   :  { %531 = vmatprep.subr.bf16.mxu0 %v574_v8  ;;  %557 = vmatprep.subr.bf16.mxu1 %v574_v8 }
  0x1b   :  { %532 = vmatpush3.bf16.msra.mxu0 %v574_v8  ;;  %565 = vmatpush3.bf16.msra.mxu1 %v574_v8 }
  0x1c   :  { %533 = vmatprep.subr.bf16.mxu0 %v575_v9  ;;  %558 = vmatprep.subr.bf16.mxu1 %v575_v9 }
  0x1f   :  { %534 = vmatpush3.bf16.msra.mxu0 %v575_v9  ;;  %566 = vmatpush3.bf16.msra.mxu1 %v575_v9 }
  0x22   :  { %536 = vmatmul.mubr.bf16.vlgmr.msra.gmra.mrb[0].mxu0 %v577_v10  ;;  %544 = vmatmul.mubr.bf16.vlgmr.msra.gmra.mrb[0].mxu1 %v581_v11 }
  0x23   :  { %539 = vmatprep.mubr.bf16.mxu0 %v578_v12  ;;  %547 = vmatprep.mubr.bf16.mxu1 %v582_v13 }
  0x2a   :  { %540 = vmatmul.mubr.bf16.gmra.mrb[4].mxu0 %v579_v14  ;;  %548 = vmatmul.mubr.bf16.gmra.mrb[4].mxu1 %v583_v15 }
  0xf5   :  { %v660_v17 = vpop.f32.mrb[0].mxu0  ;;  %v662_v18 = vpop.f32.mrb[0].mxu1 }
  0xf6   :  { %v664_v19 = vpop.f32.mrb[1].mxu0  ;;  %v666_v20 = vpop.f32.mrb[1].mxu1  ;;  %v294_v28 = vmul.f32 %v660_v17, %v660_v17  ;;  %v302_v60 = vmul.f32 %v662_v18, %v662_v18 }
  0xf7   :  { %v668_v21 = vpop.f32.mrb[2].mxu0  ;;  %v670_v22 = vpop.f32.mrb[2].mxu1  ;;  %v292_v25 = vmul.f32 %v664_v19, %v664_v19  ;;  %v300_v54 = vmul.f32 %v666_v20, %v666_v20 }
  0xf8   :  { %v672_v23 = vpop.f32.mrb[3].mxu0  ;;  %v674_v24 = vpop.f32.mrb[3].mxu1  ;;  %v295_v31 = vmul.f32 %v668_v21, %v668_v21  ;;  %v303_v63 = vmul.f32 %v670_v22, %v670_v22 }
  0xf9   :  { %v268_v26 = vadd.f32 %v672_v23, %v664_v19  ;;  %v293_v27 = vmul.f32 %v672_v23, %v672_v23  ;;  %v301_v59 = vmul.f32 %v674_v24, %v674_v24 }
  0xfb   :  { %v269_v29 = vadd.f32 %v660_v17, %v268_v26  ;;  %v308_v30 = vadd.f32 %v293_v27, %v292_v25 }
  0xfd   :  { %v309_v32 = vadd.f32 %v308_v30, %v294_v28  ;;  %v687_v33 = vpop.f32.mrb[4].mxu0  ;;  %v270_v34 = vadd.f32 %v668_v21, %v269_v29  ;;  %v690_v35 = vpop.f32.mrb[4].mxu1 }
  0xfe   :  { %v692_v36 = vpop.f32.mrb[5].mxu0  ;;  %v694_v37 = vpop.f32.mrb[5].mxu1  ;;  %v298_v48 = vmul.f32 %v687_v33, %v687_v33  ;;  %v306_v8 = vmul.f32 %v690_v35, %v690_v35 }
  0xff   :  { %v271_v38 = vadd.f32 %v270_v34, %v692_v36  ;;  %v296_v39 = vmul.f32 %v692_v36, %v692_v36  ;;  %v310_v40 = vadd.f32 %v309_v32, %v295_v31  ;;  %v699_v41 = vpop.f32.mrb[6].mxu0  ;;  %v701_v42 = vpop.f32.mrb[6].mxu1  ;;  %v304_v2 = vmul.f32 %v694_v37, %v694_v37  ;;  %v267_v32 = vld [vmem:[#allocation2] sm:$0x1] }
 0x100   :  { %v703_v43 = vpop.f32.mrb[7].mxu0  ;;  %v705_v44 = vpop.f32.mrb[7].mxu1  ;;  %v299_v51 = vmul.f32 %v699_v41, %v699_v41  ;;  %v307_v11 = vmul.f32 %v701_v42, %v701_v42 }
 0x101   :  { %v311_v45 = vadd.f32 %v310_v40, %v296_v39  ;;  %v272_v46 = vadd.f32 %v271_v38, %v703_v43  ;;  %v297_v47 = vmul.f32 %v703_v43, %v703_v43  ;;  %v305_v7 = vmul.f32 %v705_v44, %v705_v44  ;;  %v291_v39 = vld [vmem:[#allocation3] sm:$0x1] }
 0x103   :  { %v273_v49 = vadd.f32 %v687_v33, %v272_v46  ;;  %v312_v50 = vadd.f32 %v311_v45, %v297_v47 }
 0x105   :  { %v313_v52 = vadd.f32 %v312_v50, %v298_v48  ;;  %v274_v53 = vadd.f32 %v699_v41, %v273_v49 }
 0x107   :  { %v275_v55 = vadd.f32 %v274_v53, %v666_v20  ;;  %v314_v56 = vadd.f32 %v313_v52, %v299_v51  ;;  %v360_v52 = vlaneseq }
 0x109   :  { %v315_v57 = vadd.f32 %v314_v56, %v300_v54  ;;  %v276_v58 = vadd.f32 %v275_v55, %v674_v24  ;;  %v361_v55 = vshrl.u32 %v360_v52, 7 }
 0x10b   :  { %v277_v61 = vadd.f32 %v662_v18, %v276_v58  ;;  %v316_v62 = vadd.f32 %v315_v57, %v301_v59  ;;  %v362_v57 = vsub.s32 0, %v361_v55 }
 0x10d   :  { %v317_v0 = vadd.f32 %v316_v62, %v302_v60  ;;  %v278_v1 = vadd.f32 %v670_v22, %v277_v61 }
 0x10f   :  { %v279_v3 = vadd.f32 %v278_v1, %v694_v37  ;;  %v318_v4 = vadd.f32 %v317_v0, %v303_v63 }
 0x111   :  { %v319_v5 = vadd.f32 %v318_v4, %v304_v2  ;;  %v280_v6 = vadd.f32 %v279_v3, %v705_v44 }
 0x113   :  { %v281_v9 = vadd.f32 %v690_v35, %v280_v6  ;;  %v320_v10 = vadd.f32 %v319_v5, %v305_v7 }
 0x115   :  { %v282_v12 = vadd.f32 %v701_v42, %v281_v9  ;;  %v321_v13 = vadd.f32 %v320_v10, %v306_v8 }
 0x117   :  { %v283_v14 = vrot.slane %v282_v12, 4  ;;  %v322_v15 = vadd.f32 %v321_v13, %v307_v11 }
 0x119   :  { %v284_v16 = vadd.f32 %v283_v14, %v282_v12  ;;  %v323_v25 = vrot.slane %v322_v15, 4 }
 0x11b   :  { %v285_v26 = vrot.slane %v284_v16, 2  ;;  %v324_v27 = vadd.f32 %v323_v25, %v322_v15 }
 0x11d   :  { %v286_v28 = vadd.f32 %v285_v26, %v284_v16  ;;  %v325_v29 = vrot.slane %v324_v27, 2 }
 0x11f   :  { %v287_v30 = vrot.slane %v286_v28, 1  ;;  %v326_v31 = vadd.f32 %v325_v29, %v324_v27 }
 0x121   :  { %v288_v34 = vadd.f32 %v287_v30, %v286_v28  ;;  %v327_v38 = vrot.slane %v326_v31, 1  ;;  %v502_v30 = vld [vmem:[%s813_s3] ss:$0 sm:$0xff] }
 0x123   :  { %v289_v40 = vadd.f32 %v288_v34, %v267_v32  ;;  %v328_v45 = vadd.f32 %v327_v38, %v326_v31 }
 0x125   :  { %290 = vst [vmem:[#allocation2] sm:$0x1] %v289_v40  ;;  %v329_v46 = vadd.f32 %v328_v45, %v291_v39 }
 0x127   :  { %330 = vst [vmem:[#allocation3] sm:$0x1] %v329_v46 }
 0x12c   :  { %v334_v47 = vld [vmem:[#allocation2] sm:$0x1] }
 0x12d   :  { %v336_v48 = vmul.f32 0.0078125, %v334_v47 }
 0x12e   :  { %v335_v49 = vld [vmem:[#allocation3] sm:$0x1] }
 0x12f   :  { %v337_v50 = vmul.f32 0.0078125, %v335_v49  ;;  %v338_v51 = vmul.f32 %v336_v48, %v336_v48  ;;  %v363_v58 = vrot.slane %v336_v48, %v362_v57 }
 0x131   :  { %v339_v53 = vsub.f32 %v337_v50, %v338_v51  ;;  %v365_v59 = vsub.f32 %v664_v19, %v363_v58  ;;  %v366_v60 = vsub.f32 %v672_v23, %v363_v58  ;;  %v367_v61 = vsub.f32 %v660_v17, %v363_v58 }
 0x132   :  { %v368_v62 = vsub.f32 %v668_v21, %v363_v58  ;;  %v369_v63 = vsub.f32 %v692_v36, %v363_v58  ;;  %v370_v1 = vsub.f32 %v703_v43, %v363_v58  ;;  %v371_v2 = vsub.f32 %v687_v33, %v363_v58 }
 0x133   :  { %v340_v54 = vmax.f32 %v339_v53, 0.0  ;;  %v372_v3 = vsub.f32 %v699_v41, %v363_v58  ;;  %v373_v4 = vsub.f32 %v666_v20, %v363_v58  ;;  %v374_v5 = vsub.f32 %v674_v24, %v363_v58 }
 0x134   :  { %v375_v19 = vsub.f32 %v662_v18, %v363_v58  ;;  %v376_v23 = vsub.f32 %v670_v22, %v363_v58  ;;  %v377_v21 = vsub.f32 %v694_v37, %v363_v58  ;;  %v378_v36 = vsub.f32 %v705_v44, %v363_v58  ;;  %v501_v18 = vld [vmem:[%s812_s2] ss:$0 sm:$0xff] }
 0x135   :  { %v341_v56 = vadd.f32 1e-05, %v340_v54  ;;  %v379_v6 = vsub.f32 %v690_v35, %v363_v58  ;;  %v380_v43 = vsub.f32 %v701_v42, %v363_v58 }
 0x137   :  { %584 = vrsqrt.f32 %v341_v56 }
 0x141   :  { %v585_v0 = vpop.eup %584 }
 0x142   :  { %v385_v17 = vrot.slane %v585_v0, %v362_v57 }
 0x144   :  { %v387_v33 = vmul.f32 %v385_v17, %v365_v59  ;;  %v388_v7 = vmul.f32 %v385_v17, %v366_v60  ;;  %v389_v41 = vmul.f32 %v385_v17, %v367_v61  ;;  %v390_v8 = vmul.f32 %v385_v17, %v368_v62 }
 0x145   :  { %v391_v20 = vmul.f32 %v385_v17, %v369_v63  ;;  %v392_v9 = vmul.f32 %v385_v17, %v370_v1  ;;  %v393_v24 = vmul.f32 %v385_v17, %v371_v2  ;;  %v394_v10 = vmul.f32 %v385_v17, %v372_v3 }
 0x146   :  { %v395_v22 = vmul.f32 %v385_v17, %v373_v4  ;;  %v396_v37 = vmul.f32 %v385_v17, %v374_v5  ;;  %v397_v11 = vmul.f32 %v385_v17, %v375_v19  ;;  %v398_v44 = vmul.f32 %v385_v17, %v376_v23 }
 0x147   :  { %v399_v12 = vmul.f32 %v385_v17, %v377_v21  ;;  %v400_v35 = vmul.f32 %v385_v17, %v378_v36  ;;  %v401_v13 = vmul.f32 %v385_v17, %v379_v6  ;;  %v402_v42 = vmul.f32 %v385_v17, %v380_v43 }
 0x148   :  { %v410_v14 = vmul.f32 %v501_v18, %v387_v33  ;;  %v411_v15 = vmul.f32 %v501_v18, %v388_v7  ;;  %v412_v16 = vmul.f32 %v501_v18, %v389_v41  ;;  %v413_v25 = vmul.f32 %v501_v18, %v390_v8 }
 0x149   :  { %v414_v26 = vmul.f32 %v501_v18, %v391_v20  ;;  %v415_v27 = vmul.f32 %v501_v18, %v392_v9  ;;  %v416_v28 = vmul.f32 %v501_v18, %v393_v24  ;;  %v417_v29 = vmul.f32 %v501_v18, %v394_v10 }
 0x14a   :  { %v418_v31 = vmul.f32 %v501_v18, %v395_v22  ;;  %v419_v32 = vmul.f32 %v501_v18, %v396_v37  ;;  %v420_v34 = vmul.f32 %v501_v18, %v397_v11  ;;  %v421_v38 = vmul.f32 %v501_v18, %v398_v44 }
 0x14b   :  { %v422_v39 = vmul.f32 %v501_v18, %v399_v12  ;;  %v423_v40 = vmul.f32 %v501_v18, %v400_v35  ;;  %v424_v45 = vmul.f32 %v501_v18, %v401_v13  ;;  %v425_v46 = vmul.f32 %v501_v18, %v402_v42 }
 0x14c   :  { %v433_v47 = vadd.f32 %v502_v30, %v410_v14  ;;  %v434_v48 = vadd.f32 %v502_v30, %v411_v15  ;;  %v435_v49 = vadd.f32 %v502_v30, %v412_v16  ;;  %v436_v50 = vadd.f32 %v502_v30, %v413_v25 }
 0x14d   :  { %v437_v51 = vadd.f32 %v502_v30, %v414_v26  ;;  %v438_v52 = vadd.f32 %v502_v30, %v415_v27  ;;  %v439_v53 = vadd.f32 %v502_v30, %v416_v28  ;;  %v440_v54 = vadd.f32 %v502_v30, %v417_v29 }
 0x14e   :  { %v441_v55 = vadd.f32 %v502_v30, %v418_v31  ;;  %v442_v56 = vadd.f32 %v502_v30, %v419_v32  ;;  %v443_v57 = vadd.f32 %v502_v30, %v420_v34  ;;  %v444_v58 = vadd.f32 %v502_v30, %v421_v38 }
 0x14f   :  { %v445_v59 = vadd.f32 %v502_v30, %v422_v39  ;;  %v446_v60 = vadd.f32 %v502_v30, %v423_v40  ;;  %v447_v61 = vadd.f32 %v502_v30, %v424_v45  ;;  %v448_v62 = vadd.f32 %v502_v30, %v425_v46 }
 0x150   :  { %v449_v63 = vmax.f32 %v433_v47, 0.0  ;;  %v450_v0 = vmax.f32 %v434_v48, 0.0  ;;  %v451_v1 = vmax.f32 %v435_v49, 0.0  ;;  %v452_v2 = vmax.f32 %v436_v50, 0.0 }
 0x151   :  { %v453_v3 = vmax.f32 %v437_v51, 0.0  ;;  %v454_v4 = vmax.f32 %v438_v52, 0.0  ;;  %v455_v5 = vmax.f32 %v439_v53, 0.0  ;;  %v456_v19 = vmax.f32 %v440_v54, 0.0 }
 0x152   :  { %v457_v23 = vmax.f32 %v441_v55, 0.0  ;;  %v458_v17 = vmax.f32 %v442_v56, 0.0  ;;  %v459_v21 = vmax.f32 %v443_v57, 0.0  ;;  %v460_v36 = vmax.f32 %v444_v58, 0.0  ;;  %465 = vst [vmem:[%s814_s4] sm:$0xff] %v449_v63  ;;  %466 = vst [vmem:[%s814_s4 + $0x8] sm:$0xff] %v450_v0 }
 0x153   :  { %467 = vst [vmem:[%s814_s4 + $0x10] sm:$0xff] %v451_v1  ;;  %468 = vst [vmem:[%s814_s4 + $0x18] sm:$0xff] %v452_v2  ;;  %v461_v6 = vmax.f32 %v445_v59, 0.0  ;;  %v462_v43 = vmax.f32 %v446_v60, 0.0  ;;  %v463_v33 = vmax.f32 %v447_v61, 0.0  ;;  %v464_v7 = vmax.f32 %v448_v62, 0.0 }
 0x154   :  { %469 = vst [vmem:[%s814_s4 + $0x20] sm:$0xff] %v453_v3  ;;  %470 = vst [vmem:[%s814_s4 + $0x28] sm:$0xff] %v454_v4 }
 0x155   :  { %471 = vst [vmem:[%s814_s4 + $0x30] sm:$0xff] %v455_v5  ;;  %472 = vst [vmem:[%s814_s4 + $0x38] sm:$0xff] %v456_v19 }
 0x156   :  { %473 = vst [vmem:[%s814_s4 + $0x40] sm:$0xff] %v457_v23  ;;  %474 = vst [vmem:[%s814_s4 + $0x48] sm:$0xff] %v458_v17 }
 0x157   :  { %475 = vst [vmem:[%s814_s4 + $0x50] sm:$0xff] %v459_v21  ;;  %476 = vst [vmem:[%s814_s4 + $0x58] sm:$0xff] %v460_v36 }
 0x158   :  { %477 = vst [vmem:[%s814_s4 + $0x60] sm:$0xff] %v461_v6  ;;  %478 = vst [vmem:[%s814_s4 + $0x68] sm:$0xff] %v462_v43 }
 0x159   :  { %479 = vst [vmem:[%s814_s4 + $0x70] sm:$0xff] %v463_v33  ;;  %480 = vst [vmem:[%s814_s4 + $0x78] sm:$0xff] %v464_v7 }

// kernel: backbone_forward.57
= control target key start
LH: loop header
LB: loop body
LE: loop exit
PB: predicated region body
PF: predicated region fallthrough
CT: control target
= control target key end

     0   :  { %v1027_v48 = vmov 0.0   ;;  %s1350_s1 = inlined_call_operand.vmem [shape: bf16[384,128], index: 1, kind: input, shape index: {}]   ;;  %s1351_s0 = inlined_call_operand.vmem [shape: bf16[128,384], index: 0, kind: input, shape index: {}]   ;;  %s1352_s2 = inlined_call_operand.vmem [shape: f32[1,128], index: 2, kind: input, shape index: {}]   ;;  %s1353_s3 = inlined_call_operand.vmem [shape: f32[1,128], index: 3, kind: input, shape index: {}]   ;;  %s1354_s4 = inlined_call_operand.vmem [shape: f32[128,128], index: 4, kind: output, shape index: {}]  }
   0x1   :  { %v969_v0 = vld [vmem:[%s1350_s1 + $0x40] sm:$0xff]   ;;  %v972_v3 = vld [vmem:[%s1350_s1 + $0x48] sm:$0xff]   ;;  %v975_v6 = vld [vmem:[%s1350_s1 + $0x50] sm:$0xff]   ;;  %22 = vst [vmem:[#allocation2] sm:$0x1] %v1027_v48 }
   0x2   :  { %v970_v1 = vld [vmem:[%s1350_s1] sm:$0xff]   ;;  %856 = vmatprep.subr.bf16.mxu0 %v969_v0  ;;  %v973_v4 = vld [vmem:[%s1350_s1 + $0x8] sm:$0xff]   ;;  %v976_v7 = vld [vmem:[%s1350_s1 + $0x10] sm:$0xff]   ;;  %23 = vst [vmem:[#allocation3] sm:$0x1] %v1027_v48 }
   0x3   :  { %v971_v2 = vld [vmem:[%s1350_s1 + $0x80] sm:$0xff]   ;;  %857 = vmatpush3.bf16.msra.mxu0 %v970_v1  ;;  %v974_v5 = vld [vmem:[%s1350_s1 + $0x88] sm:$0xff]   ;;  %v977_v8 = vld [vmem:[%s1350_s1 + $0x90] sm:$0xff]  }
   0x4   :  { %936 = vmatprep.subr.bf16.mxu1 %v971_v2  ;;  %858 = vmatprep.subr.bf16.mxu0 %v972_v3  ;;  %v978_v9 = vld [vmem:[%s1350_s1 + $0x58] sm:$0xff]   ;;  %v981_v12 = vld [vmem:[%s1350_s1 + $0x60] sm:$0xff]   ;;  %v984_v15 = vld [vmem:[%s1350_s1 + $0x68] sm:$0xff]  }
   0x5   :  { %937 = vmatpush3.bf16.msra.mxu1 %v971_v2  ;;  %v979_v10 = vld [vmem:[%s1350_s1 + $0x18] sm:$0xff]   ;;  %v983_v13 = vld [vmem:[%s1350_s1 + $0xa0] sm:$0xff]   ;;  %v986_v16 = vld [vmem:[%s1350_s1 + $0xa8] sm:$0xff]  }
   0x6   :  { %938 = vmatprep.subr.bf16.mxu1 %v974_v5  ;;  %v980_v11 = vld [vmem:[%s1350_s1 + $0x98] sm:$0xff]   ;;  %v982_v14 = vld [vmem:[%s1350_s1 + $0x20] sm:$0xff]   ;;  %v985_v17 = vld [vmem:[%s1350_s1 + $0x28] sm:$0xff]  }
   0x7   :  { %859 = vmatpush3.bf16.msra.mxu0 %v973_v4  ;;  %v987_v18 = vld [vmem:[%s1350_s1 + $0x70] sm:$0xff]   ;;  %v990_v21 = vld [vmem:[%s1350_s1 + $0x78] sm:$0xff]   ;;  %v993_v26 = vld [vmem:[%s1351_s0] ss:$12 sps:$4 sm:$0xff]  }
   0x8   :  { %860 = vmatprep.subr.bf16.mxu0 %v975_v6  ;;  %v988_v19 = vld [vmem:[%s1350_s1 + $0x30] sm:$0xff]   ;;  %v992_v22 = vld [vmem:[%s1350_s1 + $0xb8] sm:$0xff]   ;;  %v997_v28 = vld [vmem:[%s1351_s0 + $0x20] ss:$12 sps:$4 sm:$0xff]  }
   0x9   :  { %939 = vmatpush3.bf16.msra.mxu1 %v974_v5  ;;  %v989_v20 = vld [vmem:[%s1350_s1 + $0xb0] sm:$0xff]   ;;  %v991_v25 = vld [vmem:[%s1350_s1 + $0x38] sm:$0xff]   ;;  %v1013_v36 = vld [vmem:[%s1351_s0 + $0x80] ss:$12 sps:$4 sm:$0xff]  }
   0xa   :  { %940 = vmatprep.subr.bf16.mxu1 %v977_v8  ;;  %v995_v23 = vld [vmem:[%s1351_s0 + $0x4] ss:$12 sps:$4 sm:$0xff]   ;;  %v996_v24 = vld [vmem:[%s1351_s0 + $0x8] ss:$12 sps:$4 sm:$0xff]   ;;  %v1006_v35 = vld [vmem:[%s1351_s0 + $0x4c] ss:$12 sps:$4 sm:$0xff]  }
   0xb   :  { %861 = vmatpush3.bf16.msra.mxu0 %v976_v7  ;;  %408 = vmatprep.mubr.bf16.mxu0 %v995_v23  ;;  %v998_v27 = vld [vmem:[%s1351_s0 + $0x1c] ss:$12 sps:$4 sm:$0xff]   ;;  %v1004_v29 = vld [vmem:[%s1351_s0 + $0x38] ss:$12 sps:$4 sm:$0xff]   ;;  %v1001_v31 = vld [vmem:[%s1351_s0 + $0x34] ss:$12 sps:$4 sm:$0xff]  }
   0xc   :  { %862 = vmatprep.subr.bf16.mxu0 %v978_v9  ;;  %952 = vmatprep.mubr.bf16.mxu1 %v996_v24  ;;  %v1000_v30 = vld [vmem:[%s1351_s0 + $0x18] ss:$12 sps:$4 sm:$0xff]   ;;  %v1005_v32 = vld [vmem:[%s1351_s0 + $0x50] ss:$12 sps:$4 sm:$0xff]   ;;  %v1012_v33 = vld [vmem:[%s1351_s0 + $0x68] ss:$12 sps:$4 sm:$0xff]  }
   0xd   :  { %941 = vmatpush3.bf16.msra.mxu1 %v977_v8  ;;  %v1003_v34 = vld [vmem:[%s1351_s0 + $0x30] ss:$12 sps:$4 sm:$0xff]   ;;  %v1020_v37 = vld [vmem:[%s1351_s0 + $0x98] ss:$12 sps:$4 sm:$0xff]   ;;  %v1008_v38 = vld [vmem:[%s1351_s0 + $0x48] ss:$12 sps:$4 sm:$0xff]  }
   0xe   :  { %942 = vmatprep.subr.bf16.mxu1 %v980_v11  ;;  %v1009_v39 = vld [vmem:[%s1351_s0 + $0x64] ss:$12 sps:$4 sm:$0xff]   ;;  %v1011_v41 = vld [vmem:[%s1351_s0 + $0x60] ss:$12 sps:$4 sm:$0xff]   ;;  %v1014_v42 = vld [vmem:[%s1351_s0 + $0x7c] ss:$12 sps:$4 sm:$0xff]  }
   0xf   :  { %863 = vmatpush3.bf16.msra.mxu0 %v979_v10  ;;  %v1021_v40 = vld [vmem:[%s1351_s0 + $0xb0] ss:$12 sps:$4 sm:$0xff]   ;;  %v1016_v43 = vld [vmem:[%s1351_s0 + $0x78] ss:$12 sps:$4 sm:$0xff]   ;;  %v1017_v44 = vld [vmem:[%s1351_s0 + $0x94] ss:$12 sps:$4 sm:$0xff]  }
  0x10   :  { %864 = vmatprep.subr.bf16.mxu0 %v981_v12  ;;  %v1019_v45 = vld [vmem:[%s1351_s0 + $0x90] ss:$12 sps:$4 sm:$0xff]   ;;  %v1022_v46 = vld [vmem:[%s1351_s0 + $0xac] ss:$12 sps:$4 sm:$0xff]   ;;  %v1024_v47 = vld [vmem:[%s1351_s0 + $0xa8] ss:$12 sps:$4 sm:$0xff]  }
  0x11   :  { %943 = vmatpush3.bf16.msra.mxu1 %v980_v11 }
  0x12   :  { %944 = vmatprep.subr.bf16.mxu1 %v983_v13 }
  0x13   :  { %865 = vmatpush3.bf16.msra.mxu0 %v982_v14 }
  0x14   :  { %866 = vmatprep.subr.bf16.mxu0 %v984_v15 }
  0x15   :  { %945 = vmatpush3.bf16.msra.mxu1 %v983_v13 }
  0x16   :  { %946 = vmatprep.subr.bf16.mxu1 %v986_v16 }
  0x17   :  { %867 = vmatpush3.bf16.msra.mxu0 %v985_v17 }
  0x18   :  { %868 = vmatprep.subr.bf16.mxu0 %v987_v18 }
  0x19   :  { %947 = vmatpush3.bf16.msra.mxu1 %v986_v16 }
  0x1a   :  { %948 = vmatprep.subr.bf16.mxu1 %v989_v20 }
  0x1b   :  { %869 = vmatpush3.bf16.msra.mxu0 %v988_v19 }
  0x1c   :  { %870 = vmatprep.subr.bf16.mxu0 %v990_v21 }
  0x1d   :  { %949 = vmatpush3.bf16.msra.mxu1 %v989_v20 }
  0x1e   :  { %950 = vmatprep.subr.bf16.mxu1 %v992_v22 }
  0x1f   :  { %871 = vmatpush3.bf16.msra.mxu0 %v991_v25 }
  0x21   :  { %951 = vmatpush3.bf16.msra.mxu1 %v992_v22 }
  0x22   :  { %409 = vmatmul.mubr.bf16.vlgmr.msra.gmra.mrb[0].mxu0 %v993_v26 }
  0x23   :  { %416 = vmatprep.mubr.bf16.mxu0 %v998_v27 }
  0x24   :  { %953 = vmatmul.mubr.bf16.vlgmr.msra.gmra.mrb[0].mxu1 %v997_v28 }
  0x25   :  { %956 = vmatprep.mubr.bf16.mxu1 %v1004_v29 }
  0x2a   :  { %417 = vmatmul.mubr.bf16.gmra.mrb[4].mxu0 %v1000_v30 }
  0x2b   :  { %424 = vmatprep.mubr.bf16.mxu0 %v1001_v31 }
  0x2c   :  { %957 = vmatmul.mubr.bf16.gmra.mrb[4].mxu1 %v1005_v32 }
  0x2d   :  { %960 = vmatprep.mubr.bf16.mxu1 %v1012_v33 }
  0x32   :  { %425 = vmatmul.mubr.bf16.gmra.mrb[8].mxu0 %v1003_v34 }
  0x33   :  { %432 = vmatprep.mubr.bf16.mxu0 %v1006_v35 }
  0x34   :  { %961 = vmatmul.mubr.bf16.gmra.mrb[8].mxu1 %v1013_v36 }
  0x35   :  { %964 = vmatprep.mubr.bf16.mxu1 %v1020_v37 }
  0x3a   :  { %433 = vmatmul.mubr.bf16.gmra.mrb[12].mxu0 %v1008_v38 }
  0x3b   :  { %440 = vmatprep.mubr.bf16.mxu0 %v1009_v39 }
  0x3c   :  { %965 = vmatmul.mubr.bf16.gmra.mrb[12].mxu1 %v1021_v40 }
  0x42   :  { %441 = vmatmul.mubr.bf16.gmra.mrb[16].mxu0 %v1011_v41 }
  0x43   :  { %448 = vmatprep.mubr.bf16.mxu0 %v1014_v42 }
  0x4a   :  { %449 = vmatmul.mubr.bf16.gmra.mrb[20].mxu0 %v1016_v43 }
  0x4b   :  { %456 = vmatprep.mubr.bf16.mxu0 %v1017_v44 }
  0x52   :  { %457 = vmatmul.mubr.bf16.gmra.mrb[24].mxu0 %v1019_v45 }
  0x53   :  { %464 = vmatprep.mubr.bf16.mxu0 %v1022_v46 }
  0x5a   :  { %465 = vmatmul.mubr.bf16.gmra.mrb[28].mxu0 %v1024_v47 }
  0xf5   :  { %v872_v49 = vpop.f32.mrb[0].mxu0 }
  0xf6   :  { %v873_v50 = vpop.f32.mrb[1].mxu0 }
  0xf7   :  { %v874_v51 = vadd.f32 %v873_v50, %v872_v49  ;;  %v875_v52 = vpop.f32.mrb[2].mxu0  ;;  %v954_v53 = vpop.f32.mrb[0].mxu1 }
  0xf8   :  { %v876_v54 = vpop.f32.mrb[3].mxu0  ;;  %v507_v55 = vpop.f32.mrb[1].mxu1 }
  0xf9   :  { %v877_v56 = vadd.f32 %v876_v54, %v875_v52  ;;  %v1197_v57 = vadd.f32 %v874_v51, %v507_v55  ;;  %v955_v58 = vpop.f32.mrb[2].mxu1 }
  0xfa   :  { %v510_v59 = vpop.f32.mrb[3].mxu1 }
  0xfb   :  { %v1199_v60 = vadd.f32 %v877_v56, %v510_v59  ;;  %v613_v10 = vmul.f32 %v1197_v57, %v1197_v57 }
  0xfd   :  { %v878_v61 = vpop.f32.mrb[4].mxu0  ;;  %v614_v8 = vmul.f32 %v1199_v60, %v1199_v60  ;;  %v589_v11 = vadd.f32 %v1199_v60, %v1197_v57 }
  0xfe   :  { %v879_v62 = vpop.f32.mrb[5].mxu0 }
  0xff   :  { %v880_v63 = vadd.f32 %v879_v62, %v878_v61  ;;  %v881_v0 = vpop.f32.mrb[6].mxu0  ;;  %v958_v1 = vpop.f32.mrb[4].mxu1  ;;  %v629_v15 = vadd.f32 %v614_v8, %v613_v10 }
 0x100   :  { %v882_v2 = vpop.f32.mrb[7].mxu0  ;;  %v523_v3 = vpop.f32.mrb[5].mxu1 }
 0x101   :  { %v1201_v4 = vadd.f32 %v954_v53, %v880_v63  ;;  %v883_v5 = vadd.f32 %v882_v2, %v881_v0  ;;  %v959_v6 = vpop.f32.mrb[6].mxu1 }
 0x102   :  { %v526_v7 = vpop.f32.mrb[7].mxu1 }
 0x103   :  { %v1205_v9 = vadd.f32 %v955_v58, %v883_v5  ;;  %v615_v12 = vmul.f32 %v1201_v4, %v1201_v4  ;;  %v590_v16 = vadd.f32 %v589_v11, %v1201_v4 }
 0x105   :  { %v884_v13 = vpop.f32.mrb[8].mxu0  ;;  %v630_v22 = vadd.f32 %v629_v15, %v615_v12  ;;  %v616_v23 = vmul.f32 %v1205_v9, %v1205_v9  ;;  %v591_v28 = vadd.f32 %v590_v16, %v1205_v9 }
 0x106   :  { %v885_v14 = vpop.f32.mrb[9].mxu0 }
 0x107   :  { %v886_v17 = vadd.f32 %v885_v14, %v884_v13  ;;  %v887_v18 = vpop.f32.mrb[10].mxu0  ;;  %v962_v19 = vpop.f32.mrb[8].mxu1  ;;  %v631_v32 = vadd.f32 %v630_v22, %v616_v23 }
 0x108   :  { %v888_v20 = vpop.f32.mrb[11].mxu0  ;;  %v539_v21 = vpop.f32.mrb[9].mxu1 }
 0x109   :  { %v889_v24 = vadd.f32 %v888_v20, %v887_v18  ;;  %v1216_v25 = vadd.f32 %v886_v17, %v523_v3  ;;  %v963_v26 = vpop.f32.mrb[10].mxu1 }
 0x10a   :  { %v542_v27 = vpop.f32.mrb[11].mxu1 }
 0x10b   :  { %v617_v29 = vmul.f32 %v1216_v25, %v1216_v25  ;;  %v1221_v30 = vadd.f32 %v889_v24, %v526_v7  ;;  %v592_v31 = vadd.f32 %v591_v28, %v1216_v25 }
 0x10d   :  { %v890_v33 = vpop.f32.mrb[12].mxu0  ;;  %v632_v35 = vadd.f32 %v631_v32, %v617_v29  ;;  %v618_v36 = vmul.f32 %v1221_v30, %v1221_v30  ;;  %v593_v42 = vadd.f32 %v592_v31, %v1221_v30 }
 0x10e   :  { %v891_v34 = vpop.f32.mrb[13].mxu0 }
 0x10f   :  { %v892_v37 = vadd.f32 %v891_v34, %v890_v33  ;;  %v893_v38 = vpop.f32.mrb[14].mxu0  ;;  %v1226_v39 = vpop.f32.mrb[12].mxu1  ;;  %v633_v47 = vadd.f32 %v632_v35, %v618_v36 }
 0x110   :  { %v894_v40 = vpop.f32.mrb[15].mxu0  ;;  %v555_v41 = vpop.f32.mrb[13].mxu1 }
 0x111   :  { %v1229_v43 = vadd.f32 %v958_v1, %v892_v37  ;;  %v895_v44 = vadd.f32 %v894_v40, %v893_v38  ;;  %v967_v45 = vpop.f32.mrb[14].mxu1 }
 0x112   :  { %v558_v46 = vpop.f32.mrb[15].mxu1 }
 0x113   :  { %v594_v48 = vadd.f32 %v593_v42, %v1229_v43  ;;  %v619_v49 = vmul.f32 %v1229_v43, %v1229_v43  ;;  %v1234_v50 = vadd.f32 %v959_v6, %v895_v44 }
 0x115   :  { %v634_v51 = vadd.f32 %v633_v47, %v619_v49  ;;  %v620_v52 = vmul.f32 %v1234_v50, %v1234_v50  ;;  %v896_v53 = vpop.f32.mrb[16].mxu0  ;;  %v595_v54 = vadd.f32 %v594_v48, %v1234_v50 }
 0x116   :  { %v897_v55 = vpop.f32.mrb[17].mxu0 }
 0x117   :  { %v898_v56 = vadd.f32 %v897_v55, %v896_v53  ;;  %v899_v58 = vpop.f32.mrb[18].mxu0  ;;  %v635_v59 = vadd.f32 %v634_v51, %v620_v52 }
 0x118   :  { %v900_v61 = vpop.f32.mrb[19].mxu0 }
 0x119   :  { %v901_v62 = vadd.f32 %v900_v61, %v899_v58  ;;  %v1239_v63 = vadd.f32 %v898_v56, %v539_v21 }
 0x11b   :  { %v596_v0 = vadd.f32 %v595_v54, %v1239_v63  ;;  %v621_v1 = vmul.f32 %v1239_v63, %v1239_v63  ;;  %v1244_v2 = vadd.f32 %v901_v62, %v542_v27 }
 0x11d   :  { %v636_v3 = vadd.f32 %v635_v59, %v621_v1  ;;  %v597_v5 = vadd.f32 %v596_v0, %v1244_v2  ;;  %v622_v6 = vmul.f32 %v1244_v2, %v1244_v2  ;;  %v902_v7 = vpop.f32.mrb[20].mxu0 }
 0x11e   :  { %v903_v8 = vpop.f32.mrb[21].mxu0 }
 0x11f   :  { %v637_v10 = vadd.f32 %v636_v3, %v622_v6  ;;  %v904_v11 = vadd.f32 %v903_v8, %v902_v7  ;;  %v905_v12 = vpop.f32.mrb[22].mxu0  ;;  %v588_v6 = vld [vmem:[#allocation2] sm:$0x1]  ;;  %v612_v8 = vld [vmem:[#allocation3] sm:$0x1] }
 0x120   :  { %v906_v13 = vpop.f32.mrb[23].mxu0 }
 0x121   :  { %v1249_v14 = vadd.f32 %v962_v19, %v904_v11  ;;  %v907_v15 = vadd.f32 %v906_v13, %v905_v12 }
 0x123   :  { %v598_v16 = vadd.f32 %v597_v5, %v1249_v14  ;;  %v623_v17 = vmul.f32 %v1249_v14, %v1249_v14  ;;  %v1254_v18 = vadd.f32 %v963_v26, %v907_v15 }
 0x125   :  { %v638_v20 = vadd.f32 %v637_v10, %v623_v17  ;;  %v624_v21 = vmul.f32 %v1254_v18, %v1254_v18  ;;  %v908_v22 = vpop.f32.mrb[24].mxu0  ;;  %v599_v23 = vadd.f32 %v598_v16, %v1254_v18 }
 0x126   :  { %v909_v24 = vpop.f32.mrb[25].mxu0 }
 0x127   :  { %v910_v27 = vadd.f32 %v909_v24, %v908_v22  ;;  %v911_v28 = vpop.f32.mrb[26].mxu0  ;;  %v639_v19 = vadd.f32 %v638_v20, %v624_v21  ;;  %v681_v21 = vlaneseq }
 0x128   :  { %v912_v29 = vpop.f32.mrb[27].mxu0 }
 0x129   :  { %v913_v31 = vadd.f32 %v912_v29, %v911_v28  ;;  %v1259_v32 = vadd.f32 %v910_v27, %v555_v41  ;;  %v682_v24 = vshrl.u32 %v681_v21, 7 }
 0x12b   :  { %v600_v33 = vadd.f32 %v599_v23, %v1259_v32  ;;  %v625_v26 = vmul.f32 %v1259_v32, %v1259_v32  ;;  %v1264_v34 = vadd.f32 %v913_v31, %v558_v46  ;;  %v683_v28 = vsub.s32 0, %v682_v24 }
 0x12d   :  { %v640_v35 = vadd.f32 %v639_v19, %v625_v26  ;;  %v601_v36 = vadd.f32 %v600_v33, %v1264_v34  ;;  %v626_v37 = vmul.f32 %v1264_v34, %v1264_v34  ;;  %v914_v38 = vpop.f32.mrb[28].mxu0 }
 0x12e   :  { %v915_v40 = vpop.f32.mrb[29].mxu0 }
 0x12f   :  { %v641_v42 = vadd.f32 %v640_v35, %v626_v37  ;;  %v916_v44 = vadd.f32 %v915_v40, %v914_v38  ;;  %v917_v47 = vpop.f32.mrb[30].mxu0 }
 0x130   :  { %v918_v41 = vpop.f32.mrb[31].mxu0 }
 0x131   :  { %v1270_v48 = vadd.f32 %v1226_v39, %v916_v44  ;;  %v919_v49 = vadd.f32 %v918_v41, %v917_v47 }
 0x133   :  { %v602_v51 = vadd.f32 %v601_v36, %v1270_v48  ;;  %v627_v46 = vmul.f32 %v1270_v48, %v1270_v48  ;;  %v1275_v52 = vadd.f32 %v967_v45, %v919_v49 }
 0x135   :  { %v642_v53 = vadd.f32 %v641_v42, %v627_v46  ;;  %v603_v54 = vadd.f32 %v602_v51, %v1275_v52  ;;  %v628_v55 = vmul.f32 %v1275_v52, %v1275_v52 }
 0x137   :  { %v604_v56 = vrot.slane %v603_v54, 4  ;;  %v643_v58 = vadd.f32 %v642_v53, %v628_v55 }
 0x139   :  { %v605_v59 = vadd.f32 %v604_v56, %v603_v54  ;;  %v644_v61 = vrot.slane %v643_v58, 4 }
 0x13b   :  { %v606_v39 = vrot.slane %v605_v59, 2  ;;  %v645_v62 = vadd.f32 %v644_v61, %v643_v58 }
 0x13d   :  { %v607_v0 = vadd.f32 %v606_v39, %v605_v59  ;;  %v646_v1 = vrot.slane %v645_v62, 2 }
 0x13f   :  { %v608_v3 = vrot.slane %v607_v0, 1  ;;  %v647_v5 = vadd.f32 %v646_v1, %v645_v62 }
 0x141   :  { %v609_v7 = vadd.f32 %v608_v3, %v607_v0  ;;  %v648_v45 = vrot.slane %v647_v5, 1  ;;  %v855_v3 = vld [vmem:[%s1353_s3] ss:$0 sm:$0xff] }
 0x143   :  { %v610_v10 = vadd.f32 %v609_v7, %v588_v6  ;;  %v649_v11 = vadd.f32 %v648_v45, %v647_v5 }
 0x145   :  { %611 = vst [vmem:[#allocation2] sm:$0x1] %v610_v10  ;;  %v650_v12 = vadd.f32 %v649_v11, %v612_v8 }
 0x147   :  { %651 = vst [vmem:[#allocation3] sm:$0x1] %v650_v12 }
 0x14c   :  { %v655_v13 = vld [vmem:[#allocation2] sm:$0x1] }
 0x14d   :  { %v657_v15 = vmul.f32 0.0078125, %v655_v13 }
 0x14e   :  { %v656_v16 = vld [vmem:[#allocation3] sm:$0x1] }
 0x14f   :  { %v658_v17 = vmul.f32 0.0078125, %v656_v16  ;;  %v659_v20 = vmul.f32 %v657_v15, %v657_v15  ;;  %v684_v19 = vrot.slane %v657_v15, %v683_v28 }
 0x151   :  { %v660_v22 = vsub.f32 %v658_v17, %v659_v20  ;;  %v686_v29 = vsub.f32 %v1197_v57, %v684_v19  ;;  %v687_v31 = vsub.f32 %v1199_v60, %v684_v19  ;;  %v688_v33 = vsub.f32 %v1201_v4, %v684_v19 }
 0x152   :  { %v689_v26 = vsub.f32 %v1205_v9, %v684_v19  ;;  %v690_v35 = vsub.f32 %v1216_v25, %v684_v19  ;;  %v691_v37 = vsub.f32 %v1221_v30, %v684_v19  ;;  %v692_v38 = vsub.f32 %v1229_v43, %v684_v19 }
 0x153   :  { %v661_v23 = vmax.f32 %v660_v22, 0.0  ;;  %v693_v40 = vsub.f32 %v1234_v50, %v684_v19  ;;  %v694_v42 = vsub.f32 %v1239_v63, %v684_v19  ;;  %v695_v44 = vsub.f32 %v1244_v2, %v684_v19 }
 0x154   :  { %v696_v57 = vsub.f32 %v1249_v14, %v684_v19  ;;  %v697_v60 = vsub.f32 %v1254_v18, %v684_v19  ;;  %v698_v9 = vsub.f32 %v1259_v32, %v684_v19  ;;  %v699_v25 = vsub.f32 %v1264_v34, %v684_v19  ;;  %v854_v14 = vld [vmem:[%s1352_s2] ss:$0 sm:$0xff] }
 0x155   :  { %v662_v27 = vadd.f32 1e-05, %v661_v23  ;;  %v700_v47 = vsub.f32 %v1270_v48, %v684_v19  ;;  %v701_v30 = vsub.f32 %v1275_v52, %v684_v19 }
 0x157   :  { %1025 = vrsqrt.f32 %v662_v27 }
 0x161   :  { %v1026_v36 = vpop.eup %1025 }
 0x162   :  { %v706_v4 = vrot.slane %v1026_v36, %v683_v28 }
 0x164   :  { %v708_v43 = vmul.f32 %v706_v4, %v686_v29  ;;  %v709_v41 = vmul.f32 %v706_v4, %v687_v31  ;;  %v710_v50 = vmul.f32 %v706_v4, %v688_v33  ;;  %v711_v49 = vmul.f32 %v706_v4, %v689_v26 }
 0x165   :  { %v712_v63 = vmul.f32 %v706_v4, %v690_v35  ;;  %v713_v51 = vmul.f32 %v706_v4, %v691_v37  ;;  %v714_v2 = vmul.f32 %v706_v4, %v692_v38  ;;  %v715_v46 = vmul.f32 %v706_v4, %v693_v40 }
 0x166   :  { %v716_v18 = vmul.f32 %v706_v4, %v694_v42  ;;  %v717_v32 = vmul.f32 %v706_v4, %v695_v44  ;;  %v718_v53 = vmul.f32 %v706_v4, %v696_v57  ;;  %v719_v34 = vmul.f32 %v706_v4, %v697_v60 }
 0x167   :  { %v720_v54 = vmul.f32 %v706_v4, %v698_v9  ;;  %v721_v48 = vmul.f32 %v706_v4, %v699_v25  ;;  %v722_v55 = vmul.f32 %v706_v4, %v700_v47  ;;  %v723_v52 = vmul.f32 %v706_v4, %v701_v30 }
 0x168   :  { %v731_v56 = vmul.f32 %v854_v14, %v708_v43  ;;  %v732_v58 = vmul.f32 %v854_v14, %v709_v41  ;;  %v733_v59 = vmul.f32 %v854_v14, %v710_v50  ;;  %v734_v61 = vmul.f32 %v854_v14, %v711_v49 }
 0x169   :  { %v735_v39 = vmul.f32 %v854_v14, %v712_v63  ;;  %v736_v62 = vmul.f32 %v854_v14, %v713_v51  ;;  %v737_v0 = vmul.f32 %v854_v14, %v714_v2  ;;  %v738_v1 = vmul.f32 %v854_v14, %v715_v46 }
 0x16a   :  { %v739_v5 = vmul.f32 %v854_v14, %v716_v18  ;;  %v740_v6 = vmul.f32 %v854_v14, %v717_v32  ;;  %v741_v7 = vmul.f32 %v854_v14, %v718_v53  ;;  %v742_v45 = vmul.f32 %v854_v14, %v719_v34 }
 0x16b   :  { %v743_v8 = vmul.f32 %v854_v14, %v720_v54  ;;  %v744_v10 = vmul.f32 %v854_v14, %v721_v48  ;;  %v745_v11 = vmul.f32 %v854_v14, %v722_v55  ;;  %v746_v12 = vmul.f32 %v854_v14, %v723_v52 }
 0x16c   :  { %v754_v13 = vadd.f32 %v855_v3, %v731_v56  ;;  %v755_v15 = vadd.f32 %v855_v3, %v732_v58  ;;  %v756_v16 = vadd.f32 %v855_v3, %v733_v59  ;;  %v757_v17 = vadd.f32 %v855_v3, %v734_v61 }
 0x16d   :  { %v758_v20 = vadd.f32 %v855_v3, %v735_v39  ;;  %v759_v21 = vadd.f32 %v855_v3, %v736_v62  ;;  %v760_v22 = vadd.f32 %v855_v3, %v737_v0  ;;  %v761_v23 = vadd.f32 %v855_v3, %v738_v1 }
 0x16e   :  { %v762_v24 = vadd.f32 %v855_v3, %v739_v5  ;;  %v763_v27 = vadd.f32 %v855_v3, %v740_v6  ;;  %v764_v28 = vadd.f32 %v855_v3, %v741_v7  ;;  %v765_v19 = vadd.f32 %v855_v3, %v742_v45 }
 0x16f   :  { %v766_v29 = vadd.f32 %v855_v3, %v743_v8  ;;  %v767_v31 = vadd.f32 %v855_v3, %v744_v10  ;;  %v768_v33 = vadd.f32 %v855_v3, %v745_v11  ;;  %v769_v26 = vadd.f32 %v855_v3, %v746_v12 }
 0x170   :  { %v770_v35 = vmax.f32 %v754_v13, 0.0  ;;  %v771_v36 = vmax.f32 %v755_v15, 0.0  ;;  %v772_v37 = vmax.f32 %v756_v16, 0.0  ;;  %v773_v38 = vmax.f32 %v757_v17, 0.0 }
 0x171   :  { %v774_v40 = vmax.f32 %v758_v20, 0.0  ;;  %v775_v42 = vmax.f32 %v759_v21, 0.0  ;;  %v776_v44 = vmax.f32 %v760_v22, 0.0  ;;  %v777_v57 = vmax.f32 %v761_v23, 0.0 }
 0x172   :  { %v778_v60 = vmax.f32 %v762_v24, 0.0  ;;  %v779_v4 = vmax.f32 %v763_v27, 0.0  ;;  %v780_v9 = vmax.f32 %v764_v28, 0.0  ;;  %v781_v25 = vmax.f32 %v765_v19, 0.0  ;;  %786 = vst [vmem:[%s1354_s4] sm:$0xff] %v770_v35  ;;  %787 = vst [vmem:[%s1354_s4 + $0x8] sm:$0xff] %v771_v36 }
 0x173   :  { %788 = vst [vmem:[%s1354_s4 + $0x10] sm:$0xff] %v772_v37  ;;  %789 = vst [vmem:[%s1354_s4 + $0x18] sm:$0xff] %v773_v38  ;;  %v782_v47 = vmax.f32 %v766_v29, 0.0  ;;  %v783_v30 = vmax.f32 %v767_v31, 0.0  ;;  %v784_v43 = vmax.f32 %v768_v33, 0.0  ;;  %v785_v41 = vmax.f32 %v769_v26, 0.0 }
 0x174   :  { %790 = vst [vmem:[%s1354_s4 + $0x20] sm:$0xff] %v774_v40  ;;  %791 = vst [vmem:[%s1354_s4 + $0x28] sm:$0xff] %v775_v42 }
 0x175   :  { %792 = vst [vmem:[%s1354_s4 + $0x30] sm:$0xff] %v776_v44  ;;  %793 = vst [vmem:[%s1354_s4 + $0x38] sm:$0xff] %v777_v57 }
 0x176   :  { %794 = vst [vmem:[%s1354_s4 + $0x40] sm:$0xff] %v778_v60  ;;  %795 = vst [vmem:[%s1354_s4 + $0x48] sm:$0xff] %v779_v4 }
 0x177   :  { %796 = vst [vmem:[%s1354_s4 + $0x50] sm:$0xff] %v780_v9  ;;  %797 = vst [vmem:[%s1354_s4 + $0x58] sm:$0xff] %v781_v25 }
 0x178   :  { %798 = vst [vmem:[%s1354_s4 + $0x60] sm:$0xff] %v782_v47  ;;  %799 = vst [vmem:[%s1354_s4 + $0x68] sm:$0xff] %v783_v30 }
 0x179   :  { %800 = vst [vmem:[%s1354_s4 + $0x70] sm:$0xff] %v784_v43  ;;  %801 = vst [vmem:[%s1354_s4 + $0x78] sm:$0xff] %v785_v41 }

// kernel: backbone_forward.58
= control target key start
LH: loop header
LB: loop body
LE: loop exit
PB: predicated region body
PF: predicated region fallthrough
CT: control target
= control target key end

     0   :  { %v583_v30 = vmov 0.0   ;;  %s723_s1 = inlined_call_operand.vmem [shape: bf16[384,128], index: 1, kind: input, shape index: {}]   ;;  %s724_s0 = inlined_call_operand.vmem [shape: bf16[32,384], index: 0, kind: input, shape index: {}]   ;;  %s725_s2 = inlined_call_operand.vmem [shape: f32[1,128], index: 2, kind: input, shape index: {}]   ;;  %s726_s3 = inlined_call_operand.vmem [shape: f32[1,128], index: 3, kind: input, shape index: {}]   ;;  %s727_s4 = inlined_call_operand.vmem [shape: f32[32,128], index: 4, kind: output, shape index: {}]  }
   0x1   :  { %v549_v0 = vld [vmem:[%s723_s1 + $0x40] sm:$0xff]   ;;  %v552_v3 = vld [vmem:[%s723_s1 + $0x48] sm:$0xff]   ;;  %v555_v6 = vld [vmem:[%s723_s1 + $0x50] sm:$0xff]   ;;  %22 = vst [vmem:[#allocation2] sm:$0x1] %v583_v30 }
   0x2   :  { %v550_v1 = vld [vmem:[%s723_s1] sm:$0xff]   ;;  %490 = vmatprep.subr.bf16.mxu0 %v549_v0  ;;  %v553_v4 = vld [vmem:[%s723_s1 + $0x8] sm:$0xff]   ;;  %v556_v7 = vld [vmem:[%s723_s1 + $0x10] sm:$0xff]   ;;  %23 = vst [vmem:[#allocation3] sm:$0x1] %v583_v30 }
   0x3   :  { %v551_v2 = vld [vmem:[%s723_s1 + $0x80] sm:$0xff]   ;;  %491 = vmatpush3.bf16.msra.mxu0 %v550_v1  ;;  %v554_v5 = vld [vmem:[%s723_s1 + $0x88] sm:$0xff]   ;;  %v557_v8 = vld [vmem:[%s723_s1 + $0x90] sm:$0xff]  }
   0x4   :  { %528 = vmatprep.subr.bf16.mxu1 %v551_v2  ;;  %492 = vmatprep.subr.bf16.mxu0 %v552_v3  ;;  %v558_v9 = vld [vmem:[%s723_s1 + $0x58] sm:$0xff]   ;;  %v561_v12 = vld [vmem:[%s723_s1 + $0x60] sm:$0xff]   ;;  %v564_v15 = vld [vmem:[%s723_s1 + $0x68] sm:$0xff]  }
   0x5   :  { %529 = vmatpush3.bf16.msra.mxu1 %v551_v2  ;;  %v559_v10 = vld [vmem:[%s723_s1 + $0x18] sm:$0xff]   ;;  %v563_v13 = vld [vmem:[%s723_s1 + $0xa0] sm:$0xff]   ;;  %v566_v16 = vld [vmem:[%s723_s1 + $0xa8] sm:$0xff]  }
   0x6   :  { %530 = vmatprep.subr.bf16.mxu1 %v554_v5  ;;  %v560_v11 = vld [vmem:[%s723_s1 + $0x98] sm:$0xff]   ;;  %v562_v14 = vld [vmem:[%s723_s1 + $0x20] sm:$0xff]   ;;  %v565_v17 = vld [vmem:[%s723_s1 + $0x28] sm:$0xff]  }
   0x7   :  { %493 = vmatpush3.bf16.msra.mxu0 %v553_v4  ;;  %v567_v18 = vld [vmem:[%s723_s1 + $0x70] sm:$0xff]   ;;  %v570_v21 = vld [vmem:[%s723_s1 + $0x78] sm:$0xff]   ;;  %v573_v26 = vld [vmem:[%s724_s0] ss:$12 sps:$4 sm:$0xff]  }
   0x8   :  { %494 = vmatprep.subr.bf16.mxu0 %v555_v6  ;;  %v568_v19 = vld [vmem:[%s723_s1 + $0x30] sm:$0xff]   ;;  %v572_v22 = vld [vmem:[%s723_s1 + $0xb8] sm:$0xff]   ;;  %v577_v28 = vld [vmem:[%s724_s0 + $0x20] ss:$12 sps:$4 sm:$0xff]  }
   0x9   :  { %531 = vmatpush3.bf16.msra.mxu1 %v554_v5  ;;  %v569_v20 = vld [vmem:[%s723_s1 + $0xb0] sm:$0xff]   ;;  %v571_v25 = vld [vmem:[%s723_s1 + $0x38] sm:$0xff]   ;;  %v360_v6 = vld [vmem:[#allocation2] sm:$0x1] }
   0xa   :  { %532 = vmatprep.subr.bf16.mxu1 %v557_v8  ;;  %v575_v23 = vld [vmem:[%s724_s0 + $0x4] ss:$12 sps:$4 sm:$0xff]   ;;  %v576_v24 = vld [vmem:[%s724_s0 + $0x8] ss:$12 sps:$4 sm:$0xff]  }
   0xb   :  { %495 = vmatpush3.bf16.msra.mxu0 %v556_v7  ;;  %288 = vmatprep.mubr.bf16.mxu0 %v575_v23  ;;  %v578_v27 = vld [vmem:[%s724_s0 + $0x1c] ss:$12 sps:$4 sm:$0xff]   ;;  %v580_v29 = vld [vmem:[%s724_s0 + $0x18] ss:$12 sps:$4 sm:$0xff]  }
   0xc   :  { %496 = vmatprep.subr.bf16.mxu0 %v558_v9  ;;  %544 = vmatprep.mubr.bf16.mxu1 %v576_v24  ;;  %v372_v9 = vld [vmem:[#allocation3] sm:$0x1] }
   0xd   :  { %533 = vmatpush3.bf16.msra.mxu1 %v557_v8 }
   0xe   :  { %534 = vmatprep.subr.bf16.mxu1 %v560_v11 }
   0xf   :  { %497 = vmatpush3.bf16.msra.mxu0 %v559_v10 }
  0x10   :  { %498 = vmatprep.subr.bf16.mxu0 %v561_v12 }
  0x11   :  { %535 = vmatpush3.bf16.msra.mxu1 %v560_v11 }
  0x12   :  { %536 = vmatprep.subr.bf16.mxu1 %v563_v13 }
  0x13   :  { %499 = vmatpush3.bf16.msra.mxu0 %v562_v14 }
  0x14   :  { %500 = vmatprep.subr.bf16.mxu0 %v564_v15 }
  0x15   :  { %537 = vmatpush3.bf16.msra.mxu1 %v563_v13 }
  0x16   :  { %538 = vmatprep.subr.bf16.mxu1 %v566_v16 }
  0x17   :  { %501 = vmatpush3.bf16.msra.mxu0 %v565_v17 }
  0x18   :  { %502 = vmatprep.subr.bf16.mxu0 %v567_v18 }
  0x19   :  { %539 = vmatpush3.bf16.msra.mxu1 %v566_v16 }
  0x1a   :  { %540 = vmatprep.subr.bf16.mxu1 %v569_v20 }
  0x1b   :  { %503 = vmatpush3.bf16.msra.mxu0 %v568_v19  ;;  %v405_v19 = vlaneseq }
  0x1c   :  { %504 = vmatprep.subr.bf16.mxu0 %v570_v21 }
  0x1d   :  { %541 = vmatpush3.bf16.msra.mxu1 %v569_v20 }
  0x1e   :  { %542 = vmatprep.subr.bf16.mxu1 %v572_v22 }
  0x1f   :  { %505 = vmatpush3.bf16.msra.mxu0 %v571_v25 }
  0x21   :  { %543 = vmatpush3.bf16.msra.mxu1 %v572_v22  ;;  %v406_v22 = vshrl.u32 %v405_v19, 7 }
  0x22   :  { %289 = vmatmul.mubr.bf16.vlgmr.msra.gmra.mrb[0].mxu0 %v573_v26 }
  0x23   :  { %296 = vmatprep.mubr.bf16.mxu0 %v578_v27  ;;  %v407_v23 = vsub.s32 0, %v406_v22 }
  0x24   :  { %545 = vmatmul.mubr.bf16.vlgmr.msra.gmra.mrb[0].mxu1 %v577_v28 }
  0x2a   :  { %297 = vmatmul.mubr.bf16.gmra.mrb[4].mxu0 %v580_v29 }
  0xf5   :  { %v506_v31 = vpop.f32.mrb[0].mxu0 }
  0xf6   :  { %v507_v32 = vpop.f32.mrb[1].mxu0 }
  0xf7   :  { %v508_v33 = vadd.f32 %v507_v32, %v506_v31  ;;  %v509_v34 = vpop.f32.mrb[2].mxu0  ;;  %v546_v35 = vpop.f32.mrb[0].mxu1  ;;  %v488_v31 = vld [vmem:[%s725_s2] ss:$0 sm:$0xff] }
  0xf8   :  { %v510_v36 = vpop.f32.mrb[3].mxu0  ;;  %v339_v37 = vpop.f32.mrb[1].mxu1 }
  0xf9   :  { %v511_v38 = vadd.f32 %v510_v36, %v509_v34  ;;  %v699_v39 = vadd.f32 %v508_v33, %v339_v37  ;;  %v547_v40 = vpop.f32.mrb[2].mxu1  ;;  %v489_v36 = vld [vmem:[%s726_s3] ss:$0 sm:$0xff] }
  0xfa   :  { %v342_v41 = vpop.f32.mrb[3].mxu1 }
  0xfb   :  { %v343_v42 = vadd.f32 %v511_v38, %v342_v41  ;;  %v373_v43 = vmul.f32 %v699_v39, %v699_v39 }
  0xfd   :  { %v361_v44 = vadd.f32 %v343_v42, %v699_v39  ;;  %v374_v45 = vmul.f32 %v343_v42, %v343_v42  ;;  %v512_v46 = vpop.f32.mrb[4].mxu0 }
  0xfe   :  { %v513_v47 = vpop.f32.mrb[5].mxu0 }
  0xff   :  { %v377_v48 = vadd.f32 %v374_v45, %v373_v43  ;;  %v514_v49 = vadd.f32 %v513_v47, %v512_v46  ;;  %v515_v50 = vpop.f32.mrb[6].mxu0 }
 0x100   :  { %v516_v51 = vpop.f32.mrb[7].mxu0 }
 0x101   :  { %v348_v52 = vadd.f32 %v546_v35, %v514_v49  ;;  %v517_v53 = vadd.f32 %v516_v51, %v515_v50 }
 0x103   :  { %v362_v54 = vadd.f32 %v361_v44, %v348_v52  ;;  %v375_v55 = vmul.f32 %v348_v52, %v348_v52  ;;  %v351_v56 = vadd.f32 %v547_v40, %v517_v53 }
 0x105   :  { %v378_v57 = vadd.f32 %v377_v48, %v375_v55  ;;  %v363_v58 = vadd.f32 %v362_v54, %v351_v56  ;;  %v376_v59 = vmul.f32 %v351_v56, %v351_v56 }
 0x107   :  { %v364_v60 = vrot.slane %v363_v58, 4  ;;  %v379_v61 = vadd.f32 %v378_v57, %v376_v59 }
 0x109   :  { %v365_v62 = vadd.f32 %v364_v60, %v363_v58  ;;  %v380_v63 = vrot.slane %v379_v61, 4 }
 0x10b   :  { %v366_v0 = vrot.slane %v365_v62, 2  ;;  %v381_v1 = vadd.f32 %v380_v63, %v379_v61 }
 0x10d   :  { %v367_v2 = vadd.f32 %v366_v0, %v365_v62  ;;  %v382_v3 = vrot.slane %v381_v1, 2 }
 0x10f   :  { %v368_v4 = vrot.slane %v367_v2, 1  ;;  %v383_v5 = vadd.f32 %v382_v3, %v381_v1 }
 0x111   :  { %v369_v7 = vadd.f32 %v368_v4, %v367_v2  ;;  %v384_v8 = vrot.slane %v383_v5, 1 }
 0x113   :  { %v370_v10 = vadd.f32 %v369_v7, %v360_v6  ;;  %v385_v11 = vadd.f32 %v384_v8, %v383_v5 }
 0x115   :  { %371 = vst [vmem:[#allocation2] sm:$0x1] %v370_v10  ;;  %v386_v12 = vadd.f32 %v385_v11, %v372_v9 }
 0x117   :  { %387 = vst [vmem:[#allocation3] sm:$0x1] %v386_v12 }
 0x11c   :  { %v391_v13 = vld [vmem:[#allocation2] sm:$0x1] }
 0x11d   :  { %v393_v14 = vmul.f32 0.03125, %v391_v13 }
 0x11e   :  { %v392_v15 = vld [vmem:[#allocation3] sm:$0x1] }
 0x11f   :  { %v394_v16 = vmul.f32 0.03125, %v392_v15  ;;  %v395_v17 = vmul.f32 %v393_v14, %v393_v14  ;;  %v408_v24 = vrot.slane %v393_v14, %v407_v23 }
 0x121   :  { %v396_v18 = vsub.f32 %v394_v16, %v395_v17  ;;  %v410_v26 = vsub.f32 %v699_v39, %v408_v24  ;;  %v411_v27 = vsub.f32 %v343_v42, %v408_v24  ;;  %v412_v28 = vsub.f32 %v348_v52, %v408_v24 }
 0x122   :  { %v413_v29 = vsub.f32 %v351_v56, %v408_v24 }
 0x123   :  { %v397_v20 = vmax.f32 %v396_v18, 0.0 }
 0x125   :  { %v398_v21 = vadd.f32 1e-05, %v397_v20 }
 0x127   :  { %581 = vrsqrt.f32 %v398_v21 }
 0x131   :  { %v582_v25 = vpop.eup %581 }
 0x132   :  { %v418_v30 = vrot.slane %v582_v25, %v407_v23 }
 0x134   :  { %v420_v32 = vmul.f32 %v418_v30, %v410_v26  ;;  %v421_v33 = vmul.f32 %v418_v30, %v411_v27  ;;  %v422_v34 = vmul.f32 %v418_v30, %v412_v28  ;;  %v423_v35 = vmul.f32 %v418_v30, %v413_v29 }
 0x136   :  { %v431_v37 = vmul.f32 %v488_v31, %v420_v32  ;;  %v432_v38 = vmul.f32 %v488_v31, %v421_v33  ;;  %v433_v40 = vmul.f32 %v488_v31, %v422_v34  ;;  %v434_v39 = vmul.f32 %v488_v31, %v423_v35 }
 0x138   :  { %v442_v41 = vadd.f32 %v489_v36, %v431_v37  ;;  %v443_v42 = vadd.f32 %v489_v36, %v432_v38  ;;  %v444_v43 = vadd.f32 %v489_v36, %v433_v40  ;;  %v445_v44 = vadd.f32 %v489_v36, %v434_v39 }
 0x13a   :  { %v446_v45 = vmax.f32 %v442_v41, 0.0  ;;  %v447_v46 = vmax.f32 %v443_v42, 0.0  ;;  %v448_v47 = vmax.f32 %v444_v43, 0.0  ;;  %v449_v48 = vmax.f32 %v445_v44, 0.0 }
 0x13c   :  { %450 = vst [vmem:[%s727_s4] sm:$0xff] %v446_v45  ;;  %451 = vst [vmem:[%s727_s4 + $0x8] sm:$0xff] %v447_v46 }
 0x13d   :  { %452 = vst [vmem:[%s727_s4 + $0x10] sm:$0xff] %v448_v47  ;;  %453 = vst [vmem:[%s727_s4 + $0x18] sm:$0xff] %v449_v48 }

// kernel: backbone_forward.59
= control target key start
LH: loop header
LB: loop body
LE: loop exit
PB: predicated region body
PF: predicated region fallthrough
CT: control target
= control target key end

     0   :  { %v854_v50 = vmov 0.0   ;;  %s1048_s1 = inlined_call_operand.vmem [shape: bf16[640,128], index: 1, kind: input, shape index: {}]   ;;  %s1049_s0 = inlined_call_operand.vmem [shape: bf16[32,640], index: 0, kind: input, shape index: {}]   ;;  %s1050_s2 = inlined_call_operand.vmem [shape: f32[1,128], index: 2, kind: input, shape index: {}]   ;;  %s1051_s3 = inlined_call_operand.vmem [shape: f32[1,128], index: 3, kind: input, shape index: {}]   ;;  %s1052_s4 = inlined_call_operand.vmem [shape: f32[32,128], index: 4, kind: output, shape index: {}]  }
   0x1   :  { %v798_v0 = vld [vmem:[%s1048_s1 + $0x40] sm:$0xff]   ;;  %v802_v4 = vld [vmem:[%s1048_s1 + $0x48] sm:$0xff]   ;;  %v806_v8 = vld [vmem:[%s1048_s1 + $0x50] sm:$0xff]   ;;  %22 = vst [vmem:[#allocation2] sm:$0x1] %v854_v50 }
   0x2   :  { %v799_v1 = vld [vmem:[%s1048_s1 + $0xc0] sm:$0xff]   ;;  %711 = vmatprep.subr.bf16.mxu0 %v798_v0  ;;  %v803_v5 = vld [vmem:[%s1048_s1 + $0xc8] sm:$0xff]   ;;  %v807_v9 = vld [vmem:[%s1048_s1 + $0xd0] sm:$0xff]   ;;  %23 = vst [vmem:[#allocation3] sm:$0x1] %v854_v50 }
   0x3   :  { %v800_v2 = vld [vmem:[%s1048_s1] sm:$0xff]   ;;  %739 = vmatprep.subr.bf16.mxu1 %v799_v1  ;;  %v804_v6 = vld [vmem:[%s1048_s1 + $0x8] sm:$0xff]   ;;  %v808_v10 = vld [vmem:[%s1048_s1 + $0x10] sm:$0xff]  }
   0x4   :  { %v801_v3 = vld [vmem:[%s1048_s1 + $0x80] sm:$0xff]   ;;  %712 = vmatpush3.bf16.msra.mxu0 %v800_v2  ;;  %v805_v7 = vld [vmem:[%s1048_s1 + $0x88] sm:$0xff]   ;;  %v809_v11 = vld [vmem:[%s1048_s1 + $0x90] sm:$0xff]  }
   0x5   :  { %740 = vmatpush3.bf16.msra.mxu1 %v801_v3  ;;  %713 = vmatprep.subr.bf16.mxu0 %v802_v4  ;;  %v810_v12 = vld [vmem:[%s1048_s1 + $0x58] sm:$0xff]   ;;  %v814_v16 = vld [vmem:[%s1048_s1 + $0x60] sm:$0xff]   ;;  %v818_v20 = vld [vmem:[%s1048_s1 + $0x68] sm:$0xff]  }
   0x6   :  { %741 = vmatprep.subr.bf16.mxu1 %v803_v5  ;;  %v811_v13 = vld [vmem:[%s1048_s1 + $0xd8] sm:$0xff]   ;;  %v815_v17 = vld [vmem:[%s1048_s1 + $0xe0] sm:$0xff]   ;;  %v819_v21 = vld [vmem:[%s1048_s1 + $0xe8] sm:$0xff]  }
   0x7   :  { %v812_v14 = vld [vmem:[%s1048_s1 + $0x18] sm:$0xff]   ;;  %v816_v18 = vld [vmem:[%s1048_s1 + $0x20] sm:$0xff]   ;;  %v820_v22 = vld [vmem:[%s1048_s1 + $0x28] sm:$0xff]  }
   0x8   :  { %714 = vmatpush3.bf16.msra.mxu0 %v804_v6  ;;  %v813_v15 = vld [vmem:[%s1048_s1 + $0x98] sm:$0xff]   ;;  %v817_v19 = vld [vmem:[%s1048_s1 + $0xa0] sm:$0xff]   ;;  %v821_v23 = vld [vmem:[%s1048_s1 + $0xa8] sm:$0xff]  }
   0x9   :  { %742 = vmatpush3.bf16.msra.mxu1 %v805_v7  ;;  %715 = vmatprep.subr.bf16.mxu0 %v806_v8  ;;  %v822_v24 = vld [vmem:[%s1048_s1 + $0x70] sm:$0xff]   ;;  %v826_v28 = vld [vmem:[%s1048_s1 + $0x78] sm:$0xff]   ;;  %v835_v35 = vld [vmem:[%s1049_s0 + $0xc] ss:$20 sps:$4 sm:$0xff]  }
   0xa   :  { %743 = vmatprep.subr.bf16.mxu1 %v807_v9  ;;  %v823_v25 = vld [vmem:[%s1048_s1 + $0xf0] sm:$0xff]   ;;  %v827_v29 = vld [vmem:[%s1048_s1 + $0xf8] sm:$0xff]   ;;  %v836_v36 = vld [vmem:[%s1048_s1 + $0x100] sm:$0xff]   ;;  %489 = vmatprep.mubr.bf16.mxu1 %v835_v35 }
   0xb   :  { %v824_v26 = vld [vmem:[%s1048_s1 + $0x30] sm:$0xff]   ;;  %v828_v30 = vld [vmem:[%s1048_s1 + $0x38] sm:$0xff]   ;;  %v837_v37 = vld [vmem:[%s1048_s1 + $0x108] sm:$0xff]  }
   0xc   :  { %716 = vmatpush3.bf16.msra.mxu0 %v808_v10  ;;  %v825_v27 = vld [vmem:[%s1048_s1 + $0xb0] sm:$0xff]   ;;  %v829_v31 = vld [vmem:[%s1048_s1 + $0xb8] sm:$0xff]   ;;  %v841_v39 = vld [vmem:[%s1049_s0 + $0x2c] ss:$20 sps:$4 sm:$0xff]  }
   0xd   :  { %744 = vmatpush3.bf16.msra.mxu1 %v809_v11  ;;  %717 = vmatprep.subr.bf16.mxu0 %v810_v12  ;;  %v830_v32 = vld [vmem:[%s1049_s0] ss:$20 sps:$4 sm:$0xff]   ;;  %v832_v33 = vld [vmem:[%s1049_s0 + $0x4] ss:$20 sps:$4 sm:$0xff]   ;;  %v833_v34 = vld [vmem:[%s1049_s0 + $0x8] ss:$20 sps:$4 sm:$0xff]  }
   0xe   :  { %745 = vmatprep.subr.bf16.mxu1 %v811_v13  ;;  %440 = vmatprep.mubr.bf16.mxu0 %v832_v33  ;;  %v838_v38 = vld [vmem:[%s1048_s1 + $0x110] sm:$0xff]   ;;  %v839_v41 = vld [vmem:[%s1048_s1 + $0x118] sm:$0xff]   ;;  %v840_v45 = vld [vmem:[%s1048_s1 + $0x120] sm:$0xff]  }
   0xf   :  { %v843_v40 = vld [vmem:[%s1049_s0 + $0x34] ss:$20 sps:$4 sm:$0xff]   ;;  %v847_v43 = vld [vmem:[%s1049_s0 + $0x30] ss:$20 sps:$4 sm:$0xff]   ;;  %v849_v48 = vld [vmem:[%s1048_s1 + $0x138] sm:$0xff]  }
  0x10   :  { %718 = vmatpush3.bf16.msra.mxu0 %v812_v14  ;;  %v846_v42 = vld [vmem:[%s1049_s0 + $0x28] ss:$20 sps:$4 sm:$0xff]   ;;  %v850_v44 = vld [vmem:[%s1049_s0 + $0x10] ss:$20 sps:$4 sm:$0xff]   ;;  %v851_v49 = vld [vmem:[%s1049_s0 + $0x38] ss:$20 sps:$4 sm:$0xff]  }
  0x11   :  { %746 = vmatpush3.bf16.msra.mxu1 %v813_v15  ;;  %719 = vmatprep.subr.bf16.mxu0 %v814_v16  ;;  %v845_v46 = vld [vmem:[%s1048_s1 + $0x128] sm:$0xff]   ;;  %v848_v47 = vld [vmem:[%s1048_s1 + $0x130] sm:$0xff]  }
  0x12   :  { %747 = vmatprep.subr.bf16.mxu1 %v815_v17 }
  0x14   :  { %720 = vmatpush3.bf16.msra.mxu0 %v816_v18 }
  0x15   :  { %748 = vmatpush3.bf16.msra.mxu1 %v817_v19  ;;  %721 = vmatprep.subr.bf16.mxu0 %v818_v20 }
  0x16   :  { %749 = vmatprep.subr.bf16.mxu1 %v819_v21 }
  0x18   :  { %722 = vmatpush3.bf16.msra.mxu0 %v820_v22 }
  0x19   :  { %750 = vmatpush3.bf16.msra.mxu1 %v821_v23  ;;  %723 = vmatprep.subr.bf16.mxu0 %v822_v24 }
  0x1a   :  { %751 = vmatprep.subr.bf16.mxu1 %v823_v25 }
  0x1c   :  { %724 = vmatpush3.bf16.msra.mxu0 %v824_v26 }
  0x1d   :  { %752 = vmatpush3.bf16.msra.mxu1 %v825_v27  ;;  %725 = vmatprep.subr.bf16.mxu0 %v826_v28 }
  0x1e   :  { %753 = vmatprep.subr.bf16.mxu1 %v827_v29 }
  0x20   :  { %726 = vmatpush3.bf16.msra.mxu0 %v828_v30 }
  0x21   :  { %754 = vmatpush3.bf16.msra.mxu1 %v829_v31  ;;  %777 = vmatprep.subr.bf16.mxu0 %v836_v36 }
  0x23   :  { %441 = vmatmul.mubr.bf16.vlgmr.msra.gmra.mrb[0].mxu0 %v830_v32 }
  0x24   :  { %490 = vmatmul.mubr.bf16.vlgmr.msra.gmra.mrb[0].mxu1 %v833_v34  ;;  %778 = vmatpush3.bf16.msra.mxu0 %v836_v36 }
  0x25   :  { %779 = vmatprep.subr.bf16.mxu0 %v837_v37  ;;  %448 = vmatprep.mubr.bf16.mxu0 %v841_v39 }
  0x26   :  { %497 = vmatprep.mubr.bf16.mxu1 %v843_v40 }
  0x28   :  { %780 = vmatpush3.bf16.msra.mxu0 %v837_v37 }
  0x29   :  { %781 = vmatprep.subr.bf16.mxu0 %v838_v38 }
  0x2b   :  { %449 = vmatmul.mubr.bf16.gmra.mrb[4].mxu0 %v846_v42  ;;  %v561_v42 = vld [vmem:[#allocation2] sm:$0x1] }
  0x2c   :  { %498 = vmatmul.mubr.bf16.gmra.mrb[4].mxu1 %v847_v43  ;;  %782 = vmatpush3.bf16.msra.mxu0 %v838_v38 }
  0x2d   :  { %783 = vmatprep.subr.bf16.mxu0 %v839_v41  ;;  %793 = vmatprep.mubr.bf16.mxu0 %v850_v44 }
  0x30   :  { %784 = vmatpush3.bf16.msra.mxu0 %v839_v41 }
  0x31   :  { %785 = vmatprep.subr.bf16.mxu0 %v840_v45 }
  0x34   :  { %786 = vmatpush3.bf16.msra.mxu0 %v840_v45  ;;  %v573_v45 = vld [vmem:[#allocation3] sm:$0x1] }
  0x35   :  { %787 = vmatprep.subr.bf16.mxu0 %v845_v46 }
  0x38   :  { %788 = vmatpush3.bf16.msra.mxu0 %v845_v46 }
  0x39   :  { %789 = vmatprep.subr.bf16.mxu0 %v848_v47 }
  0x3c   :  { %790 = vmatpush3.bf16.msra.mxu0 %v848_v47 }
  0x3d   :  { %791 = vmatprep.subr.bf16.mxu0 %v849_v48 }
  0x40   :  { %792 = vmatpush3.bf16.msra.mxu0 %v849_v48 }
  0x43   :  { %794 = vmatmul.mubr.bf16.vlgmr.msra.gmra.mrb[8].mxu0 %v851_v49 }
  0xf6   :  { %v727_v51 = vpop.f32.mrb[0].mxu0 }
  0xf7   :  { %v755_v52 = vpop.f32.mrb[0].mxu1  ;;  %v728_v53 = vpop.f32.mrb[1].mxu0 }
  0xf8   :  { %v729_v54 = vadd.f32 %v728_v53, %v727_v51  ;;  %v756_v55 = vpop.f32.mrb[1].mxu1  ;;  %v730_v56 = vpop.f32.mrb[2].mxu0 }
  0xf9   :  { %v757_v57 = vadd.f32 %v756_v55, %v755_v52  ;;  %v758_v58 = vpop.f32.mrb[2].mxu1  ;;  %v731_v59 = vpop.f32.mrb[3].mxu0  ;;  %v606_v55 = vlaneseq }
  0xfa   :  { %v732_v60 = vadd.f32 %v731_v59, %v730_v56  ;;  %v759_v61 = vpop.f32.mrb[3].mxu1 }
  0xfb   :  { %v760_v62 = vadd.f32 %v759_v61, %v758_v58  ;;  %v492_v63 = vadd.f32 %v757_v57, %v729_v54  ;;  %v607_v58 = vshrl.u32 %v606_v55, 7 }
  0xfd   :  { %v495_v0 = vadd.f32 %v760_v62, %v732_v60  ;;  %v608_v59 = vsub.s32 0, %v607_v58 }
  0xfe   :  { %v733_v1 = vpop.f32.mrb[4].mxu0 }
  0xff   :  { %v761_v2 = vpop.f32.mrb[4].mxu1  ;;  %v734_v3 = vpop.f32.mrb[5].mxu0 }
 0x100   :  { %v735_v4 = vadd.f32 %v734_v3, %v733_v1  ;;  %v762_v5 = vpop.f32.mrb[5].mxu1  ;;  %v736_v6 = vpop.f32.mrb[6].mxu0  ;;  %v709_v3 = vld [vmem:[%s1050_s2] ss:$0 sm:$0xff] }
 0x101   :  { %v763_v7 = vadd.f32 %v762_v5, %v761_v2  ;;  %v764_v8 = vpop.f32.mrb[6].mxu1  ;;  %v737_v9 = vpop.f32.mrb[7].mxu0 }
 0x102   :  { %v738_v10 = vadd.f32 %v737_v9, %v736_v6  ;;  %v765_v11 = vpop.f32.mrb[7].mxu1 }
 0x103   :  { %v766_v12 = vadd.f32 %v765_v11, %v764_v8  ;;  %v500_v13 = vadd.f32 %v763_v7, %v735_v4  ;;  %v710_v8 = vld [vmem:[%s1051_s3] ss:$0 sm:$0xff] }
 0x105   :  { %v503_v14 = vadd.f32 %v766_v12, %v738_v10 }
 0x116   :  { %v795_v15 = vpop.f32.mrb[8].mxu0 }
 0x117   :  { %v549_v16 = vadd.f32 %v795_v15, %v500_v13  ;;  %v540_v17 = vpop.f32.mrb[9].mxu0 }
 0x118   :  { %v541_v18 = vadd.f32 %v540_v17, %v492_v63  ;;  %v796_v19 = vpop.f32.mrb[10].mxu0 }
 0x119   :  { %v552_v20 = vadd.f32 %v796_v19, %v503_v14  ;;  %v543_v21 = vpop.f32.mrb[11].mxu0  ;;  %v576_v26 = vmul.f32 %v549_v16, %v549_v16 }
 0x11a   :  { %v544_v22 = vadd.f32 %v543_v21, %v495_v0  ;;  %v574_v23 = vmul.f32 %v541_v18, %v541_v18 }
 0x11b   :  { %v577_v29 = vmul.f32 %v552_v20, %v552_v20 }
 0x11c   :  { %v562_v24 = vadd.f32 %v544_v22, %v541_v18  ;;  %v575_v25 = vmul.f32 %v544_v22, %v544_v22 }
 0x11e   :  { %v563_v27 = vadd.f32 %v562_v24, %v549_v16  ;;  %v578_v28 = vadd.f32 %v575_v25, %v574_v23 }
 0x120   :  { %v564_v30 = vadd.f32 %v563_v27, %v552_v20  ;;  %v579_v31 = vadd.f32 %v578_v28, %v576_v26 }
 0x122   :  { %v565_v32 = vrot.slane %v564_v30, 4  ;;  %v580_v33 = vadd.f32 %v579_v31, %v577_v29 }
 0x124   :  { %v566_v34 = vadd.f32 %v565_v32, %v564_v30  ;;  %v581_v35 = vrot.slane %v580_v33, 4 }
 0x126   :  { %v567_v36 = vrot.slane %v566_v34, 2  ;;  %v582_v37 = vadd.f32 %v581_v35, %v580_v33 }
 0x128   :  { %v568_v38 = vadd.f32 %v567_v36, %v566_v34  ;;  %v583_v39 = vrot.slane %v582_v37, 2 }
 0x12a   :  { %v569_v40 = vrot.slane %v568_v38, 1  ;;  %v584_v41 = vadd.f32 %v583_v39, %v582_v37 }
 0x12c   :  { %v570_v43 = vadd.f32 %v569_v40, %v568_v38  ;;  %v585_v44 = vrot.slane %v584_v41, 1 }
 0x12e   :  { %v571_v46 = vadd.f32 %v570_v43, %v561_v42  ;;  %v586_v47 = vadd.f32 %v585_v44, %v584_v41 }
 0x130   :  { %572 = vst [vmem:[#allocation2] sm:$0x1] %v571_v46  ;;  %v587_v48 = vadd.f32 %v586_v47, %v573_v45 }
 0x132   :  { %588 = vst [vmem:[#allocation3] sm:$0x1] %v587_v48 }
 0x137   :  { %v592_v49 = vld [vmem:[#allocation2] sm:$0x1] }
 0x138   :  { %v594_v50 = vmul.f32 0.03125, %v592_v49 }
 0x139   :  { %v593_v51 = vld [vmem:[#allocation3] sm:$0x1] }
 0x13a   :  { %v595_v52 = vmul.f32 0.03125, %v593_v51  ;;  %v596_v53 = vmul.f32 %v594_v50, %v594_v50  ;;  %v609_v60 = vrot.slane %v594_v50, %v608_v59 }
 0x13c   :  { %v597_v54 = vsub.f32 %v595_v52, %v596_v53  ;;  %v611_v62 = vsub.f32 %v541_v18, %v609_v60  ;;  %v612_v63 = vsub.f32 %v544_v22, %v609_v60  ;;  %v613_v0 = vsub.f32 %v549_v16, %v609_v60 }
 0x13d   :  { %v614_v1 = vsub.f32 %v552_v20, %v609_v60 }
 0x13e   :  { %v598_v56 = vmax.f32 %v597_v54, 0.0 }
 0x140   :  { %v599_v57 = vadd.f32 1e-05, %v598_v56 }
 0x142   :  { %852 = vrsqrt.f32 %v599_v57 }
 0x14c   :  { %v853_v61 = vpop.eup %852 }
 0x14d   :  { %v619_v2 = vrot.slane %v853_v61, %v608_v59 }
 0x14f   :  { %v621_v4 = vmul.f32 %v619_v2, %v611_v62  ;;  %v622_v5 = vmul.f32 %v619_v2, %v612_v63  ;;  %v623_v6 = vmul.f32 %v619_v2, %v613_v0  ;;  %v624_v7 = vmul.f32 %v619_v2, %v614_v1 }
 0x151   :  { %v632_v9 = vmul.f32 %v709_v3, %v621_v4  ;;  %v633_v10 = vmul.f32 %v709_v3, %v622_v5  ;;  %v634_v11 = vmul.f32 %v709_v3, %v623_v6  ;;  %v635_v12 = vmul.f32 %v709_v3, %v624_v7 }
 0x153   :  { %v643_v13 = vadd.f32 %v710_v8, %v632_v9  ;;  %v644_v14 = vadd.f32 %v710_v8, %v633_v10  ;;  %v645_v15 = vadd.f32 %v710_v8, %v634_v11  ;;  %v646_v16 = vadd.f32 %v710_v8, %v635_v12 }
 0x155   :  { %v647_v17 = vmax.f32 %v643_v13, 0.0  ;;  %v648_v18 = vmax.f32 %v644_v14, 0.0  ;;  %v649_v19 = vmax.f32 %v645_v15, 0.0  ;;  %v650_v20 = vmax.f32 %v646_v16, 0.0 }
 0x157   :  { %651 = vst [vmem:[%s1052_s4] sm:$0xff] %v647_v17  ;;  %652 = vst [vmem:[%s1052_s4 + $0x8] sm:$0xff] %v648_v18 }
 0x158   :  { %653 = vst [vmem:[%s1052_s4 + $0x10] sm:$0xff] %v649_v19  ;;  %654 = vst [vmem:[%s1052_s4 + $0x18] sm:$0xff] %v650_v20 }

// kernel: backbone_forward.61
= control target key start
LH: loop header
LB: loop body
LE: loop exit
PB: predicated region body
PF: predicated region fallthrough
CT: control target
= control target key end

     0   :  { %v725_v1 = vmov 0.0   ;;  %vm726_vm0 = vmmov 0   ;;  %s901_s1 = inlined_call_operand.vmem [shape: bf16[640,128], index: 1, kind: input, shape index: {}]   ;;  %s902_s0 = inlined_call_operand.vmem [shape: bf16[8,640], index: 0, kind: input, shape index: {}]   ;;  %s903_s2 = inlined_call_operand.vmem [shape: f32[1,128], index: 2, kind: input, shape index: {}]   ;;  %s904_s3 = inlined_call_operand.vmem [shape: f32[1,128], index: 3, kind: input, shape index: {}]   ;;  %s905_s4 = inlined_call_operand.vmem [shape: f32[8,128], index: 4, kind: output, shape index: {}]  }
   0x1   :  { %v678_v0 = vld [vmem:[%s901_s1 + $0x40] sm:$0xff]   ;;  %22 = vst [vmem:[#allocation2] sm:$0x1] %v725_v1  ;;  %23 = vst [vmem:[#allocation3] sm:$0x1] %v725_v1  ;;  %v682_v5 = vld [vmem:[%s901_s1 + $0x48] sm:$0xff]  }
   0x2   :  { %v679_v2 = vld [vmem:[%s901_s1 + $0xc0] sm:$0xff]   ;;  %603 = vmatprep.subr.bf16.mxu0 %v678_v0  ;;  %v683_v6 = vld [vmem:[%s901_s1 + $0xc8] sm:$0xff]   ;;  %v686_v9 = vld [vmem:[%s901_s1 + $0x50] sm:$0xff]  }
   0x3   :  { %v680_v3 = vld [vmem:[%s901_s1] sm:$0xff]   ;;  %625 = vmatprep.subr.bf16.mxu1 %v679_v2  ;;  %v684_v7 = vld [vmem:[%s901_s1 + $0x8] sm:$0xff]   ;;  %v687_v10 = vld [vmem:[%s901_s1 + $0xd0] sm:$0xff]  }
   0x4   :  { %v681_v4 = vld [vmem:[%s901_s1 + $0x80] sm:$0xff]   ;;  %604 = vmatpush3.bf16.msra.mxu0 %v680_v3  ;;  %v685_v8 = vld [vmem:[%s901_s1 + $0x88] sm:$0xff]   ;;  %v688_v11 = vld [vmem:[%s901_s1 + $0x10] sm:$0xff]  }
   0x5   :  { %626 = vmatpush3.bf16.msra.mxu1 %v681_v4  ;;  %605 = vmatprep.subr.bf16.mxu0 %v682_v5  ;;  %v689_v12 = vld [vmem:[%s901_s1 + $0x90] sm:$0xff]   ;;  %v690_v13 = vld [vmem:[%s901_s1 + $0x58] sm:$0xff]   ;;  %v694_v17 = vld [vmem:[%s901_s1 + $0x60] sm:$0xff]  }
   0x6   :  { %627 = vmatprep.subr.bf16.mxu1 %v683_v6  ;;  %v691_v14 = vld [vmem:[%s901_s1 + $0xd8] sm:$0xff]   ;;  %v695_v18 = vld [vmem:[%s901_s1 + $0xe0] sm:$0xff]   ;;  %v698_v21 = vld [vmem:[%s901_s1 + $0x68] sm:$0xff]  }
   0x7   :  { %v692_v15 = vld [vmem:[%s901_s1 + $0x18] sm:$0xff]   ;;  %v696_v19 = vld [vmem:[%s901_s1 + $0x20] sm:$0xff]   ;;  %v699_v22 = vld [vmem:[%s901_s1 + $0xe8] sm:$0xff]  }
   0x8   :  { %606 = vmatpush3.bf16.msra.mxu0 %v684_v7  ;;  %v693_v16 = vld [vmem:[%s901_s1 + $0x98] sm:$0xff]   ;;  %v697_v20 = vld [vmem:[%s901_s1 + $0xa0] sm:$0xff]   ;;  %v700_v23 = vld [vmem:[%s901_s1 + $0x28] sm:$0xff]  }
   0x9   :  { %628 = vmatpush3.bf16.msra.mxu1 %v685_v8  ;;  %607 = vmatprep.subr.bf16.mxu0 %v686_v9  ;;  %v701_v24 = vld [vmem:[%s901_s1 + $0xa8] sm:$0xff]   ;;  %v702_v25 = vld [vmem:[%s901_s1 + $0x70] sm:$0xff]   ;;  %v706_v29 = vld [vmem:[%s901_s1 + $0x78] sm:$0xff]  }
   0xa   :  { %629 = vmatprep.subr.bf16.mxu1 %v687_v10  ;;  %v703_v26 = vld [vmem:[%s901_s1 + $0xf0] sm:$0xff]   ;;  %v707_v30 = vld [vmem:[%s901_s1 + $0xf8] sm:$0xff]   ;;  %v24_v33 = vld [vmem:[%s902_s0] sm:$0xff] }
   0xb   :  { %v704_v27 = vld [vmem:[%s901_s1 + $0x30] sm:$0xff]   ;;  %v708_v31 = vld [vmem:[%s901_s1 + $0x38] sm:$0xff]   ;;  %v556_v34 = vcombine.low %v24_v33, %v24_v33  ;;  %v557_v35 = vcombine.high %v24_v33, %v24_v33  ;;  %v25_v36 = vld [vmem:[%s902_s0 + $0x8] sm:$0xff] }
   0xc   :  { %608 = vmatpush3.bf16.msra.mxu0 %v688_v11  ;;  %v705_v28 = vld [vmem:[%s901_s1 + $0xb0] sm:$0xff]   ;;  %v709_v32 = vld [vmem:[%s901_s1 + $0xb8] sm:$0xff]   ;;  %v558_v37 = vcombine.low %v25_v36, %v25_v36  ;;  %v559_v38 = vcombine.high %v25_v36, %v25_v36  ;;  %v715_v39 = vld [vmem:[%s901_s1 + $0x100] sm:$0xff]  }
   0xd   :  { %630 = vmatpush3.bf16.msra.mxu1 %v689_v12  ;;  %609 = vmatprep.subr.bf16.mxu0 %v690_v13  ;;  %v716_v40 = vld [vmem:[%s901_s1 + $0x108] sm:$0xff]   ;;  %v717_v41 = vld [vmem:[%s901_s1 + $0x110] sm:$0xff]   ;;  %v718_v42 = vld [vmem:[%s901_s1 + $0x118] sm:$0xff]  }
   0xe   :  { %631 = vmatprep.subr.bf16.mxu1 %v691_v14  ;;  %397 = vmatprep.mubr.bf16.mxu0 %v557_v35  ;;  %v719_v43 = vld [vmem:[%s901_s1 + $0x120] sm:$0xff]   ;;  %v720_v44 = vld [vmem:[%s901_s1 + $0x128] sm:$0xff]   ;;  %v721_v45 = vld [vmem:[%s901_s1 + $0x130] sm:$0xff]  }
   0xf   :  { %437 = vmatprep.mubr.bf16.mxu1 %v559_v38  ;;  %v722_v46 = vld [vmem:[%s901_s1 + $0x138] sm:$0xff]   ;;  %v712_v47 = vld [vmem:[%s902_s0 + $0x10] ss:$0 sps:$4 sm:$0xff]   ;;  %v488_v10 = vld [vmem:[#allocation2] sm:$0x1] }
  0x10   :  { %610 = vmatpush3.bf16.msra.mxu0 %v692_v15  ;;  %v497_v13 = vld [vmem:[#allocation3] sm:$0x1] }
  0x11   :  { %632 = vmatpush3.bf16.msra.mxu1 %v693_v16  ;;  %611 = vmatprep.subr.bf16.mxu0 %v694_v17 }
  0x12   :  { %633 = vmatprep.subr.bf16.mxu1 %v695_v18 }
  0x14   :  { %612 = vmatpush3.bf16.msra.mxu0 %v696_v19 }
  0x15   :  { %634 = vmatpush3.bf16.msra.mxu1 %v697_v20  ;;  %613 = vmatprep.subr.bf16.mxu0 %v698_v21 }
  0x16   :  { %635 = vmatprep.subr.bf16.mxu1 %v699_v22 }
  0x18   :  { %614 = vmatpush3.bf16.msra.mxu0 %v700_v23  ;;  %v521_v23 = vlaneseq }
  0x19   :  { %636 = vmatpush3.bf16.msra.mxu1 %v701_v24  ;;  %615 = vmatprep.subr.bf16.mxu0 %v702_v25 }
  0x1a   :  { %637 = vmatprep.subr.bf16.mxu1 %v703_v26  ;;  %v522_v26 = vshrl.u32 %v521_v23, 7 }
  0x1c   :  { %616 = vmatpush3.bf16.msra.mxu0 %v704_v27  ;;  %v523_v27 = vsub.s32 0, %v522_v26 }
  0x1d   :  { %638 = vmatpush3.bf16.msra.mxu1 %v705_v28  ;;  %617 = vmatprep.subr.bf16.mxu0 %v706_v29 }
  0x1e   :  { %639 = vmatprep.subr.bf16.mxu1 %v707_v30 }
  0x20   :  { %618 = vmatpush3.bf16.msra.mxu0 %v708_v31 }
  0x21   :  { %640 = vmatpush3.bf16.msra.mxu1 %v709_v32  ;;  %656 = vmatprep.subr.bf16.mxu0 %v725_v1  ;;  %v601_v32 = vld [vmem:[%s903_s2] ss:$0 sm:$0xff] }
  0x23   :  { %398 = vmatmul.mubr.bf16.vlgmr.msra.gmra.mrb[0].mxu0 %v556_v34  ;;  %v602_v34 = vld [vmem:[%s904_s3] ss:$0 sm:$0xff] }
  0x24   :  { %438 = vmatmul.mubr.bf16.vlgmr.msra.gmra.mrb[0].mxu1 %v558_v37  ;;  %657 = vmatpush3.bf16.msra.mxu0 %v715_v39 }
  0x25   :  { %658 = vmatprep.subr.bf16.mxu0 %v725_v1  ;;  %672 = vmatprep.mubr.msk.bf16.mxu0 %vm726_vm0, %v725_v1 }
  0x28   :  { %659 = vmatpush3.bf16.msra.mxu0 %v716_v40 }
  0x29   :  { %660 = vmatprep.subr.bf16.mxu0 %v725_v1 }
  0x2c   :  { %661 = vmatpush3.bf16.msra.mxu0 %v717_v41 }
  0x2d   :  { %662 = vmatprep.subr.bf16.mxu0 %v725_v1 }
  0x30   :  { %663 = vmatpush3.bf16.msra.mxu0 %v718_v42 }
  0x31   :  { %664 = vmatprep.subr.bf16.mxu0 %v725_v1 }
  0x34   :  { %665 = vmatpush3.bf16.msra.mxu0 %v719_v43 }
  0x35   :  { %666 = vmatprep.subr.bf16.mxu0 %v725_v1 }
  0x38   :  { %667 = vmatpush3.bf16.msra.mxu0 %v720_v44 }
  0x39   :  { %668 = vmatprep.subr.bf16.mxu0 %v725_v1 }
  0x3c   :  { %669 = vmatpush3.bf16.msra.mxu0 %v721_v45 }
  0x3d   :  { %670 = vmatprep.subr.bf16.mxu0 %v725_v1 }
  0x40   :  { %671 = vmatpush3.bf16.msra.mxu0 %v722_v46 }
  0x43   :  { %673 = vmatmul.mubr.bf16.vlgmr.msra.gmra.mrb[4].mxu0 %v712_v47 }
  0xf6   :  { %v619_v48 = vpop.f32.mrb[0].mxu0 }
  0xf7   :  { %v641_v49 = vpop.f32.mrb[0].mxu1  ;;  %v620_v50 = vpop.f32.mrb[1].mxu0 }
  0xf8   :  { %v621_v51 = vadd.f32 %v620_v50, %v619_v48  ;;  %v642_v52 = vpop.f32.mrb[1].mxu1  ;;  %v622_v53 = vpop.f32.mrb[2].mxu0 }
  0xf9   :  { %v643_v54 = vadd.f32 %v642_v52, %v641_v49  ;;  %v623_v55 = vpop.f32.mrb[3].mxu0  ;;  %v644_v56 = vpop.f32.mrb[2].mxu1 }
  0xfa   :  { %v645_v57 = vpop.f32.mrb[3].mxu1 }
  0xfb   :  { %v440_v58 = vadd.f32 %v643_v54, %v621_v51 }
 0x116   :  { %v479_v59 = vpop.f32.mrb[4].mxu0 }
 0x117   :  { %v480_v60 = vadd.f32 %v479_v59, %v440_v58  ;;  %v674_v61 = vpop.f32.mrb[5].mxu0 }
 0x118   :  { %v482_v62 = vpop.f32.mrb[6].mxu0 }
 0x119   :  { %v489_v63 = vrot.slane %v480_v60, 4  ;;  %v498_v0 = vmul.f32 %v480_v60, %v480_v60  ;;  %v675_v1 = vpop.f32.mrb[7].mxu0 }
 0x11b   :  { %v490_v2 = vadd.f32 %v489_v63, %v480_v60  ;;  %v499_v3 = vrot.slane %v498_v0, 4 }
 0x11d   :  { %v491_v4 = vrot.slane %v490_v2, 2  ;;  %v500_v5 = vadd.f32 %v499_v3, %v498_v0 }
 0x11f   :  { %v492_v6 = vadd.f32 %v491_v4, %v490_v2  ;;  %v501_v7 = vrot.slane %v500_v5, 2 }
 0x121   :  { %v493_v8 = vrot.slane %v492_v6, 1  ;;  %v502_v9 = vadd.f32 %v501_v7, %v500_v5 }
 0x123   :  { %v494_v11 = vadd.f32 %v493_v8, %v492_v6  ;;  %v503_v12 = vrot.slane %v502_v9, 1 }
 0x125   :  { %v495_v14 = vadd.f32 %v494_v11, %v488_v10  ;;  %v504_v15 = vadd.f32 %v503_v12, %v502_v9 }
 0x127   :  { %496 = vst [vmem:[#allocation2] sm:$0x1] %v495_v14  ;;  %v505_v16 = vadd.f32 %v504_v15, %v497_v13 }
 0x129   :  { %506 = vst [vmem:[#allocation3] sm:$0x1] %v505_v16 }
 0x12e   :  { %v510_v17 = vld [vmem:[#allocation2] sm:$0x1] }
 0x12f   :  { %v512_v18 = vmul.f32 0.5, %v510_v17 }
 0x130   :  { %v511_v19 = vld [vmem:[#allocation3] sm:$0x1] }
 0x131   :  { %v513_v20 = vmul.f32 0.5, %v511_v19  ;;  %v514_v21 = vmul.f32 %v512_v18, %v512_v18  ;;  %v524_v28 = vrot.slane %v512_v18, %v523_v27 }
 0x133   :  { %v515_v22 = vsub.f32 %v513_v20, %v514_v21  ;;  %v526_v30 = vsub.f32 %v480_v60, %v524_v28 }
 0x135   :  { %v516_v24 = vmax.f32 %v515_v22, 0.0 }
 0x137   :  { %v517_v25 = vadd.f32 1e-05, %v516_v24 }
 0x139   :  { %723 = vrsqrt.f32 %v517_v25 }
 0x143   :  { %v724_v29 = vpop.eup %723 }
 0x144   :  { %v531_v31 = vrot.slane %v724_v29, %v523_v27 }
 0x146   :  { %v533_v33 = vmul.f32 %v531_v31, %v526_v30 }
 0x148   :  { %v541_v35 = vmul.f32 %v601_v32, %v533_v33 }
 0x14a   :  { %v549_v36 = vadd.f32 %v602_v34, %v541_v35 }
 0x14c   :  { %v550_v37 = vmax.f32 %v549_v36, 0.0 }
 0x14e   :  { %551 = vst [vmem:[%s905_s4] sm:$0xff] %v550_v37 }

// kernel: backbone_forward.60
= control target key start
LH: loop header
LB: loop body
LE: loop exit
PB: predicated region body
PF: predicated region fallthrough
CT: control target
= control target key end

     0   :  { %v725_v1 = vmov 0.0   ;;  %vm726_vm0 = vmmov 0   ;;  %s901_s1 = inlined_call_operand.vmem [shape: bf16[640,128], index: 1, kind: input, shape index: {}]   ;;  %s902_s0 = inlined_call_operand.vmem [shape: bf16[8,640], index: 0, kind: input, shape index: {}]   ;;  %s903_s2 = inlined_call_operand.vmem [shape: f32[1,128], index: 2, kind: input, shape index: {}]   ;;  %s904_s3 = inlined_call_operand.vmem [shape: f32[1,128], index: 3, kind: input, shape index: {}]   ;;  %s905_s4 = inlined_call_operand.vmem [shape: f32[8,128], index: 4, kind: output, shape index: {}]  }
   0x1   :  { %v678_v0 = vld [vmem:[%s901_s1 + $0x40] sm:$0xff]   ;;  %22 = vst [vmem:[#allocation2] sm:$0x1] %v725_v1  ;;  %23 = vst [vmem:[#allocation3] sm:$0x1] %v725_v1  ;;  %v682_v5 = vld [vmem:[%s901_s1 + $0x48] sm:$0xff]  }
   0x2   :  { %v679_v2 = vld [vmem:[%s901_s1 + $0xc0] sm:$0xff]   ;;  %603 = vmatprep.subr.bf16.mxu0 %v678_v0  ;;  %v683_v6 = vld [vmem:[%s901_s1 + $0xc8] sm:$0xff]   ;;  %v686_v9 = vld [vmem:[%s901_s1 + $0x50] sm:$0xff]  }
   0x3   :  { %v680_v3 = vld [vmem:[%s901_s1] sm:$0xff]   ;;  %625 = vmatprep.subr.bf16.mxu1 %v679_v2  ;;  %v684_v7 = vld [vmem:[%s901_s1 + $0x8] sm:$0xff]   ;;  %v687_v10 = vld [vmem:[%s901_s1 + $0xd0] sm:$0xff]  }
   0x4   :  { %v681_v4 = vld [vmem:[%s901_s1 + $0x80] sm:$0xff]   ;;  %604 = vmatpush3.bf16.msra.mxu0 %v680_v3  ;;  %v685_v8 = vld [vmem:[%s901_s1 + $0x88] sm:$0xff]   ;;  %v688_v11 = vld [vmem:[%s901_s1 + $0x10] sm:$0xff]  }
   0x5   :  { %626 = vmatpush3.bf16.msra.mxu1 %v681_v4  ;;  %605 = vmatprep.subr.bf16.mxu0 %v682_v5  ;;  %v689_v12 = vld [vmem:[%s901_s1 + $0x90] sm:$0xff]   ;;  %v690_v13 = vld [vmem:[%s901_s1 + $0x58] sm:$0xff]   ;;  %v694_v17 = vld [vmem:[%s901_s1 + $0x60] sm:$0xff]  }
   0x6   :  { %627 = vmatprep.subr.bf16.mxu1 %v683_v6  ;;  %v691_v14 = vld [vmem:[%s901_s1 + $0xd8] sm:$0xff]   ;;  %v695_v18 = vld [vmem:[%s901_s1 + $0xe0] sm:$0xff]   ;;  %v698_v21 = vld [vmem:[%s901_s1 + $0x68] sm:$0xff]  }
   0x7   :  { %v692_v15 = vld [vmem:[%s901_s1 + $0x18] sm:$0xff]   ;;  %v696_v19 = vld [vmem:[%s901_s1 + $0x20] sm:$0xff]   ;;  %v699_v22 = vld [vmem:[%s901_s1 + $0xe8] sm:$0xff]  }
   0x8   :  { %606 = vmatpush3.bf16.msra.mxu0 %v684_v7  ;;  %v693_v16 = vld [vmem:[%s901_s1 + $0x98] sm:$0xff]   ;;  %v697_v20 = vld [vmem:[%s901_s1 + $0xa0] sm:$0xff]   ;;  %v700_v23 = vld [vmem:[%s901_s1 + $0x28] sm:$0xff]  }
   0x9   :  { %628 = vmatpush3.bf16.msra.mxu1 %v685_v8  ;;  %607 = vmatprep.subr.bf16.mxu0 %v686_v9  ;;  %v701_v24 = vld [vmem:[%s901_s1 + $0xa8] sm:$0xff]   ;;  %v702_v25 = vld [vmem:[%s901_s1 + $0x70] sm:$0xff]   ;;  %v706_v29 = vld [vmem:[%s901_s1 + $0x78] sm:$0xff]  }
   0xa   :  { %629 = vmatprep.subr.bf16.mxu1 %v687_v10  ;;  %v703_v26 = vld [vmem:[%s901_s1 + $0xf0] sm:$0xff]   ;;  %v707_v30 = vld [vmem:[%s901_s1 + $0xf8] sm:$0xff]   ;;  %v24_v33 = vld [vmem:[%s902_s0] sm:$0xff] }
   0xb   :  { %v704_v27 = vld [vmem:[%s901_s1 + $0x30] sm:$0xff]   ;;  %v708_v31 = vld [vmem:[%s901_s1 + $0x38] sm:$0xff]   ;;  %v556_v34 = vcombine.low %v24_v33, %v24_v33  ;;  %v557_v35 = vcombine.high %v24_v33, %v24_v33  ;;  %v25_v36 = vld [vmem:[%s902_s0 + $0x8] sm:$0xff] }
   0xc   :  { %608 = vmatpush3.bf16.msra.mxu0 %v688_v11  ;;  %v705_v28 = vld [vmem:[%s901_s1 + $0xb0] sm:$0xff]   ;;  %v709_v32 = vld [vmem:[%s901_s1 + $0xb8] sm:$0xff]   ;;  %v558_v37 = vcombine.low %v25_v36, %v25_v36  ;;  %v559_v38 = vcombine.high %v25_v36, %v25_v36  ;;  %v715_v39 = vld [vmem:[%s901_s1 + $0x100] sm:$0xff]  }
   0xd   :  { %630 = vmatpush3.bf16.msra.mxu1 %v689_v12  ;;  %609 = vmatprep.subr.bf16.mxu0 %v690_v13  ;;  %v716_v40 = vld [vmem:[%s901_s1 + $0x108] sm:$0xff]   ;;  %v717_v41 = vld [vmem:[%s901_s1 + $0x110] sm:$0xff]   ;;  %v718_v42 = vld [vmem:[%s901_s1 + $0x118] sm:$0xff]  }
   0xe   :  { %631 = vmatprep.subr.bf16.mxu1 %v691_v14  ;;  %397 = vmatprep.mubr.bf16.mxu0 %v557_v35  ;;  %v719_v43 = vld [vmem:[%s901_s1 + $0x120] sm:$0xff]   ;;  %v720_v44 = vld [vmem:[%s901_s1 + $0x128] sm:$0xff]   ;;  %v721_v45 = vld [vmem:[%s901_s1 + $0x130] sm:$0xff]  }
   0xf   :  { %437 = vmatprep.mubr.bf16.mxu1 %v559_v38  ;;  %v722_v46 = vld [vmem:[%s901_s1 + $0x138] sm:$0xff]   ;;  %v712_v47 = vld [vmem:[%s902_s0 + $0x10] ss:$0 sps:$4 sm:$0xff]   ;;  %v488_v10 = vld [vmem:[#allocation2] sm:$0x1] }
  0x10   :  { %610 = vmatpush3.bf16.msra.mxu0 %v692_v15  ;;  %v497_v13 = vld [vmem:[#allocation3] sm:$0x1] }
  0x11   :  { %632 = vmatpush3.bf16.msra.mxu1 %v693_v16  ;;  %611 = vmatprep.subr.bf16.mxu0 %v694_v17 }
  0x12   :  { %633 = vmatprep.subr.bf16.mxu1 %v695_v18 }
  0x14   :  { %612 = vmatpush3.bf16.msra.mxu0 %v696_v19 }
  0x15   :  { %634 = vmatpush3.bf16.msra.mxu1 %v697_v20  ;;  %613 = vmatprep.subr.bf16.mxu0 %v698_v21 }
  0x16   :  { %635 = vmatprep.subr.bf16.mxu1 %v699_v22 }
  0x18   :  { %614 = vmatpush3.bf16.msra.mxu0 %v700_v23  ;;  %v521_v23 = vlaneseq }
  0x19   :  { %636 = vmatpush3.bf16.msra.mxu1 %v701_v24  ;;  %615 = vmatprep.subr.bf16.mxu0 %v702_v25 }
  0x1a   :  { %637 = vmatprep.subr.bf16.mxu1 %v703_v26  ;;  %v522_v26 = vshrl.u32 %v521_v23, 7 }
  0x1c   :  { %616 = vmatpush3.bf16.msra.mxu0 %v704_v27  ;;  %v523_v27 = vsub.s32 0, %v522_v26 }
  0x1d   :  { %638 = vmatpush3.bf16.msra.mxu1 %v705_v28  ;;  %617 = vmatprep.subr.bf16.mxu0 %v706_v29 }
  0x1e   :  { %639 = vmatprep.subr.bf16.mxu1 %v707_v30 }
  0x20   :  { %618 = vmatpush3.bf16.msra.mxu0 %v708_v31 }
  0x21   :  { %640 = vmatpush3.bf16.msra.mxu1 %v709_v32  ;;  %656 = vmatprep.subr.bf16.mxu0 %v725_v1  ;;  %v601_v32 = vld [vmem:[%s903_s2] ss:$0 sm:$0xff] }
  0x23   :  { %398 = vmatmul.mubr.bf16.vlgmr.msra.gmra.mrb[0].mxu0 %v556_v34  ;;  %v602_v34 = vld [vmem:[%s904_s3] ss:$0 sm:$0xff] }
  0x24   :  { %438 = vmatmul.mubr.bf16.vlgmr.msra.gmra.mrb[0].mxu1 %v558_v37  ;;  %657 = vmatpush3.bf16.msra.mxu0 %v715_v39 }
  0x25   :  { %658 = vmatprep.subr.bf16.mxu0 %v725_v1  ;;  %672 = vmatprep.mubr.msk.bf16.mxu0 %vm726_vm0, %v725_v1 }
  0x28   :  { %659 = vmatpush3.bf16.msra.mxu0 %v716_v40 }
  0x29   :  { %660 = vmatprep.subr.bf16.mxu0 %v725_v1 }
  0x2c   :  { %661 = vmatpush3.bf16.msra.mxu0 %v717_v41 }
  0x2d   :  { %662 = vmatprep.subr.bf16.mxu0 %v725_v1 }
  0x30   :  { %663 = vmatpush3.bf16.msra.mxu0 %v718_v42 }
  0x31   :  { %664 = vmatprep.subr.bf16.mxu0 %v725_v1 }
  0x34   :  { %665 = vmatpush3.bf16.msra.mxu0 %v719_v43 }
  0x35   :  { %666 = vmatprep.subr.bf16.mxu0 %v725_v1 }
  0x38   :  { %667 = vmatpush3.bf16.msra.mxu0 %v720_v44 }
  0x39   :  { %668 = vmatprep.subr.bf16.mxu0 %v725_v1 }
  0x3c   :  { %669 = vmatpush3.bf16.msra.mxu0 %v721_v45 }
  0x3d   :  { %670 = vmatprep.subr.bf16.mxu0 %v725_v1 }
  0x40   :  { %671 = vmatpush3.bf16.msra.mxu0 %v722_v46 }
  0x43   :  { %673 = vmatmul.mubr.bf16.vlgmr.msra.gmra.mrb[4].mxu0 %v712_v47 }
  0xf6   :  { %v619_v48 = vpop.f32.mrb[0].mxu0 }
  0xf7   :  { %v641_v49 = vpop.f32.mrb[0].mxu1  ;;  %v620_v50 = vpop.f32.mrb[1].mxu0 }
  0xf8   :  { %v621_v51 = vadd.f32 %v620_v50, %v619_v48  ;;  %v642_v52 = vpop.f32.mrb[1].mxu1  ;;  %v622_v53 = vpop.f32.mrb[2].mxu0 }
  0xf9   :  { %v643_v54 = vadd.f32 %v642_v52, %v641_v49  ;;  %v623_v55 = vpop.f32.mrb[3].mxu0  ;;  %v644_v56 = vpop.f32.mrb[2].mxu1 }
  0xfa   :  { %v645_v57 = vpop.f32.mrb[3].mxu1 }
  0xfb   :  { %v440_v58 = vadd.f32 %v643_v54, %v621_v51 }
 0x116   :  { %v479_v59 = vpop.f32.mrb[4].mxu0 }
 0x117   :  { %v480_v60 = vadd.f32 %v479_v59, %v440_v58  ;;  %v674_v61 = vpop.f32.mrb[5].mxu0 }
 0x118   :  { %v482_v62 = vpop.f32.mrb[6].mxu0 }
 0x119   :  { %v489_v63 = vrot.slane %v480_v60, 4  ;;  %v498_v0 = vmul.f32 %v480_v60, %v480_v60  ;;  %v675_v1 = vpop.f32.mrb[7].mxu0 }
 0x11b   :  { %v490_v2 = vadd.f32 %v489_v63, %v480_v60  ;;  %v499_v3 = vrot.slane %v498_v0, 4 }
 0x11d   :  { %v491_v4 = vrot.slane %v490_v2, 2  ;;  %v500_v5 = vadd.f32 %v499_v3, %v498_v0 }
 0x11f   :  { %v492_v6 = vadd.f32 %v491_v4, %v490_v2  ;;  %v501_v7 = vrot.slane %v500_v5, 2 }
 0x121   :  { %v493_v8 = vrot.slane %v492_v6, 1  ;;  %v502_v9 = vadd.f32 %v501_v7, %v500_v5 }
 0x123   :  { %v494_v11 = vadd.f32 %v493_v8, %v492_v6  ;;  %v503_v12 = vrot.slane %v502_v9, 1 }
 0x125   :  { %v495_v14 = vadd.f32 %v494_v11, %v488_v10  ;;  %v504_v15 = vadd.f32 %v503_v12, %v502_v9 }
 0x127   :  { %496 = vst [vmem:[#allocation2] sm:$0x1] %v495_v14  ;;  %v505_v16 = vadd.f32 %v504_v15, %v497_v13 }
 0x129   :  { %506 = vst [vmem:[#allocation3] sm:$0x1] %v505_v16 }
 0x12e   :  { %v510_v17 = vld [vmem:[#allocation2] sm:$0x1] }
 0x12f   :  { %v512_v18 = vmul.f32 0.125, %v510_v17 }
 0x130   :  { %v511_v19 = vld [vmem:[#allocation3] sm:$0x1] }
 0x131   :  { %v513_v20 = vmul.f32 0.125, %v511_v19  ;;  %v514_v21 = vmul.f32 %v512_v18, %v512_v18  ;;  %v524_v28 = vrot.slane %v512_v18, %v523_v27 }
 0x133   :  { %v515_v22 = vsub.f32 %v513_v20, %v514_v21  ;;  %v526_v30 = vsub.f32 %v480_v60, %v524_v28 }
 0x135   :  { %v516_v24 = vmax.f32 %v515_v22, 0.0 }
 0x137   :  { %v517_v25 = vadd.f32 1e-05, %v516_v24 }
 0x139   :  { %723 = vrsqrt.f32 %v517_v25 }
 0x143   :  { %v724_v29 = vpop.eup %723 }
 0x144   :  { %v531_v31 = vrot.slane %v724_v29, %v523_v27 }
 0x146   :  { %v533_v33 = vmul.f32 %v531_v31, %v526_v30 }
 0x148   :  { %v541_v35 = vmul.f32 %v601_v32, %v533_v33 }
 0x14a   :  { %v549_v36 = vadd.f32 %v602_v34, %v541_v35 }
 0x14c   :  { %v550_v37 = vmax.f32 %v549_v36, 0.0 }
 0x14e   :  { %551 = vst [vmem:[%s905_s4] sm:$0xff] %v550_v37 }

// kernel: backbone_forward.68
= control target key start
LH: loop header
LB: loop body
LE: loop exit
PB: predicated region body
PF: predicated region fallthrough
CT: control target
= control target key end

     0   :  { %v959_v1 = vmov 0.0   ;;  %vm960_vm0 = vmmov 0   ;;  %s1186_s1 = inlined_call_operand.vmem [shape: bf16[896,128], index: 1, kind: input, shape index: {}]   ;;  %s1187_s0 = inlined_call_operand.vmem [shape: bf16[8,896], index: 0, kind: input, shape index: {}]   ;;  %s1188_s2 = inlined_call_operand.vmem [shape: f32[1,128], index: 2, kind: input, shape index: {}]   ;;  %s1189_s3 = inlined_call_operand.vmem [shape: f32[1,128], index: 3, kind: input, shape index: {}]   ;;  %s1190_s4 = inlined_call_operand.vmem [shape: f32[8,128], index: 4, kind: output, shape index: {}]  }
   0x1   :  { %v894_v0 = vld [vmem:[%s1186_s1 + $0x40] sm:$0xff]   ;;  %22 = vst [vmem:[#allocation2] sm:$0x1] %v959_v1  ;;  %23 = vst [vmem:[#allocation3] sm:$0x1] %v959_v1  ;;  %v898_v5 = vld [vmem:[%s1186_s1 + $0x48] sm:$0xff]  }
   0x2   :  { %v895_v2 = vld [vmem:[%s1186_s1 + $0xc0] sm:$0xff]   ;;  %797 = vmatprep.subr.bf16.mxu0 %v894_v0  ;;  %v899_v6 = vld [vmem:[%s1186_s1 + $0xc8] sm:$0xff]   ;;  %v902_v9 = vld [vmem:[%s1186_s1 + $0x50] sm:$0xff]  }
   0x3   :  { %v896_v3 = vld [vmem:[%s1186_s1] sm:$0xff]   ;;  %819 = vmatprep.subr.bf16.mxu1 %v895_v2  ;;  %v900_v7 = vld [vmem:[%s1186_s1 + $0x8] sm:$0xff]   ;;  %v903_v10 = vld [vmem:[%s1186_s1 + $0xd0] sm:$0xff]  }
   0x4   :  { %v897_v4 = vld [vmem:[%s1186_s1 + $0x80] sm:$0xff]   ;;  %798 = vmatpush3.bf16.msra.mxu0 %v896_v3  ;;  %v901_v8 = vld [vmem:[%s1186_s1 + $0x88] sm:$0xff]   ;;  %v904_v11 = vld [vmem:[%s1186_s1 + $0x10] sm:$0xff]  }
   0x5   :  { %820 = vmatpush3.bf16.msra.mxu1 %v897_v4  ;;  %799 = vmatprep.subr.bf16.mxu0 %v898_v5  ;;  %v905_v12 = vld [vmem:[%s1186_s1 + $0x90] sm:$0xff]   ;;  %v906_v13 = vld [vmem:[%s1186_s1 + $0x58] sm:$0xff]   ;;  %v910_v17 = vld [vmem:[%s1186_s1 + $0x60] sm:$0xff]  }
   0x6   :  { %821 = vmatprep.subr.bf16.mxu1 %v899_v6  ;;  %v907_v14 = vld [vmem:[%s1186_s1 + $0xd8] sm:$0xff]   ;;  %v911_v18 = vld [vmem:[%s1186_s1 + $0xe0] sm:$0xff]   ;;  %v914_v21 = vld [vmem:[%s1186_s1 + $0x68] sm:$0xff]  }
   0x7   :  { %v908_v15 = vld [vmem:[%s1186_s1 + $0x18] sm:$0xff]   ;;  %v912_v19 = vld [vmem:[%s1186_s1 + $0x20] sm:$0xff]   ;;  %v915_v22 = vld [vmem:[%s1186_s1 + $0xe8] sm:$0xff]  }
   0x8   :  { %800 = vmatpush3.bf16.msra.mxu0 %v900_v7  ;;  %v909_v16 = vld [vmem:[%s1186_s1 + $0x98] sm:$0xff]   ;;  %v913_v20 = vld [vmem:[%s1186_s1 + $0xa0] sm:$0xff]   ;;  %v916_v23 = vld [vmem:[%s1186_s1 + $0x28] sm:$0xff]  }
   0x9   :  { %822 = vmatpush3.bf16.msra.mxu1 %v901_v8  ;;  %801 = vmatprep.subr.bf16.mxu0 %v902_v9  ;;  %v917_v24 = vld [vmem:[%s1186_s1 + $0xa8] sm:$0xff]   ;;  %v918_v25 = vld [vmem:[%s1186_s1 + $0x70] sm:$0xff]   ;;  %v922_v29 = vld [vmem:[%s1186_s1 + $0x78] sm:$0xff]  }
   0xa   :  { %823 = vmatprep.subr.bf16.mxu1 %v903_v10  ;;  %v919_v26 = vld [vmem:[%s1186_s1 + $0xf0] sm:$0xff]   ;;  %v923_v30 = vld [vmem:[%s1186_s1 + $0xf8] sm:$0xff]   ;;  %v24_v33 = vld [vmem:[%s1187_s0] sm:$0xff] }
   0xb   :  { %v920_v27 = vld [vmem:[%s1186_s1 + $0x30] sm:$0xff]   ;;  %v924_v31 = vld [vmem:[%s1186_s1 + $0x38] sm:$0xff]   ;;  %v25_v34 = vld [vmem:[%s1187_s0 + $0x8] sm:$0xff]  ;;  %v732_v35 = vcombine.low %v24_v33, %v24_v33  ;;  %v733_v36 = vcombine.high %v24_v33, %v24_v33 }
   0xc   :  { %802 = vmatpush3.bf16.msra.mxu0 %v904_v11  ;;  %v921_v28 = vld [vmem:[%s1186_s1 + $0xb0] sm:$0xff]   ;;  %v925_v32 = vld [vmem:[%s1186_s1 + $0xb8] sm:$0xff]   ;;  %v734_v37 = vcombine.low %v25_v34, %v25_v34  ;;  %v735_v38 = vcombine.high %v25_v34, %v25_v34  ;;  %v930_v39 = vld [vmem:[%s1186_s1 + $0x140] sm:$0xff]  }
   0xd   :  { %824 = vmatpush3.bf16.msra.mxu1 %v905_v12  ;;  %803 = vmatprep.subr.bf16.mxu0 %v906_v13  ;;  %v931_v40 = vld [vmem:[%s1186_s1 + $0x100] sm:$0xff]   ;;  %v933_v42 = vld [vmem:[%s1186_s1 + $0x148] sm:$0xff]   ;;  %v936_v45 = vld [vmem:[%s1186_s1 + $0x150] sm:$0xff]  }
   0xe   :  { %825 = vmatprep.subr.bf16.mxu1 %v907_v14  ;;  %533 = vmatprep.mubr.bf16.mxu0 %v733_v36  ;;  %v932_v41 = vld [vmem:[%s1186_s1 + $0x180] sm:$0xff]   ;;  %v934_v43 = vld [vmem:[%s1186_s1 + $0x108] sm:$0xff]   ;;  %v938_v46 = vld [vmem:[%s1186_s1 + $0x190] sm:$0xff]  }
   0xf   :  { %573 = vmatprep.mubr.bf16.mxu1 %v735_v38  ;;  %v935_v44 = vld [vmem:[%s1186_s1 + $0x188] sm:$0xff]   ;;  %v937_v47 = vld [vmem:[%s1186_s1 + $0x110] sm:$0xff]   ;;  %v939_v48 = vld [vmem:[%s1186_s1 + $0x158] sm:$0xff]  }
  0x10   :  { %804 = vmatpush3.bf16.msra.mxu0 %v908_v15  ;;  %v941_v49 = vld [vmem:[%s1186_s1 + $0x198] sm:$0xff]   ;;  %v942_v51 = vld [vmem:[%s1186_s1 + $0x160] sm:$0xff]   ;;  %v945_v54 = vld [vmem:[%s1186_s1 + $0x168] sm:$0xff]  }
  0x11   :  { %826 = vmatpush3.bf16.msra.mxu1 %v909_v16  ;;  %805 = vmatprep.subr.bf16.mxu0 %v910_v17  ;;  %v940_v50 = vld [vmem:[%s1186_s1 + $0x118] sm:$0xff]   ;;  %v944_v52 = vld [vmem:[%s1186_s1 + $0x1a0] sm:$0xff]   ;;  %v947_v55 = vld [vmem:[%s1186_s1 + $0x1a8] sm:$0xff]  }
  0x12   :  { %827 = vmatprep.subr.bf16.mxu1 %v911_v18  ;;  %v943_v53 = vld [vmem:[%s1186_s1 + $0x120] sm:$0xff]   ;;  %v946_v56 = vld [vmem:[%s1186_s1 + $0x128] sm:$0xff]   ;;  %v948_v57 = vld [vmem:[%s1186_s1 + $0x170] sm:$0xff]  }
  0x13   :  { %v26_v58 = vld [vmem:[%s1187_s0 + $0x10] sm:$0xff]  ;;  %v951_v62 = vld [vmem:[%s1186_s1 + $0x178] sm:$0xff]   ;;  %v673_v38 = vld [vmem:[#allocation3] sm:$0x1] }
  0x14   :  { %806 = vmatpush3.bf16.msra.mxu0 %v912_v19  ;;  %v737_v59 = vcombine.high %v26_v58, %v26_v58  ;;  %v950_v60 = vld [vmem:[%s1186_s1 + $0x1b0] sm:$0xff]   ;;  %v955_v63 = vld [vmem:[%s1186_s1 + $0x1b8] sm:$0xff]   ;;  %v736_v3 = vcombine.low %v26_v58, %v26_v58 }
  0x15   :  { %828 = vmatpush3.bf16.msra.mxu1 %v913_v20  ;;  %807 = vmatprep.subr.bf16.mxu0 %v914_v21  ;;  %v949_v61 = vld [vmem:[%s1186_s1 + $0x130] sm:$0xff]   ;;  %v952_v0 = vld [vmem:[%s1186_s1 + $0x138] sm:$0xff]  }
  0x16   :  { %829 = vmatprep.subr.bf16.mxu1 %v915_v22  ;;  %v956_v2 = vld [vmem:[%s1187_s0 + $0x18] ss:$0 sps:$4 sm:$0xff]  }
  0x18   :  { %808 = vmatpush3.bf16.msra.mxu0 %v916_v23 }
  0x19   :  { %830 = vmatpush3.bf16.msra.mxu1 %v917_v24  ;;  %809 = vmatprep.subr.bf16.mxu0 %v918_v25 }
  0x1a   :  { %831 = vmatprep.subr.bf16.mxu1 %v919_v26 }
  0x1c   :  { %810 = vmatpush3.bf16.msra.mxu0 %v920_v27 }
  0x1d   :  { %832 = vmatpush3.bf16.msra.mxu1 %v921_v28  ;;  %811 = vmatprep.subr.bf16.mxu0 %v922_v29 }
  0x1e   :  { %833 = vmatprep.subr.bf16.mxu1 %v923_v30 }
  0x20   :  { %812 = vmatpush3.bf16.msra.mxu0 %v924_v31 }
  0x21   :  { %834 = vmatpush3.bf16.msra.mxu1 %v925_v32  ;;  %841 = vmatprep.subr.bf16.mxu0 %v930_v39 }
  0x22   :  { %872 = vmatprep.subr.bf16.mxu1 %v959_v1 }
  0x23   :  { %534 = vmatmul.mubr.bf16.vlgmr.msra.gmra.mrb[0].mxu0 %v732_v35  ;;  %v664_v35 = vld [vmem:[#allocation2] sm:$0x1] }
  0x24   :  { %574 = vmatmul.mubr.bf16.vlgmr.msra.gmra.mrb[0].mxu1 %v734_v37  ;;  %842 = vmatpush3.bf16.msra.mxu0 %v931_v40 }
  0x25   :  { %873 = vmatpush3.bf16.msra.mxu1 %v932_v41  ;;  %843 = vmatprep.subr.bf16.mxu0 %v933_v42 }
  0x26   :  { %874 = vmatprep.subr.bf16.mxu1 %v959_v1  ;;  %888 = vmatprep.mubr.msk.bf16.mxu1 %vm960_vm0, %v959_v1 }
  0x27   :  { %613 = vmatprep.mubr.bf16.mxu0 %v737_v59  ;;  %v796_v59 = vld [vmem:[%s1189_s3] ss:$0 sm:$0xff] }
  0x28   :  { %844 = vmatpush3.bf16.msra.mxu0 %v934_v43 }
  0x29   :  { %875 = vmatpush3.bf16.msra.mxu1 %v935_v44  ;;  %845 = vmatprep.subr.bf16.mxu0 %v936_v45 }
  0x2a   :  { %876 = vmatprep.subr.bf16.mxu1 %v959_v1 }
  0x2c   :  { %846 = vmatpush3.bf16.msra.mxu0 %v937_v47 }
  0x2d   :  { %877 = vmatpush3.bf16.msra.mxu1 %v938_v46  ;;  %847 = vmatprep.subr.bf16.mxu0 %v939_v48  ;;  %v697_v48 = vlaneseq }
  0x2e   :  { %878 = vmatprep.subr.bf16.mxu1 %v959_v1 }
  0x30   :  { %848 = vmatpush3.bf16.msra.mxu0 %v940_v50 }
  0x31   :  { %879 = vmatpush3.bf16.msra.mxu1 %v941_v49  ;;  %849 = vmatprep.subr.bf16.mxu0 %v942_v51  ;;  %v698_v51 = vshrl.u32 %v697_v48, 7 }
  0x32   :  { %880 = vmatprep.subr.bf16.mxu1 %v959_v1 }
  0x34   :  { %850 = vmatpush3.bf16.msra.mxu0 %v943_v53 }
  0x35   :  { %881 = vmatpush3.bf16.msra.mxu1 %v944_v52  ;;  %851 = vmatprep.subr.bf16.mxu0 %v945_v54  ;;  %v699_v52 = vsub.s32 0, %v698_v51 }
  0x36   :  { %882 = vmatprep.subr.bf16.mxu1 %v959_v1 }
  0x38   :  { %852 = vmatpush3.bf16.msra.mxu0 %v946_v56 }
  0x39   :  { %883 = vmatpush3.bf16.msra.mxu1 %v947_v55  ;;  %853 = vmatprep.subr.bf16.mxu0 %v948_v57  ;;  %v795_v57 = vld [vmem:[%s1188_s2] ss:$0 sm:$0xff] }
  0x3a   :  { %884 = vmatprep.subr.bf16.mxu1 %v959_v1 }
  0x3c   :  { %854 = vmatpush3.bf16.msra.mxu0 %v949_v61 }
  0x3d   :  { %885 = vmatpush3.bf16.msra.mxu1 %v950_v60  ;;  %855 = vmatprep.subr.bf16.mxu0 %v951_v62 }
  0x3e   :  { %886 = vmatprep.subr.bf16.mxu1 %v959_v1 }
  0x40   :  { %856 = vmatpush3.bf16.msra.mxu0 %v952_v0 }
  0x41   :  { %887 = vmatpush3.bf16.msra.mxu1 %v955_v63 }
  0x43   :  { %614 = vmatmul.mubr.bf16.vlgmr.msra.gmra.mrb[4].mxu0 %v736_v3 }
  0x44   :  { %889 = vmatmul.mubr.bf16.vlgmr.msra.gmra.mrb[4].mxu1 %v956_v2 }
  0xf6   :  { %v813_v4 = vpop.f32.mrb[0].mxu0 }
  0xf7   :  { %v835_v5 = vpop.f32.mrb[0].mxu1  ;;  %v814_v6 = vpop.f32.mrb[1].mxu0 }
  0xf8   :  { %v836_v7 = vpop.f32.mrb[1].mxu1  ;;  %v815_v8 = vadd.f32 %v814_v6, %v813_v4  ;;  %v816_v10 = vpop.f32.mrb[2].mxu0 }
  0xf9   :  { %v837_v9 = vadd.f32 %v836_v7, %v835_v5  ;;  %v838_v11 = vpop.f32.mrb[2].mxu1  ;;  %v817_v12 = vpop.f32.mrb[3].mxu0 }
  0xfa   :  { %v839_v1 = vpop.f32.mrb[3].mxu1 }
  0xfb   :  { %v576_v13 = vadd.f32 %v837_v9, %v815_v8 }
 0x116   :  { %v857_v15 = vpop.f32.mrb[4].mxu0 }
 0x117   :  { %v655_v14 = vpop.f32.mrb[4].mxu1  ;;  %v858_v17 = vpop.f32.mrb[5].mxu0 }
 0x118   :  { %v890_v16 = vpop.f32.mrb[5].mxu1  ;;  %v859_v19 = vadd.f32 %v858_v17, %v857_v15  ;;  %v860_v20 = vpop.f32.mrb[6].mxu0 }
 0x119   :  { %v658_v18 = vpop.f32.mrb[6].mxu1  ;;  %v861_v22 = vpop.f32.mrb[7].mxu0 }
 0x11a   :  { %v891_v21 = vpop.f32.mrb[7].mxu1  ;;  %v616_v23 = vadd.f32 %v859_v19, %v576_v13 }
 0x11c   :  { %v656_v24 = vadd.f32 %v655_v14, %v616_v23 }
 0x11e   :  { %v665_v25 = vrot.slane %v656_v24, 4  ;;  %v674_v26 = vmul.f32 %v656_v24, %v656_v24 }
 0x120   :  { %v666_v27 = vadd.f32 %v665_v25, %v656_v24  ;;  %v675_v28 = vrot.slane %v674_v26, 4 }
 0x122   :  { %v667_v29 = vrot.slane %v666_v27, 2  ;;  %v676_v30 = vadd.f32 %v675_v28, %v674_v26 }
 0x124   :  { %v668_v31 = vadd.f32 %v667_v29, %v666_v27  ;;  %v677_v32 = vrot.slane %v676_v30, 2 }
 0x126   :  { %v669_v33 = vrot.slane %v668_v31, 1  ;;  %v678_v34 = vadd.f32 %v677_v32, %v676_v30 }
 0x128   :  { %v670_v36 = vadd.f32 %v669_v33, %v668_v31  ;;  %v679_v37 = vrot.slane %v678_v34, 1 }
 0x12a   :  { %v671_v39 = vadd.f32 %v670_v36, %v664_v35  ;;  %v680_v40 = vadd.f32 %v679_v37, %v678_v34 }
 0x12c   :  { %672 = vst [vmem:[#allocation2] sm:$0x1] %v671_v39  ;;  %v681_v41 = vadd.f32 %v680_v40, %v673_v38 }
 0x12e   :  { %682 = vst [vmem:[#allocation3] sm:$0x1] %v681_v41 }
 0x133   :  { %v686_v42 = vld [vmem:[#allocation2] sm:$0x1] }
 0x134   :  { %v688_v43 = vmul.f32 0.5, %v686_v42 }
 0x135   :  { %v687_v44 = vld [vmem:[#allocation3] sm:$0x1] }
 0x136   :  { %v689_v45 = vmul.f32 0.5, %v687_v44  ;;  %v690_v46 = vmul.f32 %v688_v43, %v688_v43  ;;  %v700_v53 = vrot.slane %v688_v43, %v699_v52 }
 0x138   :  { %v691_v47 = vsub.f32 %v689_v45, %v690_v46  ;;  %v702_v55 = vsub.f32 %v656_v24, %v700_v53 }
 0x13a   :  { %v692_v49 = vmax.f32 %v691_v47, 0.0 }
 0x13c   :  { %v693_v50 = vadd.f32 1e-05, %v692_v49 }
 0x13e   :  { %957 = vrsqrt.f32 %v693_v50 }
 0x148   :  { %v958_v54 = vpop.eup %957 }
 0x149   :  { %v707_v56 = vrot.slane %v958_v54, %v699_v52 }
 0x14b   :  { %v709_v58 = vmul.f32 %v707_v56, %v702_v55 }
 0x14d   :  { %v717_v60 = vmul.f32 %v795_v57, %v709_v58 }
 0x14f   :  { %v725_v61 = vadd.f32 %v796_v59, %v717_v60 }
 0x151   :  { %v726_v62 = vmax.f32 %v725_v61, 0.0 }
 0x153   :  { %727 = vst [vmem:[%s1190_s4] sm:$0xff] %v726_v62 }

// kernel: backbone_forward.76
= control target key start
LH: loop header
LB: loop body
LE: loop exit
PB: predicated region body
PF: predicated region fallthrough
CT: control target
= control target key end

     0   :  { %v251_v0 = vmov 0.0   ;;  %vm252_vm0 = vmmov 0   ;;  %v165_v37 = vlaneseq  ;;  %s314_s1 = inlined_call_operand.vmem [shape: bf16[128,128], index: 1, kind: input, shape index: {}]   ;;  %s315_s0 = inlined_call_operand.vmem [shape: bf16[8,128], index: 0, kind: input, shape index: {}]   ;;  %s316_s2 = inlined_call_operand.vmem [shape: f32[1,128], index: 2, kind: input, shape index: {}]   ;;  %s317_s3 = inlined_call_operand.vmem [shape: f32[1,128], index: 3, kind: input, shape index: {}]   ;;  %s318_s4 = inlined_call_operand.vmem [shape: f32[8,128], index: 4, kind: output, shape index: {}]  }
   0x1   :  { %219 = vmatprep.subr.bf16.mxu0 %v251_v0  ;;  %22 = vst [vmem:[#allocation2] sm:$0x1] %v251_v0  ;;  %23 = vst [vmem:[#allocation3] sm:$0x1] %v251_v0  ;;  %v241_v1 = vld [vmem:[%s314_s1] sm:$0xff]   ;;  %235 = vmatprep.mubr.msk.bf16.mxu0 %vm252_vm0, %v251_v0  ;;  %v242_v2 = vld [vmem:[%s314_s1 + $0x8] sm:$0xff]  }
   0x2   :  { %220 = vmatpush3.bf16.msra.mxu0 %v241_v1  ;;  %v243_v3 = vld [vmem:[%s314_s1 + $0x10] sm:$0xff]   ;;  %v244_v4 = vld [vmem:[%s314_s1 + $0x18] sm:$0xff]   ;;  %v245_v5 = vld [vmem:[%s314_s1 + $0x20] sm:$0xff]   ;;  %v166_v40 = vshrl.u32 %v165_v37, 7 }
   0x3   :  { %221 = vmatprep.subr.bf16.mxu0 %v251_v0  ;;  %v246_v6 = vld [vmem:[%s314_s1 + $0x28] sm:$0xff]   ;;  %v247_v7 = vld [vmem:[%s314_s1 + $0x30] sm:$0xff]   ;;  %v248_v8 = vld [vmem:[%s314_s1 + $0x38] sm:$0xff]  }
   0x4   :  { %v24_v9 = vld [vmem:[%s315_s0] sm:$0xf]  ;;  %v167_v41 = vsub.s32 0, %v166_v40 }
   0x5   :  { %v208_v46 = vld [vmem:[%s316_s2] ss:$0 sm:$0xff] }
   0x6   :  { %222 = vmatpush3.bf16.msra.mxu0 %v242_v2  ;;  %v209_v48 = vld [vmem:[%s317_s3] ss:$0 sm:$0xff] }
   0x7   :  { %223 = vmatprep.subr.bf16.mxu0 %v251_v0 }
   0x8   :  { %v132_v24 = vld [vmem:[#allocation2] sm:$0x1]  ;;  %v141_v27 = vld [vmem:[#allocation3] sm:$0x1] }
   0xa   :  { %224 = vmatpush3.bf16.msra.mxu0 %v243_v3 }
   0xb   :  { %225 = vmatprep.subr.bf16.mxu0 %v251_v0 }
   0xe   :  { %226 = vmatpush3.bf16.msra.mxu0 %v244_v4 }
   0xf   :  { %227 = vmatprep.subr.bf16.mxu0 %v251_v0 }
  0x12   :  { %228 = vmatpush3.bf16.msra.mxu0 %v245_v5 }
  0x13   :  { %229 = vmatprep.subr.bf16.mxu0 %v251_v0 }
  0x16   :  { %230 = vmatpush3.bf16.msra.mxu0 %v246_v6 }
  0x17   :  { %231 = vmatprep.subr.bf16.mxu0 %v251_v0 }
  0x1a   :  { %232 = vmatpush3.bf16.msra.mxu0 %v247_v7 }
  0x1b   :  { %233 = vmatprep.subr.bf16.mxu0 %v251_v0 }
  0x1e   :  { %234 = vmatpush3.bf16.msra.mxu0 %v248_v8 }
  0x21   :  { %236 = vmatmul.mubr.bf16.vlgmr.msra.gmra.mrb[0].mxu0 %v24_v9 }
  0xf4   :  { %v123_v10 = vpop.f32.mrb[0].mxu0 }
  0xf5   :  { %v133_v11 = vrot.slane %v123_v10, 4  ;;  %v142_v12 = vmul.f32 %v123_v10, %v123_v10  ;;  %v237_v13 = vpop.f32.mrb[1].mxu0 }
  0xf6   :  { %v126_v14 = vpop.f32.mrb[2].mxu0 }
  0xf7   :  { %v134_v15 = vadd.f32 %v133_v11, %v123_v10  ;;  %v143_v16 = vrot.slane %v142_v12, 4  ;;  %v238_v17 = vpop.f32.mrb[3].mxu0 }
  0xf9   :  { %v135_v18 = vrot.slane %v134_v15, 2  ;;  %v144_v19 = vadd.f32 %v143_v16, %v142_v12 }
  0xfb   :  { %v136_v20 = vadd.f32 %v135_v18, %v134_v15  ;;  %v145_v21 = vrot.slane %v144_v19, 2 }
  0xfd   :  { %v137_v22 = vrot.slane %v136_v20, 1  ;;  %v146_v23 = vadd.f32 %v145_v21, %v144_v19 }
  0xff   :  { %v138_v25 = vadd.f32 %v137_v22, %v136_v20  ;;  %v147_v26 = vrot.slane %v146_v23, 1 }
 0x101   :  { %v139_v28 = vadd.f32 %v138_v25, %v132_v24  ;;  %v148_v29 = vadd.f32 %v147_v26, %v146_v23 }
 0x103   :  { %140 = vst [vmem:[#allocation2] sm:$0x1] %v139_v28  ;;  %v149_v30 = vadd.f32 %v148_v29, %v141_v27 }
 0x105   :  { %150 = vst [vmem:[#allocation3] sm:$0x1] %v149_v30 }
 0x10a   :  { %v154_v31 = vld [vmem:[#allocation2] sm:$0x1] }
 0x10b   :  { %v156_v32 = vmul.f32 0.5, %v154_v31 }
 0x10c   :  { %v155_v33 = vld [vmem:[#allocation3] sm:$0x1] }
 0x10d   :  { %v157_v34 = vmul.f32 0.5, %v155_v33  ;;  %v158_v35 = vmul.f32 %v156_v32, %v156_v32  ;;  %v168_v42 = vrot.slane %v156_v32, %v167_v41 }
 0x10f   :  { %v159_v36 = vsub.f32 %v157_v34, %v158_v35  ;;  %v170_v44 = vsub.f32 %v123_v10, %v168_v42 }
 0x111   :  { %v160_v38 = vmax.f32 %v159_v36, 0.0 }
 0x113   :  { %v161_v39 = vadd.f32 1e-05, %v160_v38 }
 0x115   :  { %249 = vrsqrt.f32 %v161_v39 }
 0x11f   :  { %v250_v43 = vpop.eup %249 }
 0x120   :  { %v175_v45 = vrot.slane %v250_v43, %v167_v41 }
 0x122   :  { %v177_v47 = vmul.f32 %v175_v45, %v170_v44 }
 0x124   :  { %v185_v49 = vmul.f32 %v208_v46, %v177_v47 }
 0x126   :  { %v193_v50 = vadd.f32 %v209_v48, %v185_v49 }
 0x128   :  { %v194_v51 = vmax.f32 %v193_v50, 0.0 }
 0x12a   :  { %195 = vst [vmem:[%s318_s4] sm:$0xff] %v194_v51 }

// kernel: backbone_forward.75
= control target key start
LH: loop header
LB: loop body
LE: loop exit
PB: predicated region body
PF: predicated region fallthrough
CT: control target
= control target key end

     0   :  { %v251_v0 = vmov 0.0   ;;  %vm252_vm0 = vmmov 0   ;;  %v165_v37 = vlaneseq  ;;  %s314_s1 = inlined_call_operand.vmem [shape: bf16[128,128], index: 1, kind: input, shape index: {}]   ;;  %s315_s0 = inlined_call_operand.vmem [shape: bf16[8,128], index: 0, kind: input, shape index: {}]   ;;  %s316_s2 = inlined_call_operand.vmem [shape: f32[1,128], index: 2, kind: input, shape index: {}]   ;;  %s317_s3 = inlined_call_operand.vmem [shape: f32[1,128], index: 3, kind: input, shape index: {}]   ;;  %s318_s4 = inlined_call_operand.vmem [shape: f32[8,128], index: 4, kind: output, shape index: {}]  }
   0x1   :  { %219 = vmatprep.subr.bf16.mxu0 %v251_v0  ;;  %22 = vst [vmem:[#allocation2] sm:$0x1] %v251_v0  ;;  %23 = vst [vmem:[#allocation3] sm:$0x1] %v251_v0  ;;  %v241_v1 = vld [vmem:[%s314_s1] sm:$0xff]   ;;  %235 = vmatprep.mubr.msk.bf16.mxu0 %vm252_vm0, %v251_v0  ;;  %v242_v2 = vld [vmem:[%s314_s1 + $0x8] sm:$0xff]  }
   0x2   :  { %220 = vmatpush3.bf16.msra.mxu0 %v241_v1  ;;  %v243_v3 = vld [vmem:[%s314_s1 + $0x10] sm:$0xff]   ;;  %v244_v4 = vld [vmem:[%s314_s1 + $0x18] sm:$0xff]   ;;  %v245_v5 = vld [vmem:[%s314_s1 + $0x20] sm:$0xff]   ;;  %v166_v40 = vshrl.u32 %v165_v37, 7 }
   0x3   :  { %221 = vmatprep.subr.bf16.mxu0 %v251_v0  ;;  %v246_v6 = vld [vmem:[%s314_s1 + $0x28] sm:$0xff]   ;;  %v247_v7 = vld [vmem:[%s314_s1 + $0x30] sm:$0xff]   ;;  %v248_v8 = vld [vmem:[%s314_s1 + $0x38] sm:$0xff]  }
   0x4   :  { %v24_v9 = vld [vmem:[%s315_s0] sm:$0xf]  ;;  %v167_v41 = vsub.s32 0, %v166_v40 }
   0x5   :  { %v208_v46 = vld [vmem:[%s316_s2] ss:$0 sm:$0xff] }
   0x6   :  { %222 = vmatpush3.bf16.msra.mxu0 %v242_v2  ;;  %v209_v48 = vld [vmem:[%s317_s3] ss:$0 sm:$0xff] }
   0x7   :  { %223 = vmatprep.subr.bf16.mxu0 %v251_v0 }
   0x8   :  { %v132_v24 = vld [vmem:[#allocation2] sm:$0x1]  ;;  %v141_v27 = vld [vmem:[#allocation3] sm:$0x1] }
   0xa   :  { %224 = vmatpush3.bf16.msra.mxu0 %v243_v3 }
   0xb   :  { %225 = vmatprep.subr.bf16.mxu0 %v251_v0 }
   0xe   :  { %226 = vmatpush3.bf16.msra.mxu0 %v244_v4 }
   0xf   :  { %227 = vmatprep.subr.bf16.mxu0 %v251_v0 }
  0x12   :  { %228 = vmatpush3.bf16.msra.mxu0 %v245_v5 }
  0x13   :  { %229 = vmatprep.subr.bf16.mxu0 %v251_v0 }
  0x16   :  { %230 = vmatpush3.bf16.msra.mxu0 %v246_v6 }
  0x17   :  { %231 = vmatprep.subr.bf16.mxu0 %v251_v0 }
  0x1a   :  { %232 = vmatpush3.bf16.msra.mxu0 %v247_v7 }
  0x1b   :  { %233 = vmatprep.subr.bf16.mxu0 %v251_v0 }
  0x1e   :  { %234 = vmatpush3.bf16.msra.mxu0 %v248_v8 }
  0x21   :  { %236 = vmatmul.mubr.bf16.vlgmr.msra.gmra.mrb[0].mxu0 %v24_v9 }
  0xf4   :  { %v123_v10 = vpop.f32.mrb[0].mxu0 }
  0xf5   :  { %v133_v11 = vrot.slane %v123_v10, 4  ;;  %v142_v12 = vmul.f32 %v123_v10, %v123_v10  ;;  %v237_v13 = vpop.f32.mrb[1].mxu0 }
  0xf6   :  { %v126_v14 = vpop.f32.mrb[2].mxu0 }
  0xf7   :  { %v134_v15 = vadd.f32 %v133_v11, %v123_v10  ;;  %v143_v16 = vrot.slane %v142_v12, 4  ;;  %v238_v17 = vpop.f32.mrb[3].mxu0 }
  0xf9   :  { %v135_v18 = vrot.slane %v134_v15, 2  ;;  %v144_v19 = vadd.f32 %v143_v16, %v142_v12 }
  0xfb   :  { %v136_v20 = vadd.f32 %v135_v18, %v134_v15  ;;  %v145_v21 = vrot.slane %v144_v19, 2 }
  0xfd   :  { %v137_v22 = vrot.slane %v136_v20, 1  ;;  %v146_v23 = vadd.f32 %v145_v21, %v144_v19 }
  0xff   :  { %v138_v25 = vadd.f32 %v137_v22, %v136_v20  ;;  %v147_v26 = vrot.slane %v146_v23, 1 }
 0x101   :  { %v139_v28 = vadd.f32 %v138_v25, %v132_v24  ;;  %v148_v29 = vadd.f32 %v147_v26, %v146_v23 }
 0x103   :  { %140 = vst [vmem:[#allocation2] sm:$0x1] %v139_v28  ;;  %v149_v30 = vadd.f32 %v148_v29, %v141_v27 }
 0x105   :  { %150 = vst [vmem:[#allocation3] sm:$0x1] %v149_v30 }
 0x10a   :  { %v154_v31 = vld [vmem:[#allocation2] sm:$0x1] }
 0x10b   :  { %v156_v32 = vmul.f32 0.125, %v154_v31 }
 0x10c   :  { %v155_v33 = vld [vmem:[#allocation3] sm:$0x1] }
 0x10d   :  { %v157_v34 = vmul.f32 0.125, %v155_v33  ;;  %v158_v35 = vmul.f32 %v156_v32, %v156_v32  ;;  %v168_v42 = vrot.slane %v156_v32, %v167_v41 }
 0x10f   :  { %v159_v36 = vsub.f32 %v157_v34, %v158_v35  ;;  %v170_v44 = vsub.f32 %v123_v10, %v168_v42 }
 0x111   :  { %v160_v38 = vmax.f32 %v159_v36, 0.0 }
 0x113   :  { %v161_v39 = vadd.f32 1e-05, %v160_v38 }
 0x115   :  { %249 = vrsqrt.f32 %v161_v39 }
 0x11f   :  { %v250_v43 = vpop.eup %249 }
 0x120   :  { %v175_v45 = vrot.slane %v250_v43, %v167_v41 }
 0x122   :  { %v177_v47 = vmul.f32 %v175_v45, %v170_v44 }
 0x124   :  { %v185_v49 = vmul.f32 %v208_v46, %v177_v47 }
 0x126   :  { %v193_v50 = vadd.f32 %v209_v48, %v185_v49 }
 0x128   :  { %v194_v51 = vmax.f32 %v193_v50, 0.0 }
 0x12a   :  { %195 = vst [vmem:[%s318_s4] sm:$0xff] %v194_v51 }

// kernel: backbone_forward.74
= control target key start
LH: loop header
LB: loop body
LE: loop exit
PB: predicated region body
PF: predicated region fallthrough
CT: control target
= control target key end

     0   :  { %v482_v1 = vmov 0   ;;  %v22_v19 = vlaneseq  ;;  %v483_v21 = vmov 0.0   ;;  %v484_v55 = vmov 1966171168   ;;  %s654_s1 = inlined_call_operand.vmem [shape: bf16[128,256], index: 1, kind: input, shape index: {}]   ;;  %s655_s0 = inlined_call_operand.vmem [shape: bf16[32,128], index: 0, kind: input, shape index: {}]   ;;  %s656_s2 = inlined_call_operand.vmem [shape: f32[1,256], index: 2, kind: input, shape index: {}]   ;;  %s657_s3 = inlined_call_operand.vmem [shape: f32[1,256], index: 3, kind: input, shape index: {}]   ;;  %s658_s4 = inlined_call_operand.vmem [shape: f32[32,256], index: 4, kind: output, shape index: {}]  }
   0x1   :  { %v454_v0 = vld [vmem:[%s654_s1 + $0x4] ss:$8 sps:$4 sm:$0xff]   ;;  %172 = vmatprep.mubr.bf16.mxu0 %v482_v1  ;;  %182 = vmatprep.mubr.bf16.mxu1 %v482_v1  ;;  %v456_v2 = vld [vmem:[%s654_s1] ss:$8 sps:$4 sm:$0xff]   ;;  %v457_v3 = vld [vmem:[%s654_s1 + $0x14] ss:$8 sps:$4 sm:$0xff]   ;;  %v230_v56 = vunpack.c.l.s4 %v484_v55 }
   0x2   :  { %140 = vmatprep.subr.bf16.mxu0 %v454_v0  ;;  %435 = vmatprep.subr.bf16.mxu1 %v454_v0  ;;  %v459_v4 = vld [vmem:[%s654_s1 + $0x10] ss:$8 sps:$4 sm:$0xff]   ;;  %v460_v5 = vld [vmem:[%s654_s1 + $0x24] ss:$8 sps:$4 sm:$0xff]   ;;  %v462_v6 = vld [vmem:[%s654_s1 + $0x20] ss:$8 sps:$4 sm:$0xff]  }
   0x3   :  { %141 = vmatpush1.bf16.msra.mxu0 %v456_v2  ;;  %443 = vmatpush1.bf16.msra.mxu1 %v456_v2  ;;  %v463_v7 = vld [vmem:[%s654_s1 + $0x34] ss:$8 sps:$4 sm:$0xff]   ;;  %v465_v8 = vld [vmem:[%s654_s1 + $0x30] ss:$8 sps:$4 sm:$0xff]   ;;  %v466_v9 = vld [vmem:[%s654_s1 + $0x44] ss:$8 sps:$4 sm:$0xff]   ;;  %v231_v1 = vunpack.c.0.s8 %v230_v56 }
   0x4   :  { %142 = vmatprep.subr.bf16.mxu0 %v457_v3  ;;  %436 = vmatprep.subr.bf16.mxu1 %v457_v3  ;;  %v468_v10 = vld [vmem:[%s654_s1 + $0x40] ss:$8 sps:$4 sm:$0xff]   ;;  %v469_v11 = vld [vmem:[%s654_s1 + $0x54] ss:$8 sps:$4 sm:$0xff]   ;;  %v471_v12 = vld [vmem:[%s654_s1 + $0x50] ss:$8 sps:$4 sm:$0xff]  }
   0x5   :  { %v472_v13 = vld [vmem:[%s654_s1 + $0x64] ss:$8 sps:$4 sm:$0xff]   ;;  %v474_v14 = vld [vmem:[%s654_s1 + $0x60] ss:$8 sps:$4 sm:$0xff]   ;;  %v475_v15 = vld [vmem:[%s654_s1 + $0x74] ss:$8 sps:$4 sm:$0xff]  }
   0x6   :  { %v477_v16 = vld [vmem:[%s654_s1 + $0x70] ss:$8 sps:$4 sm:$0xff]   ;;  %v478_v17 = vld [vmem:[%s655_s0] sm:$0xff]   ;;  %v479_v18 = vld [vmem:[%s655_s0 + $0x8] sm:$0xff]   ;;  %vm564_vm0 = vcmp.lt.s32.totalorder %v22_v19, 256  ;;  %v233_v2 = vshrl.u32 %v22_v19, 7 }
   0x7   :  { %143 = vmatpush1.bf16.msra.mxu0 %v459_v4  ;;  %444 = vmatpush1.bf16.msra.mxu1 %v459_v4  ;;  %26 = vst.msk [vmem:[#allocation2] sm:$0x3] %vm564_vm0, %v483_v21  ;;  %27 = vst.msk [vmem:[#allocation3] sm:$0x3] %vm564_vm0, %v483_v21 }
   0x8   :  { %144 = vmatprep.subr.bf16.mxu0 %v460_v5  ;;  %437 = vmatprep.subr.bf16.mxu1 %v460_v5 }
   0xb   :  { %145 = vmatpush1.bf16.msra.mxu0 %v462_v6  ;;  %445 = vmatpush1.bf16.msra.mxu1 %v462_v6 }
   0xc   :  { %146 = vmatprep.subr.bf16.mxu0 %v463_v7  ;;  %438 = vmatprep.subr.bf16.mxu1 %v463_v7 }
   0xf   :  { %147 = vmatpush1.bf16.msra.mxu0 %v465_v8  ;;  %446 = vmatpush1.bf16.msra.mxu1 %v465_v8 }
  0x10   :  { %148 = vmatprep.subr.bf16.mxu0 %v466_v9  ;;  %439 = vmatprep.subr.bf16.mxu1 %v466_v9 }
  0x13   :  { %149 = vmatpush1.bf16.msra.mxu0 %v468_v10  ;;  %447 = vmatpush1.bf16.msra.mxu1 %v468_v10 }
  0x14   :  { %150 = vmatprep.subr.bf16.mxu0 %v469_v11  ;;  %440 = vmatprep.subr.bf16.mxu1 %v469_v11  ;;  %v234_v11 = vsub.s32 %v231_v1, %v233_v2 }
  0x17   :  { %151 = vmatpush1.bf16.msra.mxu0 %v471_v12  ;;  %448 = vmatpush1.bf16.msra.mxu1 %v471_v12 }
  0x18   :  { %152 = vmatprep.subr.bf16.mxu0 %v472_v13  ;;  %441 = vmatprep.subr.bf16.mxu1 %v472_v13 }
  0x1b   :  { %153 = vmatpush1.bf16.msra.mxu0 %v474_v14  ;;  %449 = vmatpush1.bf16.msra.mxu1 %v474_v14 }
  0x1c   :  { %154 = vmatprep.subr.bf16.mxu0 %v475_v15  ;;  %442 = vmatprep.subr.bf16.mxu1 %v475_v15 }
  0x1f   :  { %155 = vmatpush1.bf16.msra.mxu0 %v477_v16  ;;  %450 = vmatpush1.bf16.msra.mxu1 %v477_v16 }
  0x22   :  { %173 = vmatmul.mubr.bf16.vlgmr.msra.gmra.mrb[0].mxu0 %v478_v17  ;;  %183 = vmatmul.mubr.bf16.vlgmr.msra.gmra.mrb[0].mxu1 %v479_v18  ;;  %v207_v18 = vld [vmem:[#allocation2] sm:$0x3] }
  0xf5   :  { %v572_v22 = vpop.f32.mrb[0].mxu0  ;;  %v574_v23 = vpop.f32.mrb[0].mxu1 }
  0xf6   :  { %v576_v24 = vpop.f32.mrb[1].mxu0  ;;  %v578_v25 = vpop.f32.mrb[1].mxu1  ;;  %v251_v28 = vmul.f32 %v572_v22, %v572_v22  ;;  %v255_v29 = vmul.f32 %v574_v23, %v574_v23 }
  0xf7   :  { %v580_v26 = vpop.f32.mrb[2].mxu0  ;;  %v582_v27 = vpop.f32.mrb[2].mxu1  ;;  %v252_v34 = vmul.f32 %v576_v24, %v576_v24  ;;  %v256_v35 = vmul.f32 %v578_v25, %v578_v25 }
  0xf8   :  { %v208_v30 = vadd.f32 %v580_v26, %v572_v22  ;;  %v253_v31 = vmul.f32 %v580_v26, %v580_v26  ;;  %v592_v32 = vpop.f32.mrb[3].mxu0  ;;  %v594_v33 = vpop.f32.mrb[3].mxu1  ;;  %v257_v43 = vmul.f32 %v582_v27, %v582_v27 }
  0xf9   :  { %v217_v36 = vadd.f32 %v592_v32, %v576_v24  ;;  %v254_v37 = vmul.f32 %v592_v32, %v592_v32  ;;  %v258_v46 = vmul.f32 %v594_v33, %v594_v33 }
  0xfa   :  { %v259_v38 = vadd.f32 %v253_v31, %v251_v28  ;;  %v209_v39 = vadd.f32 %v208_v30, %v574_v23 }
  0xfb   :  { %v268_v40 = vadd.f32 %v254_v37, %v252_v34  ;;  %v218_v41 = vadd.f32 %v217_v36, %v578_v25  ;;  %v320_v34 = vsub.s32 0, %v233_v2 }
  0xfc   :  { %v210_v42 = vadd.f32 %v209_v39, %v582_v27  ;;  %v260_v44 = vadd.f32 %v259_v38, %v255_v29  ;;  %v250_v29 = vld [vmem:[#allocation3] sm:$0x3] }
  0xfd   :  { %v219_v45 = vadd.f32 %v218_v41, %v594_v33  ;;  %v269_v47 = vadd.f32 %v268_v40, %v256_v35  ;;  %v324_v35 = vsub.s32 1, %v233_v2 }
  0xfe   :  { %v211_v48 = vrot.slane %v210_v42, 4  ;;  %v261_v49 = vadd.f32 %v260_v44, %v257_v43 }
  0xff   :  { %v220_v50 = vrot.slane %v219_v45, 4  ;;  %v270_v51 = vadd.f32 %v269_v47, %v258_v46 }
 0x100   :  { %v212_v52 = vadd.f32 %v211_v48, %v210_v42  ;;  %v262_v53 = vrot.slane %v261_v49, 4 }
 0x101   :  { %v221_v54 = vadd.f32 %v220_v50, %v219_v45  ;;  %v271_v57 = vrot.slane %v270_v51, 4 }
 0x102   :  { %v213_v58 = vrot.slane %v212_v52, 2  ;;  %v263_v59 = vadd.f32 %v262_v53, %v261_v49 }
 0x103   :  { %v222_v60 = vrot.slane %v221_v54, 2  ;;  %v272_v61 = vadd.f32 %v271_v57, %v270_v51 }
 0x104   :  { %v214_v62 = vadd.f32 %v213_v58, %v212_v52  ;;  %v264_v63 = vrot.slane %v263_v59, 2 }
 0x105   :  { %v223_v0 = vadd.f32 %v222_v60, %v221_v54  ;;  %v273_v3 = vrot.slane %v272_v61, 2 }
 0x106   :  { %v215_v4 = vrot.slane %v214_v62, 1  ;;  %v265_v5 = vadd.f32 %v264_v63, %v263_v59 }
 0x107   :  { %v224_v6 = vrot.slane %v223_v0, 1  ;;  %v274_v7 = vadd.f32 %v273_v3, %v272_v61 }
 0x108   :  { %v216_v8 = vadd.f32 %v215_v4, %v214_v62  ;;  %v266_v9 = vrot.slane %v265_v5, 1 }
 0x109   :  { %v225_v10 = vadd.f32 %v224_v6, %v223_v0  ;;  %v275_v12 = vrot.slane %v274_v7, 1 }
 0x10a   :  { %v267_v13 = vadd.f32 %v266_v9, %v265_v5 }
 0x10b   :  { %v228_v14 = vcombine.low %v216_v8, %v225_v10  ;;  %v276_v15 = vadd.f32 %v275_v12, %v274_v7 }
 0x10d   :  { %v235_v16 = vrot.slane %v228_v14, %v234_v11  ;;  %v279_v17 = vcombine.low %v267_v13, %v276_v15 }
 0x10f   :  { %v242_v21 = vrot.slane %v235_v16, %v234_v11  ;;  %v286_v28 = vrot.slane %v279_v17, %v234_v11 }
 0x111   :  { %v244_v19 = vadd.f32 %v242_v21, %v207_v18  ;;  %v293_v30 = vrot.slane %v286_v28, %v234_v11 }
 0x113   :  { %249 = vst.msk [vmem:[#allocation2] sm:$0x3] %vm564_vm0, %v244_v19  ;;  %v295_v31 = vadd.f32 %v293_v30, %v250_v29 }
 0x115   :  { %296 = vst.msk [vmem:[#allocation3] sm:$0x3] %vm564_vm0, %v295_v31 }
 0x11a   :  { %v300_v36 = vld [vmem:[#allocation2] sm:$0x3] }
 0x11b   :  { %v302_v37 = vmul.f32 0.03125, %v300_v36 }
 0x11c   :  { %v301_v38 = vld [vmem:[#allocation3] sm:$0x3] }
 0x11d   :  { %v303_v39 = vmul.f32 0.03125, %v301_v38  ;;  %v304_v40 = vmul.f32 %v302_v37, %v302_v37  ;;  %v321_v41 = vrot.slane %v302_v37, %v320_v34  ;;  %v325_v42 = vrot.slane %v302_v37, %v324_v35 }
 0x11f   :  { %v305_v43 = vsub.f32 %v303_v39, %v304_v40  ;;  %v328_v44 = vsub.f32 %v572_v22, %v321_v41  ;;  %v329_v45 = vsub.f32 %v576_v24, %v325_v42  ;;  %v330_v46 = vsub.f32 %v580_v26, %v321_v41  ;;  %v355_v22 = vld [vmem:[%s656_s2] sm:$0x3] }
 0x120   :  { %v331_v47 = vsub.f32 %v592_v32, %v325_v42  ;;  %v332_v20 = vsub.f32 %v574_v23, %v321_v41  ;;  %v333_v48 = vsub.f32 %v578_v25, %v325_v42  ;;  %v334_v49 = vsub.f32 %v582_v27, %v321_v41  ;;  %v375_v24 = vld [vmem:[%s657_s3] sm:$0x3] }
 0x121   :  { %v306_v50 = vmax.f32 %v305_v43, 0.0  ;;  %v335_v51 = vsub.f32 %v594_v33, %v325_v42  ;;  %v360_v53 = vrot.slane %v355_v22, %v320_v34  ;;  %v364_v25 = vrot.slane %v355_v22, %v324_v35 }
 0x122   :  { %v380_v54 = vrot.slane %v375_v24, %v320_v34  ;;  %v384_v27 = vrot.slane %v375_v24, %v324_v35 }
 0x123   :  { %v307_v52 = vadd.f32 1e-05, %v306_v50 }
 0x125   :  { %480 = vrsqrt.f32 %v307_v52 }
 0x12f   :  { %v481_v26 = vpop.eup %480 }
 0x130   :  { %v340_v32 = vrot.slane %v481_v26, %v320_v34  ;;  %v344_v23 = vrot.slane %v481_v26, %v324_v35 }
 0x132   :  { %v347_v55 = vmul.f32 %v340_v32, %v328_v44  ;;  %v348_v56 = vmul.f32 %v344_v23, %v329_v45  ;;  %v349_v33 = vmul.f32 %v340_v32, %v330_v46  ;;  %v350_v57 = vmul.f32 %v344_v23, %v331_v47 }
 0x133   :  { %v351_v58 = vmul.f32 %v340_v32, %v332_v20  ;;  %v352_v59 = vmul.f32 %v344_v23, %v333_v48  ;;  %v353_v60 = vmul.f32 %v340_v32, %v334_v49  ;;  %v354_v61 = vmul.f32 %v344_v23, %v335_v51 }
 0x134   :  { %v367_v62 = vmul.f32 %v360_v53, %v347_v55  ;;  %v368_v63 = vmul.f32 %v364_v25, %v348_v56  ;;  %v369_v0 = vmul.f32 %v360_v53, %v349_v33  ;;  %v370_v1 = vmul.f32 %v364_v25, %v350_v57 }
 0x135   :  { %v371_v2 = vmul.f32 %v360_v53, %v351_v58  ;;  %v372_v3 = vmul.f32 %v364_v25, %v352_v59  ;;  %v373_v4 = vmul.f32 %v360_v53, %v353_v60  ;;  %v374_v5 = vmul.f32 %v364_v25, %v354_v61 }
 0x136   :  { %v387_v6 = vadd.f32 %v380_v54, %v367_v62  ;;  %v388_v7 = vadd.f32 %v384_v27, %v368_v63  ;;  %v389_v8 = vadd.f32 %v380_v54, %v369_v0  ;;  %v390_v9 = vadd.f32 %v384_v27, %v370_v1 }
 0x137   :  { %v391_v10 = vadd.f32 %v380_v54, %v371_v2  ;;  %v392_v11 = vadd.f32 %v384_v27, %v372_v3  ;;  %v393_v12 = vadd.f32 %v380_v54, %v373_v4  ;;  %v394_v13 = vadd.f32 %v384_v27, %v374_v5 }
 0x138   :  { %v395_v14 = vmax.f32 %v387_v6, 0.0  ;;  %v396_v15 = vmax.f32 %v388_v7, 0.0  ;;  %v397_v16 = vmax.f32 %v389_v8, 0.0  ;;  %v398_v17 = vmax.f32 %v390_v9, 0.0 }
 0x139   :  { %v399_v18 = vmax.f32 %v391_v10, 0.0  ;;  %v400_v21 = vmax.f32 %v392_v11, 0.0  ;;  %v401_v28 = vmax.f32 %v393_v12, 0.0  ;;  %v402_v29 = vmax.f32 %v394_v13, 0.0 }
 0x13a   :  { %403 = vst [vmem:[%s658_s4] sm:$0xff] %v395_v14  ;;  %404 = vst [vmem:[%s658_s4 + $0x8] sm:$0xff] %v396_v15 }
 0x13b   :  { %405 = vst [vmem:[%s658_s4 + $0x10] sm:$0xff] %v397_v16  ;;  %406 = vst [vmem:[%s658_s4 + $0x18] sm:$0xff] %v398_v17 }
 0x13c   :  { %407 = vst [vmem:[%s658_s4 + $0x20] sm:$0xff] %v399_v18  ;;  %408 = vst [vmem:[%s658_s4 + $0x28] sm:$0xff] %v400_v21 }
 0x13d   :  { %409 = vst [vmem:[%s658_s4 + $0x30] sm:$0xff] %v401_v28  ;;  %410 = vst [vmem:[%s658_s4 + $0x38] sm:$0xff] %v402_v29 }

// kernel: backbone_forward.108
= control target key start
LH: loop header
LB: loop body
LE: loop exit
PB: predicated region body
PF: predicated region fallthrough
CT: control target
= control target key end

     0   :  { %s4226_s1 = inlined_call_operand.vmem [shape: bf16[1152,512], index: 1, kind: input, shape index: {}]   ;;  %s4227_s0 = inlined_call_operand.vmem [shape: bf16[8,1152], index: 0, kind: input, shape index: {}]   ;;  %s4228_s2 = inlined_call_operand.vmem [shape: f32[1,512], index: 2, kind: input, shape index: {}]   ;;  %s4229_s3 = inlined_call_operand.vmem [shape: f32[1,512], index: 3, kind: input, shape index: {}]   ;;  %s4230_s4 = inlined_call_operand.vmem [shape: f32[8,512], index: 4, kind: output, shape index: {}]  }
   0x1   :  { %v2785_v0 = vld [vmem:[%s4226_s1 + $0x4] ss:$16 sps:$4 sm:$0xff]   ;;  %v2787_v1 = vld [vmem:[%s4226_s1 + $0xc] ss:$16 sps:$4 sm:$0xff]   ;;  %v2789_v2 = vld [vmem:[%s4226_s1] ss:$16 sps:$4 sm:$0xff]  }
   0x2   :  { %1793 = vmatprep.subr.bf16.mxu0 %v2785_v0  ;;  %v2790_v3 = vld [vmem:[%s4226_s1 + $0x8] ss:$16 sps:$4 sm:$0xff]   ;;  %1998 = vmatprep.subr.bf16.mxu1 %v2787_v1  ;;  %v2791_v4 = vld [vmem:[%s4226_s1 + $0x24] ss:$16 sps:$4 sm:$0xff]   ;;  %v2793_v5 = vld [vmem:[%s4226_s1 + $0x2c] ss:$16 sps:$4 sm:$0xff]  }
   0x3   :  { %1794 = vmatpush1.bf16.msra.mxu0 %v2789_v2  ;;  %1999 = vmatpush1.bf16.msra.mxu1 %v2790_v3  ;;  %v2795_v6 = vld [vmem:[%s4226_s1 + $0x20] ss:$16 sps:$4 sm:$0xff]   ;;  %v2796_v7 = vld [vmem:[%s4226_s1 + $0x28] ss:$16 sps:$4 sm:$0xff]   ;;  %v2797_v8 = vld [vmem:[%s4226_s1 + $0x44] ss:$16 sps:$4 sm:$0xff]  }
   0x4   :  { %1795 = vmatprep.subr.bf16.mxu0 %v2791_v4  ;;  %2000 = vmatprep.subr.bf16.mxu1 %v2793_v5  ;;  %v2799_v9 = vld [vmem:[%s4226_s1 + $0x4c] ss:$16 sps:$4 sm:$0xff]   ;;  %v2801_v10 = vld [vmem:[%s4226_s1 + $0x40] ss:$16 sps:$4 sm:$0xff]   ;;  %v2802_v11 = vld [vmem:[%s4226_s1 + $0x48] ss:$16 sps:$4 sm:$0xff]  }
   0x5   :  { %v2803_v12 = vld [vmem:[%s4226_s1 + $0x64] ss:$16 sps:$4 sm:$0xff]   ;;  %v2805_v13 = vld [vmem:[%s4226_s1 + $0x6c] ss:$16 sps:$4 sm:$0xff]   ;;  %v2807_v14 = vld [vmem:[%s4226_s1 + $0x60] ss:$16 sps:$4 sm:$0xff]  }
   0x6   :  { %v2808_v15 = vld [vmem:[%s4226_s1 + $0x68] ss:$16 sps:$4 sm:$0xff]   ;;  %v2809_v16 = vld [vmem:[%s4226_s1 + $0x84] ss:$16 sps:$4 sm:$0xff]   ;;  %v2811_v17 = vld [vmem:[%s4226_s1 + $0x8c] ss:$16 sps:$4 sm:$0xff]  }
   0x7   :  { %1796 = vmatpush1.bf16.msra.mxu0 %v2795_v6  ;;  %2001 = vmatpush1.bf16.msra.mxu1 %v2796_v7  ;;  %v2813_v18 = vld [vmem:[%s4226_s1 + $0x80] ss:$16 sps:$4 sm:$0xff]   ;;  %v2814_v19 = vld [vmem:[%s4226_s1 + $0x88] ss:$16 sps:$4 sm:$0xff]   ;;  %v2815_v20 = vld [vmem:[%s4226_s1 + $0xa4] ss:$16 sps:$4 sm:$0xff]  }
   0x8   :  { %1797 = vmatprep.subr.bf16.mxu0 %v2797_v8  ;;  %2002 = vmatprep.subr.bf16.mxu1 %v2799_v9  ;;  %v2817_v21 = vld [vmem:[%s4226_s1 + $0xac] ss:$16 sps:$4 sm:$0xff]   ;;  %v2819_v22 = vld [vmem:[%s4226_s1 + $0xa0] ss:$16 sps:$4 sm:$0xff]   ;;  %v2820_v23 = vld [vmem:[%s4226_s1 + $0xa8] ss:$16 sps:$4 sm:$0xff]  }
   0x9   :  { %v2821_v24 = vld [vmem:[%s4226_s1 + $0xc4] ss:$16 sps:$4 sm:$0xff]   ;;  %v2823_v25 = vld [vmem:[%s4226_s1 + $0xcc] ss:$16 sps:$4 sm:$0xff]   ;;  %v2825_v26 = vld [vmem:[%s4226_s1 + $0xc0] ss:$16 sps:$4 sm:$0xff]  }
   0xa   :  { %v2826_v27 = vld [vmem:[%s4226_s1 + $0xc8] ss:$16 sps:$4 sm:$0xff]   ;;  %v2827_v28 = vld [vmem:[%s4226_s1 + $0xe4] ss:$16 sps:$4 sm:$0xff]   ;;  %v2829_v29 = vld [vmem:[%s4226_s1 + $0xec] ss:$16 sps:$4 sm:$0xff]  }
   0xb   :  { %1798 = vmatpush1.bf16.msra.mxu0 %v2801_v10  ;;  %2003 = vmatpush1.bf16.msra.mxu1 %v2802_v11  ;;  %v2831_v30 = vld [vmem:[%s4226_s1 + $0xe0] ss:$16 sps:$4 sm:$0xff]   ;;  %v2832_v31 = vld [vmem:[%s4226_s1 + $0xe8] ss:$16 sps:$4 sm:$0xff]   ;;  %v2833_v32 = vld [vmem:[%s4226_s1 + $0x104] ss:$16 sps:$4 sm:$0xff]  }
   0xc   :  { %1799 = vmatprep.subr.bf16.mxu0 %v2803_v12  ;;  %2004 = vmatprep.subr.bf16.mxu1 %v2805_v13  ;;  %v2835_v33 = vld [vmem:[%s4226_s1 + $0x10c] ss:$16 sps:$4 sm:$0xff]   ;;  %v2837_v34 = vld [vmem:[%s4226_s1 + $0x100] ss:$16 sps:$4 sm:$0xff]   ;;  %v2838_v35 = vld [vmem:[%s4226_s1 + $0x108] ss:$16 sps:$4 sm:$0xff]  }
   0xd   :  { %v2839_v36 = vld [vmem:[%s4226_s1 + $0x124] ss:$16 sps:$4 sm:$0xff]   ;;  %v2841_v37 = vld [vmem:[%s4226_s1 + $0x12c] ss:$16 sps:$4 sm:$0xff]   ;;  %v2843_v38 = vld [vmem:[%s4226_s1 + $0x120] ss:$16 sps:$4 sm:$0xff]  }
   0xe   :  { %v2844_v39 = vld [vmem:[%s4226_s1 + $0x128] ss:$16 sps:$4 sm:$0xff]   ;;  %v2845_v40 = vld [vmem:[%s4226_s1 + $0x144] ss:$16 sps:$4 sm:$0xff]   ;;  %v2847_v41 = vld [vmem:[%s4226_s1 + $0x14c] ss:$16 sps:$4 sm:$0xff]  }
   0xf   :  { %1800 = vmatpush1.bf16.msra.mxu0 %v2807_v14  ;;  %2005 = vmatpush1.bf16.msra.mxu1 %v2808_v15  ;;  %v2849_v42 = vld [vmem:[%s4226_s1 + $0x140] ss:$16 sps:$4 sm:$0xff]   ;;  %v2850_v43 = vld [vmem:[%s4226_s1 + $0x148] ss:$16 sps:$4 sm:$0xff]   ;;  %v2851_v44 = vld [vmem:[%s4226_s1 + $0x164] ss:$16 sps:$4 sm:$0xff]  }
  0x10   :  { %1801 = vmatprep.subr.bf16.mxu0 %v2809_v16  ;;  %2006 = vmatprep.subr.bf16.mxu1 %v2811_v17  ;;  %v2853_v45 = vld [vmem:[%s4226_s1 + $0x16c] ss:$16 sps:$4 sm:$0xff]   ;;  %v28_v46 = vld [vmem:[%s4227_s0] sm:$0xff]  ;;  %v2856_v49 = vld [vmem:[%s4226_s1 + $0x168] ss:$16 sps:$4 sm:$0xff]  }
  0x11   :  { %v2855_v47 = vld [vmem:[%s4226_s1 + $0x160] ss:$16 sps:$4 sm:$0xff]   ;;  %v2454_v48 = vcombine.high %v28_v46, %v28_v46  ;;  %v2857_v50 = vld [vmem:[%s4226_s1 + $0x184] ss:$16 sps:$4 sm:$0xff]   ;;  %v2859_v51 = vld [vmem:[%s4226_s1 + $0x18c] ss:$16 sps:$4 sm:$0xff]   ;;  %v2453_v4 = vcombine.low %v28_v46, %v28_v46 }
  0x12   :  { %v2861_v52 = vld [vmem:[%s4226_s1 + $0x180] ss:$16 sps:$4 sm:$0xff]   ;;  %v2862_v53 = vld [vmem:[%s4226_s1 + $0x188] ss:$16 sps:$4 sm:$0xff]   ;;  %v2863_v54 = vld [vmem:[%s4226_s1 + $0x1a4] ss:$16 sps:$4 sm:$0xff]  }
  0x13   :  { %1802 = vmatpush1.bf16.msra.mxu0 %v2813_v18  ;;  %2007 = vmatpush1.bf16.msra.mxu1 %v2814_v19  ;;  %v2865_v55 = vld [vmem:[%s4226_s1 + $0x1ac] ss:$16 sps:$4 sm:$0xff]   ;;  %v2867_v56 = vld [vmem:[%s4226_s1 + $0x1a0] ss:$16 sps:$4 sm:$0xff]   ;;  %v2868_v57 = vld [vmem:[%s4226_s1 + $0x1a8] ss:$16 sps:$4 sm:$0xff]  }
  0x14   :  { %1803 = vmatprep.subr.bf16.mxu0 %v2815_v20  ;;  %2008 = vmatprep.subr.bf16.mxu1 %v2817_v21  ;;  %v2869_v58 = vld [vmem:[%s4226_s1 + $0x1c4] ss:$16 sps:$4 sm:$0xff]   ;;  %v2871_v59 = vld [vmem:[%s4226_s1 + $0x1cc] ss:$16 sps:$4 sm:$0xff]   ;;  %v2873_v60 = vld [vmem:[%s4226_s1 + $0x1c0] ss:$16 sps:$4 sm:$0xff]  }
  0x15   :  { %1825 = vmatprep.mubr.bf16.mxu0 %v2454_v48  ;;  %2030 = vmatprep.mubr.bf16.mxu1 %v2454_v48  ;;  %v2874_v61 = vld [vmem:[%s4226_s1 + $0x1c8] ss:$16 sps:$4 sm:$0xff]   ;;  %v2875_v62 = vld [vmem:[%s4226_s1 + $0x1e4] ss:$16 sps:$4 sm:$0xff]   ;;  %v2877_v63 = vld [vmem:[%s4226_s1 + $0x1ec] ss:$16 sps:$4 sm:$0xff]  }
  0x16   :  { %v2879_v0 = vld [vmem:[%s4226_s1 + $0x1e0] ss:$16 sps:$4 sm:$0xff]   ;;  %v2880_v1 = vld [vmem:[%s4226_s1 + $0x1e8] ss:$16 sps:$4 sm:$0xff]   ;;  %v2885_v2 = vld [vmem:[%s4226_s1 + $0x204] ss:$16 sps:$4 sm:$0xff]  }
  0x17   :  { %1804 = vmatpush1.bf16.msra.mxu0 %v2819_v22  ;;  %2009 = vmatpush1.bf16.msra.mxu1 %v2820_v23  ;;  %v2888_v3 = vld [vmem:[%s4226_s1 + $0x20c] ss:$16 sps:$4 sm:$0xff]   ;;  %v2883_v5 = vld [vmem:[%s4226_s1 + $0x200] ss:$16 sps:$4 sm:$0xff]   ;;  %v2886_v6 = vld [vmem:[%s4226_s1 + $0x208] ss:$16 sps:$4 sm:$0xff]  }
  0x18   :  { %1805 = vmatprep.subr.bf16.mxu0 %v2821_v24  ;;  %2010 = vmatprep.subr.bf16.mxu1 %v2823_v25  ;;  %v2891_v7 = vld [vmem:[%s4226_s1 + $0x224] ss:$16 sps:$4 sm:$0xff]   ;;  %v2894_v8 = vld [vmem:[%s4226_s1 + $0x22c] ss:$16 sps:$4 sm:$0xff]   ;;  %v2889_v9 = vld [vmem:[%s4226_s1 + $0x220] ss:$16 sps:$4 sm:$0xff]  }
  0x19   :  { %v2892_v10 = vld [vmem:[%s4226_s1 + $0x228] ss:$16 sps:$4 sm:$0xff]   ;;  %v2897_v11 = vld [vmem:[%s4226_s1 + $0x244] ss:$16 sps:$4 sm:$0xff]   ;;  %v2900_v12 = vld [vmem:[%s4226_s1 + $0x24c] ss:$16 sps:$4 sm:$0xff]  }
  0x1a   :  { %v2895_v13 = vld [vmem:[%s4226_s1 + $0x240] ss:$16 sps:$4 sm:$0xff]   ;;  %v2898_v14 = vld [vmem:[%s4226_s1 + $0x248] ss:$16 sps:$4 sm:$0xff]   ;;  %v2903_v15 = vld [vmem:[%s4226_s1 + $0x264] ss:$16 sps:$4 sm:$0xff]  }
  0x1b   :  { %1806 = vmatpush1.bf16.msra.mxu0 %v2825_v26  ;;  %2011 = vmatpush1.bf16.msra.mxu1 %v2826_v27  ;;  %v2906_v16 = vld [vmem:[%s4226_s1 + $0x26c] ss:$16 sps:$4 sm:$0xff]   ;;  %v2901_v17 = vld [vmem:[%s4226_s1 + $0x260] ss:$16 sps:$4 sm:$0xff]   ;;  %v2904_v18 = vld [vmem:[%s4226_s1 + $0x268] ss:$16 sps:$4 sm:$0xff]  }
  0x1c   :  { %1807 = vmatprep.subr.bf16.mxu0 %v2827_v28  ;;  %2012 = vmatprep.subr.bf16.mxu1 %v2829_v29  ;;  %v2909_v19 = vld [vmem:[%s4226_s1 + $0x284] ss:$16 sps:$4 sm:$0xff]   ;;  %v2912_v20 = vld [vmem:[%s4226_s1 + $0x28c] ss:$16 sps:$4 sm:$0xff]   ;;  %v2907_v21 = vld [vmem:[%s4226_s1 + $0x280] ss:$16 sps:$4 sm:$0xff]  }
  0x1d   :  { %v2910_v22 = vld [vmem:[%s4226_s1 + $0x288] ss:$16 sps:$4 sm:$0xff]   ;;  %v2915_v23 = vld [vmem:[%s4226_s1 + $0x2a4] ss:$16 sps:$4 sm:$0xff]   ;;  %v2918_v24 = vld [vmem:[%s4226_s1 + $0x2ac] ss:$16 sps:$4 sm:$0xff]  }
  0x1e   :  { %v2913_v25 = vld [vmem:[%s4226_s1 + $0x2a0] ss:$16 sps:$4 sm:$0xff]   ;;  %v2916_v26 = vld [vmem:[%s4226_s1 + $0x2a8] ss:$16 sps:$4 sm:$0xff]   ;;  %v2921_v27 = vld [vmem:[%s4226_s1 + $0x2c4] ss:$16 sps:$4 sm:$0xff]  }
  0x1f   :  { %1808 = vmatpush1.bf16.msra.mxu0 %v2831_v30  ;;  %2013 = vmatpush1.bf16.msra.mxu1 %v2832_v31  ;;  %v2924_v28 = vld [vmem:[%s4226_s1 + $0x2cc] ss:$16 sps:$4 sm:$0xff]   ;;  %v2919_v31 = vld [vmem:[%s4226_s1 + $0x2c0] ss:$16 sps:$4 sm:$0xff]   ;;  %v2946_v48 = vld [vmem:[%s4226_s1 + $0x348] ss:$16 sps:$4 sm:$0xff]  }
  0x20   :  { %1809 = vmatprep.subr.bf16.mxu0 %v2833_v32  ;;  %2014 = vmatprep.subr.bf16.mxu1 %v2835_v33  ;;  %v3532_v29 = vld [vmem:[%s4227_s0 + $0x8] sm:$0xff]  ;;  %v2927_v33 = vld [vmem:[%s4226_s1 + $0x2e4] ss:$16 sps:$4 sm:$0xff]  }
  0x21   :  { %v2456_v30 = vcombine.high %v3532_v29, %v3532_v29  ;;  %v2922_v32 = vld [vmem:[%s4226_s1 + $0x2c8] ss:$16 sps:$4 sm:$0xff]   ;;  %v2948_v46 = vld [vmem:[%s4226_s1 + $0x34c] ss:$16 sps:$4 sm:$0xff]  }
  0x23   :  { %1810 = vmatpush1.bf16.msra.mxu0 %v2837_v34  ;;  %2015 = vmatpush1.bf16.msra.mxu1 %v2838_v35  ;;  %v2930_v34 = vld [vmem:[%s4226_s1 + $0x2ec] ss:$16 sps:$4 sm:$0xff]   ;;  %v2925_v35 = vld [vmem:[%s4226_s1 + $0x2e0] ss:$16 sps:$4 sm:$0xff]  }
  0x24   :  { %1811 = vmatprep.subr.bf16.mxu0 %v2839_v36  ;;  %2016 = vmatprep.subr.bf16.mxu1 %v2841_v37  ;;  %v2928_v36 = vld [vmem:[%s4226_s1 + $0x2e8] ss:$16 sps:$4 sm:$0xff]   ;;  %v2933_v37 = vld [vmem:[%s4226_s1 + $0x304] ss:$16 sps:$4 sm:$0xff]  }
  0x27   :  { %1812 = vmatpush1.bf16.msra.mxu0 %v2843_v38  ;;  %2017 = vmatpush1.bf16.msra.mxu1 %v2844_v39  ;;  %v2936_v38 = vld [vmem:[%s4226_s1 + $0x30c] ss:$16 sps:$4 sm:$0xff]   ;;  %v2931_v39 = vld [vmem:[%s4226_s1 + $0x300] ss:$16 sps:$4 sm:$0xff]  }
  0x28   :  { %1813 = vmatprep.subr.bf16.mxu0 %v2845_v40  ;;  %2018 = vmatprep.subr.bf16.mxu1 %v2847_v41  ;;  %v2934_v40 = vld [vmem:[%s4226_s1 + $0x308] ss:$16 sps:$4 sm:$0xff]   ;;  %v2939_v41 = vld [vmem:[%s4226_s1 + $0x324] ss:$16 sps:$4 sm:$0xff]  }
  0x2b   :  { %1814 = vmatpush1.bf16.msra.mxu0 %v2849_v42  ;;  %2019 = vmatpush1.bf16.msra.mxu1 %v2850_v43  ;;  %v2942_v42 = vld [vmem:[%s4226_s1 + $0x32c] ss:$16 sps:$4 sm:$0xff]   ;;  %v2937_v43 = vld [vmem:[%s4226_s1 + $0x320] ss:$16 sps:$4 sm:$0xff]  }
  0x2c   :  { %1815 = vmatprep.subr.bf16.mxu0 %v2851_v44  ;;  %2020 = vmatprep.subr.bf16.mxu1 %v2853_v45  ;;  %v2940_v44 = vld [vmem:[%s4226_s1 + $0x328] ss:$16 sps:$4 sm:$0xff]   ;;  %v2945_v45 = vld [vmem:[%s4226_s1 + $0x344] ss:$16 sps:$4 sm:$0xff]  }
  0x2f   :  { %1816 = vmatpush1.bf16.msra.mxu0 %v2855_v47  ;;  %2021 = vmatpush1.bf16.msra.mxu1 %v2856_v49  ;;  %v2943_v47 = vld [vmem:[%s4226_s1 + $0x340] ss:$16 sps:$4 sm:$0xff]   ;;  %v2951_v49 = vld [vmem:[%s4226_s1 + $0x364] ss:$16 sps:$4 sm:$0xff]  }
  0x30   :  { %1817 = vmatprep.subr.bf16.mxu0 %v2857_v50  ;;  %2022 = vmatprep.subr.bf16.mxu1 %v2859_v51  ;;  %v2954_v50 = vld [vmem:[%s4226_s1 + $0x36c] ss:$16 sps:$4 sm:$0xff]   ;;  %v2949_v51 = vld [vmem:[%s4226_s1 + $0x360] ss:$16 sps:$4 sm:$0xff]  }
  0x33   :  { %1818 = vmatpush1.bf16.msra.mxu0 %v2861_v52  ;;  %2023 = vmatpush1.bf16.msra.mxu1 %v2862_v53  ;;  %v2952_v52 = vld [vmem:[%s4226_s1 + $0x368] ss:$16 sps:$4 sm:$0xff]   ;;  %v2957_v53 = vld [vmem:[%s4226_s1 + $0x384] ss:$16 sps:$4 sm:$0xff]  }
  0x34   :  { %1819 = vmatprep.subr.bf16.mxu0 %v2863_v54  ;;  %2024 = vmatprep.subr.bf16.mxu1 %v2865_v55  ;;  %v2960_v54 = vld [vmem:[%s4226_s1 + $0x38c] ss:$16 sps:$4 sm:$0xff]   ;;  %v2955_v55 = vld [vmem:[%s4226_s1 + $0x380] ss:$16 sps:$4 sm:$0xff]  }
  0x37   :  { %1820 = vmatpush1.bf16.msra.mxu0 %v2867_v56  ;;  %2025 = vmatpush1.bf16.msra.mxu1 %v2868_v57  ;;  %v2958_v56 = vld [vmem:[%s4226_s1 + $0x388] ss:$16 sps:$4 sm:$0xff]   ;;  %v2963_v57 = vld [vmem:[%s4226_s1 + $0x3a4] ss:$16 sps:$4 sm:$0xff]  }
  0x38   :  { %1821 = vmatprep.subr.bf16.mxu0 %v2869_v58  ;;  %2026 = vmatprep.subr.bf16.mxu1 %v2871_v59  ;;  %v2966_v58 = vld [vmem:[%s4226_s1 + $0x3ac] ss:$16 sps:$4 sm:$0xff]   ;;  %v2961_v59 = vld [vmem:[%s4226_s1 + $0x3a0] ss:$16 sps:$4 sm:$0xff]  }
  0x3b   :  { %1822 = vmatpush1.bf16.msra.mxu0 %v2873_v60  ;;  %2027 = vmatpush1.bf16.msra.mxu1 %v2874_v61  ;;  %v2964_v60 = vld [vmem:[%s4226_s1 + $0x3a8] ss:$16 sps:$4 sm:$0xff]   ;;  %v2969_v61 = vld [vmem:[%s4226_s1 + $0x3c4] ss:$16 sps:$4 sm:$0xff]  }
  0x3c   :  { %1823 = vmatprep.subr.bf16.mxu0 %v2875_v62  ;;  %2028 = vmatprep.subr.bf16.mxu1 %v2877_v63  ;;  %v2972_v62 = vld [vmem:[%s4226_s1 + $0x3cc] ss:$16 sps:$4 sm:$0xff]   ;;  %v2967_v63 = vld [vmem:[%s4226_s1 + $0x3c0] ss:$16 sps:$4 sm:$0xff]  }
  0x3f   :  { %1824 = vmatpush1.bf16.msra.mxu0 %v2879_v0  ;;  %2029 = vmatpush1.bf16.msra.mxu1 %v2880_v1  ;;  %v2970_v0 = vld [vmem:[%s4226_s1 + $0x3c8] ss:$16 sps:$4 sm:$0xff]   ;;  %v2975_v1 = vld [vmem:[%s4226_s1 + $0x3e4] ss:$16 sps:$4 sm:$0xff]  }
  0x40   :  { %1834 = vmatprep.subr.bf16.mxu0 %v2885_v2  ;;  %2039 = vmatprep.subr.bf16.mxu1 %v2888_v3  ;;  %v2978_v2 = vld [vmem:[%s4226_s1 + $0x3ec] ss:$16 sps:$4 sm:$0xff]   ;;  %v2973_v3 = vld [vmem:[%s4226_s1 + $0x3e0] ss:$16 sps:$4 sm:$0xff]  }
  0x42   :  { %1826 = vmatmul.mubr.bf16.vlgmr.msra.gmra.mrb[0].mxu0 %v2453_v4  ;;  %2031 = vmatmul.mubr.bf16.vlgmr.msra.gmra.mrb[0].mxu1 %v2453_v4  ;;  %v2976_v4 = vld [vmem:[%s4226_s1 + $0x3e8] ss:$16 sps:$4 sm:$0xff]  }
  0x43   :  { %1835 = vmatpush1.bf16.msra.mxu0 %v2883_v5  ;;  %2040 = vmatpush1.bf16.msra.mxu1 %v2886_v6  ;;  %v2983_v5 = vld [vmem:[%s4226_s1 + $0x404] ss:$16 sps:$4 sm:$0xff]   ;;  %v2986_v6 = vld [vmem:[%s4226_s1 + $0x40c] ss:$16 sps:$4 sm:$0xff]  }
  0x44   :  { %1836 = vmatprep.subr.bf16.mxu0 %v2891_v7  ;;  %2041 = vmatprep.subr.bf16.mxu1 %v2894_v8  ;;  %v2455_v7 = vcombine.low %v3532_v29, %v3532_v29  ;;  %v2981_v8 = vld [vmem:[%s4226_s1 + $0x400] ss:$16 sps:$4 sm:$0xff]   ;;  %v3016_v29 = vld [vmem:[%s4226_s1 + $0x4ac] ss:$16 sps:$4 sm:$0xff]  }
  0x45   :  { %1866 = vmatprep.mubr.bf16.mxu0 %v2456_v30  ;;  %2071 = vmatprep.mubr.bf16.mxu1 %v2456_v30  ;;  %v3011_v30 = vld [vmem:[%s4226_s1 + $0x4a0] ss:$16 sps:$4 sm:$0xff]  }
  0x47   :  { %1837 = vmatpush1.bf16.msra.mxu0 %v2889_v9  ;;  %2042 = vmatpush1.bf16.msra.mxu1 %v2892_v10  ;;  %v2984_v9 = vld [vmem:[%s4226_s1 + $0x408] ss:$16 sps:$4 sm:$0xff]   ;;  %v2989_v10 = vld [vmem:[%s4226_s1 + $0x424] ss:$16 sps:$4 sm:$0xff]  }
  0x48   :  { %1838 = vmatprep.subr.bf16.mxu0 %v2897_v11  ;;  %2043 = vmatprep.subr.bf16.mxu1 %v2900_v12  ;;  %v3670_v11 = vld [vmem:[%s4227_s0 + $0x10] sm:$0xff]  ;;  %v2992_v12 = vld [vmem:[%s4226_s1 + $0x42c] ss:$16 sps:$4 sm:$0xff]  }
  0x4b   :  { %1839 = vmatpush1.bf16.msra.mxu0 %v2895_v13  ;;  %2044 = vmatpush1.bf16.msra.mxu1 %v2898_v14  ;;  %v2458_v13 = vcombine.high %v3670_v11, %v3670_v11  ;;  %v2987_v14 = vld [vmem:[%s4226_s1 + $0x420] ss:$16 sps:$4 sm:$0xff]  }
  0x4c   :  { %1840 = vmatprep.subr.bf16.mxu0 %v2903_v15  ;;  %2045 = vmatprep.subr.bf16.mxu1 %v2906_v16  ;;  %v2990_v15 = vld [vmem:[%s4226_s1 + $0x428] ss:$16 sps:$4 sm:$0xff]   ;;  %v2995_v16 = vld [vmem:[%s4226_s1 + $0x444] ss:$16 sps:$4 sm:$0xff]  }
  0x4f   :  { %1841 = vmatpush1.bf16.msra.mxu0 %v2901_v17  ;;  %2046 = vmatpush1.bf16.msra.mxu1 %v2904_v18  ;;  %v2998_v17 = vld [vmem:[%s4226_s1 + $0x44c] ss:$16 sps:$4 sm:$0xff]   ;;  %v2993_v18 = vld [vmem:[%s4226_s1 + $0x440] ss:$16 sps:$4 sm:$0xff]  }
  0x50   :  { %1842 = vmatprep.subr.bf16.mxu0 %v2909_v19  ;;  %2047 = vmatprep.subr.bf16.mxu1 %v2912_v20  ;;  %v2996_v19 = vld [vmem:[%s4226_s1 + $0x448] ss:$16 sps:$4 sm:$0xff]   ;;  %v3001_v20 = vld [vmem:[%s4226_s1 + $0x464] ss:$16 sps:$4 sm:$0xff]  }
  0x53   :  { %1843 = vmatpush1.bf16.msra.mxu0 %v2907_v21  ;;  %2048 = vmatpush1.bf16.msra.mxu1 %v2910_v22  ;;  %v3004_v21 = vld [vmem:[%s4226_s1 + $0x46c] ss:$16 sps:$4 sm:$0xff]   ;;  %v2999_v22 = vld [vmem:[%s4226_s1 + $0x460] ss:$16 sps:$4 sm:$0xff]  }
  0x54   :  { %1844 = vmatprep.subr.bf16.mxu0 %v2915_v23  ;;  %2049 = vmatprep.subr.bf16.mxu1 %v2918_v24  ;;  %v3002_v23 = vld [vmem:[%s4226_s1 + $0x468] ss:$16 sps:$4 sm:$0xff]   ;;  %v3007_v24 = vld [vmem:[%s4226_s1 + $0x484] ss:$16 sps:$4 sm:$0xff]  }
  0x57   :  { %1845 = vmatpush1.bf16.msra.mxu0 %v2913_v25  ;;  %2050 = vmatpush1.bf16.msra.mxu1 %v2916_v26  ;;  %v3010_v25 = vld [vmem:[%s4226_s1 + $0x48c] ss:$16 sps:$4 sm:$0xff]   ;;  %v3005_v26 = vld [vmem:[%s4226_s1 + $0x480] ss:$16 sps:$4 sm:$0xff]  }
  0x58   :  { %1846 = vmatprep.subr.bf16.mxu0 %v2921_v27  ;;  %2051 = vmatprep.subr.bf16.mxu1 %v2924_v28  ;;  %v3008_v27 = vld [vmem:[%s4226_s1 + $0x488] ss:$16 sps:$4 sm:$0xff]   ;;  %v3013_v28 = vld [vmem:[%s4226_s1 + $0x4a4] ss:$16 sps:$4 sm:$0xff]  }
  0x5b   :  { %1847 = vmatpush1.bf16.msra.mxu0 %v2919_v31  ;;  %2052 = vmatpush1.bf16.msra.mxu1 %v2922_v32  ;;  %v3014_v31 = vld [vmem:[%s4226_s1 + $0x4a8] ss:$16 sps:$4 sm:$0xff]   ;;  %v3019_v32 = vld [vmem:[%s4226_s1 + $0x4c4] ss:$16 sps:$4 sm:$0xff]  }
  0x5c   :  { %1848 = vmatprep.subr.bf16.mxu0 %v2927_v33  ;;  %2053 = vmatprep.subr.bf16.mxu1 %v2930_v34  ;;  %v3022_v33 = vld [vmem:[%s4226_s1 + $0x4cc] ss:$16 sps:$4 sm:$0xff]   ;;  %v3017_v34 = vld [vmem:[%s4226_s1 + $0x4c0] ss:$16 sps:$4 sm:$0xff]  }
  0x5f   :  { %1849 = vmatpush1.bf16.msra.mxu0 %v2925_v35  ;;  %2054 = vmatpush1.bf16.msra.mxu1 %v2928_v36  ;;  %v3020_v35 = vld [vmem:[%s4226_s1 + $0x4c8] ss:$16 sps:$4 sm:$0xff]   ;;  %v3025_v36 = vld [vmem:[%s4226_s1 + $0x4e4] ss:$16 sps:$4 sm:$0xff]  }
  0x60   :  { %1850 = vmatprep.subr.bf16.mxu0 %v2933_v37  ;;  %2055 = vmatprep.subr.bf16.mxu1 %v2936_v38  ;;  %v3028_v37 = vld [vmem:[%s4226_s1 + $0x4ec] ss:$16 sps:$4 sm:$0xff]   ;;  %v3023_v38 = vld [vmem:[%s4226_s1 + $0x4e0] ss:$16 sps:$4 sm:$0xff]  }
  0x63   :  { %1851 = vmatpush1.bf16.msra.mxu0 %v2931_v39  ;;  %2056 = vmatpush1.bf16.msra.mxu1 %v2934_v40  ;;  %v3026_v39 = vld [vmem:[%s4226_s1 + $0x4e8] ss:$16 sps:$4 sm:$0xff]   ;;  %v3031_v40 = vld [vmem:[%s4226_s1 + $0x504] ss:$16 sps:$4 sm:$0xff]  }
  0x64   :  { %1852 = vmatprep.subr.bf16.mxu0 %v2939_v41  ;;  %2057 = vmatprep.subr.bf16.mxu1 %v2942_v42  ;;  %v3034_v41 = vld [vmem:[%s4226_s1 + $0x50c] ss:$16 sps:$4 sm:$0xff]   ;;  %v3029_v42 = vld [vmem:[%s4226_s1 + $0x500] ss:$16 sps:$4 sm:$0xff]  }
  0x67   :  { %1853 = vmatpush1.bf16.msra.mxu0 %v2937_v43  ;;  %2058 = vmatpush1.bf16.msra.mxu1 %v2940_v44  ;;  %v3032_v43 = vld [vmem:[%s4226_s1 + $0x508] ss:$16 sps:$4 sm:$0xff]   ;;  %v3037_v44 = vld [vmem:[%s4226_s1 + $0x524] ss:$16 sps:$4 sm:$0xff]  }
  0x68   :  { %1854 = vmatprep.subr.bf16.mxu0 %v2945_v45  ;;  %2059 = vmatprep.subr.bf16.mxu1 %v2948_v46  ;;  %v3040_v45 = vld [vmem:[%s4226_s1 + $0x52c] ss:$16 sps:$4 sm:$0xff]   ;;  %v3035_v46 = vld [vmem:[%s4226_s1 + $0x520] ss:$16 sps:$4 sm:$0xff]  }
  0x6b   :  { %1855 = vmatpush1.bf16.msra.mxu0 %v2943_v47  ;;  %2060 = vmatpush1.bf16.msra.mxu1 %v2946_v48  ;;  %v3038_v47 = vld [vmem:[%s4226_s1 + $0x528] ss:$16 sps:$4 sm:$0xff]   ;;  %v3043_v48 = vld [vmem:[%s4226_s1 + $0x544] ss:$16 sps:$4 sm:$0xff]  }
  0x6c   :  { %1856 = vmatprep.subr.bf16.mxu0 %v2951_v49  ;;  %2061 = vmatprep.subr.bf16.mxu1 %v2954_v50  ;;  %v3046_v49 = vld [vmem:[%s4226_s1 + $0x54c] ss:$16 sps:$4 sm:$0xff]   ;;  %v3041_v50 = vld [vmem:[%s4226_s1 + $0x540] ss:$16 sps:$4 sm:$0xff]  }
  0x6f   :  { %1857 = vmatpush1.bf16.msra.mxu0 %v2949_v51  ;;  %2062 = vmatpush1.bf16.msra.mxu1 %v2952_v52  ;;  %v3044_v51 = vld [vmem:[%s4226_s1 + $0x548] ss:$16 sps:$4 sm:$0xff]   ;;  %v3049_v52 = vld [vmem:[%s4226_s1 + $0x564] ss:$16 sps:$4 sm:$0xff]  }
  0x70   :  { %1858 = vmatprep.subr.bf16.mxu0 %v2957_v53  ;;  %2063 = vmatprep.subr.bf16.mxu1 %v2960_v54  ;;  %v3052_v53 = vld [vmem:[%s4226_s1 + $0x56c] ss:$16 sps:$4 sm:$0xff]   ;;  %v3047_v54 = vld [vmem:[%s4226_s1 + $0x560] ss:$16 sps:$4 sm:$0xff]  }
  0x73   :  { %1859 = vmatpush1.bf16.msra.mxu0 %v2955_v55  ;;  %2064 = vmatpush1.bf16.msra.mxu1 %v2958_v56  ;;  %v3050_v55 = vld [vmem:[%s4226_s1 + $0x568] ss:$16 sps:$4 sm:$0xff]   ;;  %v3055_v56 = vld [vmem:[%s4226_s1 + $0x584] ss:$16 sps:$4 sm:$0xff]  }
  0x74   :  { %1860 = vmatprep.subr.bf16.mxu0 %v2963_v57  ;;  %2065 = vmatprep.subr.bf16.mxu1 %v2966_v58  ;;  %v3058_v57 = vld [vmem:[%s4226_s1 + $0x58c] ss:$16 sps:$4 sm:$0xff]   ;;  %v3053_v58 = vld [vmem:[%s4226_s1 + $0x580] ss:$16 sps:$4 sm:$0xff]  }
  0x77   :  { %1861 = vmatpush1.bf16.msra.mxu0 %v2961_v59  ;;  %2066 = vmatpush1.bf16.msra.mxu1 %v2964_v60  ;;  %v3056_v59 = vld [vmem:[%s4226_s1 + $0x588] ss:$16 sps:$4 sm:$0xff]   ;;  %v3061_v60 = vld [vmem:[%s4226_s1 + $0x5a4] ss:$16 sps:$4 sm:$0xff]  }
  0x78   :  { %1862 = vmatprep.subr.bf16.mxu0 %v2969_v61  ;;  %2067 = vmatprep.subr.bf16.mxu1 %v2972_v62  ;;  %v3064_v61 = vld [vmem:[%s4226_s1 + $0x5ac] ss:$16 sps:$4 sm:$0xff]   ;;  %v3059_v62 = vld [vmem:[%s4226_s1 + $0x5a0] ss:$16 sps:$4 sm:$0xff]  }
  0x7b   :  { %1863 = vmatpush1.bf16.msra.mxu0 %v2967_v63  ;;  %2068 = vmatpush1.bf16.msra.mxu1 %v2970_v0  ;;  %v3062_v63 = vld [vmem:[%s4226_s1 + $0x5a8] ss:$16 sps:$4 sm:$0xff]   ;;  %v3067_v0 = vld [vmem:[%s4226_s1 + $0x5c4] ss:$16 sps:$4 sm:$0xff]  }
  0x7c   :  { %1864 = vmatprep.subr.bf16.mxu0 %v2975_v1  ;;  %2069 = vmatprep.subr.bf16.mxu1 %v2978_v2  ;;  %v3070_v1 = vld [vmem:[%s4226_s1 + $0x5cc] ss:$16 sps:$4 sm:$0xff]   ;;  %v3065_v2 = vld [vmem:[%s4226_s1 + $0x5c0] ss:$16 sps:$4 sm:$0xff]  }
  0x7f   :  { %1865 = vmatpush1.bf16.msra.mxu0 %v2973_v3  ;;  %2070 = vmatpush1.bf16.msra.mxu1 %v2976_v4  ;;  %v3068_v3 = vld [vmem:[%s4226_s1 + $0x5c8] ss:$16 sps:$4 sm:$0xff]   ;;  %v3073_v4 = vld [vmem:[%s4226_s1 + $0x5e4] ss:$16 sps:$4 sm:$0xff]  }
  0x80   :  { %1875 = vmatprep.subr.bf16.mxu0 %v2983_v5  ;;  %2080 = vmatprep.subr.bf16.mxu1 %v2986_v6  ;;  %v3076_v5 = vld [vmem:[%s4226_s1 + $0x5ec] ss:$16 sps:$4 sm:$0xff]   ;;  %v3071_v6 = vld [vmem:[%s4226_s1 + $0x5e0] ss:$16 sps:$4 sm:$0xff]  }
  0x82   :  { %1867 = vmatmul.mubr.bf16.vlgmr.msra.gmra.mrb[0].mxu0 %v2455_v7  ;;  %2072 = vmatmul.mubr.bf16.vlgmr.msra.gmra.mrb[0].mxu1 %v2455_v7  ;;  %v3074_v7 = vld [vmem:[%s4226_s1 + $0x5e8] ss:$16 sps:$4 sm:$0xff]  }
  0x83   :  { %1876 = vmatpush1.bf16.msra.mxu0 %v2981_v8  ;;  %2081 = vmatpush1.bf16.msra.mxu1 %v2984_v9  ;;  %v3081_v8 = vld [vmem:[%s4226_s1 + $0x604] ss:$16 sps:$4 sm:$0xff]   ;;  %v3084_v9 = vld [vmem:[%s4226_s1 + $0x60c] ss:$16 sps:$4 sm:$0xff]  }
  0x84   :  { %1877 = vmatprep.subr.bf16.mxu0 %v2989_v10  ;;  %2082 = vmatprep.subr.bf16.mxu1 %v2992_v12  ;;  %v2457_v10 = vcombine.low %v3670_v11, %v3670_v11  ;;  %v3079_v12 = vld [vmem:[%s4226_s1 + $0x600] ss:$16 sps:$4 sm:$0xff]   ;;  %v3087_v11 = vld [vmem:[%s4226_s1 + $0x624] ss:$16 sps:$4 sm:$0xff]  }
  0x85   :  { %1907 = vmatprep.mubr.bf16.mxu0 %v2458_v13  ;;  %2112 = vmatprep.mubr.bf16.mxu1 %v2458_v13  ;;  %v3865_v13 = vld [vmem:[%s4227_s0 + $0x18] sm:$0xff] }
  0x87   :  { %1878 = vmatpush1.bf16.msra.mxu0 %v2987_v14  ;;  %2083 = vmatpush1.bf16.msra.mxu1 %v2990_v15  ;;  %v3082_v14 = vld [vmem:[%s4226_s1 + $0x608] ss:$16 sps:$4 sm:$0xff]   ;;  %v3090_v15 = vld [vmem:[%s4226_s1 + $0x62c] ss:$16 sps:$4 sm:$0xff]  }
  0x88   :  { %1879 = vmatprep.subr.bf16.mxu0 %v2995_v16  ;;  %2084 = vmatprep.subr.bf16.mxu1 %v2998_v17  ;;  %v2460_v16 = vcombine.high %v3865_v13, %v3865_v13  ;;  %v3085_v17 = vld [vmem:[%s4226_s1 + $0x620] ss:$16 sps:$4 sm:$0xff]  }
  0x8b   :  { %1880 = vmatpush1.bf16.msra.mxu0 %v2993_v18  ;;  %2085 = vmatpush1.bf16.msra.mxu1 %v2996_v19  ;;  %v3088_v18 = vld [vmem:[%s4226_s1 + $0x628] ss:$16 sps:$4 sm:$0xff]   ;;  %v3093_v19 = vld [vmem:[%s4226_s1 + $0x644] ss:$16 sps:$4 sm:$0xff]  }
  0x8c   :  { %1881 = vmatprep.subr.bf16.mxu0 %v3001_v20  ;;  %2086 = vmatprep.subr.bf16.mxu1 %v3004_v21  ;;  %v3096_v20 = vld [vmem:[%s4226_s1 + $0x64c] ss:$16 sps:$4 sm:$0xff]   ;;  %v3091_v21 = vld [vmem:[%s4226_s1 + $0x640] ss:$16 sps:$4 sm:$0xff]  }
  0x8f   :  { %1882 = vmatpush1.bf16.msra.mxu0 %v2999_v22  ;;  %2087 = vmatpush1.bf16.msra.mxu1 %v3002_v23  ;;  %v3094_v22 = vld [vmem:[%s4226_s1 + $0x648] ss:$16 sps:$4 sm:$0xff]   ;;  %v3099_v23 = vld [vmem:[%s4226_s1 + $0x664] ss:$16 sps:$4 sm:$0xff]  }
  0x90   :  { %1883 = vmatprep.subr.bf16.mxu0 %v3007_v24  ;;  %2088 = vmatprep.subr.bf16.mxu1 %v3010_v25  ;;  %v3102_v24 = vld [vmem:[%s4226_s1 + $0x66c] ss:$16 sps:$4 sm:$0xff]   ;;  %v3097_v25 = vld [vmem:[%s4226_s1 + $0x660] ss:$16 sps:$4 sm:$0xff]  }
  0x93   :  { %1884 = vmatpush1.bf16.msra.mxu0 %v3005_v26  ;;  %2089 = vmatpush1.bf16.msra.mxu1 %v3008_v27  ;;  %v3100_v26 = vld [vmem:[%s4226_s1 + $0x668] ss:$16 sps:$4 sm:$0xff]   ;;  %v3105_v27 = vld [vmem:[%s4226_s1 + $0x684] ss:$16 sps:$4 sm:$0xff]  }
  0x94   :  { %1885 = vmatprep.subr.bf16.mxu0 %v3013_v28  ;;  %2090 = vmatprep.subr.bf16.mxu1 %v3016_v29  ;;  %v3108_v28 = vld [vmem:[%s4226_s1 + $0x68c] ss:$16 sps:$4 sm:$0xff]   ;;  %v3103_v29 = vld [vmem:[%s4226_s1 + $0x680] ss:$16 sps:$4 sm:$0xff]  }
  0x97   :  { %1886 = vmatpush1.bf16.msra.mxu0 %v3011_v30  ;;  %2091 = vmatpush1.bf16.msra.mxu1 %v3014_v31  ;;  %v3106_v30 = vld [vmem:[%s4226_s1 + $0x688] ss:$16 sps:$4 sm:$0xff]   ;;  %v3111_v31 = vld [vmem:[%s4226_s1 + $0x6a4] ss:$16 sps:$4 sm:$0xff]  }
  0x98   :  { %1887 = vmatprep.subr.bf16.mxu0 %v3019_v32  ;;  %2092 = vmatprep.subr.bf16.mxu1 %v3022_v33  ;;  %v3114_v32 = vld [vmem:[%s4226_s1 + $0x6ac] ss:$16 sps:$4 sm:$0xff]   ;;  %v3109_v33 = vld [vmem:[%s4226_s1 + $0x6a0] ss:$16 sps:$4 sm:$0xff]  }
  0x9b   :  { %1888 = vmatpush1.bf16.msra.mxu0 %v3017_v34  ;;  %2093 = vmatpush1.bf16.msra.mxu1 %v3020_v35  ;;  %v3112_v34 = vld [vmem:[%s4226_s1 + $0x6a8] ss:$16 sps:$4 sm:$0xff]   ;;  %v3117_v35 = vld [vmem:[%s4226_s1 + $0x6c4] ss:$16 sps:$4 sm:$0xff]  }
  0x9c   :  { %1889 = vmatprep.subr.bf16.mxu0 %v3025_v36  ;;  %2094 = vmatprep.subr.bf16.mxu1 %v3028_v37  ;;  %v3120_v36 = vld [vmem:[%s4226_s1 + $0x6cc] ss:$16 sps:$4 sm:$0xff]   ;;  %v3115_v37 = vld [vmem:[%s4226_s1 + $0x6c0] ss:$16 sps:$4 sm:$0xff]  }
  0x9f   :  { %1890 = vmatpush1.bf16.msra.mxu0 %v3023_v38  ;;  %2095 = vmatpush1.bf16.msra.mxu1 %v3026_v39  ;;  %v3118_v38 = vld [vmem:[%s4226_s1 + $0x6c8] ss:$16 sps:$4 sm:$0xff]   ;;  %v3123_v39 = vld [vmem:[%s4226_s1 + $0x6e4] ss:$16 sps:$4 sm:$0xff]  }
  0xa0   :  { %1891 = vmatprep.subr.bf16.mxu0 %v3031_v40  ;;  %2096 = vmatprep.subr.bf16.mxu1 %v3034_v41  ;;  %v3126_v40 = vld [vmem:[%s4226_s1 + $0x6ec] ss:$16 sps:$4 sm:$0xff]   ;;  %v3121_v41 = vld [vmem:[%s4226_s1 + $0x6e0] ss:$16 sps:$4 sm:$0xff]  }
  0xa3   :  { %1892 = vmatpush1.bf16.msra.mxu0 %v3029_v42  ;;  %2097 = vmatpush1.bf16.msra.mxu1 %v3032_v43  ;;  %v3124_v42 = vld [vmem:[%s4226_s1 + $0x6e8] ss:$16 sps:$4 sm:$0xff]   ;;  %v3129_v43 = vld [vmem:[%s4226_s1 + $0x704] ss:$16 sps:$4 sm:$0xff]  }
  0xa4   :  { %1893 = vmatprep.subr.bf16.mxu0 %v3037_v44  ;;  %2098 = vmatprep.subr.bf16.mxu1 %v3040_v45  ;;  %v3132_v44 = vld [vmem:[%s4226_s1 + $0x70c] ss:$16 sps:$4 sm:$0xff]   ;;  %v3127_v45 = vld [vmem:[%s4226_s1 + $0x700] ss:$16 sps:$4 sm:$0xff]  }
  0xa7   :  { %1894 = vmatpush1.bf16.msra.mxu0 %v3035_v46  ;;  %2099 = vmatpush1.bf16.msra.mxu1 %v3038_v47  ;;  %v3130_v46 = vld [vmem:[%s4226_s1 + $0x708] ss:$16 sps:$4 sm:$0xff]   ;;  %v3135_v47 = vld [vmem:[%s4226_s1 + $0x724] ss:$16 sps:$4 sm:$0xff]  }
  0xa8   :  { %1895 = vmatprep.subr.bf16.mxu0 %v3043_v48  ;;  %2100 = vmatprep.subr.bf16.mxu1 %v3046_v49  ;;  %v3138_v48 = vld [vmem:[%s4226_s1 + $0x72c] ss:$16 sps:$4 sm:$0xff]   ;;  %v3133_v49 = vld [vmem:[%s4226_s1 + $0x720] ss:$16 sps:$4 sm:$0xff]  }
  0xab   :  { %1896 = vmatpush1.bf16.msra.mxu0 %v3041_v50  ;;  %2101 = vmatpush1.bf16.msra.mxu1 %v3044_v51  ;;  %v3136_v50 = vld [vmem:[%s4226_s1 + $0x728] ss:$16 sps:$4 sm:$0xff]   ;;  %v3141_v51 = vld [vmem:[%s4226_s1 + $0x744] ss:$16 sps:$4 sm:$0xff]  }
  0xac   :  { %1897 = vmatprep.subr.bf16.mxu0 %v3049_v52  ;;  %2102 = vmatprep.subr.bf16.mxu1 %v3052_v53  ;;  %v3144_v52 = vld [vmem:[%s4226_s1 + $0x74c] ss:$16 sps:$4 sm:$0xff]   ;;  %v3139_v53 = vld [vmem:[%s4226_s1 + $0x740] ss:$16 sps:$4 sm:$0xff]  }
  0xaf   :  { %1898 = vmatpush1.bf16.msra.mxu0 %v3047_v54  ;;  %2103 = vmatpush1.bf16.msra.mxu1 %v3050_v55  ;;  %v3142_v54 = vld [vmem:[%s4226_s1 + $0x748] ss:$16 sps:$4 sm:$0xff]   ;;  %v3147_v55 = vld [vmem:[%s4226_s1 + $0x764] ss:$16 sps:$4 sm:$0xff]  }
  0xb0   :  { %1899 = vmatprep.subr.bf16.mxu0 %v3055_v56  ;;  %2104 = vmatprep.subr.bf16.mxu1 %v3058_v57  ;;  %v3150_v56 = vld [vmem:[%s4226_s1 + $0x76c] ss:$16 sps:$4 sm:$0xff]   ;;  %v3145_v57 = vld [vmem:[%s4226_s1 + $0x760] ss:$16 sps:$4 sm:$0xff]  }
  0xb3   :  { %1900 = vmatpush1.bf16.msra.mxu0 %v3053_v58  ;;  %2105 = vmatpush1.bf16.msra.mxu1 %v3056_v59  ;;  %v3148_v58 = vld [vmem:[%s4226_s1 + $0x768] ss:$16 sps:$4 sm:$0xff]   ;;  %v3153_v59 = vld [vmem:[%s4226_s1 + $0x784] ss:$16 sps:$4 sm:$0xff]  }
  0xb4   :  { %1901 = vmatprep.subr.bf16.mxu0 %v3061_v60  ;;  %2106 = vmatprep.subr.bf16.mxu1 %v3064_v61  ;;  %v3156_v60 = vld [vmem:[%s4226_s1 + $0x78c] ss:$16 sps:$4 sm:$0xff]   ;;  %v3151_v61 = vld [vmem:[%s4226_s1 + $0x780] ss:$16 sps:$4 sm:$0xff]  }
  0xb7   :  { %1902 = vmatpush1.bf16.msra.mxu0 %v3059_v62  ;;  %2107 = vmatpush1.bf16.msra.mxu1 %v3062_v63  ;;  %v3154_v62 = vld [vmem:[%s4226_s1 + $0x788] ss:$16 sps:$4 sm:$0xff]   ;;  %v3159_v63 = vld [vmem:[%s4226_s1 + $0x7a4] ss:$16 sps:$4 sm:$0xff]  }
  0xb8   :  { %1903 = vmatprep.subr.bf16.mxu0 %v3067_v0  ;;  %2108 = vmatprep.subr.bf16.mxu1 %v3070_v1  ;;  %v3162_v0 = vld [vmem:[%s4226_s1 + $0x7ac] ss:$16 sps:$4 sm:$0xff]   ;;  %v3157_v1 = vld [vmem:[%s4226_s1 + $0x7a0] ss:$16 sps:$4 sm:$0xff]  }
  0xbb   :  { %1904 = vmatpush1.bf16.msra.mxu0 %v3065_v2  ;;  %2109 = vmatpush1.bf16.msra.mxu1 %v3068_v3  ;;  %v3160_v2 = vld [vmem:[%s4226_s1 + $0x7a8] ss:$16 sps:$4 sm:$0xff]   ;;  %v3165_v3 = vld [vmem:[%s4226_s1 + $0x7c4] ss:$16 sps:$4 sm:$0xff]  }
  0xbc   :  { %1905 = vmatprep.subr.bf16.mxu0 %v3073_v4  ;;  %2110 = vmatprep.subr.bf16.mxu1 %v3076_v5  ;;  %v3168_v4 = vld [vmem:[%s4226_s1 + $0x7cc] ss:$16 sps:$4 sm:$0xff]   ;;  %v3163_v5 = vld [vmem:[%s4226_s1 + $0x7c0] ss:$16 sps:$4 sm:$0xff]  }
  0xbf   :  { %1906 = vmatpush1.bf16.msra.mxu0 %v3071_v6  ;;  %2111 = vmatpush1.bf16.msra.mxu1 %v3074_v7  ;;  %v3166_v6 = vld [vmem:[%s4226_s1 + $0x7c8] ss:$16 sps:$4 sm:$0xff]   ;;  %v3171_v7 = vld [vmem:[%s4226_s1 + $0x7e4] ss:$16 sps:$4 sm:$0xff]  }
  0xc0   :  { %1916 = vmatprep.subr.bf16.mxu0 %v3081_v8  ;;  %2121 = vmatprep.subr.bf16.mxu1 %v3084_v9  ;;  %v3174_v8 = vld [vmem:[%s4226_s1 + $0x7ec] ss:$16 sps:$4 sm:$0xff]   ;;  %v3169_v9 = vld [vmem:[%s4226_s1 + $0x7e0] ss:$16 sps:$4 sm:$0xff]  }
  0xc2   :  { %1908 = vmatmul.mubr.bf16.vlgmr.msra.gmra.mrb[0].mxu0 %v2457_v10  ;;  %2113 = vmatmul.mubr.bf16.vlgmr.msra.gmra.mrb[0].mxu1 %v2457_v10  ;;  %v3172_v10 = vld [vmem:[%s4226_s1 + $0x7e8] ss:$16 sps:$4 sm:$0xff]  }
  0xc3   :  { %1917 = vmatpush1.bf16.msra.mxu0 %v3079_v12  ;;  %2122 = vmatpush1.bf16.msra.mxu1 %v3082_v14  ;;  %v3179_v12 = vld [vmem:[%s4226_s1 + $0x804] ss:$16 sps:$4 sm:$0xff]   ;;  %v3182_v14 = vld [vmem:[%s4226_s1 + $0x80c] ss:$16 sps:$4 sm:$0xff]  }
  0xc4   :  { %1918 = vmatprep.subr.bf16.mxu0 %v3087_v11  ;;  %2123 = vmatprep.subr.bf16.mxu1 %v3090_v15  ;;  %v2459_v11 = vcombine.low %v3865_v13, %v3865_v13  ;;  %v3177_v15 = vld [vmem:[%s4226_s1 + $0x800] ss:$16 sps:$4 sm:$0xff]   ;;  %v3188_v13 = vld [vmem:[%s4226_s1 + $0x82c] ss:$16 sps:$4 sm:$0xff]  }
  0xc5   :  { %1948 = vmatprep.mubr.bf16.mxu0 %v2460_v16  ;;  %2153 = vmatprep.mubr.bf16.mxu1 %v2460_v16  ;;  %v3180_v16 = vld [vmem:[%s4226_s1 + $0x808] ss:$16 sps:$4 sm:$0xff]  }
  0xc7   :  { %1919 = vmatpush1.bf16.msra.mxu0 %v3085_v17  ;;  %2124 = vmatpush1.bf16.msra.mxu1 %v3088_v18  ;;  %v3185_v17 = vld [vmem:[%s4226_s1 + $0x824] ss:$16 sps:$4 sm:$0xff]   ;;  %v3183_v18 = vld [vmem:[%s4226_s1 + $0x820] ss:$16 sps:$4 sm:$0xff]  }
  0xc8   :  { %1920 = vmatprep.subr.bf16.mxu0 %v3093_v19  ;;  %2125 = vmatprep.subr.bf16.mxu1 %v3096_v20  ;;  %v3186_v19 = vld [vmem:[%s4226_s1 + $0x828] ss:$16 sps:$4 sm:$0xff]   ;;  %v3191_v20 = vld [vmem:[%s4226_s1 + $0x844] ss:$16 sps:$4 sm:$0xff]  }
  0xcb   :  { %1921 = vmatpush1.bf16.msra.mxu0 %v3091_v21  ;;  %2126 = vmatpush1.bf16.msra.mxu1 %v3094_v22  ;;  %v3194_v21 = vld [vmem:[%s4226_s1 + $0x84c] ss:$16 sps:$4 sm:$0xff]   ;;  %v3228_v22 = vmov 0  }
  0xcc   :  { %1922 = vmatprep.subr.bf16.mxu0 %v3099_v23  ;;  %2127 = vmatprep.subr.bf16.mxu1 %v3102_v24  ;;  %v3189_v23 = vld [vmem:[%s4226_s1 + $0x840] ss:$16 sps:$4 sm:$0xff]   ;;  %v3192_v24 = vld [vmem:[%s4226_s1 + $0x848] ss:$16 sps:$4 sm:$0xff]  }
  0xcf   :  { %1923 = vmatpush1.bf16.msra.mxu0 %v3097_v25  ;;  %2128 = vmatpush1.bf16.msra.mxu1 %v3100_v26  ;;  %v3197_v25 = vld [vmem:[%s4226_s1 + $0x864] ss:$16 sps:$4 sm:$0xff]   ;;  %v3200_v26 = vld [vmem:[%s4226_s1 + $0x86c] ss:$16 sps:$4 sm:$0xff]  }
  0xd0   :  { %1924 = vmatprep.subr.bf16.mxu0 %v3105_v27  ;;  %2129 = vmatprep.subr.bf16.mxu1 %v3108_v28  ;;  %v3195_v27 = vld [vmem:[%s4226_s1 + $0x860] ss:$16 sps:$4 sm:$0xff]   ;;  %v3198_v28 = vld [vmem:[%s4226_s1 + $0x868] ss:$16 sps:$4 sm:$0xff]  }
  0xd3   :  { %1925 = vmatpush1.bf16.msra.mxu0 %v3103_v29  ;;  %2130 = vmatpush1.bf16.msra.mxu1 %v3106_v30  ;;  %v3203_v29 = vld [vmem:[%s4226_s1 + $0x884] ss:$16 sps:$4 sm:$0xff]   ;;  %v3206_v30 = vld [vmem:[%s4226_s1 + $0x88c] ss:$16 sps:$4 sm:$0xff]  }
  0xd4   :  { %1926 = vmatprep.subr.bf16.mxu0 %v3111_v31  ;;  %2131 = vmatprep.subr.bf16.mxu1 %v3114_v32  ;;  %v3201_v31 = vld [vmem:[%s4226_s1 + $0x880] ss:$16 sps:$4 sm:$0xff]   ;;  %v3204_v32 = vld [vmem:[%s4226_s1 + $0x888] ss:$16 sps:$4 sm:$0xff]  }
  0xd7   :  { %1927 = vmatpush1.bf16.msra.mxu0 %v3109_v33  ;;  %2132 = vmatpush1.bf16.msra.mxu1 %v3112_v34  ;;  %v3209_v33 = vld [vmem:[%s4226_s1 + $0x8a4] ss:$16 sps:$4 sm:$0xff]   ;;  %v3212_v34 = vld [vmem:[%s4226_s1 + $0x8ac] ss:$16 sps:$4 sm:$0xff]  }
  0xd8   :  { %1928 = vmatprep.subr.bf16.mxu0 %v3117_v35  ;;  %2133 = vmatprep.subr.bf16.mxu1 %v3120_v36  ;;  %v3207_v35 = vld [vmem:[%s4226_s1 + $0x8a0] ss:$16 sps:$4 sm:$0xff]   ;;  %v3210_v36 = vld [vmem:[%s4226_s1 + $0x8a8] ss:$16 sps:$4 sm:$0xff]  }
  0xdb   :  { %1929 = vmatpush1.bf16.msra.mxu0 %v3115_v37  ;;  %2134 = vmatpush1.bf16.msra.mxu1 %v3118_v38  ;;  %v3215_v37 = vld [vmem:[%s4226_s1 + $0x8c4] ss:$16 sps:$4 sm:$0xff]   ;;  %v3218_v38 = vld [vmem:[%s4226_s1 + $0x8cc] ss:$16 sps:$4 sm:$0xff]  }
  0xdc   :  { %1930 = vmatprep.subr.bf16.mxu0 %v3123_v39  ;;  %2135 = vmatprep.subr.bf16.mxu1 %v3126_v40  ;;  %v3213_v39 = vld [vmem:[%s4226_s1 + $0x8c0] ss:$16 sps:$4 sm:$0xff]   ;;  %v3216_v40 = vld [vmem:[%s4226_s1 + $0x8c8] ss:$16 sps:$4 sm:$0xff]  }
  0xdf   :  { %1931 = vmatpush1.bf16.msra.mxu0 %v3121_v41  ;;  %2136 = vmatpush1.bf16.msra.mxu1 %v3124_v42  ;;  %v3221_v41 = vld [vmem:[%s4226_s1 + $0x8e4] ss:$16 sps:$4 sm:$0xff]   ;;  %v3224_v42 = vld [vmem:[%s4226_s1 + $0x8ec] ss:$16 sps:$4 sm:$0xff]  }
  0xe0   :  { %1932 = vmatprep.subr.bf16.mxu0 %v3129_v43  ;;  %2137 = vmatprep.subr.bf16.mxu1 %v3132_v44  ;;  %v3219_v43 = vld [vmem:[%s4226_s1 + $0x8e0] ss:$16 sps:$4 sm:$0xff]   ;;  %v3222_v44 = vld [vmem:[%s4226_s1 + $0x8e8] ss:$16 sps:$4 sm:$0xff]  }
  0xe3   :  { %1933 = vmatpush1.bf16.msra.mxu0 %v3127_v45  ;;  %2138 = vmatpush1.bf16.msra.mxu1 %v3130_v46  ;;  %v3225_v45 = vld [vmem:[%s4227_s0 + $0x20] ss:$0 sps:$4 sm:$0xff]   ;;  %v22_v46 = vlaneseq }
  0xe4   :  { %1934 = vmatprep.subr.bf16.mxu0 %v3135_v47  ;;  %2139 = vmatprep.subr.bf16.mxu1 %v3138_v48  ;;  %v3229_v48 = vmov 0.0  }
  0xe5   :  { %vm4153_vm0 = vcmp.lt.s32.totalorder %v22_v46, 512 }
  0xe6   :  { %26 = vst.msk [vmem:[#allocation2] sm:$0xf] %vm4153_vm0, %v3229_v48  ;;  %27 = vst.msk [vmem:[#allocation3] sm:$0xf] %vm4153_vm0, %v3229_v48 }
  0xe7   :  { %1935 = vmatpush1.bf16.msra.mxu0 %v3133_v49  ;;  %2140 = vmatpush1.bf16.msra.mxu1 %v3136_v50  ;;  %v3230_v49 = vmov 1966171168  }
  0xe8   :  { %1936 = vmatprep.subr.bf16.mxu0 %v3141_v51  ;;  %2141 = vmatprep.subr.bf16.mxu1 %v3144_v52  ;;  %v2245_v50 = vunpack.c.l.s4 %v3230_v49  ;;  %v4161_v52 = vshrl.u32 %v22_v46, 7 }
  0xea   :  { %v2246_v51 = vunpack.c.0.s8 %v2245_v50 }
  0xeb   :  { %1937 = vmatpush1.bf16.msra.mxu0 %v3139_v53  ;;  %2142 = vmatpush1.bf16.msra.mxu1 %v3142_v54 }
  0xec   :  { %1938 = vmatprep.subr.bf16.mxu0 %v3147_v55  ;;  %2143 = vmatprep.subr.bf16.mxu1 %v3150_v56  ;;  %v4168_v55 = vsub.s32 %v2246_v51, %v4161_v52 }
  0xef   :  { %1939 = vmatpush1.bf16.msra.mxu0 %v3145_v57  ;;  %2144 = vmatpush1.bf16.msra.mxu1 %v3148_v58 }
  0xf0   :  { %1940 = vmatprep.subr.bf16.mxu0 %v3153_v59  ;;  %2145 = vmatprep.subr.bf16.mxu1 %v3156_v60 }
  0xf3   :  { %1941 = vmatpush1.bf16.msra.mxu0 %v3151_v61  ;;  %2146 = vmatpush1.bf16.msra.mxu1 %v3154_v62 }
  0xf4   :  { %1942 = vmatprep.subr.bf16.mxu0 %v3159_v63  ;;  %2147 = vmatprep.subr.bf16.mxu1 %v3162_v0 }
  0xf7   :  { %1943 = vmatpush1.bf16.msra.mxu0 %v3157_v1  ;;  %2148 = vmatpush1.bf16.msra.mxu1 %v3160_v2 }
  0xf8   :  { %1944 = vmatprep.subr.bf16.mxu0 %v3165_v3  ;;  %2149 = vmatprep.subr.bf16.mxu1 %v3168_v4 }
  0xfb   :  { %1945 = vmatpush1.bf16.msra.mxu0 %v3163_v5  ;;  %2150 = vmatpush1.bf16.msra.mxu1 %v3166_v6 }
  0xfc   :  { %1946 = vmatprep.subr.bf16.mxu0 %v3171_v7  ;;  %2151 = vmatprep.subr.bf16.mxu1 %v3174_v8 }
  0xff   :  { %1947 = vmatpush1.bf16.msra.mxu0 %v3169_v9  ;;  %2152 = vmatpush1.bf16.msra.mxu1 %v3172_v10 }
 0x100   :  { %1957 = vmatprep.subr.bf16.mxu0 %v3179_v12  ;;  %2162 = vmatprep.subr.bf16.mxu1 %v3182_v14 }
 0x102   :  { %1949 = vmatmul.mubr.bf16.vlgmr.msra.gmra.mrb[0].mxu0 %v2459_v11  ;;  %2154 = vmatmul.mubr.bf16.vlgmr.msra.gmra.mrb[0].mxu1 %v2459_v11 }
 0x103   :  { %1958 = vmatpush1.bf16.msra.mxu0 %v3177_v15  ;;  %2163 = vmatpush1.bf16.msra.mxu1 %v3180_v16 }
 0x104   :  { %1959 = vmatprep.subr.bf16.mxu0 %v3185_v17  ;;  %2164 = vmatprep.subr.bf16.mxu1 %v3188_v13 }
 0x105   :  { %1989 = vmatprep.mubr.bf16.mxu0 %v3228_v22  ;;  %2194 = vmatprep.mubr.bf16.mxu1 %v3228_v22 }
 0x107   :  { %1960 = vmatpush1.bf16.msra.mxu0 %v3183_v18  ;;  %2165 = vmatpush1.bf16.msra.mxu1 %v3186_v19 }
 0x108   :  { %1961 = vmatprep.subr.bf16.mxu0 %v3191_v20  ;;  %2166 = vmatprep.subr.bf16.mxu1 %v3194_v21 }
 0x10b   :  { %1962 = vmatpush1.bf16.msra.mxu0 %v3189_v23  ;;  %2167 = vmatpush1.bf16.msra.mxu1 %v3192_v24 }
 0x10c   :  { %1963 = vmatprep.subr.bf16.mxu0 %v3197_v25  ;;  %2168 = vmatprep.subr.bf16.mxu1 %v3200_v26 }
 0x10f   :  { %1964 = vmatpush1.bf16.msra.mxu0 %v3195_v27  ;;  %2169 = vmatpush1.bf16.msra.mxu1 %v3198_v28 }
 0x110   :  { %1965 = vmatprep.subr.bf16.mxu0 %v3203_v29  ;;  %2170 = vmatprep.subr.bf16.mxu1 %v3206_v30 }
 0x113   :  { %1966 = vmatpush1.bf16.msra.mxu0 %v3201_v31  ;;  %2171 = vmatpush1.bf16.msra.mxu1 %v3204_v32 }
 0x114   :  { %1967 = vmatprep.subr.bf16.mxu0 %v3209_v33  ;;  %2172 = vmatprep.subr.bf16.mxu1 %v3212_v34 }
 0x117   :  { %1968 = vmatpush1.bf16.msra.mxu0 %v3207_v35  ;;  %2173 = vmatpush1.bf16.msra.mxu1 %v3210_v36 }
 0x118   :  { %1969 = vmatprep.subr.bf16.mxu0 %v3215_v37  ;;  %2174 = vmatprep.subr.bf16.mxu1 %v3218_v38 }
 0x11b   :  { %1970 = vmatpush1.bf16.msra.mxu0 %v3213_v39  ;;  %2175 = vmatpush1.bf16.msra.mxu1 %v3216_v40 }
 0x11c   :  { %1971 = vmatprep.subr.bf16.mxu0 %v3221_v41  ;;  %2176 = vmatprep.subr.bf16.mxu1 %v3224_v42 }
 0x11f   :  { %1972 = vmatpush1.bf16.msra.mxu0 %v3219_v43  ;;  %2177 = vmatpush1.bf16.msra.mxu1 %v3222_v44 }
 0x122   :  { %1990 = vmatmul.mubr.bf16.vlgmr.msra.gmra.mrb[0].mxu0 %v3225_v45  ;;  %2195 = vmatmul.mubr.bf16.vlgmr.msra.gmra.mrb[0].mxu1 %v3225_v45 }
 0x1f5   :  { %v4163_v53 = vpop.f32.mrb[0].mxu0  ;;  %v4165_v54 = vpop.f32.mrb[0].mxu1 }
 0x1f6   :  { %v2214_v56 = vrot.slane %v4163_v53, 4  ;;  %v2274_v57 = vmul.f32 %v4163_v53, %v4163_v53  ;;  %v2226_v58 = vrot.slane %v4165_v54, 4  ;;  %v2276_v59 = vmul.f32 %v4165_v54, %v4165_v54  ;;  %v4176_v60 = vpop.f32.mrb[1].mxu0  ;;  %v4178_v61 = vpop.f32.mrb[1].mxu1 }
 0x1f7   :  { %v2220_v62 = vrot.slane %v4176_v60, 4  ;;  %v2275_v63 = vmul.f32 %v4176_v60, %v4176_v60  ;;  %v2232_v0 = vrot.slane %v4178_v61, 4  ;;  %v2277_v1 = vmul.f32 %v4178_v61, %v4178_v61  ;;  %v1995_v2 = vpop.f32.mrb[2].mxu0  ;;  %v2200_v3 = vpop.f32.mrb[2].mxu1 }
 0x1f8   :  { %v2215_v4 = vadd.f32 %v2214_v56, %v4163_v53  ;;  %v2278_v5 = vrot.slane %v2274_v57, 4  ;;  %v2227_v6 = vadd.f32 %v2226_v58, %v4165_v54  ;;  %v2290_v7 = vrot.slane %v2276_v59, 4  ;;  %v1996_v8 = vpop.f32.mrb[3].mxu0  ;;  %v2201_v9 = vpop.f32.mrb[3].mxu1  ;;  %v2213_v2 = vld [vmem:[#allocation2] sm:$0xf] }
 0x1f9   :  { %v2221_v10 = vadd.f32 %v2220_v62, %v4176_v60  ;;  %v2284_v12 = vrot.slane %v2275_v63, 4  ;;  %v2233_v14 = vadd.f32 %v2232_v0, %v4178_v61  ;;  %v2296_v11 = vrot.slane %v2277_v1, 4 }
 0x1fa   :  { %v2216_v15 = vrot.slane %v2215_v4, 2  ;;  %v2279_v16 = vadd.f32 %v2278_v5, %v2274_v57  ;;  %v2228_v17 = vrot.slane %v2227_v6, 2  ;;  %v2291_v13 = vadd.f32 %v2290_v7, %v2276_v59  ;;  %v2273_v5 = vld [vmem:[#allocation3] sm:$0xf] }
 0x1fb   :  { %v2222_v18 = vrot.slane %v2221_v10, 2  ;;  %v2285_v19 = vadd.f32 %v2284_v12, %v2275_v63  ;;  %v2234_v20 = vrot.slane %v2233_v14, 2  ;;  %v2297_v21 = vadd.f32 %v2296_v11, %v2277_v1 }
 0x1fc   :  { %v2217_v22 = vadd.f32 %v2216_v15, %v2215_v4  ;;  %v2280_v23 = vrot.slane %v2279_v16, 2  ;;  %v2229_v24 = vadd.f32 %v2228_v17, %v2227_v6  ;;  %v2292_v25 = vrot.slane %v2291_v13, 2 }
 0x1fd   :  { %v2223_v26 = vadd.f32 %v2222_v18, %v2221_v10  ;;  %v2286_v27 = vrot.slane %v2285_v19, 2  ;;  %v2235_v28 = vadd.f32 %v2234_v20, %v2233_v14  ;;  %v2298_v29 = vrot.slane %v2297_v21, 2 }
 0x1fe   :  { %v2218_v30 = vrot.slane %v2217_v22, 1  ;;  %v2281_v31 = vadd.f32 %v2280_v23, %v2279_v16  ;;  %v2230_v32 = vrot.slane %v2229_v24, 1  ;;  %v2293_v33 = vadd.f32 %v2292_v25, %v2291_v13 }
 0x1ff   :  { %v2224_v34 = vrot.slane %v2223_v26, 1  ;;  %v2287_v35 = vadd.f32 %v2286_v27, %v2285_v19  ;;  %v2236_v36 = vrot.slane %v2235_v28, 1  ;;  %v2299_v37 = vadd.f32 %v2298_v29, %v2297_v21 }
 0x200   :  { %v2219_v38 = vadd.f32 %v2218_v30, %v2217_v22  ;;  %v2282_v39 = vrot.slane %v2281_v31, 1  ;;  %v2231_v40 = vadd.f32 %v2230_v32, %v2229_v24  ;;  %v2294_v41 = vrot.slane %v2293_v33, 1 }
 0x201   :  { %v2225_v42 = vadd.f32 %v2224_v34, %v2223_v26  ;;  %v2288_v43 = vrot.slane %v2287_v35, 1  ;;  %v2237_v44 = vadd.f32 %v2236_v36, %v2235_v28  ;;  %v2300_v45 = vrot.slane %v2299_v37, 1 }
 0x202   :  { %v2283_v46 = vadd.f32 %v2282_v39, %v2281_v31  ;;  %v2295_v48 = vadd.f32 %v2294_v41, %v2293_v33  ;;  %v2373_v21 = vsub.s32 0, %v4161_v52  ;;  %v2387_v33 = vld [vmem:[%s4228_s2] sm:$0xf]  ;;  %v2395_v34 = vsub.s32 1, %v4161_v52 }
 0x203   :  { %v2242_v49 = vcombine.low %v2219_v38, %v2225_v42  ;;  %v2289_v50 = vadd.f32 %v2288_v43, %v2287_v35  ;;  %v2243_v51 = vcombine.low %v2231_v40, %v2237_v44  ;;  %v2301_v56 = vadd.f32 %v2300_v45, %v2299_v37 }
 0x204   :  { %v2399_v35 = vsub.s32 2, %v4161_v52  ;;  %v2403_v36 = vsub.s32 3, %v4161_v52  ;;  %v2396_v37 = vrot.slane %v2387_v33, %v2395_v34 }
 0x205   :  { %v2250_v57 = vrot.slane %v2242_v49, %v4168_v55  ;;  %v2306_v58 = vcombine.low %v2283_v46, %v2289_v50  ;;  %v2257_v59 = vrot.slane %v2243_v51, %v4168_v55  ;;  %v2307_v62 = vcombine.low %v2295_v48, %v2301_v56 }
 0x206   :  { %v2400_v38 = vrot.slane %v2387_v33, %v2399_v35  ;;  %v2404_v39 = vrot.slane %v2387_v33, %v2403_v36 }
 0x207   :  { %v2314_v63 = vrot.slane %v2306_v58, %v4168_v55  ;;  %v2258_v0 = vcombine.low %v2250_v57, %v2257_v59  ;;  %v2321_v1 = vrot.slane %v2307_v62, %v4168_v55 }
 0x209   :  { %v2265_v3 = vrot.slane %v2258_v0, %v4168_v55  ;;  %v2322_v4 = vcombine.low %v2314_v63, %v2321_v1 }
 0x20b   :  { %v2267_v6 = vadd.f32 %v2265_v3, %v2213_v2  ;;  %v2329_v7 = vrot.slane %v2322_v4, %v4168_v55 }
 0x20d   :  { %2272 = vst.msk [vmem:[#allocation2] sm:$0xf] %vm4153_vm0, %v2267_v6  ;;  %v2331_v8 = vadd.f32 %v2329_v7, %v2273_v5 }
 0x20f   :  { %2332 = vst.msk [vmem:[#allocation3] sm:$0xf] %vm4153_vm0, %v2331_v8 }
 0x214   :  { %v2336_v9 = vld [vmem:[#allocation2] sm:$0xf] }
 0x215   :  { %v2340_v10 = vrot.slane %v2336_v9, 1  ;;  %v2343_v11 = vrot.slane %v2336_v9, 2  ;;  %v2346_v17 = vrot.slane %v2336_v9, 3 }
 0x216   :  { %v2337_v12 = vld [vmem:[#allocation3] sm:$0xf] }
 0x217   :  { %v2342_v14 = vadd.f32 %v2340_v10, %v2336_v9  ;;  %v2351_v15 = vrot.slane %v2337_v12, 1  ;;  %v2354_v18 = vrot.slane %v2337_v12, 2  ;;  %v2357_v55 = vrot.slane %v2337_v12, 3 }
 0x219   :  { %v2345_v16 = vadd.f32 %v2343_v11, %v2342_v14  ;;  %v2353_v13 = vadd.f32 %v2351_v15, %v2337_v12 }
 0x21b   :  { %v2348_v19 = vadd.f32 %v2346_v17, %v2345_v16  ;;  %v2356_v20 = vadd.f32 %v2354_v18, %v2353_v13 }
 0x21d   :  { %v2359_v22 = vadd.f32 %v2357_v55, %v2356_v20  ;;  %v2360_v23 = vmul.f32 0.125, %v2348_v19 }
 0x21f   :  { %v2361_v24 = vmul.f32 0.125, %v2359_v22  ;;  %v2362_v47 = vmul.f32 %v2360_v23, %v2360_v23  ;;  %v2374_v25 = vrot.slane %v2360_v23, %v2373_v21 }
 0x221   :  { %v2363_v26 = vsub.f32 %v2361_v24, %v2362_v47  ;;  %v2375_v27 = vsub.f32 %v4163_v53, %v2374_v25  ;;  %v2376_v28 = vsub.f32 %v4176_v60, %v2374_v25  ;;  %v2377_v29 = vsub.f32 %v4165_v54, %v2374_v25  ;;  %v2413_v53 = vld [vmem:[%s4229_s3] sm:$0xf] }
 0x222   :  { %v2378_v30 = vsub.f32 %v4178_v61, %v2374_v25  ;;  %v2392_v60 = vrot.slane %v2387_v33, %v2373_v21  ;;  %v2418_v40 = vrot.slane %v2413_v53, %v2373_v21  ;;  %v2422_v41 = vrot.slane %v2413_v53, %v2395_v34 }
 0x223   :  { %v2364_v31 = vmax.f32 %v2363_v26, 0.0  ;;  %v2426_v42 = vrot.slane %v2413_v53, %v2399_v35  ;;  %v2430_v43 = vrot.slane %v2413_v53, %v2403_v36 }
 0x225   :  { %v2365_v32 = vadd.f32 1e-05, %v2364_v31 }
 0x227   :  { %3226 = vrsqrt.f32 %v2365_v32 }
 0x231   :  { %v3227_v54 = vpop.eup %3226 }
 0x232   :  { %v2382_v61 = vrot.slane %v3227_v54, %v2373_v21 }
 0x234   :  { %v2383_v44 = vmul.f32 %v2382_v61, %v2375_v27  ;;  %v2384_v45 = vmul.f32 %v2382_v61, %v2376_v28  ;;  %v2385_v46 = vmul.f32 %v2382_v61, %v2377_v29  ;;  %v2386_v48 = vmul.f32 %v2382_v61, %v2378_v30 }
 0x236   :  { %v2409_v49 = vmul.f32 %v2392_v60, %v2383_v44  ;;  %v2410_v52 = vmul.f32 %v2396_v37, %v2384_v45  ;;  %v2411_v50 = vmul.f32 %v2400_v38, %v2385_v46  ;;  %v2412_v51 = vmul.f32 %v2404_v39, %v2386_v48 }
 0x238   :  { %v2435_v56 = vadd.f32 %v2418_v40, %v2409_v49  ;;  %v2436_v57 = vadd.f32 %v2422_v41, %v2410_v52  ;;  %v2437_v58 = vadd.f32 %v2426_v42, %v2411_v50  ;;  %v2438_v59 = vadd.f32 %v2430_v43, %v2412_v51 }
 0x23a   :  { %v2439_v62 = vmax.f32 %v2435_v56, 0.0  ;;  %v2440_v63 = vmax.f32 %v2436_v57, 0.0  ;;  %v2441_v0 = vmax.f32 %v2437_v58, 0.0  ;;  %v2442_v1 = vmax.f32 %v2438_v59, 0.0 }
 0x23c   :  { %2443 = vst [vmem:[%s4230_s4] sm:$0xff] %v2439_v62  ;;  %2444 = vst [vmem:[%s4230_s4 + $0x8] sm:$0xff] %v2440_v63 }
 0x23d   :  { %2445 = vst [vmem:[%s4230_s4 + $0x10] sm:$0xff] %v2441_v0  ;;  %2446 = vst [vmem:[%s4230_s4 + $0x18] sm:$0xff] %v2442_v1 }

// kernel: backbone_forward.110
= control target key start
LH: loop header
LB: loop body
LE: loop exit
PB: predicated region body
PF: predicated region fallthrough
CT: control target
= control target key end

     0   :  { %s4226_s1 = inlined_call_operand.vmem [shape: bf16[1152,512], index: 1, kind: input, shape index: {}]   ;;  %s4227_s0 = inlined_call_operand.vmem [shape: bf16[8,1152], index: 0, kind: input, shape index: {}]   ;;  %s4228_s2 = inlined_call_operand.vmem [shape: f32[1,512], index: 2, kind: input, shape index: {}]   ;;  %s4229_s3 = inlined_call_operand.vmem [shape: f32[1,512], index: 3, kind: input, shape index: {}]   ;;  %s4230_s4 = inlined_call_operand.vmem [shape: f32[8,512], index: 4, kind: output, shape index: {}]  }
   0x1   :  { %v2785_v0 = vld [vmem:[%s4226_s1 + $0x4] ss:$16 sps:$4 sm:$0xff]   ;;  %v2787_v1 = vld [vmem:[%s4226_s1 + $0xc] ss:$16 sps:$4 sm:$0xff]   ;;  %v2789_v2 = vld [vmem:[%s4226_s1] ss:$16 sps:$4 sm:$0xff]  }
   0x2   :  { %1793 = vmatprep.subr.bf16.mxu0 %v2785_v0  ;;  %v2790_v3 = vld [vmem:[%s4226_s1 + $0x8] ss:$16 sps:$4 sm:$0xff]   ;;  %1998 = vmatprep.subr.bf16.mxu1 %v2787_v1  ;;  %v2791_v4 = vld [vmem:[%s4226_s1 + $0x24] ss:$16 sps:$4 sm:$0xff]   ;;  %v2793_v5 = vld [vmem:[%s4226_s1 + $0x2c] ss:$16 sps:$4 sm:$0xff]  }
   0x3   :  { %1794 = vmatpush1.bf16.msra.mxu0 %v2789_v2  ;;  %1999 = vmatpush1.bf16.msra.mxu1 %v2790_v3  ;;  %v2795_v6 = vld [vmem:[%s4226_s1 + $0x20] ss:$16 sps:$4 sm:$0xff]   ;;  %v2796_v7 = vld [vmem:[%s4226_s1 + $0x28] ss:$16 sps:$4 sm:$0xff]   ;;  %v2797_v8 = vld [vmem:[%s4226_s1 + $0x44] ss:$16 sps:$4 sm:$0xff]  }
   0x4   :  { %1795 = vmatprep.subr.bf16.mxu0 %v2791_v4  ;;  %2000 = vmatprep.subr.bf16.mxu1 %v2793_v5  ;;  %v2799_v9 = vld [vmem:[%s4226_s1 + $0x4c] ss:$16 sps:$4 sm:$0xff]   ;;  %v2801_v10 = vld [vmem:[%s4226_s1 + $0x40] ss:$16 sps:$4 sm:$0xff]   ;;  %v2802_v11 = vld [vmem:[%s4226_s1 + $0x48] ss:$16 sps:$4 sm:$0xff]  }
   0x5   :  { %v2803_v12 = vld [vmem:[%s4226_s1 + $0x64] ss:$16 sps:$4 sm:$0xff]   ;;  %v2805_v13 = vld [vmem:[%s4226_s1 + $0x6c] ss:$16 sps:$4 sm:$0xff]   ;;  %v2807_v14 = vld [vmem:[%s4226_s1 + $0x60] ss:$16 sps:$4 sm:$0xff]  }
   0x6   :  { %v2808_v15 = vld [vmem:[%s4226_s1 + $0x68] ss:$16 sps:$4 sm:$0xff]   ;;  %v2809_v16 = vld [vmem:[%s4226_s1 + $0x84] ss:$16 sps:$4 sm:$0xff]   ;;  %v2811_v17 = vld [vmem:[%s4226_s1 + $0x8c] ss:$16 sps:$4 sm:$0xff]  }
   0x7   :  { %1796 = vmatpush1.bf16.msra.mxu0 %v2795_v6  ;;  %2001 = vmatpush1.bf16.msra.mxu1 %v2796_v7  ;;  %v2813_v18 = vld [vmem:[%s4226_s1 + $0x80] ss:$16 sps:$4 sm:$0xff]   ;;  %v2814_v19 = vld [vmem:[%s4226_s1 + $0x88] ss:$16 sps:$4 sm:$0xff]   ;;  %v2815_v20 = vld [vmem:[%s4226_s1 + $0xa4] ss:$16 sps:$4 sm:$0xff]  }
   0x8   :  { %1797 = vmatprep.subr.bf16.mxu0 %v2797_v8  ;;  %2002 = vmatprep.subr.bf16.mxu1 %v2799_v9  ;;  %v2817_v21 = vld [vmem:[%s4226_s1 + $0xac] ss:$16 sps:$4 sm:$0xff]   ;;  %v2819_v22 = vld [vmem:[%s4226_s1 + $0xa0] ss:$16 sps:$4 sm:$0xff]   ;;  %v2820_v23 = vld [vmem:[%s4226_s1 + $0xa8] ss:$16 sps:$4 sm:$0xff]  }
   0x9   :  { %v2821_v24 = vld [vmem:[%s4226_s1 + $0xc4] ss:$16 sps:$4 sm:$0xff]   ;;  %v2823_v25 = vld [vmem:[%s4226_s1 + $0xcc] ss:$16 sps:$4 sm:$0xff]   ;;  %v2825_v26 = vld [vmem:[%s4226_s1 + $0xc0] ss:$16 sps:$4 sm:$0xff]  }
   0xa   :  { %v2826_v27 = vld [vmem:[%s4226_s1 + $0xc8] ss:$16 sps:$4 sm:$0xff]   ;;  %v2827_v28 = vld [vmem:[%s4226_s1 + $0xe4] ss:$16 sps:$4 sm:$0xff]   ;;  %v2829_v29 = vld [vmem:[%s4226_s1 + $0xec] ss:$16 sps:$4 sm:$0xff]  }
   0xb   :  { %1798 = vmatpush1.bf16.msra.mxu0 %v2801_v10  ;;  %2003 = vmatpush1.bf16.msra.mxu1 %v2802_v11  ;;  %v2831_v30 = vld [vmem:[%s4226_s1 + $0xe0] ss:$16 sps:$4 sm:$0xff]   ;;  %v2832_v31 = vld [vmem:[%s4226_s1 + $0xe8] ss:$16 sps:$4 sm:$0xff]   ;;  %v2833_v32 = vld [vmem:[%s4226_s1 + $0x104] ss:$16 sps:$4 sm:$0xff]  }
   0xc   :  { %1799 = vmatprep.subr.bf16.mxu0 %v2803_v12  ;;  %2004 = vmatprep.subr.bf16.mxu1 %v2805_v13  ;;  %v2835_v33 = vld [vmem:[%s4226_s1 + $0x10c] ss:$16 sps:$4 sm:$0xff]   ;;  %v2837_v34 = vld [vmem:[%s4226_s1 + $0x100] ss:$16 sps:$4 sm:$0xff]   ;;  %v2838_v35 = vld [vmem:[%s4226_s1 + $0x108] ss:$16 sps:$4 sm:$0xff]  }
   0xd   :  { %v2839_v36 = vld [vmem:[%s4226_s1 + $0x124] ss:$16 sps:$4 sm:$0xff]   ;;  %v2841_v37 = vld [vmem:[%s4226_s1 + $0x12c] ss:$16 sps:$4 sm:$0xff]   ;;  %v2843_v38 = vld [vmem:[%s4226_s1 + $0x120] ss:$16 sps:$4 sm:$0xff]  }
   0xe   :  { %v2844_v39 = vld [vmem:[%s4226_s1 + $0x128] ss:$16 sps:$4 sm:$0xff]   ;;  %v2845_v40 = vld [vmem:[%s4226_s1 + $0x144] ss:$16 sps:$4 sm:$0xff]   ;;  %v2847_v41 = vld [vmem:[%s4226_s1 + $0x14c] ss:$16 sps:$4 sm:$0xff]  }
   0xf   :  { %1800 = vmatpush1.bf16.msra.mxu0 %v2807_v14  ;;  %2005 = vmatpush1.bf16.msra.mxu1 %v2808_v15  ;;  %v2849_v42 = vld [vmem:[%s4226_s1 + $0x140] ss:$16 sps:$4 sm:$0xff]   ;;  %v2850_v43 = vld [vmem:[%s4226_s1 + $0x148] ss:$16 sps:$4 sm:$0xff]   ;;  %v2851_v44 = vld [vmem:[%s4226_s1 + $0x164] ss:$16 sps:$4 sm:$0xff]  }
  0x10   :  { %1801 = vmatprep.subr.bf16.mxu0 %v2809_v16  ;;  %2006 = vmatprep.subr.bf16.mxu1 %v2811_v17  ;;  %v2853_v45 = vld [vmem:[%s4226_s1 + $0x16c] ss:$16 sps:$4 sm:$0xff]   ;;  %v28_v46 = vld [vmem:[%s4227_s0] sm:$0xff]  ;;  %v2856_v49 = vld [vmem:[%s4226_s1 + $0x168] ss:$16 sps:$4 sm:$0xff]  }
  0x11   :  { %v2855_v47 = vld [vmem:[%s4226_s1 + $0x160] ss:$16 sps:$4 sm:$0xff]   ;;  %v2454_v48 = vcombine.high %v28_v46, %v28_v46  ;;  %v2857_v50 = vld [vmem:[%s4226_s1 + $0x184] ss:$16 sps:$4 sm:$0xff]   ;;  %v2859_v51 = vld [vmem:[%s4226_s1 + $0x18c] ss:$16 sps:$4 sm:$0xff]   ;;  %v2453_v4 = vcombine.low %v28_v46, %v28_v46 }
  0x12   :  { %v2861_v52 = vld [vmem:[%s4226_s1 + $0x180] ss:$16 sps:$4 sm:$0xff]   ;;  %v2862_v53 = vld [vmem:[%s4226_s1 + $0x188] ss:$16 sps:$4 sm:$0xff]   ;;  %v2863_v54 = vld [vmem:[%s4226_s1 + $0x1a4] ss:$16 sps:$4 sm:$0xff]  }
  0x13   :  { %1802 = vmatpush1.bf16.msra.mxu0 %v2813_v18  ;;  %2007 = vmatpush1.bf16.msra.mxu1 %v2814_v19  ;;  %v2865_v55 = vld [vmem:[%s4226_s1 + $0x1ac] ss:$16 sps:$4 sm:$0xff]   ;;  %v2867_v56 = vld [vmem:[%s4226_s1 + $0x1a0] ss:$16 sps:$4 sm:$0xff]   ;;  %v2868_v57 = vld [vmem:[%s4226_s1 + $0x1a8] ss:$16 sps:$4 sm:$0xff]  }
  0x14   :  { %1803 = vmatprep.subr.bf16.mxu0 %v2815_v20  ;;  %2008 = vmatprep.subr.bf16.mxu1 %v2817_v21  ;;  %v2869_v58 = vld [vmem:[%s4226_s1 + $0x1c4] ss:$16 sps:$4 sm:$0xff]   ;;  %v2871_v59 = vld [vmem:[%s4226_s1 + $0x1cc] ss:$16 sps:$4 sm:$0xff]   ;;  %v2873_v60 = vld [vmem:[%s4226_s1 + $0x1c0] ss:$16 sps:$4 sm:$0xff]  }
  0x15   :  { %1825 = vmatprep.mubr.bf16.mxu0 %v2454_v48  ;;  %2030 = vmatprep.mubr.bf16.mxu1 %v2454_v48  ;;  %v2874_v61 = vld [vmem:[%s4226_s1 + $0x1c8] ss:$16 sps:$4 sm:$0xff]   ;;  %v2875_v62 = vld [vmem:[%s4226_s1 + $0x1e4] ss:$16 sps:$4 sm:$0xff]   ;;  %v2877_v63 = vld [vmem:[%s4226_s1 + $0x1ec] ss:$16 sps:$4 sm:$0xff]  }
  0x16   :  { %v2879_v0 = vld [vmem:[%s4226_s1 + $0x1e0] ss:$16 sps:$4 sm:$0xff]   ;;  %v2880_v1 = vld [vmem:[%s4226_s1 + $0x1e8] ss:$16 sps:$4 sm:$0xff]   ;;  %v2885_v2 = vld [vmem:[%s4226_s1 + $0x204] ss:$16 sps:$4 sm:$0xff]  }
  0x17   :  { %1804 = vmatpush1.bf16.msra.mxu0 %v2819_v22  ;;  %2009 = vmatpush1.bf16.msra.mxu1 %v2820_v23  ;;  %v2888_v3 = vld [vmem:[%s4226_s1 + $0x20c] ss:$16 sps:$4 sm:$0xff]   ;;  %v2883_v5 = vld [vmem:[%s4226_s1 + $0x200] ss:$16 sps:$4 sm:$0xff]   ;;  %v2886_v6 = vld [vmem:[%s4226_s1 + $0x208] ss:$16 sps:$4 sm:$0xff]  }
  0x18   :  { %1805 = vmatprep.subr.bf16.mxu0 %v2821_v24  ;;  %2010 = vmatprep.subr.bf16.mxu1 %v2823_v25  ;;  %v2891_v7 = vld [vmem:[%s4226_s1 + $0x224] ss:$16 sps:$4 sm:$0xff]   ;;  %v2894_v8 = vld [vmem:[%s4226_s1 + $0x22c] ss:$16 sps:$4 sm:$0xff]   ;;  %v2889_v9 = vld [vmem:[%s4226_s1 + $0x220] ss:$16 sps:$4 sm:$0xff]  }
  0x19   :  { %v2892_v10 = vld [vmem:[%s4226_s1 + $0x228] ss:$16 sps:$4 sm:$0xff]   ;;  %v2897_v11 = vld [vmem:[%s4226_s1 + $0x244] ss:$16 sps:$4 sm:$0xff]   ;;  %v2900_v12 = vld [vmem:[%s4226_s1 + $0x24c] ss:$16 sps:$4 sm:$0xff]  }
  0x1a   :  { %v2895_v13 = vld [vmem:[%s4226_s1 + $0x240] ss:$16 sps:$4 sm:$0xff]   ;;  %v2898_v14 = vld [vmem:[%s4226_s1 + $0x248] ss:$16 sps:$4 sm:$0xff]   ;;  %v2903_v15 = vld [vmem:[%s4226_s1 + $0x264] ss:$16 sps:$4 sm:$0xff]  }
  0x1b   :  { %1806 = vmatpush1.bf16.msra.mxu0 %v2825_v26  ;;  %2011 = vmatpush1.bf16.msra.mxu1 %v2826_v27  ;;  %v2906_v16 = vld [vmem:[%s4226_s1 + $0x26c] ss:$16 sps:$4 sm:$0xff]   ;;  %v2901_v17 = vld [vmem:[%s4226_s1 + $0x260] ss:$16 sps:$4 sm:$0xff]   ;;  %v2904_v18 = vld [vmem:[%s4226_s1 + $0x268] ss:$16 sps:$4 sm:$0xff]  }
  0x1c   :  { %1807 = vmatprep.subr.bf16.mxu0 %v2827_v28  ;;  %2012 = vmatprep.subr.bf16.mxu1 %v2829_v29  ;;  %v2909_v19 = vld [vmem:[%s4226_s1 + $0x284] ss:$16 sps:$4 sm:$0xff]   ;;  %v2912_v20 = vld [vmem:[%s4226_s1 + $0x28c] ss:$16 sps:$4 sm:$0xff]   ;;  %v2907_v21 = vld [vmem:[%s4226_s1 + $0x280] ss:$16 sps:$4 sm:$0xff]  }
  0x1d   :  { %v2910_v22 = vld [vmem:[%s4226_s1 + $0x288] ss:$16 sps:$4 sm:$0xff]   ;;  %v2915_v23 = vld [vmem:[%s4226_s1 + $0x2a4] ss:$16 sps:$4 sm:$0xff]   ;;  %v2918_v24 = vld [vmem:[%s4226_s1 + $0x2ac] ss:$16 sps:$4 sm:$0xff]  }
  0x1e   :  { %v2913_v25 = vld [vmem:[%s4226_s1 + $0x2a0] ss:$16 sps:$4 sm:$0xff]   ;;  %v2916_v26 = vld [vmem:[%s4226_s1 + $0x2a8] ss:$16 sps:$4 sm:$0xff]   ;;  %v2921_v27 = vld [vmem:[%s4226_s1 + $0x2c4] ss:$16 sps:$4 sm:$0xff]  }
  0x1f   :  { %1808 = vmatpush1.bf16.msra.mxu0 %v2831_v30  ;;  %2013 = vmatpush1.bf16.msra.mxu1 %v2832_v31  ;;  %v2924_v28 = vld [vmem:[%s4226_s1 + $0x2cc] ss:$16 sps:$4 sm:$0xff]   ;;  %v2919_v31 = vld [vmem:[%s4226_s1 + $0x2c0] ss:$16 sps:$4 sm:$0xff]   ;;  %v2946_v48 = vld [vmem:[%s4226_s1 + $0x348] ss:$16 sps:$4 sm:$0xff]  }
  0x20   :  { %1809 = vmatprep.subr.bf16.mxu0 %v2833_v32  ;;  %2014 = vmatprep.subr.bf16.mxu1 %v2835_v33  ;;  %v3532_v29 = vld [vmem:[%s4227_s0 + $0x8] sm:$0xff]  ;;  %v2927_v33 = vld [vmem:[%s4226_s1 + $0x2e4] ss:$16 sps:$4 sm:$0xff]  }
  0x21   :  { %v2456_v30 = vcombine.high %v3532_v29, %v3532_v29  ;;  %v2922_v32 = vld [vmem:[%s4226_s1 + $0x2c8] ss:$16 sps:$4 sm:$0xff]   ;;  %v2948_v46 = vld [vmem:[%s4226_s1 + $0x34c] ss:$16 sps:$4 sm:$0xff]  }
  0x23   :  { %1810 = vmatpush1.bf16.msra.mxu0 %v2837_v34  ;;  %2015 = vmatpush1.bf16.msra.mxu1 %v2838_v35  ;;  %v2930_v34 = vld [vmem:[%s4226_s1 + $0x2ec] ss:$16 sps:$4 sm:$0xff]   ;;  %v2925_v35 = vld [vmem:[%s4226_s1 + $0x2e0] ss:$16 sps:$4 sm:$0xff]  }
  0x24   :  { %1811 = vmatprep.subr.bf16.mxu0 %v2839_v36  ;;  %2016 = vmatprep.subr.bf16.mxu1 %v2841_v37  ;;  %v2928_v36 = vld [vmem:[%s4226_s1 + $0x2e8] ss:$16 sps:$4 sm:$0xff]   ;;  %v2933_v37 = vld [vmem:[%s4226_s1 + $0x304] ss:$16 sps:$4 sm:$0xff]  }
  0x27   :  { %1812 = vmatpush1.bf16.msra.mxu0 %v2843_v38  ;;  %2017 = vmatpush1.bf16.msra.mxu1 %v2844_v39  ;;  %v2936_v38 = vld [vmem:[%s4226_s1 + $0x30c] ss:$16 sps:$4 sm:$0xff]   ;;  %v2931_v39 = vld [vmem:[%s4226_s1 + $0x300] ss:$16 sps:$4 sm:$0xff]  }
  0x28   :  { %1813 = vmatprep.subr.bf16.mxu0 %v2845_v40  ;;  %2018 = vmatprep.subr.bf16.mxu1 %v2847_v41  ;;  %v2934_v40 = vld [vmem:[%s4226_s1 + $0x308] ss:$16 sps:$4 sm:$0xff]   ;;  %v2939_v41 = vld [vmem:[%s4226_s1 + $0x324] ss:$16 sps:$4 sm:$0xff]  }
  0x2b   :  { %1814 = vmatpush1.bf16.msra.mxu0 %v2849_v42  ;;  %2019 = vmatpush1.bf16.msra.mxu1 %v2850_v43  ;;  %v2942_v42 = vld [vmem:[%s4226_s1 + $0x32c] ss:$16 sps:$4 sm:$0xff]   ;;  %v2937_v43 = vld [vmem:[%s4226_s1 + $0x320] ss:$16 sps:$4 sm:$0xff]  }
  0x2c   :  { %1815 = vmatprep.subr.bf16.mxu0 %v2851_v44  ;;  %2020 = vmatprep.subr.bf16.mxu1 %v2853_v45  ;;  %v2940_v44 = vld [vmem:[%s4226_s1 + $0x328] ss:$16 sps:$4 sm:$0xff]   ;;  %v2945_v45 = vld [vmem:[%s4226_s1 + $0x344] ss:$16 sps:$4 sm:$0xff]  }
  0x2f   :  { %1816 = vmatpush1.bf16.msra.mxu0 %v2855_v47  ;;  %2021 = vmatpush1.bf16.msra.mxu1 %v2856_v49  ;;  %v2943_v47 = vld [vmem:[%s4226_s1 + $0x340] ss:$16 sps:$4 sm:$0xff]   ;;  %v2951_v49 = vld [vmem:[%s4226_s1 + $0x364] ss:$16 sps:$4 sm:$0xff]  }
  0x30   :  { %1817 = vmatprep.subr.bf16.mxu0 %v2857_v50  ;;  %2022 = vmatprep.subr.bf16.mxu1 %v2859_v51  ;;  %v2954_v50 = vld [vmem:[%s4226_s1 + $0x36c] ss:$16 sps:$4 sm:$0xff]   ;;  %v2949_v51 = vld [vmem:[%s4226_s1 + $0x360] ss:$16 sps:$4 sm:$0xff]  }
  0x33   :  { %1818 = vmatpush1.bf16.msra.mxu0 %v2861_v52  ;;  %2023 = vmatpush1.bf16.msra.mxu1 %v2862_v53  ;;  %v2952_v52 = vld [vmem:[%s4226_s1 + $0x368] ss:$16 sps:$4 sm:$0xff]   ;;  %v2957_v53 = vld [vmem:[%s4226_s1 + $0x384] ss:$16 sps:$4 sm:$0xff]  }
  0x34   :  { %1819 = vmatprep.subr.bf16.mxu0 %v2863_v54  ;;  %2024 = vmatprep.subr.bf16.mxu1 %v2865_v55  ;;  %v2960_v54 = vld [vmem:[%s4226_s1 + $0x38c] ss:$16 sps:$4 sm:$0xff]   ;;  %v2955_v55 = vld [vmem:[%s4226_s1 + $0x380] ss:$16 sps:$4 sm:$0xff]  }
  0x37   :  { %1820 = vmatpush1.bf16.msra.mxu0 %v2867_v56  ;;  %2025 = vmatpush1.bf16.msra.mxu1 %v2868_v57  ;;  %v2958_v56 = vld [vmem:[%s4226_s1 + $0x388] ss:$16 sps:$4 sm:$0xff]   ;;  %v2963_v57 = vld [vmem:[%s4226_s1 + $0x3a4] ss:$16 sps:$4 sm:$0xff]  }
  0x38   :  { %1821 = vmatprep.subr.bf16.mxu0 %v2869_v58  ;;  %2026 = vmatprep.subr.bf16.mxu1 %v2871_v59  ;;  %v2966_v58 = vld [vmem:[%s4226_s1 + $0x3ac] ss:$16 sps:$4 sm:$0xff]   ;;  %v2961_v59 = vld [vmem:[%s4226_s1 + $0x3a0] ss:$16 sps:$4 sm:$0xff]  }
  0x3b   :  { %1822 = vmatpush1.bf16.msra.mxu0 %v2873_v60  ;;  %2027 = vmatpush1.bf16.msra.mxu1 %v2874_v61  ;;  %v2964_v60 = vld [vmem:[%s4226_s1 + $0x3a8] ss:$16 sps:$4 sm:$0xff]   ;;  %v2969_v61 = vld [vmem:[%s4226_s1 + $0x3c4] ss:$16 sps:$4 sm:$0xff]  }
  0x3c   :  { %1823 = vmatprep.subr.bf16.mxu0 %v2875_v62  ;;  %2028 = vmatprep.subr.bf16.mxu1 %v2877_v63  ;;  %v2972_v62 = vld [vmem:[%s4226_s1 + $0x3cc] ss:$16 sps:$4 sm:$0xff]   ;;  %v2967_v63 = vld [vmem:[%s4226_s1 + $0x3c0] ss:$16 sps:$4 sm:$0xff]  }
  0x3f   :  { %1824 = vmatpush1.bf16.msra.mxu0 %v2879_v0  ;;  %2029 = vmatpush1.bf16.msra.mxu1 %v2880_v1  ;;  %v2970_v0 = vld [vmem:[%s4226_s1 + $0x3c8] ss:$16 sps:$4 sm:$0xff]   ;;  %v2975_v1 = vld [vmem:[%s4226_s1 + $0x3e4] ss:$16 sps:$4 sm:$0xff]  }
  0x40   :  { %1834 = vmatprep.subr.bf16.mxu0 %v2885_v2  ;;  %2039 = vmatprep.subr.bf16.mxu1 %v2888_v3  ;;  %v2978_v2 = vld [vmem:[%s4226_s1 + $0x3ec] ss:$16 sps:$4 sm:$0xff]   ;;  %v2973_v3 = vld [vmem:[%s4226_s1 + $0x3e0] ss:$16 sps:$4 sm:$0xff]  }
  0x42   :  { %1826 = vmatmul.mubr.bf16.vlgmr.msra.gmra.mrb[0].mxu0 %v2453_v4  ;;  %2031 = vmatmul.mubr.bf16.vlgmr.msra.gmra.mrb[0].mxu1 %v2453_v4  ;;  %v2976_v4 = vld [vmem:[%s4226_s1 + $0x3e8] ss:$16 sps:$4 sm:$0xff]  }
  0x43   :  { %1835 = vmatpush1.bf16.msra.mxu0 %v2883_v5  ;;  %2040 = vmatpush1.bf16.msra.mxu1 %v2886_v6  ;;  %v2983_v5 = vld [vmem:[%s4226_s1 + $0x404] ss:$16 sps:$4 sm:$0xff]   ;;  %v2986_v6 = vld [vmem:[%s4226_s1 + $0x40c] ss:$16 sps:$4 sm:$0xff]  }
  0x44   :  { %1836 = vmatprep.subr.bf16.mxu0 %v2891_v7  ;;  %2041 = vmatprep.subr.bf16.mxu1 %v2894_v8  ;;  %v2455_v7 = vcombine.low %v3532_v29, %v3532_v29  ;;  %v2981_v8 = vld [vmem:[%s4226_s1 + $0x400] ss:$16 sps:$4 sm:$0xff]   ;;  %v3016_v29 = vld [vmem:[%s4226_s1 + $0x4ac] ss:$16 sps:$4 sm:$0xff]  }
  0x45   :  { %1866 = vmatprep.mubr.bf16.mxu0 %v2456_v30  ;;  %2071 = vmatprep.mubr.bf16.mxu1 %v2456_v30  ;;  %v3011_v30 = vld [vmem:[%s4226_s1 + $0x4a0] ss:$16 sps:$4 sm:$0xff]  }
  0x47   :  { %1837 = vmatpush1.bf16.msra.mxu0 %v2889_v9  ;;  %2042 = vmatpush1.bf16.msra.mxu1 %v2892_v10  ;;  %v2984_v9 = vld [vmem:[%s4226_s1 + $0x408] ss:$16 sps:$4 sm:$0xff]   ;;  %v2989_v10 = vld [vmem:[%s4226_s1 + $0x424] ss:$16 sps:$4 sm:$0xff]  }
  0x48   :  { %1838 = vmatprep.subr.bf16.mxu0 %v2897_v11  ;;  %2043 = vmatprep.subr.bf16.mxu1 %v2900_v12  ;;  %v3670_v11 = vld [vmem:[%s4227_s0 + $0x10] sm:$0xff]  ;;  %v2992_v12 = vld [vmem:[%s4226_s1 + $0x42c] ss:$16 sps:$4 sm:$0xff]  }
  0x4b   :  { %1839 = vmatpush1.bf16.msra.mxu0 %v2895_v13  ;;  %2044 = vmatpush1.bf16.msra.mxu1 %v2898_v14  ;;  %v2458_v13 = vcombine.high %v3670_v11, %v3670_v11  ;;  %v2987_v14 = vld [vmem:[%s4226_s1 + $0x420] ss:$16 sps:$4 sm:$0xff]  }
  0x4c   :  { %1840 = vmatprep.subr.bf16.mxu0 %v2903_v15  ;;  %2045 = vmatprep.subr.bf16.mxu1 %v2906_v16  ;;  %v2990_v15 = vld [vmem:[%s4226_s1 + $0x428] ss:$16 sps:$4 sm:$0xff]   ;;  %v2995_v16 = vld [vmem:[%s4226_s1 + $0x444] ss:$16 sps:$4 sm:$0xff]  }
  0x4f   :  { %1841 = vmatpush1.bf16.msra.mxu0 %v2901_v17  ;;  %2046 = vmatpush1.bf16.msra.mxu1 %v2904_v18  ;;  %v2998_v17 = vld [vmem:[%s4226_s1 + $0x44c] ss:$16 sps:$4 sm:$0xff]   ;;  %v2993_v18 = vld [vmem:[%s4226_s1 + $0x440] ss:$16 sps:$4 sm:$0xff]  }
  0x50   :  { %1842 = vmatprep.subr.bf16.mxu0 %v2909_v19  ;;  %2047 = vmatprep.subr.bf16.mxu1 %v2912_v20  ;;  %v2996_v19 = vld [vmem:[%s4226_s1 + $0x448] ss:$16 sps:$4 sm:$0xff]   ;;  %v3001_v20 = vld [vmem:[%s4226_s1 + $0x464] ss:$16 sps:$4 sm:$0xff]  }
  0x53   :  { %1843 = vmatpush1.bf16.msra.mxu0 %v2907_v21  ;;  %2048 = vmatpush1.bf16.msra.mxu1 %v2910_v22  ;;  %v3004_v21 = vld [vmem:[%s4226_s1 + $0x46c] ss:$16 sps:$4 sm:$0xff]   ;;  %v2999_v22 = vld [vmem:[%s4226_s1 + $0x460] ss:$16 sps:$4 sm:$0xff]  }
  0x54   :  { %1844 = vmatprep.subr.bf16.mxu0 %v2915_v23  ;;  %2049 = vmatprep.subr.bf16.mxu1 %v2918_v24  ;;  %v3002_v23 = vld [vmem:[%s4226_s1 + $0x468] ss:$16 sps:$4 sm:$0xff]   ;;  %v3007_v24 = vld [vmem:[%s4226_s1 + $0x484] ss:$16 sps:$4 sm:$0xff]  }
  0x57   :  { %1845 = vmatpush1.bf16.msra.mxu0 %v2913_v25  ;;  %2050 = vmatpush1.bf16.msra.mxu1 %v2916_v26  ;;  %v3010_v25 = vld [vmem:[%s4226_s1 + $0x48c] ss:$16 sps:$4 sm:$0xff]   ;;  %v3005_v26 = vld [vmem:[%s4226_s1 + $0x480] ss:$16 sps:$4 sm:$0xff]  }
  0x58   :  { %1846 = vmatprep.subr.bf16.mxu0 %v2921_v27  ;;  %2051 = vmatprep.subr.bf16.mxu1 %v2924_v28  ;;  %v3008_v27 = vld [vmem:[%s4226_s1 + $0x488] ss:$16 sps:$4 sm:$0xff]   ;;  %v3013_v28 = vld [vmem:[%s4226_s1 + $0x4a4] ss:$16 sps:$4 sm:$0xff]  }
  0x5b   :  { %1847 = vmatpush1.bf16.msra.mxu0 %v2919_v31  ;;  %2052 = vmatpush1.bf16.msra.mxu1 %v2922_v32  ;;  %v3014_v31 = vld [vmem:[%s4226_s1 + $0x4a8] ss:$16 sps:$4 sm:$0xff]   ;;  %v3019_v32 = vld [vmem:[%s4226_s1 + $0x4c4] ss:$16 sps:$4 sm:$0xff]  }
  0x5c   :  { %1848 = vmatprep.subr.bf16.mxu0 %v2927_v33  ;;  %2053 = vmatprep.subr.bf16.mxu1 %v2930_v34  ;;  %v3022_v33 = vld [vmem:[%s4226_s1 + $0x4cc] ss:$16 sps:$4 sm:$0xff]   ;;  %v3017_v34 = vld [vmem:[%s4226_s1 + $0x4c0] ss:$16 sps:$4 sm:$0xff]  }
  0x5f   :  { %1849 = vmatpush1.bf16.msra.mxu0 %v2925_v35  ;;  %2054 = vmatpush1.bf16.msra.mxu1 %v2928_v36  ;;  %v3020_v35 = vld [vmem:[%s4226_s1 + $0x4c8] ss:$16 sps:$4 sm:$0xff]   ;;  %v3025_v36 = vld [vmem:[%s4226_s1 + $0x4e4] ss:$16 sps:$4 sm:$0xff]  }
  0x60   :  { %1850 = vmatprep.subr.bf16.mxu0 %v2933_v37  ;;  %2055 = vmatprep.subr.bf16.mxu1 %v2936_v38  ;;  %v3028_v37 = vld [vmem:[%s4226_s1 + $0x4ec] ss:$16 sps:$4 sm:$0xff]   ;;  %v3023_v38 = vld [vmem:[%s4226_s1 + $0x4e0] ss:$16 sps:$4 sm:$0xff]  }
  0x63   :  { %1851 = vmatpush1.bf16.msra.mxu0 %v2931_v39  ;;  %2056 = vmatpush1.bf16.msra.mxu1 %v2934_v40  ;;  %v3026_v39 = vld [vmem:[%s4226_s1 + $0x4e8] ss:$16 sps:$4 sm:$0xff]   ;;  %v3031_v40 = vld [vmem:[%s4226_s1 + $0x504] ss:$16 sps:$4 sm:$0xff]  }
  0x64   :  { %1852 = vmatprep.subr.bf16.mxu0 %v2939_v41  ;;  %2057 = vmatprep.subr.bf16.mxu1 %v2942_v42  ;;  %v3034_v41 = vld [vmem:[%s4226_s1 + $0x50c] ss:$16 sps:$4 sm:$0xff]   ;;  %v3029_v42 = vld [vmem:[%s4226_s1 + $0x500] ss:$16 sps:$4 sm:$0xff]  }
  0x67   :  { %1853 = vmatpush1.bf16.msra.mxu0 %v2937_v43  ;;  %2058 = vmatpush1.bf16.msra.mxu1 %v2940_v44  ;;  %v3032_v43 = vld [vmem:[%s4226_s1 + $0x508] ss:$16 sps:$4 sm:$0xff]   ;;  %v3037_v44 = vld [vmem:[%s4226_s1 + $0x524] ss:$16 sps:$4 sm:$0xff]  }
  0x68   :  { %1854 = vmatprep.subr.bf16.mxu0 %v2945_v45  ;;  %2059 = vmatprep.subr.bf16.mxu1 %v2948_v46  ;;  %v3040_v45 = vld [vmem:[%s4226_s1 + $0x52c] ss:$16 sps:$4 sm:$0xff]   ;;  %v3035_v46 = vld [vmem:[%s4226_s1 + $0x520] ss:$16 sps:$4 sm:$0xff]  }
  0x6b   :  { %1855 = vmatpush1.bf16.msra.mxu0 %v2943_v47  ;;  %2060 = vmatpush1.bf16.msra.mxu1 %v2946_v48  ;;  %v3038_v47 = vld [vmem:[%s4226_s1 + $0x528] ss:$16 sps:$4 sm:$0xff]   ;;  %v3043_v48 = vld [vmem:[%s4226_s1 + $0x544] ss:$16 sps:$4 sm:$0xff]  }
  0x6c   :  { %1856 = vmatprep.subr.bf16.mxu0 %v2951_v49  ;;  %2061 = vmatprep.subr.bf16.mxu1 %v2954_v50  ;;  %v3046_v49 = vld [vmem:[%s4226_s1 + $0x54c] ss:$16 sps:$4 sm:$0xff]   ;;  %v3041_v50 = vld [vmem:[%s4226_s1 + $0x540] ss:$16 sps:$4 sm:$0xff]  }
  0x6f   :  { %1857 = vmatpush1.bf16.msra.mxu0 %v2949_v51  ;;  %2062 = vmatpush1.bf16.msra.mxu1 %v2952_v52  ;;  %v3044_v51 = vld [vmem:[%s4226_s1 + $0x548] ss:$16 sps:$4 sm:$0xff]   ;;  %v3049_v52 = vld [vmem:[%s4226_s1 + $0x564] ss:$16 sps:$4 sm:$0xff]  }
  0x70   :  { %1858 = vmatprep.subr.bf16.mxu0 %v2957_v53  ;;  %2063 = vmatprep.subr.bf16.mxu1 %v2960_v54  ;;  %v3052_v53 = vld [vmem:[%s4226_s1 + $0x56c] ss:$16 sps:$4 sm:$0xff]   ;;  %v3047_v54 = vld [vmem:[%s4226_s1 + $0x560] ss:$16 sps:$4 sm:$0xff]  }
  0x73   :  { %1859 = vmatpush1.bf16.msra.mxu0 %v2955_v55  ;;  %2064 = vmatpush1.bf16.msra.mxu1 %v2958_v56  ;;  %v3050_v55 = vld [vmem:[%s4226_s1 + $0x568] ss:$16 sps:$4 sm:$0xff]   ;;  %v3055_v56 = vld [vmem:[%s4226_s1 + $0x584] ss:$16 sps:$4 sm:$0xff]  }
  0x74   :  { %1860 = vmatprep.subr.bf16.mxu0 %v2963_v57  ;;  %2065 = vmatprep.subr.bf16.mxu1 %v2966_v58  ;;  %v3058_v57 = vld [vmem:[%s4226_s1 + $0x58c] ss:$16 sps:$4 sm:$0xff]   ;;  %v3053_v58 = vld [vmem:[%s4226_s1 + $0x580] ss:$16 sps:$4 sm:$0xff]  }
  0x77   :  { %1861 = vmatpush1.bf16.msra.mxu0 %v2961_v59  ;;  %2066 = vmatpush1.bf16.msra.mxu1 %v2964_v60  ;;  %v3056_v59 = vld [vmem:[%s4226_s1 + $0x588] ss:$16 sps:$4 sm:$0xff]   ;;  %v3061_v60 = vld [vmem:[%s4226_s1 + $0x5a4] ss:$16 sps:$4 sm:$0xff]  }
  0x78   :  { %1862 = vmatprep.subr.bf16.mxu0 %v2969_v61  ;;  %2067 = vmatprep.subr.bf16.mxu1 %v2972_v62  ;;  %v3064_v61 = vld [vmem:[%s4226_s1 + $0x5ac] ss:$16 sps:$4 sm:$0xff]   ;;  %v3059_v62 = vld [vmem:[%s4226_s1 + $0x5a0] ss:$16 sps:$4 sm:$0xff]  }
  0x7b   :  { %1863 = vmatpush1.bf16.msra.mxu0 %v2967_v63  ;;  %2068 = vmatpush1.bf16.msra.mxu1 %v2970_v0  ;;  %v3062_v63 = vld [vmem:[%s4226_s1 + $0x5a8] ss:$16 sps:$4 sm:$0xff]   ;;  %v3067_v0 = vld [vmem:[%s4226_s1 + $0x5c4] ss:$16 sps:$4 sm:$0xff]  }
  0x7c   :  { %1864 = vmatprep.subr.bf16.mxu0 %v2975_v1  ;;  %2069 = vmatprep.subr.bf16.mxu1 %v2978_v2  ;;  %v3070_v1 = vld [vmem:[%s4226_s1 + $0x5cc] ss:$16 sps:$4 sm:$0xff]   ;;  %v3065_v2 = vld [vmem:[%s4226_s1 + $0x5c0] ss:$16 sps:$4 sm:$0xff]  }
  0x7f   :  { %1865 = vmatpush1.bf16.msra.mxu0 %v2973_v3  ;;  %2070 = vmatpush1.bf16.msra.mxu1 %v2976_v4  ;;  %v3068_v3 = vld [vmem:[%s4226_s1 + $0x5c8] ss:$16 sps:$4 sm:$0xff]   ;;  %v3073_v4 = vld [vmem:[%s4226_s1 + $0x5e4] ss:$16 sps:$4 sm:$0xff]  }
  0x80   :  { %1875 = vmatprep.subr.bf16.mxu0 %v2983_v5  ;;  %2080 = vmatprep.subr.bf16.mxu1 %v2986_v6  ;;  %v3076_v5 = vld [vmem:[%s4226_s1 + $0x5ec] ss:$16 sps:$4 sm:$0xff]   ;;  %v3071_v6 = vld [vmem:[%s4226_s1 + $0x5e0] ss:$16 sps:$4 sm:$0xff]  }
  0x82   :  { %1867 = vmatmul.mubr.bf16.vlgmr.msra.gmra.mrb[0].mxu0 %v2455_v7  ;;  %2072 = vmatmul.mubr.bf16.vlgmr.msra.gmra.mrb[0].mxu1 %v2455_v7  ;;  %v3074_v7 = vld [vmem:[%s4226_s1 + $0x5e8] ss:$16 sps:$4 sm:$0xff]  }
  0x83   :  { %1876 = vmatpush1.bf16.msra.mxu0 %v2981_v8  ;;  %2081 = vmatpush1.bf16.msra.mxu1 %v2984_v9  ;;  %v3081_v8 = vld [vmem:[%s4226_s1 + $0x604] ss:$16 sps:$4 sm:$0xff]   ;;  %v3084_v9 = vld [vmem:[%s4226_s1 + $0x60c] ss:$16 sps:$4 sm:$0xff]  }
  0x84   :  { %1877 = vmatprep.subr.bf16.mxu0 %v2989_v10  ;;  %2082 = vmatprep.subr.bf16.mxu1 %v2992_v12  ;;  %v2457_v10 = vcombine.low %v3670_v11, %v3670_v11  ;;  %v3079_v12 = vld [vmem:[%s4226_s1 + $0x600] ss:$16 sps:$4 sm:$0xff]   ;;  %v3087_v11 = vld [vmem:[%s4226_s1 + $0x624] ss:$16 sps:$4 sm:$0xff]  }
  0x85   :  { %1907 = vmatprep.mubr.bf16.mxu0 %v2458_v13  ;;  %2112 = vmatprep.mubr.bf16.mxu1 %v2458_v13  ;;  %v3865_v13 = vld [vmem:[%s4227_s0 + $0x18] sm:$0xff] }
  0x87   :  { %1878 = vmatpush1.bf16.msra.mxu0 %v2987_v14  ;;  %2083 = vmatpush1.bf16.msra.mxu1 %v2990_v15  ;;  %v3082_v14 = vld [vmem:[%s4226_s1 + $0x608] ss:$16 sps:$4 sm:$0xff]   ;;  %v3090_v15 = vld [vmem:[%s4226_s1 + $0x62c] ss:$16 sps:$4 sm:$0xff]  }
  0x88   :  { %1879 = vmatprep.subr.bf16.mxu0 %v2995_v16  ;;  %2084 = vmatprep.subr.bf16.mxu1 %v2998_v17  ;;  %v2460_v16 = vcombine.high %v3865_v13, %v3865_v13  ;;  %v3085_v17 = vld [vmem:[%s4226_s1 + $0x620] ss:$16 sps:$4 sm:$0xff]  }
  0x8b   :  { %1880 = vmatpush1.bf16.msra.mxu0 %v2993_v18  ;;  %2085 = vmatpush1.bf16.msra.mxu1 %v2996_v19  ;;  %v3088_v18 = vld [vmem:[%s4226_s1 + $0x628] ss:$16 sps:$4 sm:$0xff]   ;;  %v3093_v19 = vld [vmem:[%s4226_s1 + $0x644] ss:$16 sps:$4 sm:$0xff]  }
  0x8c   :  { %1881 = vmatprep.subr.bf16.mxu0 %v3001_v20  ;;  %2086 = vmatprep.subr.bf16.mxu1 %v3004_v21  ;;  %v3096_v20 = vld [vmem:[%s4226_s1 + $0x64c] ss:$16 sps:$4 sm:$0xff]   ;;  %v3091_v21 = vld [vmem:[%s4226_s1 + $0x640] ss:$16 sps:$4 sm:$0xff]  }
  0x8f   :  { %1882 = vmatpush1.bf16.msra.mxu0 %v2999_v22  ;;  %2087 = vmatpush1.bf16.msra.mxu1 %v3002_v23  ;;  %v3094_v22 = vld [vmem:[%s4226_s1 + $0x648] ss:$16 sps:$4 sm:$0xff]   ;;  %v3099_v23 = vld [vmem:[%s4226_s1 + $0x664] ss:$16 sps:$4 sm:$0xff]  }
  0x90   :  { %1883 = vmatprep.subr.bf16.mxu0 %v3007_v24  ;;  %2088 = vmatprep.subr.bf16.mxu1 %v3010_v25  ;;  %v3102_v24 = vld [vmem:[%s4226_s1 + $0x66c] ss:$16 sps:$4 sm:$0xff]   ;;  %v3097_v25 = vld [vmem:[%s4226_s1 + $0x660] ss:$16 sps:$4 sm:$0xff]  }
  0x93   :  { %1884 = vmatpush1.bf16.msra.mxu0 %v3005_v26  ;;  %2089 = vmatpush1.bf16.msra.mxu1 %v3008_v27  ;;  %v3100_v26 = vld [vmem:[%s4226_s1 + $0x668] ss:$16 sps:$4 sm:$0xff]   ;;  %v3105_v27 = vld [vmem:[%s4226_s1 + $0x684] ss:$16 sps:$4 sm:$0xff]  }
  0x94   :  { %1885 = vmatprep.subr.bf16.mxu0 %v3013_v28  ;;  %2090 = vmatprep.subr.bf16.mxu1 %v3016_v29  ;;  %v3108_v28 = vld [vmem:[%s4226_s1 + $0x68c] ss:$16 sps:$4 sm:$0xff]   ;;  %v3103_v29 = vld [vmem:[%s4226_s1 + $0x680] ss:$16 sps:$4 sm:$0xff]  }
  0x97   :  { %1886 = vmatpush1.bf16.msra.mxu0 %v3011_v30  ;;  %2091 = vmatpush1.bf16.msra.mxu1 %v3014_v31  ;;  %v3106_v30 = vld [vmem:[%s4226_s1 + $0x688] ss:$16 sps:$4 sm:$0xff]   ;;  %v3111_v31 = vld [vmem:[%s4226_s1 + $0x6a4] ss:$16 sps:$4 sm:$0xff]  }
  0x98   :  { %1887 = vmatprep.subr.bf16.mxu0 %v3019_v32  ;;  %2092 = vmatprep.subr.bf16.mxu1 %v3022_v33  ;;  %v3114_v32 = vld [vmem:[%s4226_s1 + $0x6ac] ss:$16 sps:$4 sm:$0xff]   ;;  %v3109_v33 = vld [vmem:[%s4226_s1 + $0x6a0] ss:$16 sps:$4 sm:$0xff]  }
  0x9b   :  { %1888 = vmatpush1.bf16.msra.mxu0 %v3017_v34  ;;  %2093 = vmatpush1.bf16.msra.mxu1 %v3020_v35  ;;  %v3112_v34 = vld [vmem:[%s4226_s1 + $0x6a8] ss:$16 sps:$4 sm:$0xff]   ;;  %v3117_v35 = vld [vmem:[%s4226_s1 + $0x6c4] ss:$16 sps:$4 sm:$0xff]  }
  0x9c   :  { %1889 = vmatprep.subr.bf16.mxu0 %v3025_v36  ;;  %2094 = vmatprep.subr.bf16.mxu1 %v3028_v37  ;;  %v3120_v36 = vld [vmem:[%s4226_s1 + $0x6cc] ss:$16 sps:$4 sm:$0xff]   ;;  %v3115_v37 = vld [vmem:[%s4226_s1 + $0x6c0] ss:$16 sps:$4 sm:$0xff]  }
  0x9f   :  { %1890 = vmatpush1.bf16.msra.mxu0 %v3023_v38  ;;  %2095 = vmatpush1.bf16.msra.mxu1 %v3026_v39  ;;  %v3118_v38 = vld [vmem:[%s4226_s1 + $0x6c8] ss:$16 sps:$4 sm:$0xff]   ;;  %v3123_v39 = vld [vmem:[%s4226_s1 + $0x6e4] ss:$16 sps:$4 sm:$0xff]  }
  0xa0   :  { %1891 = vmatprep.subr.bf16.mxu0 %v3031_v40  ;;  %2096 = vmatprep.subr.bf16.mxu1 %v3034_v41  ;;  %v3126_v40 = vld [vmem:[%s4226_s1 + $0x6ec] ss:$16 sps:$4 sm:$0xff]   ;;  %v3121_v41 = vld [vmem:[%s4226_s1 + $0x6e0] ss:$16 sps:$4 sm:$0xff]  }
  0xa3   :  { %1892 = vmatpush1.bf16.msra.mxu0 %v3029_v42  ;;  %2097 = vmatpush1.bf16.msra.mxu1 %v3032_v43  ;;  %v3124_v42 = vld [vmem:[%s4226_s1 + $0x6e8] ss:$16 sps:$4 sm:$0xff]   ;;  %v3129_v43 = vld [vmem:[%s4226_s1 + $0x704] ss:$16 sps:$4 sm:$0xff]  }
  0xa4   :  { %1893 = vmatprep.subr.bf16.mxu0 %v3037_v44  ;;  %2098 = vmatprep.subr.bf16.mxu1 %v3040_v45  ;;  %v3132_v44 = vld [vmem:[%s4226_s1 + $0x70c] ss:$16 sps:$4 sm:$0xff]   ;;  %v3127_v45 = vld [vmem:[%s4226_s1 + $0x700] ss:$16 sps:$4 sm:$0xff]  }
  0xa7   :  { %1894 = vmatpush1.bf16.msra.mxu0 %v3035_v46  ;;  %2099 = vmatpush1.bf16.msra.mxu1 %v3038_v47  ;;  %v3130_v46 = vld [vmem:[%s4226_s1 + $0x708] ss:$16 sps:$4 sm:$0xff]   ;;  %v3135_v47 = vld [vmem:[%s4226_s1 + $0x724] ss:$16 sps:$4 sm:$0xff]  }
  0xa8   :  { %1895 = vmatprep.subr.bf16.mxu0 %v3043_v48  ;;  %2100 = vmatprep.subr.bf16.mxu1 %v3046_v49  ;;  %v3138_v48 = vld [vmem:[%s4226_s1 + $0x72c] ss:$16 sps:$4 sm:$0xff]   ;;  %v3133_v49 = vld [vmem:[%s4226_s1 + $0x720] ss:$16 sps:$4 sm:$0xff]  }
  0xab   :  { %1896 = vmatpush1.bf16.msra.mxu0 %v3041_v50  ;;  %2101 = vmatpush1.bf16.msra.mxu1 %v3044_v51  ;;  %v3136_v50 = vld [vmem:[%s4226_s1 + $0x728] ss:$16 sps:$4 sm:$0xff]   ;;  %v3141_v51 = vld [vmem:[%s4226_s1 + $0x744] ss:$16 sps:$4 sm:$0xff]  }
  0xac   :  { %1897 = vmatprep.subr.bf16.mxu0 %v3049_v52  ;;  %2102 = vmatprep.subr.bf16.mxu1 %v3052_v53  ;;  %v3144_v52 = vld [vmem:[%s4226_s1 + $0x74c] ss:$16 sps:$4 sm:$0xff]   ;;  %v3139_v53 = vld [vmem:[%s4226_s1 + $0x740] ss:$16 sps:$4 sm:$0xff]  }
  0xaf   :  { %1898 = vmatpush1.bf16.msra.mxu0 %v3047_v54  ;;  %2103 = vmatpush1.bf16.msra.mxu1 %v3050_v55  ;;  %v3142_v54 = vld [vmem:[%s4226_s1 + $0x748] ss:$16 sps:$4 sm:$0xff]   ;;  %v3147_v55 = vld [vmem:[%s4226_s1 + $0x764] ss:$16 sps:$4 sm:$0xff]  }
  0xb0   :  { %1899 = vmatprep.subr.bf16.mxu0 %v3055_v56  ;;  %2104 = vmatprep.subr.bf16.mxu1 %v3058_v57  ;;  %v3150_v56 = vld [vmem:[%s4226_s1 + $0x76c] ss:$16 sps:$4 sm:$0xff]   ;;  %v3145_v57 = vld [vmem:[%s4226_s1 + $0x760] ss:$16 sps:$4 sm:$0xff]  }
  0xb3   :  { %1900 = vmatpush1.bf16.msra.mxu0 %v3053_v58  ;;  %2105 = vmatpush1.bf16.msra.mxu1 %v3056_v59  ;;  %v3148_v58 = vld [vmem:[%s4226_s1 + $0x768] ss:$16 sps:$4 sm:$0xff]   ;;  %v3153_v59 = vld [vmem:[%s4226_s1 + $0x784] ss:$16 sps:$4 sm:$0xff]  }
  0xb4   :  { %1901 = vmatprep.subr.bf16.mxu0 %v3061_v60  ;;  %2106 = vmatprep.subr.bf16.mxu1 %v3064_v61  ;;  %v3156_v60 = vld [vmem:[%s4226_s1 + $0x78c] ss:$16 sps:$4 sm:$0xff]   ;;  %v3151_v61 = vld [vmem:[%s4226_s1 + $0x780] ss:$16 sps:$4 sm:$0xff]  }
  0xb7   :  { %1902 = vmatpush1.bf16.msra.mxu0 %v3059_v62  ;;  %2107 = vmatpush1.bf16.msra.mxu1 %v3062_v63  ;;  %v3154_v62 = vld [vmem:[%s4226_s1 + $0x788] ss:$16 sps:$4 sm:$0xff]   ;;  %v3159_v63 = vld [vmem:[%s4226_s1 + $0x7a4] ss:$16 sps:$4 sm:$0xff]  }
  0xb8   :  { %1903 = vmatprep.subr.bf16.mxu0 %v3067_v0  ;;  %2108 = vmatprep.subr.bf16.mxu1 %v3070_v1  ;;  %v3162_v0 = vld [vmem:[%s4226_s1 + $0x7ac] ss:$16 sps:$4 sm:$0xff]   ;;  %v3157_v1 = vld [vmem:[%s4226_s1 + $0x7a0] ss:$16 sps:$4 sm:$0xff]  }
  0xbb   :  { %1904 = vmatpush1.bf16.msra.mxu0 %v3065_v2  ;;  %2109 = vmatpush1.bf16.msra.mxu1 %v3068_v3  ;;  %v3160_v2 = vld [vmem:[%s4226_s1 + $0x7a8] ss:$16 sps:$4 sm:$0xff]   ;;  %v3165_v3 = vld [vmem:[%s4226_s1 + $0x7c4] ss:$16 sps:$4 sm:$0xff]  }
  0xbc   :  { %1905 = vmatprep.subr.bf16.mxu0 %v3073_v4  ;;  %2110 = vmatprep.subr.bf16.mxu1 %v3076_v5  ;;  %v3168_v4 = vld [vmem:[%s4226_s1 + $0x7cc] ss:$16 sps:$4 sm:$0xff]   ;;  %v3163_v5 = vld [vmem:[%s4226_s1 + $0x7c0] ss:$16 sps:$4 sm:$0xff]  }
  0xbf   :  { %1906 = vmatpush1.bf16.msra.mxu0 %v3071_v6  ;;  %2111 = vmatpush1.bf16.msra.mxu1 %v3074_v7  ;;  %v3166_v6 = vld [vmem:[%s4226_s1 + $0x7c8] ss:$16 sps:$4 sm:$0xff]   ;;  %v3171_v7 = vld [vmem:[%s4226_s1 + $0x7e4] ss:$16 sps:$4 sm:$0xff]  }
  0xc0   :  { %1916 = vmatprep.subr.bf16.mxu0 %v3081_v8  ;;  %2121 = vmatprep.subr.bf16.mxu1 %v3084_v9  ;;  %v3174_v8 = vld [vmem:[%s4226_s1 + $0x7ec] ss:$16 sps:$4 sm:$0xff]   ;;  %v3169_v9 = vld [vmem:[%s4226_s1 + $0x7e0] ss:$16 sps:$4 sm:$0xff]  }
  0xc2   :  { %1908 = vmatmul.mubr.bf16.vlgmr.msra.gmra.mrb[0].mxu0 %v2457_v10  ;;  %2113 = vmatmul.mubr.bf16.vlgmr.msra.gmra.mrb[0].mxu1 %v2457_v10  ;;  %v3172_v10 = vld [vmem:[%s4226_s1 + $0x7e8] ss:$16 sps:$4 sm:$0xff]  }
  0xc3   :  { %1917 = vmatpush1.bf16.msra.mxu0 %v3079_v12  ;;  %2122 = vmatpush1.bf16.msra.mxu1 %v3082_v14  ;;  %v3179_v12 = vld [vmem:[%s4226_s1 + $0x804] ss:$16 sps:$4 sm:$0xff]   ;;  %v3182_v14 = vld [vmem:[%s4226_s1 + $0x80c] ss:$16 sps:$4 sm:$0xff]  }
  0xc4   :  { %1918 = vmatprep.subr.bf16.mxu0 %v3087_v11  ;;  %2123 = vmatprep.subr.bf16.mxu1 %v3090_v15  ;;  %v2459_v11 = vcombine.low %v3865_v13, %v3865_v13  ;;  %v3177_v15 = vld [vmem:[%s4226_s1 + $0x800] ss:$16 sps:$4 sm:$0xff]   ;;  %v3188_v13 = vld [vmem:[%s4226_s1 + $0x82c] ss:$16 sps:$4 sm:$0xff]  }
  0xc5   :  { %1948 = vmatprep.mubr.bf16.mxu0 %v2460_v16  ;;  %2153 = vmatprep.mubr.bf16.mxu1 %v2460_v16  ;;  %v3180_v16 = vld [vmem:[%s4226_s1 + $0x808] ss:$16 sps:$4 sm:$0xff]  }
  0xc7   :  { %1919 = vmatpush1.bf16.msra.mxu0 %v3085_v17  ;;  %2124 = vmatpush1.bf16.msra.mxu1 %v3088_v18  ;;  %v3185_v17 = vld [vmem:[%s4226_s1 + $0x824] ss:$16 sps:$4 sm:$0xff]   ;;  %v3183_v18 = vld [vmem:[%s4226_s1 + $0x820] ss:$16 sps:$4 sm:$0xff]  }
  0xc8   :  { %1920 = vmatprep.subr.bf16.mxu0 %v3093_v19  ;;  %2125 = vmatprep.subr.bf16.mxu1 %v3096_v20  ;;  %v3186_v19 = vld [vmem:[%s4226_s1 + $0x828] ss:$16 sps:$4 sm:$0xff]   ;;  %v3191_v20 = vld [vmem:[%s4226_s1 + $0x844] ss:$16 sps:$4 sm:$0xff]  }
  0xcb   :  { %1921 = vmatpush1.bf16.msra.mxu0 %v3091_v21  ;;  %2126 = vmatpush1.bf16.msra.mxu1 %v3094_v22  ;;  %v3194_v21 = vld [vmem:[%s4226_s1 + $0x84c] ss:$16 sps:$4 sm:$0xff]   ;;  %v3228_v22 = vmov 0  }
  0xcc   :  { %1922 = vmatprep.subr.bf16.mxu0 %v3099_v23  ;;  %2127 = vmatprep.subr.bf16.mxu1 %v3102_v24  ;;  %v3189_v23 = vld [vmem:[%s4226_s1 + $0x840] ss:$16 sps:$4 sm:$0xff]   ;;  %v3192_v24 = vld [vmem:[%s4226_s1 + $0x848] ss:$16 sps:$4 sm:$0xff]  }
  0xcf   :  { %1923 = vmatpush1.bf16.msra.mxu0 %v3097_v25  ;;  %2128 = vmatpush1.bf16.msra.mxu1 %v3100_v26  ;;  %v3197_v25 = vld [vmem:[%s4226_s1 + $0x864] ss:$16 sps:$4 sm:$0xff]   ;;  %v3200_v26 = vld [vmem:[%s4226_s1 + $0x86c] ss:$16 sps:$4 sm:$0xff]  }
  0xd0   :  { %1924 = vmatprep.subr.bf16.mxu0 %v3105_v27  ;;  %2129 = vmatprep.subr.bf16.mxu1 %v3108_v28  ;;  %v3195_v27 = vld [vmem:[%s4226_s1 + $0x860] ss:$16 sps:$4 sm:$0xff]   ;;  %v3198_v28 = vld [vmem:[%s4226_s1 + $0x868] ss:$16 sps:$4 sm:$0xff]  }
  0xd3   :  { %1925 = vmatpush1.bf16.msra.mxu0 %v3103_v29  ;;  %2130 = vmatpush1.bf16.msra.mxu1 %v3106_v30  ;;  %v3203_v29 = vld [vmem:[%s4226_s1 + $0x884] ss:$16 sps:$4 sm:$0xff]   ;;  %v3206_v30 = vld [vmem:[%s4226_s1 + $0x88c] ss:$16 sps:$4 sm:$0xff]  }
  0xd4   :  { %1926 = vmatprep.subr.bf16.mxu0 %v3111_v31  ;;  %2131 = vmatprep.subr.bf16.mxu1 %v3114_v32  ;;  %v3201_v31 = vld [vmem:[%s4226_s1 + $0x880] ss:$16 sps:$4 sm:$0xff]   ;;  %v3204_v32 = vld [vmem:[%s4226_s1 + $0x888] ss:$16 sps:$4 sm:$0xff]  }
  0xd7   :  { %1927 = vmatpush1.bf16.msra.mxu0 %v3109_v33  ;;  %2132 = vmatpush1.bf16.msra.mxu1 %v3112_v34  ;;  %v3209_v33 = vld [vmem:[%s4226_s1 + $0x8a4] ss:$16 sps:$4 sm:$0xff]   ;;  %v3212_v34 = vld [vmem:[%s4226_s1 + $0x8ac] ss:$16 sps:$4 sm:$0xff]  }
  0xd8   :  { %1928 = vmatprep.subr.bf16.mxu0 %v3117_v35  ;;  %2133 = vmatprep.subr.bf16.mxu1 %v3120_v36  ;;  %v3207_v35 = vld [vmem:[%s4226_s1 + $0x8a0] ss:$16 sps:$4 sm:$0xff]   ;;  %v3210_v36 = vld [vmem:[%s4226_s1 + $0x8a8] ss:$16 sps:$4 sm:$0xff]  }
  0xdb   :  { %1929 = vmatpush1.bf16.msra.mxu0 %v3115_v37  ;;  %2134 = vmatpush1.bf16.msra.mxu1 %v3118_v38  ;;  %v3215_v37 = vld [vmem:[%s4226_s1 + $0x8c4] ss:$16 sps:$4 sm:$0xff]   ;;  %v3218_v38 = vld [vmem:[%s4226_s1 + $0x8cc] ss:$16 sps:$4 sm:$0xff]  }
  0xdc   :  { %1930 = vmatprep.subr.bf16.mxu0 %v3123_v39  ;;  %2135 = vmatprep.subr.bf16.mxu1 %v3126_v40  ;;  %v3213_v39 = vld [vmem:[%s4226_s1 + $0x8c0] ss:$16 sps:$4 sm:$0xff]   ;;  %v3216_v40 = vld [vmem:[%s4226_s1 + $0x8c8] ss:$16 sps:$4 sm:$0xff]  }
  0xdf   :  { %1931 = vmatpush1.bf16.msra.mxu0 %v3121_v41  ;;  %2136 = vmatpush1.bf16.msra.mxu1 %v3124_v42  ;;  %v3221_v41 = vld [vmem:[%s4226_s1 + $0x8e4] ss:$16 sps:$4 sm:$0xff]   ;;  %v3224_v42 = vld [vmem:[%s4226_s1 + $0x8ec] ss:$16 sps:$4 sm:$0xff]  }
  0xe0   :  { %1932 = vmatprep.subr.bf16.mxu0 %v3129_v43  ;;  %2137 = vmatprep.subr.bf16.mxu1 %v3132_v44  ;;  %v3219_v43 = vld [vmem:[%s4226_s1 + $0x8e0] ss:$16 sps:$4 sm:$0xff]   ;;  %v3222_v44 = vld [vmem:[%s4226_s1 + $0x8e8] ss:$16 sps:$4 sm:$0xff]  }
  0xe3   :  { %1933 = vmatpush1.bf16.msra.mxu0 %v3127_v45  ;;  %2138 = vmatpush1.bf16.msra.mxu1 %v3130_v46  ;;  %v3225_v45 = vld [vmem:[%s4227_s0 + $0x20] ss:$0 sps:$4 sm:$0xff]   ;;  %v22_v46 = vlaneseq }
  0xe4   :  { %1934 = vmatprep.subr.bf16.mxu0 %v3135_v47  ;;  %2139 = vmatprep.subr.bf16.mxu1 %v3138_v48  ;;  %v3229_v48 = vmov 0.0  }
  0xe5   :  { %vm4153_vm0 = vcmp.lt.s32.totalorder %v22_v46, 512 }
  0xe6   :  { %26 = vst.msk [vmem:[#allocation2] sm:$0xf] %vm4153_vm0, %v3229_v48  ;;  %27 = vst.msk [vmem:[#allocation3] sm:$0xf] %vm4153_vm0, %v3229_v48 }
  0xe7   :  { %1935 = vmatpush1.bf16.msra.mxu0 %v3133_v49  ;;  %2140 = vmatpush1.bf16.msra.mxu1 %v3136_v50  ;;  %v3230_v49 = vmov 1966171168  }
  0xe8   :  { %1936 = vmatprep.subr.bf16.mxu0 %v3141_v51  ;;  %2141 = vmatprep.subr.bf16.mxu1 %v3144_v52  ;;  %v2245_v50 = vunpack.c.l.s4 %v3230_v49  ;;  %v4161_v52 = vshrl.u32 %v22_v46, 7 }
  0xea   :  { %v2246_v51 = vunpack.c.0.s8 %v2245_v50 }
  0xeb   :  { %1937 = vmatpush1.bf16.msra.mxu0 %v3139_v53  ;;  %2142 = vmatpush1.bf16.msra.mxu1 %v3142_v54 }
  0xec   :  { %1938 = vmatprep.subr.bf16.mxu0 %v3147_v55  ;;  %2143 = vmatprep.subr.bf16.mxu1 %v3150_v56  ;;  %v4168_v55 = vsub.s32 %v2246_v51, %v4161_v52 }
  0xef   :  { %1939 = vmatpush1.bf16.msra.mxu0 %v3145_v57  ;;  %2144 = vmatpush1.bf16.msra.mxu1 %v3148_v58 }
  0xf0   :  { %1940 = vmatprep.subr.bf16.mxu0 %v3153_v59  ;;  %2145 = vmatprep.subr.bf16.mxu1 %v3156_v60 }
  0xf3   :  { %1941 = vmatpush1.bf16.msra.mxu0 %v3151_v61  ;;  %2146 = vmatpush1.bf16.msra.mxu1 %v3154_v62 }
  0xf4   :  { %1942 = vmatprep.subr.bf16.mxu0 %v3159_v63  ;;  %2147 = vmatprep.subr.bf16.mxu1 %v3162_v0 }
  0xf7   :  { %1943 = vmatpush1.bf16.msra.mxu0 %v3157_v1  ;;  %2148 = vmatpush1.bf16.msra.mxu1 %v3160_v2 }
  0xf8   :  { %1944 = vmatprep.subr.bf16.mxu0 %v3165_v3  ;;  %2149 = vmatprep.subr.bf16.mxu1 %v3168_v4 }
  0xfb   :  { %1945 = vmatpush1.bf16.msra.mxu0 %v3163_v5  ;;  %2150 = vmatpush1.bf16.msra.mxu1 %v3166_v6 }
  0xfc   :  { %1946 = vmatprep.subr.bf16.mxu0 %v3171_v7  ;;  %2151 = vmatprep.subr.bf16.mxu1 %v3174_v8 }
  0xff   :  { %1947 = vmatpush1.bf16.msra.mxu0 %v3169_v9  ;;  %2152 = vmatpush1.bf16.msra.mxu1 %v3172_v10 }
 0x100   :  { %1957 = vmatprep.subr.bf16.mxu0 %v3179_v12  ;;  %2162 = vmatprep.subr.bf16.mxu1 %v3182_v14 }
 0x102   :  { %1949 = vmatmul.mubr.bf16.vlgmr.msra.gmra.mrb[0].mxu0 %v2459_v11  ;;  %2154 = vmatmul.mubr.bf16.vlgmr.msra.gmra.mrb[0].mxu1 %v2459_v11 }
 0x103   :  { %1958 = vmatpush1.bf16.msra.mxu0 %v3177_v15  ;;  %2163 = vmatpush1.bf16.msra.mxu1 %v3180_v16 }
 0x104   :  { %1959 = vmatprep.subr.bf16.mxu0 %v3185_v17  ;;  %2164 = vmatprep.subr.bf16.mxu1 %v3188_v13 }
 0x105   :  { %1989 = vmatprep.mubr.bf16.mxu0 %v3228_v22  ;;  %2194 = vmatprep.mubr.bf16.mxu1 %v3228_v22 }
 0x107   :  { %1960 = vmatpush1.bf16.msra.mxu0 %v3183_v18  ;;  %2165 = vmatpush1.bf16.msra.mxu1 %v3186_v19 }
 0x108   :  { %1961 = vmatprep.subr.bf16.mxu0 %v3191_v20  ;;  %2166 = vmatprep.subr.bf16.mxu1 %v3194_v21 }
 0x10b   :  { %1962 = vmatpush1.bf16.msra.mxu0 %v3189_v23  ;;  %2167 = vmatpush1.bf16.msra.mxu1 %v3192_v24 }
 0x10c   :  { %1963 = vmatprep.subr.bf16.mxu0 %v3197_v25  ;;  %2168 = vmatprep.subr.bf16.mxu1 %v3200_v26 }
 0x10f   :  { %1964 = vmatpush1.bf16.msra.mxu0 %v3195_v27  ;;  %2169 = vmatpush1.bf16.msra.mxu1 %v3198_v28 }
 0x110   :  { %1965 = vmatprep.subr.bf16.mxu0 %v3203_v29  ;;  %2170 = vmatprep.subr.bf16.mxu1 %v3206_v30 }
 0x113   :  { %1966 = vmatpush1.bf16.msra.mxu0 %v3201_v31  ;;  %2171 = vmatpush1.bf16.msra.mxu1 %v3204_v32 }
 0x114   :  { %1967 = vmatprep.subr.bf16.mxu0 %v3209_v33  ;;  %2172 = vmatprep.subr.bf16.mxu1 %v3212_v34 }
 0x117   :  { %1968 = vmatpush1.bf16.msra.mxu0 %v3207_v35  ;;  %2173 = vmatpush1.bf16.msra.mxu1 %v3210_v36 }
 0x118   :  { %1969 = vmatprep.subr.bf16.mxu0 %v3215_v37  ;;  %2174 = vmatprep.subr.bf16.mxu1 %v3218_v38 }
 0x11b   :  { %1970 = vmatpush1.bf16.msra.mxu0 %v3213_v39  ;;  %2175 = vmatpush1.bf16.msra.mxu1 %v3216_v40 }
 0x11c   :  { %1971 = vmatprep.subr.bf16.mxu0 %v3221_v41  ;;  %2176 = vmatprep.subr.bf16.mxu1 %v3224_v42 }
 0x11f   :  { %1972 = vmatpush1.bf16.msra.mxu0 %v3219_v43  ;;  %2177 = vmatpush1.bf16.msra.mxu1 %v3222_v44 }
 0x122   :  { %1990 = vmatmul.mubr.bf16.vlgmr.msra.gmra.mrb[0].mxu0 %v3225_v45  ;;  %2195 = vmatmul.mubr.bf16.vlgmr.msra.gmra.mrb[0].mxu1 %v3225_v45 }
 0x1f5   :  { %v4163_v53 = vpop.f32.mrb[0].mxu0  ;;  %v4165_v54 = vpop.f32.mrb[0].mxu1 }
 0x1f6   :  { %v2214_v56 = vrot.slane %v4163_v53, 4  ;;  %v2274_v57 = vmul.f32 %v4163_v53, %v4163_v53  ;;  %v2226_v58 = vrot.slane %v4165_v54, 4  ;;  %v2276_v59 = vmul.f32 %v4165_v54, %v4165_v54  ;;  %v4176_v60 = vpop.f32.mrb[1].mxu0  ;;  %v4178_v61 = vpop.f32.mrb[1].mxu1 }
 0x1f7   :  { %v2220_v62 = vrot.slane %v4176_v60, 4  ;;  %v2275_v63 = vmul.f32 %v4176_v60, %v4176_v60  ;;  %v2232_v0 = vrot.slane %v4178_v61, 4  ;;  %v2277_v1 = vmul.f32 %v4178_v61, %v4178_v61  ;;  %v1995_v2 = vpop.f32.mrb[2].mxu0  ;;  %v2200_v3 = vpop.f32.mrb[2].mxu1 }
 0x1f8   :  { %v2215_v4 = vadd.f32 %v2214_v56, %v4163_v53  ;;  %v2278_v5 = vrot.slane %v2274_v57, 4  ;;  %v2227_v6 = vadd.f32 %v2226_v58, %v4165_v54  ;;  %v2290_v7 = vrot.slane %v2276_v59, 4  ;;  %v1996_v8 = vpop.f32.mrb[3].mxu0  ;;  %v2201_v9 = vpop.f32.mrb[3].mxu1  ;;  %v2213_v2 = vld [vmem:[#allocation2] sm:$0xf] }
 0x1f9   :  { %v2221_v10 = vadd.f32 %v2220_v62, %v4176_v60  ;;  %v2284_v12 = vrot.slane %v2275_v63, 4  ;;  %v2233_v14 = vadd.f32 %v2232_v0, %v4178_v61  ;;  %v2296_v11 = vrot.slane %v2277_v1, 4 }
 0x1fa   :  { %v2216_v15 = vrot.slane %v2215_v4, 2  ;;  %v2279_v16 = vadd.f32 %v2278_v5, %v2274_v57  ;;  %v2228_v17 = vrot.slane %v2227_v6, 2  ;;  %v2291_v13 = vadd.f32 %v2290_v7, %v2276_v59  ;;  %v2273_v5 = vld [vmem:[#allocation3] sm:$0xf] }
 0x1fb   :  { %v2222_v18 = vrot.slane %v2221_v10, 2  ;;  %v2285_v19 = vadd.f32 %v2284_v12, %v2275_v63  ;;  %v2234_v20 = vrot.slane %v2233_v14, 2  ;;  %v2297_v21 = vadd.f32 %v2296_v11, %v2277_v1 }
 0x1fc   :  { %v2217_v22 = vadd.f32 %v2216_v15, %v2215_v4  ;;  %v2280_v23 = vrot.slane %v2279_v16, 2  ;;  %v2229_v24 = vadd.f32 %v2228_v17, %v2227_v6  ;;  %v2292_v25 = vrot.slane %v2291_v13, 2 }
 0x1fd   :  { %v2223_v26 = vadd.f32 %v2222_v18, %v2221_v10  ;;  %v2286_v27 = vrot.slane %v2285_v19, 2  ;;  %v2235_v28 = vadd.f32 %v2234_v20, %v2233_v14  ;;  %v2298_v29 = vrot.slane %v2297_v21, 2 }
 0x1fe   :  { %v2218_v30 = vrot.slane %v2217_v22, 1  ;;  %v2281_v31 = vadd.f32 %v2280_v23, %v2279_v16  ;;  %v2230_v32 = vrot.slane %v2229_v24, 1  ;;  %v2293_v33 = vadd.f32 %v2292_v25, %v2291_v13 }
 0x1ff   :  { %v2224_v34 = vrot.slane %v2223_v26, 1  ;;  %v2287_v35 = vadd.f32 %v2286_v27, %v2285_v19  ;;  %v2236_v36 = vrot.slane %v2235_v28, 1  ;;  %v2299_v37 = vadd.f32 %v2298_v29, %v2297_v21 }
 0x200   :  { %v2219_v38 = vadd.f32 %v2218_v30, %v2217_v22  ;;  %v2282_v39 = vrot.slane %v2281_v31, 1  ;;  %v2231_v40 = vadd.f32 %v2230_v32, %v2229_v24  ;;  %v2294_v41 = vrot.slane %v2293_v33, 1 }
 0x201   :  { %v2225_v42 = vadd.f32 %v2224_v34, %v2223_v26  ;;  %v2288_v43 = vrot.slane %v2287_v35, 1  ;;  %v2237_v44 = vadd.f32 %v2236_v36, %v2235_v28  ;;  %v2300_v45 = vrot.slane %v2299_v37, 1 }
 0x202   :  { %v2283_v46 = vadd.f32 %v2282_v39, %v2281_v31  ;;  %v2295_v48 = vadd.f32 %v2294_v41, %v2293_v33  ;;  %v2373_v21 = vsub.s32 0, %v4161_v52  ;;  %v2387_v33 = vld [vmem:[%s4228_s2] sm:$0xf]  ;;  %v2395_v34 = vsub.s32 1, %v4161_v52 }
 0x203   :  { %v2242_v49 = vcombine.low %v2219_v38, %v2225_v42  ;;  %v2289_v50 = vadd.f32 %v2288_v43, %v2287_v35  ;;  %v2243_v51 = vcombine.low %v2231_v40, %v2237_v44  ;;  %v2301_v56 = vadd.f32 %v2300_v45, %v2299_v37 }
 0x204   :  { %v2399_v35 = vsub.s32 2, %v4161_v52  ;;  %v2403_v36 = vsub.s32 3, %v4161_v52  ;;  %v2396_v37 = vrot.slane %v2387_v33, %v2395_v34 }
 0x205   :  { %v2250_v57 = vrot.slane %v2242_v49, %v4168_v55  ;;  %v2306_v58 = vcombine.low %v2283_v46, %v2289_v50  ;;  %v2257_v59 = vrot.slane %v2243_v51, %v4168_v55  ;;  %v2307_v62 = vcombine.low %v2295_v48, %v2301_v56 }
 0x206   :  { %v2400_v38 = vrot.slane %v2387_v33, %v2399_v35  ;;  %v2404_v39 = vrot.slane %v2387_v33, %v2403_v36 }
 0x207   :  { %v2314_v63 = vrot.slane %v2306_v58, %v4168_v55  ;;  %v2258_v0 = vcombine.low %v2250_v57, %v2257_v59  ;;  %v2321_v1 = vrot.slane %v2307_v62, %v4168_v55 }
 0x209   :  { %v2265_v3 = vrot.slane %v2258_v0, %v4168_v55  ;;  %v2322_v4 = vcombine.low %v2314_v63, %v2321_v1 }
 0x20b   :  { %v2267_v6 = vadd.f32 %v2265_v3, %v2213_v2  ;;  %v2329_v7 = vrot.slane %v2322_v4, %v4168_v55 }
 0x20d   :  { %2272 = vst.msk [vmem:[#allocation2] sm:$0xf] %vm4153_vm0, %v2267_v6  ;;  %v2331_v8 = vadd.f32 %v2329_v7, %v2273_v5 }
 0x20f   :  { %2332 = vst.msk [vmem:[#allocation3] sm:$0xf] %vm4153_vm0, %v2331_v8 }
 0x214   :  { %v2336_v9 = vld [vmem:[#allocation2] sm:$0xf] }
 0x215   :  { %v2340_v10 = vrot.slane %v2336_v9, 1  ;;  %v2343_v11 = vrot.slane %v2336_v9, 2  ;;  %v2346_v17 = vrot.slane %v2336_v9, 3 }
 0x216   :  { %v2337_v12 = vld [vmem:[#allocation3] sm:$0xf] }
 0x217   :  { %v2342_v14 = vadd.f32 %v2340_v10, %v2336_v9  ;;  %v2351_v15 = vrot.slane %v2337_v12, 1  ;;  %v2354_v18 = vrot.slane %v2337_v12, 2  ;;  %v2357_v55 = vrot.slane %v2337_v12, 3 }
 0x219   :  { %v2345_v16 = vadd.f32 %v2343_v11, %v2342_v14  ;;  %v2353_v13 = vadd.f32 %v2351_v15, %v2337_v12 }
 0x21b   :  { %v2348_v19 = vadd.f32 %v2346_v17, %v2345_v16  ;;  %v2356_v20 = vadd.f32 %v2354_v18, %v2353_v13 }
 0x21d   :  { %v2359_v22 = vadd.f32 %v2357_v55, %v2356_v20  ;;  %v2360_v23 = vmul.f32 0.03125, %v2348_v19 }
 0x21f   :  { %v2361_v24 = vmul.f32 0.03125, %v2359_v22  ;;  %v2362_v47 = vmul.f32 %v2360_v23, %v2360_v23  ;;  %v2374_v25 = vrot.slane %v2360_v23, %v2373_v21 }
 0x221   :  { %v2363_v26 = vsub.f32 %v2361_v24, %v2362_v47  ;;  %v2375_v27 = vsub.f32 %v4163_v53, %v2374_v25  ;;  %v2376_v28 = vsub.f32 %v4176_v60, %v2374_v25  ;;  %v2377_v29 = vsub.f32 %v4165_v54, %v2374_v25  ;;  %v2413_v53 = vld [vmem:[%s4229_s3] sm:$0xf] }
 0x222   :  { %v2378_v30 = vsub.f32 %v4178_v61, %v2374_v25  ;;  %v2392_v60 = vrot.slane %v2387_v33, %v2373_v21  ;;  %v2418_v40 = vrot.slane %v2413_v53, %v2373_v21  ;;  %v2422_v41 = vrot.slane %v2413_v53, %v2395_v34 }
 0x223   :  { %v2364_v31 = vmax.f32 %v2363_v26, 0.0  ;;  %v2426_v42 = vrot.slane %v2413_v53, %v2399_v35  ;;  %v2430_v43 = vrot.slane %v2413_v53, %v2403_v36 }
 0x225   :  { %v2365_v32 = vadd.f32 1e-05, %v2364_v31 }
 0x227   :  { %3226 = vrsqrt.f32 %v2365_v32 }
 0x231   :  { %v3227_v54 = vpop.eup %3226 }
 0x232   :  { %v2382_v61 = vrot.slane %v3227_v54, %v2373_v21 }
 0x234   :  { %v2383_v44 = vmul.f32 %v2382_v61, %v2375_v27  ;;  %v2384_v45 = vmul.f32 %v2382_v61, %v2376_v28  ;;  %v2385_v46 = vmul.f32 %v2382_v61, %v2377_v29  ;;  %v2386_v48 = vmul.f32 %v2382_v61, %v2378_v30 }
 0x236   :  { %v2409_v49 = vmul.f32 %v2392_v60, %v2383_v44  ;;  %v2410_v52 = vmul.f32 %v2396_v37, %v2384_v45  ;;  %v2411_v50 = vmul.f32 %v2400_v38, %v2385_v46  ;;  %v2412_v51 = vmul.f32 %v2404_v39, %v2386_v48 }
 0x238   :  { %v2435_v56 = vadd.f32 %v2418_v40, %v2409_v49  ;;  %v2436_v57 = vadd.f32 %v2422_v41, %v2410_v52  ;;  %v2437_v58 = vadd.f32 %v2426_v42, %v2411_v50  ;;  %v2438_v59 = vadd.f32 %v2430_v43, %v2412_v51 }
 0x23a   :  { %v2439_v62 = vmax.f32 %v2435_v56, 0.0  ;;  %v2440_v63 = vmax.f32 %v2436_v57, 0.0  ;;  %v2441_v0 = vmax.f32 %v2437_v58, 0.0  ;;  %v2442_v1 = vmax.f32 %v2438_v59, 0.0 }
 0x23c   :  { %2443 = vst [vmem:[%s4230_s4] sm:$0xff] %v2439_v62  ;;  %2444 = vst [vmem:[%s4230_s4 + $0x8] sm:$0xff] %v2440_v63 }
 0x23d   :  { %2445 = vst [vmem:[%s4230_s4 + $0x10] sm:$0xff] %v2441_v0  ;;  %2446 = vst [vmem:[%s4230_s4 + $0x18] sm:$0xff] %v2442_v1 }

</bundles_post_ra>
